<compile_context>
chip_gen: v6e
topology: v6e:2x2x1
jax: 0.10.0
libtpu: 0.0.40
codegen_flags: <defaults>
</compile_context>

<pallas_src>
import functools

import jax
import jax.numpy as jnp
from jax import lax
from jax.experimental import pallas as pl
from jax.experimental.pallas import tpu as pltpu

GN_GROUPS = 32
GN_EPS = 1e-5


# ----------------------------- kernel body -------------------------------
def _conv_gn_relu_stage(x2d, bt, L, first_mask, last_mask,
                        w0_ref, w1_ref, w2_ref, b_ref, gamma_ref, beta_ref,
                        m_ref, mt_ref):
  """One Conv1d(k=3,pad=1) + GroupNorm(32) + ReLU stage on a (Bt*L, Cin) slab."""
  m_rows, _ = x2d.shape
  cout = w0_ref.shape[-1]
  mm_dtype = w0_ref.dtype

  # Shifted copies along L via XLU rolls on the flattened (Bt*L) row axis.
  # Per-sample boundary rows are zeroed (fixes the roll wrap-around and any
  # cross-sample contamination when Bt > 1).  Masking stays in f32.
  xprev = jnp.where(first_mask, 0.0, pltpu.roll(x2d, shift=1, axis=0))
  xnext = jnp.where(last_mask, 0.0, pltpu.roll(x2d, shift=m_rows - 1, axis=0))

  # Three tap matmuls accumulating in f32.  Taps are cast to the weight dtype
  # (bf16 for the MXU-aligned layers, f32 for the tiny Cin=4 first layer)
  # only at the matmul operand boundary.
  y = (jnp.dot(xprev.astype(mm_dtype), w0_ref[...],
               preferred_element_type=jnp.float32)
       + jnp.dot(x2d.astype(mm_dtype), w1_ref[...],
                 preferred_element_type=jnp.float32)
       + jnp.dot(xnext.astype(mm_dtype), w2_ref[...],
                 preferred_element_type=jnp.float32))
  y = y + b_ref[...]                                    # (Bt*L, Cout), f32

  # GroupNorm(32) per sample.  Column sums over L, then the four tiny one-hot
  # matmuls are fused into two by stacking (sum, sum_sq) / (mean, inv_std).
  y3 = y.reshape(bt, L, cout)
  s = jnp.sum(y3, axis=1)                               # (Bt, Cout)
  ss = jnp.sum(y3 * y3, axis=1)                         # (Bt, Cout)
  stats = jnp.concatenate([s, ss], axis=0)              # (2*Bt, Cout)
  stats_g = jnp.dot(stats, m_ref[...],
                    preferred_element_type=jnp.float32)  # (2*Bt, G)
  n = jnp.float32(L * (cout // GN_GROUPS))
  mean_g = stats_g[:bt] / n
  var_g = jnp.maximum(stats_g[bt:] / n - mean_g * mean_g, 0.0)
  inv_g = lax.rsqrt(var_g + jnp.float32(GN_EPS))
  mi = jnp.concatenate([mean_g, inv_g], axis=0)          # (2*Bt, G)
  mi_c = jnp.dot(mi, mt_ref[...],
                 preferred_element_type=jnp.float32)     # (2*Bt, Cout)
  mean_c = mi_c[:bt]
  inv_c = mi_c[bt:]

  yn = (y3 - mean_c[:, None, :]) * inv_c[:, None, :]
  yn = yn * gamma_ref[...] + beta_ref[...]
  return jnp.maximum(yn, 0.0).reshape(m_rows, cout)      # ReLU


def _fused_cnn_embedding_kernel(x_ref, *refs, bt, L, c_in, n_layers):
  o_ref = refs[-1]
  layer_refs = refs[:-1]
  m_rows = bt * L

  # Hoisted per-sample boundary masks: the iota + compares are built once per
  # grid step and shared by all three stages (JAX does not CSE iota/broadcast).
  row = lax.broadcasted_iota(jnp.int32, (m_rows, 1), 0) % L
  first_mask = row == 0
  last_mask = row == (L - 1)

  h = x_ref[...].reshape(m_rows, c_in)
  for li in range(n_layers):
    lr = layer_refs[li * 8:(li + 1) * 8]
    h = _conv_gn_relu_stage(h, bt, L, first_mask, last_mask, *lr)
  o_ref[...] = h.reshape(bt, L, h.shape[-1])


# ------------------------- host-side construction ------------------------
def _gn_onehot(cout):
  """One-hot group matrices for GroupNorm(32): (Cout, G) and (G, Cout)."""
  gsize = cout // GN_GROUPS
  m = (jnp.arange(cout)[:, None] // gsize ==
       jnp.arange(GN_GROUPS)[None, :]).astype(jnp.float32)
  return m, m.T


def _vmem_budget_bytes():
  """Chip-aware scoped-VMEM budget: ~55% of physical, capped at 96 MiB."""
  try:
    phys = int(pltpu.get_tpu_info().vmem_capacity_bytes)
  except Exception:
    phys = 64 * 1024 * 1024   # conservative (v7x-sized) fallback
  return min(int(phys * 0.55), 96 * 1024 * 1024)


def _num_tensorcores():
  try:
    kind = jax.devices()[0].device_kind.lower()
  except Exception:
    return 1
  return 2 if "v7" in kind else 1     # v5e/v6e expose 1 TC per device


def _pick_block_batch(B, L, vmem_budget, num_cores):
  """Pick Bt so the per-step slab M = Bt*L targets ~512-2048 MXU rows."""
  bytes_per_row = 16 * 1024          # worst-case live bytes/row across stages
  vmem_rows = max(L, (vmem_budget // 2) // bytes_per_row)
  target_rows = min(2048, vmem_rows)
  bt = max(1, min(B, target_rows // L))
  while B % bt:                       # Bt must divide B
    bt -= 1
  # Split across TensorCores only when every step still keeps >= 256 MXU rows;
  # single-TC chips never split just to create extra (serial) grid steps.
  if num_cores >= 2 and (B // bt) < num_cores and bt > 1:
    half = bt // 2
    while half > 1 and B % half:
      half -= 1
    if B % half == 0 and half * L >= 256:
      bt = half
  return bt


def _build_call(x_blc, params, bt, use_bf16, vmem_budget, single_buffer_consts):
  B, L, c_in = x_blc.shape
  const_kwargs = (dict(pipeline_mode=pl.Buffered(1))
                  if single_buffer_consts else {})

  kernel_args = [x_blc]
  in_specs = [pl.BlockSpec((bt, L, c_in), lambda i: (i, 0, 0))]
  for (w_kio, b, gamma, beta) in params:
    _, cin, cout = w_kio.shape
    taps = [w_kio[t] for t in range(3)]          # three (Cin, Cout) matrices
    if use_bf16 and cin % 128 == 0:
      taps = [t.astype(jnp.bfloat16) for t in taps]
    m, mt = _gn_onehot(cout)
    layer_args = taps + [b, gamma, beta, m, mt]
    kernel_args += layer_args
    in_specs += [pl.BlockSpec(a.shape, lambda i: (0, 0), **const_kwargs)
                 for a in layer_args]

  c_out = params[-1][0].shape[-1]
  kernel = functools.partial(_fused_cnn_embedding_kernel, bt=bt, L=L,
                             c_in=c_in, n_layers=len(params))
  return pl.pallas_call(
      kernel,
      out_shape=jax.ShapeDtypeStruct((B, L, c_out), jnp.float32),
      grid_spec=pltpu.PrefetchScalarGridSpec(
          num_scalar_prefetch=0,
          grid=(B // bt,),
          in_specs=in_specs,
          out_specs=pl.BlockSpec((bt, L, c_out), lambda i: (i, 0, 0)),
      ),
      compiler_params=pltpu.CompilerParams(
          dimension_semantics=("parallel",),
          vmem_limit_bytes=vmem_budget),
  )(*kernel_args)


def cnn_embedding_forward(x_blc, params, *, block_batch=None, use_bf16=True):
  """x_blc: (B, L, C_in) f32 -> (B, L, 512) f32 via a single fused pallas_call."""
  B, L, _ = x_blc.shape
  vmem_budget = _vmem_budget_bytes()
  bt = (_pick_block_batch(B, L, vmem_budget, _num_tensorcores())
        if block_batch is None else block_batch)
  assert B % bt == 0
  try:
    return _build_call(x_blc, params, bt, use_bf16, vmem_budget,
                       single_buffer_consts=True)
  except Exception:
    # pl.Buffered(1) hint unsupported on this jax/Mosaic build -> fall back to
    # default double-buffering of the (small) constant operands.
    return _build_call(x_blc, params, bt, use_bf16, vmem_budget,
                       single_buffer_consts=False)


def init_params(key, in_channels):
  """Deterministic synthetic parameters for CNN_Embedding."""
  dims = [(in_channels, 128), (128, 256), (256, 512)]
  params = []
  for i, (cin, cout) in enumerate(dims):
    kw, kb = jax.random.split(jax.random.fold_in(key, i))
    w = jax.random.normal(kw, (3, cin, cout), jnp.float32) * (1.0 / (3 * cin) ** 0.5)
    b = jax.random.normal(kb, (1, cout), jnp.float32) * 0.01
    gamma = jnp.ones((1, cout), jnp.float32)   # GroupNorm default affine init
    beta = jnp.zeros((1, cout), jnp.float32)
    params.append((w, b, gamma, beta))
  return params


def clip_embedding_forward(x_ncl, params, *, use_bf16=True):
  """x_ncl: (B, C_in, L) like PyTorch. Returns (B, 512, L)."""
  x = jnp.transpose(x_ncl, (0, 2, 1)).astype(jnp.float32)           # (B, L, C)
  x1 = cnn_embedding_forward(x, params, use_bf16=use_bf16)          # (B, L, 512)
  # mask = ones(B, 1, L) in the reference; with an all-True mask it is a no-op.
  # TODO(synk): MaskMambaBlock(n_embd=512, use_mamba_type='vim') definition is
  # not provided; embedding2 is treated as identity here.
  x3 = x1
  return jnp.transpose(x3, (0, 2, 1))                                # (B, 512, L)


# ---------------- pure-JAX f32 reference for verification ----------------
def _ref_layer(x_blc, w_kio, bias, gamma, beta):
  B, L, _ = x_blc.shape
  C_out = w_kio.shape[-1]
  xp = jnp.pad(x_blc, ((0, 0), (1, 1), (0, 0)))
  y = (jnp.einsum("bli,io->blo", xp[:, 0:L], w_kio[0])
       + jnp.einsum("bli,io->blo", xp[:, 1:L + 1], w_kio[1])
       + jnp.einsum("bli,io->blo", xp[:, 2:L + 2], w_kio[2])
       + bias)
  g = GN_GROUPS
  yg = y.reshape(B, L, g, C_out // g)
  mean = yg.mean(axis=(1, 3), keepdims=True)
  var = yg.var(axis=(1, 3), keepdims=True)
  yn = ((yg - mean) / jnp.sqrt(var + GN_EPS)).reshape(B, L, C_out)
  return jnp.maximum(yn * gamma + beta, 0.0)


def reference_forward(x_ncl, params):
  x = jnp.transpose(x_ncl, (0, 2, 1)).astype(jnp.float32)
  for (w, b, g, be) in params:
    x = _ref_layer(x, w, b, g, be)
  return jnp.transpose(x, (0, 2, 1))


if __name__ == "__main__":
  B, C_in, L = 2, 4, 16
  x = jax.random.normal(jax.random.PRNGKey(0), (B, C_in, L), jnp.float32)
  params = init_params(jax.random.PRNGKey(1), C_in)

  ref = jax.block_until_ready(reference_forward(x, params))

  # bf16-MXU production path (loose tolerance sized for bf16 operands through
  # three chained conv+GroupNorm stages; real layout/tap/grouping bugs give
  # O(1) errors).
  out = jax.block_until_ready(clip_embedding_forward(x, params))
  assert out.shape == (B, 512, L), out.shape
  max_err = float(jnp.max(jnp.abs(out - ref)))
  assert jnp.allclose(out, ref, atol=1e-1, rtol=1e-1), max_err

  # f32-weights pass of the SAME kernel: tight tolerance separates layout /
  # indexing bugs from bf16 precision loss.
  out_f32 = jax.block_until_ready(
      clip_embedding_forward(x, params, use_bf16=False))
  max_err_f32 = float(jnp.max(jnp.abs(out_f32 - ref)))
  assert jnp.allclose(out_f32, ref, atol=1e-2, rtol=1e-2), max_err_f32

  print("KERNEL_OK")
</pallas_src>

<mosaic_0001>
module attributes {stable_mosaic.version = 11 : i64} {
  func.func @_fused_cnn_embedding_kernel(%arg0: i32, %arg1: memref<2x16x4xf32, #tpu.memory_space<vmem>>, %arg2: memref<4x128xf32, #tpu.memory_space<vmem>>, %arg3: memref<4x128xf32, #tpu.memory_space<vmem>>, %arg4: memref<4x128xf32, #tpu.memory_space<vmem>>, %arg5: memref<1x128xf32, #tpu.memory_space<vmem>>, %arg6: memref<1x128xf32, #tpu.memory_space<vmem>>, %arg7: memref<1x128xf32, #tpu.memory_space<vmem>>, %arg8: memref<128x32xf32, #tpu.memory_space<vmem>>, %arg9: memref<32x128xf32, #tpu.memory_space<vmem>>, %arg10: memref<128x256xbf16, #tpu.memory_space<vmem>>, %arg11: memref<128x256xbf16, #tpu.memory_space<vmem>>, %arg12: memref<128x256xbf16, #tpu.memory_space<vmem>>, %arg13: memref<1x256xf32, #tpu.memory_space<vmem>>, %arg14: memref<1x256xf32, #tpu.memory_space<vmem>>, %arg15: memref<1x256xf32, #tpu.memory_space<vmem>>, %arg16: memref<256x32xf32, #tpu.memory_space<vmem>>, %arg17: memref<32x256xf32, #tpu.memory_space<vmem>>, %arg18: memref<256x512xbf16, #tpu.memory_space<vmem>>, %arg19: memref<256x512xbf16, #tpu.memory_space<vmem>>, %arg20: memref<256x512xbf16, #tpu.memory_space<vmem>>, %arg21: memref<1x512xf32, #tpu.memory_space<vmem>>, %arg22: memref<1x512xf32, #tpu.memory_space<vmem>>, %arg23: memref<1x512xf32, #tpu.memory_space<vmem>>, %arg24: memref<512x32xf32, #tpu.memory_space<vmem>>, %arg25: memref<32x512xf32, #tpu.memory_space<vmem>>, %arg26: memref<2x16x512xf32, #tpu.memory_space<vmem>>) attributes {dimension_semantics = [#tpu.dimension_semantics<parallel>], iteration_bounds = array<i64: 1>, scalar_prefetch = 0 : i64, scratch_operands = 0 : i64, tpu.core_type = #tpu.core_type<tc>, window_params = [{transform_indices = @transform_0, window_bounds = array<i64: 2, 16, 4>}, {pipeline_mode = #tpu.pipeline_mode<synchronous>, transform_indices = @transform_1, window_bounds = array<i64: 4, 128>}, {pipeline_mode = #tpu.pipeline_mode<synchronous>, transform_indices = @transform_2, window_bounds = array<i64: 4, 128>}, {pipeline_mode = #tpu.pipeline_mode<synchronous>, transform_indices = @transform_3, window_bounds = array<i64: 4, 128>}, {pipeline_mode = #tpu.pipeline_mode<synchronous>, transform_indices = @transform_4, window_bounds = array<i64: 1, 128>}, {pipeline_mode = #tpu.pipeline_mode<synchronous>, transform_indices = @transform_5, window_bounds = array<i64: 1, 128>}, {pipeline_mode = #tpu.pipeline_mode<synchronous>, transform_indices = @transform_6, window_bounds = array<i64: 1, 128>}, {pipeline_mode = #tpu.pipeline_mode<synchronous>, transform_indices = @transform_7, window_bounds = array<i64: 128, 32>}, {pipeline_mode = #tpu.pipeline_mode<synchronous>, transform_indices = @transform_8, window_bounds = array<i64: 32, 128>}, {pipeline_mode = #tpu.pipeline_mode<synchronous>, transform_indices = @transform_9, window_bounds = array<i64: 128, 256>}, {pipeline_mode = #tpu.pipeline_mode<synchronous>, transform_indices = @transform_10, window_bounds = array<i64: 128, 256>}, {pipeline_mode = #tpu.pipeline_mode<synchronous>, transform_indices = @transform_11, window_bounds = array<i64: 128, 256>}, {pipeline_mode = #tpu.pipeline_mode<synchronous>, transform_indices = @transform_12, window_bounds = array<i64: 1, 256>}, {pipeline_mode = #tpu.pipeline_mode<synchronous>, transform_indices = @transform_13, window_bounds = array<i64: 1, 256>}, {pipeline_mode = #tpu.pipeline_mode<synchronous>, transform_indices = @transform_14, window_bounds = array<i64: 1, 256>}, {pipeline_mode = #tpu.pipeline_mode<synchronous>, transform_indices = @transform_15, window_bounds = array<i64: 256, 32>}, {pipeline_mode = #tpu.pipeline_mode<synchronous>, transform_indices = @transform_16, window_bounds = array<i64: 32, 256>}, {pipeline_mode = #tpu.pipeline_mode<synchronous>, transform_indices = @transform_17, window_bounds = array<i64: 256, 512>}, {pipeline_mode = #tpu.pipeline_mode<synchronous>, transform_indices = @transform_18, window_bounds = array<i64: 256, 512>}, {pipeline_mode = #tpu.pipeline_mode<synchronous>, transform_indices = @transform_19, window_bounds = array<i64: 256, 512>}, {pipeline_mode = #tpu.pipeline_mode<synchronous>, transform_indices = @transform_20, window_bounds = array<i64: 1, 512>}, {pipeline_mode = #tpu.pipeline_mode<synchronous>, transform_indices = @transform_21, window_bounds = array<i64: 1, 512>}, {pipeline_mode = #tpu.pipeline_mode<synchronous>, transform_indices = @transform_22, window_bounds = array<i64: 1, 512>}, {pipeline_mode = #tpu.pipeline_mode<synchronous>, transform_indices = @transform_23, window_bounds = array<i64: 512, 32>}, {pipeline_mode = #tpu.pipeline_mode<synchronous>, transform_indices = @transform_24, window_bounds = array<i64: 32, 512>}, {transform_indices = @transform_25, window_bounds = array<i64: 2, 16, 512>}]} {
    %0 = tpu.iota {dimensions = array<i32: 0>} : vector<32x1xi32>
    %c16_i32 = arith.constant 16 : i32
    %c0_i32 = arith.constant 0 : i32
    %1 = arith.cmpi eq, %c16_i32, %c0_i32 : i32
    %c1_i32 = arith.constant 1 : i32
    %2 = arith.select %1, %c1_i32, %c16_i32 : i32
    %3 = vector.broadcast %2 : i32 to vector<32x1xi32>
    %4 = arith.remsi %0, %3 : vector<32x1xi32>
    %c0_i32_0 = arith.constant 0 : i32
    %5 = vector.broadcast %c0_i32_0 : i32 to vector<32x1xi32>
    %6 = arith.cmpi ne, %4, %5 : vector<32x1xi32>
    %c0_i32_1 = arith.constant 0 : i32
    %7 = vector.broadcast %c0_i32_1 : i32 to vector<32x1xi32>
    %8 = arith.cmpi slt, %4, %7 : vector<32x1xi32>
    %c0_i32_2 = arith.constant 0 : i32
    %9 = arith.cmpi slt, %2, %c0_i32_2 : i32
    %10 = vector.broadcast %9 : i1 to vector<32x1xi1>
    %11 = vector.broadcast %10 : vector<32x1xi1> to vector<32x1xi1>
    %12 = arith.xori %8, %11 : vector<32x1xi1>
    %13 = arith.andi %12, %6 : vector<32x1xi1>
    %14 = vector.broadcast %2 : i32 to vector<32x1xi32>
    %15 = arith.addi %4, %14 : vector<32x1xi32>
    %16 = arith.select %13, %15, %4 : vector<32x1xi1>, vector<32x1xi32>
    %c0_i32_3 = arith.constant 0 : i32
    %17 = vector.broadcast %c0_i32_3 : i32 to vector<32x1xi32>
    %18 = arith.cmpi eq, %16, %17 : vector<32x1xi32>
    %c15_i32 = arith.constant 15 : i32
    %19 = vector.broadcast %c15_i32 : i32 to vector<32x1xi32>
    %20 = arith.cmpi eq, %16, %19 : vector<32x1xi32>
    %c0 = arith.constant 0 : index
    %c0_4 = arith.constant 0 : index
    %c0_5 = arith.constant 0 : index
    %21 = vector.load %arg1[%c0, %c0_4, %c0_5] : memref<2x16x4xf32, #tpu.memory_space<vmem>>, vector<2x16x4xf32>
    %22 = vector.shape_cast %21 : vector<2x16x4xf32> to vector<32x4xf32>
    %c1_i32_6 = arith.constant 1 : i32
    %23 = tpu.dynamic_rotate %22 by %c1_i32_6 dim 0 : vector<32x4xf32>, i32 -> vector<32x4xf32>
    %cst = arith.constant 0.000000e+00 : f32
    %24 = vector.shape_cast %18 : vector<32x1xi1> to vector<32x1xi1>
    %25 = vector.broadcast %24 : vector<32x1xi1> to vector<32x4xi1>
    %26 = vector.broadcast %cst : f32 to vector<32x4xf32>
    %27 = arith.select %25, %26, %23 : vector<32x4xi1>, vector<32x4xf32>
    %c31_i32 = arith.constant 31 : i32
    %28 = tpu.dynamic_rotate %22 by %c31_i32 dim 0 : vector<32x4xf32>, i32 -> vector<32x4xf32>
    %cst_7 = arith.constant 0.000000e+00 : f32
    %29 = vector.shape_cast %20 : vector<32x1xi1> to vector<32x1xi1>
    %30 = vector.broadcast %29 : vector<32x1xi1> to vector<32x4xi1>
    %31 = vector.broadcast %cst_7 : f32 to vector<32x4xf32>
    %32 = arith.select %30, %31, %28 : vector<32x4xi1>, vector<32x4xf32>
    %c0_8 = arith.constant 0 : index
    %c0_9 = arith.constant 0 : index
    %33 = vector.load %arg2[%c0_8, %c0_9] : memref<4x128xf32, #tpu.memory_space<vmem>>, vector<4x128xf32>
    %cst_10 = arith.constant dense<0.000000e+00> : vector<32x128xf32>
    %34 = tpu.matmul %27, %33, %cst_10 {dimension_numbers = #tpu.dot_dimension_numbers<[1], [0], [0], [1], [0, 0, 1, 1], [], []>} : vector<32x4xf32>, vector<4x128xf32>, vector<32x128xf32> -> vector<32x128xf32>
    %c0_11 = arith.constant 0 : index
    %c0_12 = arith.constant 0 : index
    %35 = vector.load %arg3[%c0_11, %c0_12] : memref<4x128xf32, #tpu.memory_space<vmem>>, vector<4x128xf32>
    %cst_13 = arith.constant dense<0.000000e+00> : vector<32x128xf32>
    %36 = tpu.matmul %22, %35, %cst_13 {dimension_numbers = #tpu.dot_dimension_numbers<[1], [0], [0], [1], [0, 0, 1, 1], [], []>} : vector<32x4xf32>, vector<4x128xf32>, vector<32x128xf32> -> vector<32x128xf32>
    %37 = arith.addf %34, %36 : vector<32x128xf32>
    %c0_14 = arith.constant 0 : index
    %c0_15 = arith.constant 0 : index
    %38 = vector.load %arg4[%c0_14, %c0_15] : memref<4x128xf32, #tpu.memory_space<vmem>>, vector<4x128xf32>
    %cst_16 = arith.constant dense<0.000000e+00> : vector<32x128xf32>
    %39 = tpu.matmul %32, %38, %cst_16 {dimension_numbers = #tpu.dot_dimension_numbers<[1], [0], [0], [1], [0, 0, 1, 1], [], []>} : vector<32x4xf32>, vector<4x128xf32>, vector<32x128xf32> -> vector<32x128xf32>
    %40 = arith.addf %37, %39 : vector<32x128xf32>
    %c0_17 = arith.constant 0 : index
    %c0_18 = arith.constant 0 : index
    %41 = vector.load %arg5[%c0_17, %c0_18] : memref<1x128xf32, #tpu.memory_space<vmem>>, vector<1x128xf32>
    %42 = vector.broadcast %41 : vector<1x128xf32> to vector<32x128xf32>
    %43 = arith.addf %40, %42 : vector<32x128xf32>
    %44 = vector.shape_cast %43 : vector<32x128xf32> to vector<2x16x128xf32>
    %cst_19 = arith.constant dense<0.000000e+00> : vector<2x128xf32>
    %45 = vector.multi_reduction <add>, %44, %cst_19 [1] : vector<2x16x128xf32> to vector<2x128xf32>
    %46 = arith.mulf %44, %44 : vector<2x16x128xf32>
    %cst_20 = arith.constant dense<0.000000e+00> : vector<2x128xf32>
    %47 = vector.multi_reduction <add>, %46, %cst_20 [1] : vector<2x16x128xf32> to vector<2x128xf32>
    %48 = tpu.concatenate %45, %47 in 0 : vector<2x128xf32>, vector<2x128xf32> -> vector<4x128xf32>
    %c0_21 = arith.constant 0 : index
    %c0_22 = arith.constant 0 : index
    %49 = vector.load %arg8[%c0_21, %c0_22] : memref<128x32xf32, #tpu.memory_space<vmem>>, vector<128x32xf32>
    %cst_23 = arith.constant dense<0.000000e+00> : vector<4x32xf32>
    %50 = tpu.matmul %48, %49, %cst_23 {dimension_numbers = #tpu.dot_dimension_numbers<[1], [0], [0], [1], [0, 0, 1, 1], [], []>} : vector<4x128xf32>, vector<128x32xf32>, vector<4x32xf32> -> vector<4x32xf32>
    %51 = vector.extract_strided_slice %50 {offsets = [0, 0], sizes = [2, 32], strides = [1, 1]} : vector<4x32xf32> to vector<2x32xf32>
    %cst_24 = arith.constant 6.400000e+01 : f32
    %52 = vector.broadcast %cst_24 : f32 to vector<2x32xf32>
    %53 = arith.divf %51, %52 : vector<2x32xf32>
    %54 = vector.extract_strided_slice %50 {offsets = [2, 0], sizes = [2, 32], strides = [1, 1]} : vector<4x32xf32> to vector<2x32xf32>
    %cst_25 = arith.constant 6.400000e+01 : f32
    %55 = vector.broadcast %cst_25 : f32 to vector<2x32xf32>
    %56 = arith.divf %54, %55 : vector<2x32xf32>
    %57 = arith.mulf %53, %53 : vector<2x32xf32>
    %58 = arith.subf %56, %57 : vector<2x32xf32>
    %cst_26 = arith.constant 0.000000e+00 : f32
    %59 = vector.broadcast %cst_26 : f32 to vector<2x32xf32>
    %60 = arith.maximumf %58, %59 : vector<2x32xf32>
    %cst_27 = arith.constant 9.99999974E-6 : f32
    %61 = vector.broadcast %cst_27 : f32 to vector<2x32xf32>
    %62 = arith.addf %60, %61 : vector<2x32xf32>
    %63 = math.rsqrt %62 : vector<2x32xf32>
    %64 = tpu.concatenate %53, %63 in 0 : vector<2x32xf32>, vector<2x32xf32> -> vector<4x32xf32>
    %c0_28 = arith.constant 0 : index
    %c0_29 = arith.constant 0 : index
    %65 = vector.load %arg9[%c0_28, %c0_29] : memref<32x128xf32, #tpu.memory_space<vmem>>, vector<32x128xf32>
    %cst_30 = arith.constant dense<0.000000e+00> : vector<4x128xf32>
    %66 = tpu.matmul %64, %65, %cst_30 {dimension_numbers = #tpu.dot_dimension_numbers<[1], [0], [0], [1], [0, 0, 1, 1], [], []>} : vector<4x32xf32>, vector<32x128xf32>, vector<4x128xf32> -> vector<4x128xf32>
    %67 = vector.extract_strided_slice %66 {offsets = [0, 0], sizes = [2, 128], strides = [1, 1]} : vector<4x128xf32> to vector<2x128xf32>
    %68 = vector.extract_strided_slice %66 {offsets = [2, 0], sizes = [2, 128], strides = [1, 1]} : vector<4x128xf32> to vector<2x128xf32>
    %69 = vector.shape_cast %67 : vector<2x128xf32> to vector<2x1x128xf32>
    %70 = vector.broadcast %69 : vector<2x1x128xf32> to vector<2x16x128xf32>
    %71 = arith.subf %44, %70 : vector<2x16x128xf32>
    %72 = vector.shape_cast %68 : vector<2x128xf32> to vector<2x1x128xf32>
    %73 = vector.broadcast %72 : vector<2x1x128xf32> to vector<2x16x128xf32>
    %74 = arith.mulf %71, %73 : vector<2x16x128xf32>
    %c0_31 = arith.constant 0 : index
    %c0_32 = arith.constant 0 : index
    %75 = vector.load %arg6[%c0_31, %c0_32] : memref<1x128xf32, #tpu.memory_space<vmem>>, vector<1x128xf32>
    %76 = vector.shape_cast %75 : vector<1x128xf32> to vector<1x1x128xf32>
    %77 = vector.broadcast %76 : vector<1x1x128xf32> to vector<2x16x128xf32>
    %78 = arith.mulf %74, %77 : vector<2x16x128xf32>
    %c0_33 = arith.constant 0 : index
    %c0_34 = arith.constant 0 : index
    %79 = vector.load %arg7[%c0_33, %c0_34] : memref<1x128xf32, #tpu.memory_space<vmem>>, vector<1x128xf32>
    %80 = vector.shape_cast %79 : vector<1x128xf32> to vector<1x1x128xf32>
    %81 = vector.broadcast %80 : vector<1x1x128xf32> to vector<2x16x128xf32>
    %82 = arith.addf %78, %81 : vector<2x16x128xf32>
    %cst_35 = arith.constant 0.000000e+00 : f32
    %83 = vector.broadcast %cst_35 : f32 to vector<2x16x128xf32>
    %84 = arith.maximumf %82, %83 : vector<2x16x128xf32>
    %85 = vector.shape_cast %84 : vector<2x16x128xf32> to vector<32x128xf32>
    %c1_i32_36 = arith.constant 1 : i32
    %86 = tpu.dynamic_rotate %85 by %c1_i32_36 dim 0 : vector<32x128xf32>, i32 -> vector<32x128xf32>
    %cst_37 = arith.constant 0.000000e+00 : f32
    %87 = vector.shape_cast %18 : vector<32x1xi1> to vector<32x1xi1>
    %88 = vector.broadcast %87 : vector<32x1xi1> to vector<32x128xi1>
    %89 = vector.broadcast %cst_37 : f32 to vector<32x128xf32>
    %90 = arith.select %88, %89, %86 : vector<32x128xi1>, vector<32x128xf32>
    %c31_i32_38 = arith.constant 31 : i32
    %91 = tpu.dynamic_rotate %85 by %c31_i32_38 dim 0 : vector<32x128xf32>, i32 -> vector<32x128xf32>
    %cst_39 = arith.constant 0.000000e+00 : f32
    %92 = vector.shape_cast %20 : vector<32x1xi1> to vector<32x1xi1>
    %93 = vector.broadcast %92 : vector<32x1xi1> to vector<32x128xi1>
    %94 = vector.broadcast %cst_39 : f32 to vector<32x128xf32>
    %95 = arith.select %93, %94, %91 : vector<32x128xi1>, vector<32x128xf32>
    %96 = arith.truncf %90 : vector<32x128xf32> to vector<32x128xbf16>
    %c0_40 = arith.constant 0 : index
    %c0_41 = arith.constant 0 : index
    %97 = vector.load %arg10[%c0_40, %c0_41] : memref<128x256xbf16, #tpu.memory_space<vmem>>, vector<128x256xbf16>
    %cst_42 = arith.constant dense<0.000000e+00> : vector<32x256xf32>
    %98 = tpu.matmul %96, %97, %cst_42 {dimension_numbers = #tpu.dot_dimension_numbers<[1], [0], [0], [1], [0, 0, 1, 1], [], []>} : vector<32x128xbf16>, vector<128x256xbf16>, vector<32x256xf32> -> vector<32x256xf32>
    %99 = arith.truncf %85 : vector<32x128xf32> to vector<32x128xbf16>
    %c0_43 = arith.constant 0 : index
    %c0_44 = arith.constant 0 : index
    %100 = vector.load %arg11[%c0_43, %c0_44] : memref<128x256xbf16, #tpu.memory_space<vmem>>, vector<128x256xbf16>
    %cst_45 = arith.constant dense<0.000000e+00> : vector<32x256xf32>
    %101 = tpu.matmul %99, %100, %cst_45 {dimension_numbers = #tpu.dot_dimension_numbers<[1], [0], [0], [1], [0, 0, 1, 1], [], []>} : vector<32x128xbf16>, vector<128x256xbf16>, vector<32x256xf32> -> vector<32x256xf32>
    %102 = arith.addf %98, %101 : vector<32x256xf32>
    %103 = arith.truncf %95 : vector<32x128xf32> to vector<32x128xbf16>
    %c0_46 = arith.constant 0 : index
    %c0_47 = arith.constant 0 : index
    %104 = vector.load %arg12[%c0_46, %c0_47] : memref<128x256xbf16, #tpu.memory_space<vmem>>, vector<128x256xbf16>
    %cst_48 = arith.constant dense<0.000000e+00> : vector<32x256xf32>
    %105 = tpu.matmul %103, %104, %cst_48 {dimension_numbers = #tpu.dot_dimension_numbers<[1], [0], [0], [1], [0, 0, 1, 1], [], []>} : vector<32x128xbf16>, vector<128x256xbf16>, vector<32x256xf32> -> vector<32x256xf32>
    %106 = arith.addf %102, %105 : vector<32x256xf32>
    %c0_49 = arith.constant 0 : index
    %c0_50 = arith.constant 0 : index
    %107 = vector.load %arg13[%c0_49, %c0_50] : memref<1x256xf32, #tpu.memory_space<vmem>>, vector<1x256xf32>
    %108 = vector.broadcast %107 : vector<1x256xf32> to vector<32x256xf32>
    %109 = arith.addf %106, %108 : vector<32x256xf32>
    %110 = vector.shape_cast %109 : vector<32x256xf32> to vector<2x16x256xf32>
    %cst_51 = arith.constant dense<0.000000e+00> : vector<2x256xf32>
    %111 = vector.multi_reduction <add>, %110, %cst_51 [1] : vector<2x16x256xf32> to vector<2x256xf32>
    %112 = arith.mulf %110, %110 : vector<2x16x256xf32>
    %cst_52 = arith.constant dense<0.000000e+00> : vector<2x256xf32>
    %113 = vector.multi_reduction <add>, %112, %cst_52 [1] : vector<2x16x256xf32> to vector<2x256xf32>
    %114 = tpu.concatenate %111, %113 in 0 : vector<2x256xf32>, vector<2x256xf32> -> vector<4x256xf32>
    %c0_53 = arith.constant 0 : index
    %c0_54 = arith.constant 0 : index
    %115 = vector.load %arg16[%c0_53, %c0_54] : memref<256x32xf32, #tpu.memory_space<vmem>>, vector<256x32xf32>
    %cst_55 = arith.constant dense<0.000000e+00> : vector<4x32xf32>
    %116 = tpu.matmul %114, %115, %cst_55 {dimension_numbers = #tpu.dot_dimension_numbers<[1], [0], [0], [1], [0, 0, 1, 1], [], []>} : vector<4x256xf32>, vector<256x32xf32>, vector<4x32xf32> -> vector<4x32xf32>
    %117 = vector.extract_strided_slice %116 {offsets = [0, 0], sizes = [2, 32], strides = [1, 1]} : vector<4x32xf32> to vector<2x32xf32>
    %cst_56 = arith.constant 1.280000e+02 : f32
    %118 = vector.broadcast %cst_56 : f32 to vector<2x32xf32>
    %119 = arith.divf %117, %118 : vector<2x32xf32>
    %120 = vector.extract_strided_slice %116 {offsets = [2, 0], sizes = [2, 32], strides = [1, 1]} : vector<4x32xf32> to vector<2x32xf32>
    %cst_57 = arith.constant 1.280000e+02 : f32
    %121 = vector.broadcast %cst_57 : f32 to vector<2x32xf32>
    %122 = arith.divf %120, %121 : vector<2x32xf32>
    %123 = arith.mulf %119, %119 : vector<2x32xf32>
    %124 = arith.subf %122, %123 : vector<2x32xf32>
    %cst_58 = arith.constant 0.000000e+00 : f32
    %125 = vector.broadcast %cst_58 : f32 to vector<2x32xf32>
    %126 = arith.maximumf %124, %125 : vector<2x32xf32>
    %cst_59 = arith.constant 9.99999974E-6 : f32
    %127 = vector.broadcast %cst_59 : f32 to vector<2x32xf32>
    %128 = arith.addf %126, %127 : vector<2x32xf32>
    %129 = math.rsqrt %128 : vector<2x32xf32>
    %130 = tpu.concatenate %119, %129 in 0 : vector<2x32xf32>, vector<2x32xf32> -> vector<4x32xf32>
    %c0_60 = arith.constant 0 : index
    %c0_61 = arith.constant 0 : index
    %131 = vector.load %arg17[%c0_60, %c0_61] : memref<32x256xf32, #tpu.memory_space<vmem>>, vector<32x256xf32>
    %cst_62 = arith.constant dense<0.000000e+00> : vector<4x256xf32>
    %132 = tpu.matmul %130, %131, %cst_62 {dimension_numbers = #tpu.dot_dimension_numbers<[1], [0], [0], [1], [0, 0, 1, 1], [], []>} : vector<4x32xf32>, vector<32x256xf32>, vector<4x256xf32> -> vector<4x256xf32>
    %133 = vector.extract_strided_slice %132 {offsets = [0, 0], sizes = [2, 256], strides = [1, 1]} : vector<4x256xf32> to vector<2x256xf32>
    %134 = vector.extract_strided_slice %132 {offsets = [2, 0], sizes = [2, 256], strides = [1, 1]} : vector<4x256xf32> to vector<2x256xf32>
    %135 = vector.shape_cast %133 : vector<2x256xf32> to vector<2x1x256xf32>
    %136 = vector.broadcast %135 : vector<2x1x256xf32> to vector<2x16x256xf32>
    %137 = arith.subf %110, %136 : vector<2x16x256xf32>
    %138 = vector.shape_cast %134 : vector<2x256xf32> to vector<2x1x256xf32>
    %139 = vector.broadcast %138 : vector<2x1x256xf32> to vector<2x16x256xf32>
    %140 = arith.mulf %137, %139 : vector<2x16x256xf32>
    %c0_63 = arith.constant 0 : index
    %c0_64 = arith.constant 0 : index
    %141 = vector.load %arg14[%c0_63, %c0_64] : memref<1x256xf32, #tpu.memory_space<vmem>>, vector<1x256xf32>
    %142 = vector.shape_cast %141 : vector<1x256xf32> to vector<1x1x256xf32>
    %143 = vector.broadcast %142 : vector<1x1x256xf32> to vector<2x16x256xf32>
    %144 = arith.mulf %140, %143 : vector<2x16x256xf32>
    %c0_65 = arith.constant 0 : index
    %c0_66 = arith.constant 0 : index
    %145 = vector.load %arg15[%c0_65, %c0_66] : memref<1x256xf32, #tpu.memory_space<vmem>>, vector<1x256xf32>
    %146 = vector.shape_cast %145 : vector<1x256xf32> to vector<1x1x256xf32>
    %147 = vector.broadcast %146 : vector<1x1x256xf32> to vector<2x16x256xf32>
    %148 = arith.addf %144, %147 : vector<2x16x256xf32>
    %cst_67 = arith.constant 0.000000e+00 : f32
    %149 = vector.broadcast %cst_67 : f32 to vector<2x16x256xf32>
    %150 = arith.maximumf %148, %149 : vector<2x16x256xf32>
    %151 = vector.shape_cast %150 : vector<2x16x256xf32> to vector<32x256xf32>
    %c1_i32_68 = arith.constant 1 : i32
    %152 = tpu.dynamic_rotate %151 by %c1_i32_68 dim 0 : vector<32x256xf32>, i32 -> vector<32x256xf32>
    %cst_69 = arith.constant 0.000000e+00 : f32
    %153 = vector.shape_cast %18 : vector<32x1xi1> to vector<32x1xi1>
    %154 = vector.broadcast %153 : vector<32x1xi1> to vector<32x256xi1>
    %155 = vector.broadcast %cst_69 : f32 to vector<32x256xf32>
    %156 = arith.select %154, %155, %152 : vector<32x256xi1>, vector<32x256xf32>
    %c31_i32_70 = arith.constant 31 : i32
    %157 = tpu.dynamic_rotate %151 by %c31_i32_70 dim 0 : vector<32x256xf32>, i32 -> vector<32x256xf32>
    %cst_71 = arith.constant 0.000000e+00 : f32
    %158 = vector.shape_cast %20 : vector<32x1xi1> to vector<32x1xi1>
    %159 = vector.broadcast %158 : vector<32x1xi1> to vector<32x256xi1>
    %160 = vector.broadcast %cst_71 : f32 to vector<32x256xf32>
    %161 = arith.select %159, %160, %157 : vector<32x256xi1>, vector<32x256xf32>
    %162 = arith.truncf %156 : vector<32x256xf32> to vector<32x256xbf16>
    %c0_72 = arith.constant 0 : index
    %c0_73 = arith.constant 0 : index
    %163 = vector.load %arg18[%c0_72, %c0_73] : memref<256x512xbf16, #tpu.memory_space<vmem>>, vector<256x512xbf16>
    %cst_74 = arith.constant dense<0.000000e+00> : vector<32x512xf32>
    %164 = tpu.matmul %162, %163, %cst_74 {dimension_numbers = #tpu.dot_dimension_numbers<[1], [0], [0], [1], [0, 0, 1, 1], [], []>} : vector<32x256xbf16>, vector<256x512xbf16>, vector<32x512xf32> -> vector<32x512xf32>
    %165 = arith.truncf %151 : vector<32x256xf32> to vector<32x256xbf16>
    %c0_75 = arith.constant 0 : index
    %c0_76 = arith.constant 0 : index
    %166 = vector.load %arg19[%c0_75, %c0_76] : memref<256x512xbf16, #tpu.memory_space<vmem>>, vector<256x512xbf16>
    %cst_77 = arith.constant dense<0.000000e+00> : vector<32x512xf32>
    %167 = tpu.matmul %165, %166, %cst_77 {dimension_numbers = #tpu.dot_dimension_numbers<[1], [0], [0], [1], [0, 0, 1, 1], [], []>} : vector<32x256xbf16>, vector<256x512xbf16>, vector<32x512xf32> -> vector<32x512xf32>
    %168 = arith.addf %164, %167 : vector<32x512xf32>
    %169 = arith.truncf %161 : vector<32x256xf32> to vector<32x256xbf16>
    %c0_78 = arith.constant 0 : index
    %c0_79 = arith.constant 0 : index
    %170 = vector.load %arg20[%c0_78, %c0_79] : memref<256x512xbf16, #tpu.memory_space<vmem>>, vector<256x512xbf16>
    %cst_80 = arith.constant dense<0.000000e+00> : vector<32x512xf32>
    %171 = tpu.matmul %169, %170, %cst_80 {dimension_numbers = #tpu.dot_dimension_numbers<[1], [0], [0], [1], [0, 0, 1, 1], [], []>} : vector<32x256xbf16>, vector<256x512xbf16>, vector<32x512xf32> -> vector<32x512xf32>
    %172 = arith.addf %168, %171 : vector<32x512xf32>
    %c0_81 = arith.constant 0 : index
    %c0_82 = arith.constant 0 : index
    %173 = vector.load %arg21[%c0_81, %c0_82] : memref<1x512xf32, #tpu.memory_space<vmem>>, vector<1x512xf32>
    %174 = vector.broadcast %173 : vector<1x512xf32> to vector<32x512xf32>
    %175 = arith.addf %172, %174 : vector<32x512xf32>
    %176 = vector.shape_cast %175 : vector<32x512xf32> to vector<2x16x512xf32>
    %cst_83 = arith.constant dense<0.000000e+00> : vector<2x512xf32>
    %177 = vector.multi_reduction <add>, %176, %cst_83 [1] : vector<2x16x512xf32> to vector<2x512xf32>
    %178 = arith.mulf %176, %176 : vector<2x16x512xf32>
    %cst_84 = arith.constant dense<0.000000e+00> : vector<2x512xf32>
    %179 = vector.multi_reduction <add>, %178, %cst_84 [1] : vector<2x16x512xf32> to vector<2x512xf32>
    %180 = tpu.concatenate %177, %179 in 0 : vector<2x512xf32>, vector<2x512xf32> -> vector<4x512xf32>
    %c0_85 = arith.constant 0 : index
    %c0_86 = arith.constant 0 : index
    %181 = vector.load %arg24[%c0_85, %c0_86] : memref<512x32xf32, #tpu.memory_space<vmem>>, vector<512x32xf32>
    %cst_87 = arith.constant dense<0.000000e+00> : vector<4x32xf32>
    %182 = tpu.matmul %180, %181, %cst_87 {dimension_numbers = #tpu.dot_dimension_numbers<[1], [0], [0], [1], [0, 0, 1, 1], [], []>} : vector<4x512xf32>, vector<512x32xf32>, vector<4x32xf32> -> vector<4x32xf32>
    %183 = vector.extract_strided_slice %182 {offsets = [0, 0], sizes = [2, 32], strides = [1, 1]} : vector<4x32xf32> to vector<2x32xf32>
    %cst_88 = arith.constant 2.560000e+02 : f32
    %184 = vector.broadcast %cst_88 : f32 to vector<2x32xf32>
    %185 = arith.divf %183, %184 : vector<2x32xf32>
    %186 = vector.extract_strided_slice %182 {offsets = [2, 0], sizes = [2, 32], strides = [1, 1]} : vector<4x32xf32> to vector<2x32xf32>
    %cst_89 = arith.constant 2.560000e+02 : f32
    %187 = vector.broadcast %cst_89 : f32 to vector<2x32xf32>
    %188 = arith.divf %186, %187 : vector<2x32xf32>
    %189 = arith.mulf %185, %185 : vector<2x32xf32>
    %190 = arith.subf %188, %189 : vector<2x32xf32>
    %cst_90 = arith.constant 0.000000e+00 : f32
    %191 = vector.broadcast %cst_90 : f32 to vector<2x32xf32>
    %192 = arith.maximumf %190, %191 : vector<2x32xf32>
    %cst_91 = arith.constant 9.99999974E-6 : f32
    %193 = vector.broadcast %cst_91 : f32 to vector<2x32xf32>
    %194 = arith.addf %192, %193 : vector<2x32xf32>
    %195 = math.rsqrt %194 : vector<2x32xf32>
    %196 = tpu.concatenate %185, %195 in 0 : vector<2x32xf32>, vector<2x32xf32> -> vector<4x32xf32>
    %c0_92 = arith.constant 0 : index
    %c0_93 = arith.constant 0 : index
    %197 = vector.load %arg25[%c0_92, %c0_93] : memref<32x512xf32, #tpu.memory_space<vmem>>, vector<32x512xf32>
    %cst_94 = arith.constant dense<0.000000e+00> : vector<4x512xf32>
    %198 = tpu.matmul %196, %197, %cst_94 {dimension_numbers = #tpu.dot_dimension_numbers<[1], [0], [0], [1], [0, 0, 1, 1], [], []>} : vector<4x32xf32>, vector<32x512xf32>, vector<4x512xf32> -> vector<4x512xf32>
    %199 = vector.extract_strided_slice %198 {offsets = [0, 0], sizes = [2, 512], strides = [1, 1]} : vector<4x512xf32> to vector<2x512xf32>
    %200 = vector.extract_strided_slice %198 {offsets = [2, 0], sizes = [2, 512], strides = [1, 1]} : vector<4x512xf32> to vector<2x512xf32>
    %201 = vector.shape_cast %199 : vector<2x512xf32> to vector<2x1x512xf32>
    %202 = vector.broadcast %201 : vector<2x1x512xf32> to vector<2x16x512xf32>
    %203 = arith.subf %176, %202 : vector<2x16x512xf32>
    %204 = vector.shape_cast %200 : vector<2x512xf32> to vector<2x1x512xf32>
    %205 = vector.broadcast %204 : vector<2x1x512xf32> to vector<2x16x512xf32>
    %206 = arith.mulf %203, %205 : vector<2x16x512xf32>
    %c0_95 = arith.constant 0 : index
    %c0_96 = arith.constant 0 : index
    %207 = vector.load %arg22[%c0_95, %c0_96] : memref<1x512xf32, #tpu.memory_space<vmem>>, vector<1x512xf32>
    %208 = vector.shape_cast %207 : vector<1x512xf32> to vector<1x1x512xf32>
    %209 = vector.broadcast %208 : vector<1x1x512xf32> to vector<2x16x512xf32>
    %210 = arith.mulf %206, %209 : vector<2x16x512xf32>
    %c0_97 = arith.constant 0 : index
    %c0_98 = arith.constant 0 : index
    %211 = vector.load %arg23[%c0_97, %c0_98] : memref<1x512xf32, #tpu.memory_space<vmem>>, vector<1x512xf32>
    %212 = vector.shape_cast %211 : vector<1x512xf32> to vector<1x1x512xf32>
    %213 = vector.broadcast %212 : vector<1x1x512xf32> to vector<2x16x512xf32>
    %214 = arith.addf %210, %213 : vector<2x16x512xf32>
    %cst_99 = arith.constant 0.000000e+00 : f32
    %215 = vector.broadcast %cst_99 : f32 to vector<2x16x512xf32>
    %216 = arith.maximumf %214, %215 : vector<2x16x512xf32>
    %217 = vector.shape_cast %216 : vector<2x16x512xf32> to vector<32x512xf32>
    %218 = vector.shape_cast %217 : vector<32x512xf32> to vector<2x16x512xf32>
    %c0_100 = arith.constant 0 : index
    %c0_101 = arith.constant 0 : index
    %c0_102 = arith.constant 0 : index
    %219 = vector.load %arg26[%c0_100, %c0_101, %c0_102] : memref<2x16x512xf32, #tpu.memory_space<vmem>>, vector<2x16x512xf32>
    tpu.vector_store %arg26[%c0_100, %c0_101, %c0_102], %218 {strides = array<i32>} : memref<2x16x512xf32, #tpu.memory_space<vmem>>, vector<2x16x512xf32>,
    return
  }
  func.func @transform_0(%arg0: i32) -> (i32, i32, i32) {
    %c0_i32 = arith.constant 0 : i32
    %c0_i32_0 = arith.constant 0 : i32
    %c0_i32_1 = arith.constant 0 : i32
    return %arg0, %c0_i32, %c0_i32_0 : i32, i32, i32
  }
  func.func @transform_1(%arg0: i32) -> (i32, i32) {
    %c0_i32 = arith.constant 0 : i32
    %c0_i32_0 = arith.constant 0 : i32
    %c0_i32_1 = arith.constant 0 : i32
    return %c0_i32, %c0_i32_0 : i32, i32
  }
  func.func @transform_2(%arg0: i32) -> (i32, i32) {
    %c0_i32 = arith.constant 0 : i32
    %c0_i32_0 = arith.constant 0 : i32
    %c0_i32_1 = arith.constant 0 : i32
    return %c0_i32, %c0_i32_0 : i32, i32
  }
  func.func @transform_3(%arg0: i32) -> (i32, i32) {
    %c0_i32 = arith.constant 0 : i32
    %c0_i32_0 = arith.constant 0 : i32
    %c0_i32_1 = arith.constant 0 : i32
    return %c0_i32, %c0_i32_0 : i32, i32
  }
  func.func @transform_4(%arg0: i32) -> (i32, i32) {
    %c0_i32 = arith.constant 0 : i32
    %c0_i32_0 = arith.constant 0 : i32
    %c0_i32_1 = arith.constant 0 : i32
    return %c0_i32, %c0_i32_0 : i32, i32
  }
  func.func @transform_5(%arg0: i32) -> (i32, i32) {
    %c0_i32 = arith.constant 0 : i32
    %c0_i32_0 = arith.constant 0 : i32
    %c0_i32_1 = arith.constant 0 : i32
    return %c0_i32, %c0_i32_0 : i32, i32
  }
  func.func @transform_6(%arg0: i32) -> (i32, i32) {
    %c0_i32 = arith.constant 0 : i32
    %c0_i32_0 = arith.constant 0 : i32
    %c0_i32_1 = arith.constant 0 : i32
    return %c0_i32, %c0_i32_0 : i32, i32
  }
  func.func @transform_7(%arg0: i32) -> (i32, i32) {
    %c0_i32 = arith.constant 0 : i32
    %c0_i32_0 = arith.constant 0 : i32
    %c0_i32_1 = arith.constant 0 : i32
    return %c0_i32, %c0_i32_0 : i32, i32
  }
  func.func @transform_8(%arg0: i32) -> (i32, i32) {
    %c0_i32 = arith.constant 0 : i32
    %c0_i32_0 = arith.constant 0 : i32
    %c0_i32_1 = arith.constant 0 : i32
    return %c0_i32, %c0_i32_0 : i32, i32
  }
  func.func @transform_9(%arg0: i32) -> (i32, i32) {
    %c0_i32 = arith.constant 0 : i32
    %c0_i32_0 = arith.constant 0 : i32
    %c0_i32_1 = arith.constant 0 : i32
    return %c0_i32, %c0_i32_0 : i32, i32
  }
  func.func @transform_10(%arg0: i32) -> (i32, i32) {
    %c0_i32 = arith.constant 0 : i32
    %c0_i32_0 = arith.constant 0 : i32
    %c0_i32_1 = arith.constant 0 : i32
    return %c0_i32, %c0_i32_0 : i32, i32
  }
  func.func @transform_11(%arg0: i32) -> (i32, i32) {
    %c0_i32 = arith.constant 0 : i32
    %c0_i32_0 = arith.constant 0 : i32
    %c0_i32_1 = arith.constant 0 : i32
    return %c0_i32, %c0_i32_0 : i32, i32
  }
  func.func @transform_12(%arg0: i32) -> (i32, i32) {
    %c0_i32 = arith.constant 0 : i32
    %c0_i32_0 = arith.constant 0 : i32
    %c0_i32_1 = arith.constant 0 : i32
    return %c0_i32, %c0_i32_0 : i32, i32
  }
  func.func @transform_13(%arg0: i32) -> (i32, i32) {
    %c0_i32 = arith.constant 0 : i32
    %c0_i32_0 = arith.constant 0 : i32
    %c0_i32_1 = arith.constant 0 : i32
    return %c0_i32, %c0_i32_0 : i32, i32
  }
  func.func @transform_14(%arg0: i32) -> (i32, i32) {
    %c0_i32 = arith.constant 0 : i32
    %c0_i32_0 = arith.constant 0 : i32
    %c0_i32_1 = arith.constant 0 : i32
    return %c0_i32, %c0_i32_0 : i32, i32
  }
  func.func @transform_15(%arg0: i32) -> (i32, i32) {
    %c0_i32 = arith.constant 0 : i32
    %c0_i32_0 = arith.constant 0 : i32
    %c0_i32_1 = arith.constant 0 : i32
    return %c0_i32, %c0_i32_0 : i32, i32
  }
  func.func @transform_16(%arg0: i32) -> (i32, i32) {
    %c0_i32 = arith.constant 0 : i32
    %c0_i32_0 = arith.constant 0 : i32
    %c0_i32_1 = arith.constant 0 : i32
    return %c0_i32, %c0_i32_0 : i32, i32
  }
  func.func @transform_17(%arg0: i32) -> (i32, i32) {
    %c0_i32 = arith.constant 0 : i32
    %c0_i32_0 = arith.constant 0 : i32
    %c0_i32_1 = arith.constant 0 : i32
    return %c0_i32, %c0_i32_0 : i32, i32
  }
  func.func @transform_18(%arg0: i32) -> (i32, i32) {
    %c0_i32 = arith.constant 0 : i32
    %c0_i32_0 = arith.constant 0 : i32
    %c0_i32_1 = arith.constant 0 : i32
    return %c0_i32, %c0_i32_0 : i32, i32
  }
  func.func @transform_19(%arg0: i32) -> (i32, i32) {
    %c0_i32 = arith.constant 0 : i32
    %c0_i32_0 = arith.constant 0 : i32
    %c0_i32_1 = arith.constant 0 : i32
    return %c0_i32, %c0_i32_0 : i32, i32
  }
  func.func @transform_20(%arg0: i32) -> (i32, i32) {
    %c0_i32 = arith.constant 0 : i32
    %c0_i32_0 = arith.constant 0 : i32
    %c0_i32_1 = arith.constant 0 : i32
    return %c0_i32, %c0_i32_0 : i32, i32
  }
  func.func @transform_21(%arg0: i32) -> (i32, i32) {
    %c0_i32 = arith.constant 0 : i32
    %c0_i32_0 = arith.constant 0 : i32
    %c0_i32_1 = arith.constant 0 : i32
    return %c0_i32, %c0_i32_0 : i32, i32
  }
  func.func @transform_22(%arg0: i32) -> (i32, i32) {
    %c0_i32 = arith.constant 0 : i32
    %c0_i32_0 = arith.constant 0 : i32
    %c0_i32_1 = arith.constant 0 : i32
    return %c0_i32, %c0_i32_0 : i32, i32
  }
  func.func @transform_23(%arg0: i32) -> (i32, i32) {
    %c0_i32 = arith.constant 0 : i32
    %c0_i32_0 = arith.constant 0 : i32
    %c0_i32_1 = arith.constant 0 : i32
    return %c0_i32, %c0_i32_0 : i32, i32
  }
  func.func @transform_24(%arg0: i32) -> (i32, i32) {
    %c0_i32 = arith.constant 0 : i32
    %c0_i32_0 = arith.constant 0 : i32
    %c0_i32_1 = arith.constant 0 : i32
    return %c0_i32, %c0_i32_0 : i32, i32
  }
  func.func @transform_25(%arg0: i32) -> (i32, i32, i32) {
    %c0_i32 = arith.constant 0 : i32
    %c0_i32_0 = arith.constant 0 : i32
    %c0_i32_1 = arith.constant 0 : i32
    return %arg0, %c0_i32, %c0_i32_0 : i32, i32, i32
  }
}

module attributes {stable_mosaic.version = 11 : i64} {
  func.func @_fused_cnn_embedding_kernel(%arg0: i32, %arg1: memref<2x16x4xf32, #tpu.memory_space<vmem>>, %arg2: memref<4x128xf32, #tpu.memory_space<vmem>>, %arg3: memref<4x128xf32, #tpu.memory_space<vmem>>, %arg4: memref<4x128xf32, #tpu.memory_space<vmem>>, %arg5: memref<1x128xf32, #tpu.memory_space<vmem>>, %arg6: memref<1x128xf32, #tpu.memory_space<vmem>>, %arg7: memref<1x128xf32, #tpu.memory_space<vmem>>, %arg8: memref<128x32xf32, #tpu.memory_space<vmem>>, %arg9: memref<32x128xf32, #tpu.memory_space<vmem>>, %arg10: memref<128x256xbf16, #tpu.memory_space<vmem>>, %arg11: memref<128x256xbf16, #tpu.memory_space<vmem>>, %arg12: memref<128x256xbf16, #tpu.memory_space<vmem>>, %arg13: memref<1x256xf32, #tpu.memory_space<vmem>>, %arg14: memref<1x256xf32, #tpu.memory_space<vmem>>, %arg15: memref<1x256xf32, #tpu.memory_space<vmem>>, %arg16: memref<256x32xf32, #tpu.memory_space<vmem>>, %arg17: memref<32x256xf32, #tpu.memory_space<vmem>>, %arg18: memref<256x512xbf16, #tpu.memory_space<vmem>>, %arg19: memref<256x512xbf16, #tpu.memory_space<vmem>>, %arg20: memref<256x512xbf16, #tpu.memory_space<vmem>>, %arg21: memref<1x512xf32, #tpu.memory_space<vmem>>, %arg22: memref<1x512xf32, #tpu.memory_space<vmem>>, %arg23: memref<1x512xf32, #tpu.memory_space<vmem>>, %arg24: memref<512x32xf32, #tpu.memory_space<vmem>>, %arg25: memref<32x512xf32, #tpu.memory_space<vmem>>, %arg26: memref<2x16x512xf32, #tpu.memory_space<vmem>>) attributes {dimension_semantics = [#tpu.dimension_semantics<parallel>], iteration_bounds = array<i64: 1>, scalar_prefetch = 0 : i64, scratch_operands = 0 : i64, tpu.core_type = #tpu.core_type<tc>, window_params = [{transform_indices = @transform_0, window_bounds = array<i64: 2, 16, 4>}, {pipeline_mode = #tpu.pipeline_mode<synchronous>, transform_indices = @transform_1, window_bounds = array<i64: 4, 128>}, {pipeline_mode = #tpu.pipeline_mode<synchronous>, transform_indices = @transform_2, window_bounds = array<i64: 4, 128>}, {pipeline_mode = #tpu.pipeline_mode<synchronous>, transform_indices = @transform_3, window_bounds = array<i64: 4, 128>}, {pipeline_mode = #tpu.pipeline_mode<synchronous>, transform_indices = @transform_4, window_bounds = array<i64: 1, 128>}, {pipeline_mode = #tpu.pipeline_mode<synchronous>, transform_indices = @transform_5, window_bounds = array<i64: 1, 128>}, {pipeline_mode = #tpu.pipeline_mode<synchronous>, transform_indices = @transform_6, window_bounds = array<i64: 1, 128>}, {pipeline_mode = #tpu.pipeline_mode<synchronous>, transform_indices = @transform_7, window_bounds = array<i64: 128, 32>}, {pipeline_mode = #tpu.pipeline_mode<synchronous>, transform_indices = @transform_8, window_bounds = array<i64: 32, 128>}, {pipeline_mode = #tpu.pipeline_mode<synchronous>, transform_indices = @transform_9, window_bounds = array<i64: 128, 256>}, {pipeline_mode = #tpu.pipeline_mode<synchronous>, transform_indices = @transform_10, window_bounds = array<i64: 128, 256>}, {pipeline_mode = #tpu.pipeline_mode<synchronous>, transform_indices = @transform_11, window_bounds = array<i64: 128, 256>}, {pipeline_mode = #tpu.pipeline_mode<synchronous>, transform_indices = @transform_12, window_bounds = array<i64: 1, 256>}, {pipeline_mode = #tpu.pipeline_mode<synchronous>, transform_indices = @transform_13, window_bounds = array<i64: 1, 256>}, {pipeline_mode = #tpu.pipeline_mode<synchronous>, transform_indices = @transform_14, window_bounds = array<i64: 1, 256>}, {pipeline_mode = #tpu.pipeline_mode<synchronous>, transform_indices = @transform_15, window_bounds = array<i64: 256, 32>}, {pipeline_mode = #tpu.pipeline_mode<synchronous>, transform_indices = @transform_16, window_bounds = array<i64: 32, 256>}, {pipeline_mode = #tpu.pipeline_mode<synchronous>, transform_indices = @transform_17, window_bounds = array<i64: 256, 512>}, {pipeline_mode = #tpu.pipeline_mode<synchronous>, transform_indices = @transform_18, window_bounds = array<i64: 256, 512>}, {pipeline_mode = #tpu.pipeline_mode<synchronous>, transform_indices = @transform_19, window_bounds = array<i64: 256, 512>}, {pipeline_mode = #tpu.pipeline_mode<synchronous>, transform_indices = @transform_20, window_bounds = array<i64: 1, 512>}, {pipeline_mode = #tpu.pipeline_mode<synchronous>, transform_indices = @transform_21, window_bounds = array<i64: 1, 512>}, {pipeline_mode = #tpu.pipeline_mode<synchronous>, transform_indices = @transform_22, window_bounds = array<i64: 1, 512>}, {pipeline_mode = #tpu.pipeline_mode<synchronous>, transform_indices = @transform_23, window_bounds = array<i64: 512, 32>}, {pipeline_mode = #tpu.pipeline_mode<synchronous>, transform_indices = @transform_24, window_bounds = array<i64: 32, 512>}, {transform_indices = @transform_25, window_bounds = array<i64: 2, 16, 512>}]} {
    %0 = tpu.iota {dimensions = array<i32: 0>} : vector<32x1xi32>
    %c16_i32 = arith.constant 16 : i32
    %c0_i32 = arith.constant 0 : i32
    %1 = arith.cmpi eq, %c16_i32, %c0_i32 : i32
    %c1_i32 = arith.constant 1 : i32
    %2 = arith.select %1, %c1_i32, %c16_i32 : i32
    %3 = vector.broadcast %2 : i32 to vector<32x1xi32>
    %4 = arith.remsi %0, %3 : vector<32x1xi32>
    %c0_i32_0 = arith.constant 0 : i32
    %5 = vector.broadcast %c0_i32_0 : i32 to vector<32x1xi32>
    %6 = arith.cmpi ne, %4, %5 : vector<32x1xi32>
    %c0_i32_1 = arith.constant 0 : i32
    %7 = vector.broadcast %c0_i32_1 : i32 to vector<32x1xi32>
    %8 = arith.cmpi slt, %4, %7 : vector<32x1xi32>
    %c0_i32_2 = arith.constant 0 : i32
    %9 = arith.cmpi slt, %2, %c0_i32_2 : i32
    %10 = vector.broadcast %9 : i1 to vector<32x1xi1>
    %11 = vector.broadcast %10 : vector<32x1xi1> to vector<32x1xi1>
    %12 = arith.xori %8, %11 : vector<32x1xi1>
    %13 = arith.andi %12, %6 : vector<32x1xi1>
    %14 = vector.broadcast %2 : i32 to vector<32x1xi32>
    %15 = arith.addi %4, %14 : vector<32x1xi32>
    %16 = arith.select %13, %15, %4 : vector<32x1xi1>, vector<32x1xi32>
    %c0_i32_3 = arith.constant 0 : i32
    %17 = vector.broadcast %c0_i32_3 : i32 to vector<32x1xi32>
    %18 = arith.cmpi eq, %16, %17 : vector<32x1xi32>
    %c15_i32 = arith.constant 15 : i32
    %19 = vector.broadcast %c15_i32 : i32 to vector<32x1xi32>
    %20 = arith.cmpi eq, %16, %19 : vector<32x1xi32>
    %c0 = arith.constant 0 : index
    %c0_4 = arith.constant 0 : index
    %c0_5 = arith.constant 0 : index
    %21 = vector.load %arg1[%c0, %c0_4, %c0_5] : memref<2x16x4xf32, #tpu.memory_space<vmem>>, vector<2x16x4xf32>
    %22 = vector.shape_cast %21 : vector<2x16x4xf32> to vector<32x4xf32>
    %c1_i32_6 = arith.constant 1 : i32
    %23 = tpu.dynamic_rotate %22 by %c1_i32_6 dim 0 : vector<32x4xf32>, i32 -> vector<32x4xf32>
    %cst = arith.constant 0.000000e+00 : f32
    %24 = vector.shape_cast %18 : vector<32x1xi1> to vector<32x1xi1>
    %25 = vector.broadcast %24 : vector<32x1xi1> to vector<32x4xi1>
    %26 = vector.broadcast %cst : f32 to vector<32x4xf32>
    %27 = arith.select %25, %26, %23 : vector<32x4xi1>, vector<32x4xf32>
    %c31_i32 = arith.constant 31 : i32
    %28 = tpu.dynamic_rotate %22 by %c31_i32 dim 0 : vector<32x4xf32>, i32 -> vector<32x4xf32>
    %cst_7 = arith.constant 0.000000e+00 : f32
    %29 = vector.shape_cast %20 : vector<32x1xi1> to vector<32x1xi1>
    %30 = vector.broadcast %29 : vector<32x1xi1> to vector<32x4xi1>
    %31 = vector.broadcast %cst_7 : f32 to vector<32x4xf32>
    %32 = arith.select %30, %31, %28 : vector<32x4xi1>, vector<32x4xf32>
    %c0_8 = arith.constant 0 : index
    %c0_9 = arith.constant 0 : index
    %33 = vector.load %arg2[%c0_8, %c0_9] : memref<4x128xf32, #tpu.memory_space<vmem>>, vector<4x128xf32>
    %cst_10 = arith.constant dense<0.000000e+00> : vector<32x128xf32>
    %34 = tpu.matmul %27, %33, %cst_10 {dimension_numbers = #tpu.dot_dimension_numbers<[1], [0], [0], [1], [0, 0, 1, 1], [], []>} : vector<32x4xf32>, vector<4x128xf32>, vector<32x128xf32> -> vector<32x128xf32>
    %c0_11 = arith.constant 0 : index
    %c0_12 = arith.constant 0 : index
    %35 = vector.load %arg3[%c0_11, %c0_12] : memref<4x128xf32, #tpu.memory_space<vmem>>, vector<4x128xf32>
    %cst_13 = arith.constant dense<0.000000e+00> : vector<32x128xf32>
    %36 = tpu.matmul %22, %35, %cst_13 {dimension_numbers = #tpu.dot_dimension_numbers<[1], [0], [0], [1], [0, 0, 1, 1], [], []>} : vector<32x4xf32>, vector<4x128xf32>, vector<32x128xf32> -> vector<32x128xf32>
    %37 = arith.addf %34, %36 : vector<32x128xf32>
    %c0_14 = arith.constant 0 : index
    %c0_15 = arith.constant 0 : index
    %38 = vector.load %arg4[%c0_14, %c0_15] : memref<4x128xf32, #tpu.memory_space<vmem>>, vector<4x128xf32>
    %cst_16 = arith.constant dense<0.000000e+00> : vector<32x128xf32>
    %39 = tpu.matmul %32, %38, %cst_16 {dimension_numbers = #tpu.dot_dimension_numbers<[1], [0], [0], [1], [0, 0, 1, 1], [], []>} : vector<32x4xf32>, vector<4x128xf32>, vector<32x128xf32> -> vector<32x128xf32>
    %40 = arith.addf %37, %39 : vector<32x128xf32>
    %c0_17 = arith.constant 0 : index
    %c0_18 = arith.constant 0 : index
    %41 = vector.load %arg5[%c0_17, %c0_18] : memref<1x128xf32, #tpu.memory_space<vmem>>, vector<1x128xf32>
    %42 = vector.broadcast %41 : vector<1x128xf32> to vector<32x128xf32>
    %43 = arith.addf %40, %42 : vector<32x128xf32>
    %44 = vector.shape_cast %43 : vector<32x128xf32> to vector<2x16x128xf32>
    %cst_19 = arith.constant dense<0.000000e+00> : vector<2x128xf32>
    %45 = vector.multi_reduction <add>, %44, %cst_19 [1] : vector<2x16x128xf32> to vector<2x128xf32>
    %46 = arith.mulf %44, %44 : vector<2x16x128xf32>
    %cst_20 = arith.constant dense<0.000000e+00> : vector<2x128xf32>
    %47 = vector.multi_reduction <add>, %46, %cst_20 [1] : vector<2x16x128xf32> to vector<2x128xf32>
    %48 = tpu.concatenate %45, %47 in 0 : vector<2x128xf32>, vector<2x128xf32> -> vector<4x128xf32>
    %c0_21 = arith.constant 0 : index
    %c0_22 = arith.constant 0 : index
    %49 = vector.load %arg8[%c0_21, %c0_22] : memref<128x32xf32, #tpu.memory_space<vmem>>, vector<128x32xf32>
    %cst_23 = arith.constant dense<0.000000e+00> : vector<4x32xf32>
    %50 = tpu.matmul %48, %49, %cst_23 {dimension_numbers = #tpu.dot_dimension_numbers<[1], [0], [0], [1], [0, 0, 1, 1], [], []>} : vector<4x128xf32>, vector<128x32xf32>, vector<4x32xf32> -> vector<4x32xf32>
    %51 = vector.extract_strided_slice %50 {offsets = [0, 0], sizes = [2, 32], strides = [1, 1]} : vector<4x32xf32> to vector<2x32xf32>
    %cst_24 = arith.constant 6.400000e+01 : f32
    %52 = vector.broadcast %cst_24 : f32 to vector<2x32xf32>
    %53 = arith.divf %51, %52 : vector<2x32xf32>
    %54 = vector.extract_strided_slice %50 {offsets = [2, 0], sizes = [2, 32], strides = [1, 1]} : vector<4x32xf32> to vector<2x32xf32>
    %cst_25 = arith.constant 6.400000e+01 : f32
    %55 = vector.broadcast %cst_25 : f32 to vector<2x32xf32>
    %56 = arith.divf %54, %55 : vector<2x32xf32>
    %57 = arith.mulf %53, %53 : vector<2x32xf32>
    %58 = arith.subf %56, %57 : vector<2x32xf32>
    %cst_26 = arith.constant 0.000000e+00 : f32
    %59 = vector.broadcast %cst_26 : f32 to vector<2x32xf32>
    %60 = arith.maximumf %58, %59 : vector<2x32xf32>
    %cst_27 = arith.constant 9.99999974E-6 : f32
    %61 = vector.broadcast %cst_27 : f32 to vector<2x32xf32>
    %62 = arith.addf %60, %61 : vector<2x32xf32>
    %63 = math.rsqrt %62 : vector<2x32xf32>
    %64 = tpu.concatenate %53, %63 in 0 : vector<2x32xf32>, vector<2x32xf32> -> vector<4x32xf32>
    %c0_28 = arith.constant 0 : index
    %c0_29 = arith.constant 0 : index
    %65 = vector.load %arg9[%c0_28, %c0_29] : memref<32x128xf32, #tpu.memory_space<vmem>>, vector<32x128xf32>
    %cst_30 = arith.constant dense<0.000000e+00> : vector<4x128xf32>
    %66 = tpu.matmul %64, %65, %cst_30 {dimension_numbers = #tpu.dot_dimension_numbers<[1], [0], [0], [1], [0, 0, 1, 1], [], []>} : vector<4x32xf32>, vector<32x128xf32>, vector<4x128xf32> -> vector<4x128xf32>
    %67 = vector.extract_strided_slice %66 {offsets = [0, 0], sizes = [2, 128], strides = [1, 1]} : vector<4x128xf32> to vector<2x128xf32>
    %68 = vector.extract_strided_slice %66 {offsets = [2, 0], sizes = [2, 128], strides = [1, 1]} : vector<4x128xf32> to vector<2x128xf32>
    %69 = vector.shape_cast %67 : vector<2x128xf32> to vector<2x1x128xf32>
    %70 = vector.broadcast %69 : vector<2x1x128xf32> to vector<2x16x128xf32>
    %71 = arith.subf %44, %70 : vector<2x16x128xf32>
    %72 = vector.shape_cast %68 : vector<2x128xf32> to vector<2x1x128xf32>
    %73 = vector.broadcast %72 : vector<2x1x128xf32> to vector<2x16x128xf32>
    %74 = arith.mulf %71, %73 : vector<2x16x128xf32>
    %c0_31 = arith.constant 0 : index
    %c0_32 = arith.constant 0 : index
    %75 = vector.load %arg6[%c0_31, %c0_32] : memref<1x128xf32, #tpu.memory_space<vmem>>, vector<1x128xf32>
    %76 = vector.shape_cast %75 : vector<1x128xf32> to vector<1x1x128xf32>
    %77 = vector.broadcast %76 : vector<1x1x128xf32> to vector<2x16x128xf32>
    %78 = arith.mulf %74, %77 : vector<2x16x128xf32>
    %c0_33 = arith.constant 0 : index
    %c0_34 = arith.constant 0 : index
    %79 = vector.load %arg7[%c0_33, %c0_34] : memref<1x128xf32, #tpu.memory_space<vmem>>, vector<1x128xf32>
    %80 = vector.shape_cast %79 : vector<1x128xf32> to vector<1x1x128xf32>
    %81 = vector.broadcast %80 : vector<1x1x128xf32> to vector<2x16x128xf32>
    %82 = arith.addf %78, %81 : vector<2x16x128xf32>
    %cst_35 = arith.constant 0.000000e+00 : f32
    %83 = vector.broadcast %cst_35 : f32 to vector<2x16x128xf32>
    %84 = arith.maximumf %82, %83 : vector<2x16x128xf32>
    %85 = vector.shape_cast %84 : vector<2x16x128xf32> to vector<32x128xf32>
    %c1_i32_36 = arith.constant 1 : i32
    %86 = tpu.dynamic_rotate %85 by %c1_i32_36 dim 0 : vector<32x128xf32>, i32 -> vector<32x128xf32>
    %cst_37 = arith.constant 0.000000e+00 : f32
    %87 = vector.shape_cast %18 : vector<32x1xi1> to vector<32x1xi1>
    %88 = vector.broadcast %87 : vector<32x1xi1> to vector<32x128xi1>
    %89 = vector.broadcast %cst_37 : f32 to vector<32x128xf32>
    %90 = arith.select %88, %89, %86 : vector<32x128xi1>, vector<32x128xf32>
    %c31_i32_38 = arith.constant 31 : i32
    %91 = tpu.dynamic_rotate %85 by %c31_i32_38 dim 0 : vector<32x128xf32>, i32 -> vector<32x128xf32>
    %cst_39 = arith.constant 0.000000e+00 : f32
    %92 = vector.shape_cast %20 : vector<32x1xi1> to vector<32x1xi1>
    %93 = vector.broadcast %92 : vector<32x1xi1> to vector<32x128xi1>
    %94 = vector.broadcast %cst_39 : f32 to vector<32x128xf32>
    %95 = arith.select %93, %94, %91 : vector<32x128xi1>, vector<32x128xf32>
    %96 = arith.truncf %90 : vector<32x128xf32> to vector<32x128xbf16>
    %c0_40 = arith.constant 0 : index
    %c0_41 = arith.constant 0 : index
    %97 = vector.load %arg10[%c0_40, %c0_41] : memref<128x256xbf16, #tpu.memory_space<vmem>>, vector<128x256xbf16>
    %cst_42 = arith.constant dense<0.000000e+00> : vector<32x256xf32>
    %98 = tpu.matmul %96, %97, %cst_42 {dimension_numbers = #tpu.dot_dimension_numbers<[1], [0], [0], [1], [0, 0, 1, 1], [], []>} : vector<32x128xbf16>, vector<128x256xbf16>, vector<32x256xf32> -> vector<32x256xf32>
    %99 = arith.truncf %85 : vector<32x128xf32> to vector<32x128xbf16>
    %c0_43 = arith.constant 0 : index
    %c0_44 = arith.constant 0 : index
    %100 = vector.load %arg11[%c0_43, %c0_44] : memref<128x256xbf16, #tpu.memory_space<vmem>>, vector<128x256xbf16>
    %cst_45 = arith.constant dense<0.000000e+00> : vector<32x256xf32>
    %101 = tpu.matmul %99, %100, %cst_45 {dimension_numbers = #tpu.dot_dimension_numbers<[1], [0], [0], [1], [0, 0, 1, 1], [], []>} : vector<32x128xbf16>, vector<128x256xbf16>, vector<32x256xf32> -> vector<32x256xf32>
    %102 = arith.addf %98, %101 : vector<32x256xf32>
    %103 = arith.truncf %95 : vector<32x128xf32> to vector<32x128xbf16>
    %c0_46 = arith.constant 0 : index
    %c0_47 = arith.constant 0 : index
    %104 = vector.load %arg12[%c0_46, %c0_47] : memref<128x256xbf16, #tpu.memory_space<vmem>>, vector<128x256xbf16>
    %cst_48 = arith.constant dense<0.000000e+00> : vector<32x256xf32>
    %105 = tpu.matmul %103, %104, %cst_48 {dimension_numbers = #tpu.dot_dimension_numbers<[1], [0], [0], [1], [0, 0, 1, 1], [], []>} : vector<32x128xbf16>, vector<128x256xbf16>, vector<32x256xf32> -> vector<32x256xf32>
    %106 = arith.addf %102, %105 : vector<32x256xf32>
    %c0_49 = arith.constant 0 : index
    %c0_50 = arith.constant 0 : index
    %107 = vector.load %arg13[%c0_49, %c0_50] : memref<1x256xf32, #tpu.memory_space<vmem>>, vector<1x256xf32>
    %108 = vector.broadcast %107 : vector<1x256xf32> to vector<32x256xf32>
    %109 = arith.addf %106, %108 : vector<32x256xf32>
    %110 = vector.shape_cast %109 : vector<32x256xf32> to vector<2x16x256xf32>
    %cst_51 = arith.constant dense<0.000000e+00> : vector<2x256xf32>
    %111 = vector.multi_reduction <add>, %110, %cst_51 [1] : vector<2x16x256xf32> to vector<2x256xf32>
    %112 = arith.mulf %110, %110 : vector<2x16x256xf32>
    %cst_52 = arith.constant dense<0.000000e+00> : vector<2x256xf32>
    %113 = vector.multi_reduction <add>, %112, %cst_52 [1] : vector<2x16x256xf32> to vector<2x256xf32>
    %114 = tpu.concatenate %111, %113 in 0 : vector<2x256xf32>, vector<2x256xf32> -> vector<4x256xf32>
    %c0_53 = arith.constant 0 : index
    %c0_54 = arith.constant 0 : index
    %115 = vector.load %arg16[%c0_53, %c0_54] : memref<256x32xf32, #tpu.memory_space<vmem>>, vector<256x32xf32>
    %cst_55 = arith.constant dense<0.000000e+00> : vector<4x32xf32>
    %116 = tpu.matmul %114, %115, %cst_55 {dimension_numbers = #tpu.dot_dimension_numbers<[1], [0], [0], [1], [0, 0, 1, 1], [], []>} : vector<4x256xf32>, vector<256x32xf32>, vector<4x32xf32> -> vector<4x32xf32>
    %117 = vector.extract_strided_slice %116 {offsets = [0, 0], sizes = [2, 32], strides = [1, 1]} : vector<4x32xf32> to vector<2x32xf32>
    %cst_56 = arith.constant 1.280000e+02 : f32
    %118 = vector.broadcast %cst_56 : f32 to vector<2x32xf32>
    %119 = arith.divf %117, %118 : vector<2x32xf32>
    %120 = vector.extract_strided_slice %116 {offsets = [2, 0], sizes = [2, 32], strides = [1, 1]} : vector<4x32xf32> to vector<2x32xf32>
    %cst_57 = arith.constant 1.280000e+02 : f32
    %121 = vector.broadcast %cst_57 : f32 to vector<2x32xf32>
    %122 = arith.divf %120, %121 : vector<2x32xf32>
    %123 = arith.mulf %119, %119 : vector<2x32xf32>
    %124 = arith.subf %122, %123 : vector<2x32xf32>
    %cst_58 = arith.constant 0.000000e+00 : f32
    %125 = vector.broadcast %cst_58 : f32 to vector<2x32xf32>
    %126 = arith.maximumf %124, %125 : vector<2x32xf32>
    %cst_59 = arith.constant 9.99999974E-6 : f32
    %127 = vector.broadcast %cst_59 : f32 to vector<2x32xf32>
    %128 = arith.addf %126, %127 : vector<2x32xf32>
    %129 = math.rsqrt %128 : vector<2x32xf32>
    %130 = tpu.concatenate %119, %129 in 0 : vector<2x32xf32>, vector<2x32xf32> -> vector<4x32xf32>
    %c0_60 = arith.constant 0 : index
    %c0_61 = arith.constant 0 : index
    %131 = vector.load %arg17[%c0_60, %c0_61] : memref<32x256xf32, #tpu.memory_space<vmem>>, vector<32x256xf32>
    %cst_62 = arith.constant dense<0.000000e+00> : vector<4x256xf32>
    %132 = tpu.matmul %130, %131, %cst_62 {dimension_numbers = #tpu.dot_dimension_numbers<[1], [0], [0], [1], [0, 0, 1, 1], [], []>} : vector<4x32xf32>, vector<32x256xf32>, vector<4x256xf32> -> vector<4x256xf32>
    %133 = vector.extract_strided_slice %132 {offsets = [0, 0], sizes = [2, 256], strides = [1, 1]} : vector<4x256xf32> to vector<2x256xf32>
    %134 = vector.extract_strided_slice %132 {offsets = [2, 0], sizes = [2, 256], strides = [1, 1]} : vector<4x256xf32> to vector<2x256xf32>
    %135 = vector.shape_cast %133 : vector<2x256xf32> to vector<2x1x256xf32>
    %136 = vector.broadcast %135 : vector<2x1x256xf32> to vector<2x16x256xf32>
    %137 = arith.subf %110, %136 : vector<2x16x256xf32>
    %138 = vector.shape_cast %134 : vector<2x256xf32> to vector<2x1x256xf32>
    %139 = vector.broadcast %138 : vector<2x1x256xf32> to vector<2x16x256xf32>
    %140 = arith.mulf %137, %139 : vector<2x16x256xf32>
    %c0_63 = arith.constant 0 : index
    %c0_64 = arith.constant 0 : index
    %141 = vector.load %arg14[%c0_63, %c0_64] : memref<1x256xf32, #tpu.memory_space<vmem>>, vector<1x256xf32>
    %142 = vector.shape_cast %141 : vector<1x256xf32> to vector<1x1x256xf32>
    %143 = vector.broadcast %142 : vector<1x1x256xf32> to vector<2x16x256xf32>
    %144 = arith.mulf %140, %143 : vector<2x16x256xf32>
    %c0_65 = arith.constant 0 : index
    %c0_66 = arith.constant 0 : index
    %145 = vector.load %arg15[%c0_65, %c0_66] : memref<1x256xf32, #tpu.memory_space<vmem>>, vector<1x256xf32>
    %146 = vector.shape_cast %145 : vector<1x256xf32> to vector<1x1x256xf32>
    %147 = vector.broadcast %146 : vector<1x1x256xf32> to vector<2x16x256xf32>
    %148 = arith.addf %144, %147 : vector<2x16x256xf32>
    %cst_67 = arith.constant 0.000000e+00 : f32
    %149 = vector.broadcast %cst_67 : f32 to vector<2x16x256xf32>
    %150 = arith.maximumf %148, %149 : vector<2x16x256xf32>
    %151 = vector.shape_cast %150 : vector<2x16x256xf32> to vector<32x256xf32>
    %c1_i32_68 = arith.constant 1 : i32
    %152 = tpu.dynamic_rotate %151 by %c1_i32_68 dim 0 : vector<32x256xf32>, i32 -> vector<32x256xf32>
    %cst_69 = arith.constant 0.000000e+00 : f32
    %153 = vector.shape_cast %18 : vector<32x1xi1> to vector<32x1xi1>
    %154 = vector.broadcast %153 : vector<32x1xi1> to vector<32x256xi1>
    %155 = vector.broadcast %cst_69 : f32 to vector<32x256xf32>
    %156 = arith.select %154, %155, %152 : vector<32x256xi1>, vector<32x256xf32>
    %c31_i32_70 = arith.constant 31 : i32
    %157 = tpu.dynamic_rotate %151 by %c31_i32_70 dim 0 : vector<32x256xf32>, i32 -> vector<32x256xf32>
    %cst_71 = arith.constant 0.000000e+00 : f32
    %158 = vector.shape_cast %20 : vector<32x1xi1> to vector<32x1xi1>
    %159 = vector.broadcast %158 : vector<32x1xi1> to vector<32x256xi1>
    %160 = vector.broadcast %cst_71 : f32 to vector<32x256xf32>
    %161 = arith.select %159, %160, %157 : vector<32x256xi1>, vector<32x256xf32>
    %162 = arith.truncf %156 : vector<32x256xf32> to vector<32x256xbf16>
    %c0_72 = arith.constant 0 : index
    %c0_73 = arith.constant 0 : index
    %163 = vector.load %arg18[%c0_72, %c0_73] : memref<256x512xbf16, #tpu.memory_space<vmem>>, vector<256x512xbf16>
    %cst_74 = arith.constant dense<0.000000e+00> : vector<32x512xf32>
    %164 = tpu.matmul %162, %163, %cst_74 {dimension_numbers = #tpu.dot_dimension_numbers<[1], [0], [0], [1], [0, 0, 1, 1], [], []>} : vector<32x256xbf16>, vector<256x512xbf16>, vector<32x512xf32> -> vector<32x512xf32>
    %165 = arith.truncf %151 : vector<32x256xf32> to vector<32x256xbf16>
    %c0_75 = arith.constant 0 : index
    %c0_76 = arith.constant 0 : index
    %166 = vector.load %arg19[%c0_75, %c0_76] : memref<256x512xbf16, #tpu.memory_space<vmem>>, vector<256x512xbf16>
    %cst_77 = arith.constant dense<0.000000e+00> : vector<32x512xf32>
    %167 = tpu.matmul %165, %166, %cst_77 {dimension_numbers = #tpu.dot_dimension_numbers<[1], [0], [0], [1], [0, 0, 1, 1], [], []>} : vector<32x256xbf16>, vector<256x512xbf16>, vector<32x512xf32> -> vector<32x512xf32>
    %168 = arith.addf %164, %167 : vector<32x512xf32>
    %169 = arith.truncf %161 : vector<32x256xf32> to vector<32x256xbf16>
    %c0_78 = arith.constant 0 : index
    %c0_79 = arith.constant 0 : index
    %170 = vector.load %arg20[%c0_78, %c0_79] : memref<256x512xbf16, #tpu.memory_space<vmem>>, vector<256x512xbf16>
    %cst_80 = arith.constant dense<0.000000e+00> : vector<32x512xf32>
    %171 = tpu.matmul %169, %170, %cst_80 {dimension_numbers = #tpu.dot_dimension_numbers<[1], [0], [0], [1], [0, 0, 1, 1], [], []>} : vector<32x256xbf16>, vector<256x512xbf16>, vector<32x512xf32> -> vector<32x512xf32>
    %172 = arith.addf %168, %171 : vector<32x512xf32>
    %c0_81 = arith.constant 0 : index
    %c0_82 = arith.constant 0 : index
    %173 = vector.load %arg21[%c0_81, %c0_82] : memref<1x512xf32, #tpu.memory_space<vmem>>, vector<1x512xf32>
    %174 = vector.broadcast %173 : vector<1x512xf32> to vector<32x512xf32>
    %175 = arith.addf %172, %174 : vector<32x512xf32>
    %176 = vector.shape_cast %175 : vector<32x512xf32> to vector<2x16x512xf32>
    %cst_83 = arith.constant dense<0.000000e+00> : vector<2x512xf32>
    %177 = vector.multi_reduction <add>, %176, %cst_83 [1] : vector<2x16x512xf32> to vector<2x512xf32>
    %178 = arith.mulf %176, %176 : vector<2x16x512xf32>
    %cst_84 = arith.constant dense<0.000000e+00> : vector<2x512xf32>
    %179 = vector.multi_reduction <add>, %178, %cst_84 [1] : vector<2x16x512xf32> to vector<2x512xf32>
    %180 = tpu.concatenate %177, %179 in 0 : vector<2x512xf32>, vector<2x512xf32> -> vector<4x512xf32>
    %c0_85 = arith.constant 0 : index
    %c0_86 = arith.constant 0 : index
    %181 = vector.load %arg24[%c0_85, %c0_86] : memref<512x32xf32, #tpu.memory_space<vmem>>, vector<512x32xf32>
    %cst_87 = arith.constant dense<0.000000e+00> : vector<4x32xf32>
    %182 = tpu.matmul %180, %181, %cst_87 {dimension_numbers = #tpu.dot_dimension_numbers<[1], [0], [0], [1], [0, 0, 1, 1], [], []>} : vector<4x512xf32>, vector<512x32xf32>, vector<4x32xf32> -> vector<4x32xf32>
    %183 = vector.extract_strided_slice %182 {offsets = [0, 0], sizes = [2, 32], strides = [1, 1]} : vector<4x32xf32> to vector<2x32xf32>
    %cst_88 = arith.constant 2.560000e+02 : f32
    %184 = vector.broadcast %cst_88 : f32 to vector<2x32xf32>
    %185 = arith.divf %183, %184 : vector<2x32xf32>
    %186 = vector.extract_strided_slice %182 {offsets = [2, 0], sizes = [2, 32], strides = [1, 1]} : vector<4x32xf32> to vector<2x32xf32>
    %cst_89 = arith.constant 2.560000e+02 : f32
    %187 = vector.broadcast %cst_89 : f32 to vector<2x32xf32>
    %188 = arith.divf %186, %187 : vector<2x32xf32>
    %189 = arith.mulf %185, %185 : vector<2x32xf32>
    %190 = arith.subf %188, %189 : vector<2x32xf32>
    %cst_90 = arith.constant 0.000000e+00 : f32
    %191 = vector.broadcast %cst_90 : f32 to vector<2x32xf32>
    %192 = arith.maximumf %190, %191 : vector<2x32xf32>
    %cst_91 = arith.constant 9.99999974E-6 : f32
    %193 = vector.broadcast %cst_91 : f32 to vector<2x32xf32>
    %194 = arith.addf %192, %193 : vector<2x32xf32>
    %195 = math.rsqrt %194 : vector<2x32xf32>
    %196 = tpu.concatenate %185, %195 in 0 : vector<2x32xf32>, vector<2x32xf32> -> vector<4x32xf32>
    %c0_92 = arith.constant 0 : index
    %c0_93 = arith.constant 0 : index
    %197 = vector.load %arg25[%c0_92, %c0_93] : memref<32x512xf32, #tpu.memory_space<vmem>>, vector<32x512xf32>
    %cst_94 = arith.constant dense<0.000000e+00> : vector<4x512xf32>
    %198 = tpu.matmul %196, %197, %cst_94 {dimension_numbers = #tpu.dot_dimension_numbers<[1], [0], [0], [1], [0, 0, 1, 1], [], []>} : vector<4x32xf32>, vector<32x512xf32>, vector<4x512xf32> -> vector<4x512xf32>
    %199 = vector.extract_strided_slice %198 {offsets = [0, 0], sizes = [2, 512], strides = [1, 1]} : vector<4x512xf32> to vector<2x512xf32>
    %200 = vector.extract_strided_slice %198 {offsets = [2, 0], sizes = [2, 512], strides = [1, 1]} : vector<4x512xf32> to vector<2x512xf32>
    %201 = vector.shape_cast %199 : vector<2x512xf32> to vector<2x1x512xf32>
    %202 = vector.broadcast %201 : vector<2x1x512xf32> to vector<2x16x512xf32>
    %203 = arith.subf %176, %202 : vector<2x16x512xf32>
    %204 = vector.shape_cast %200 : vector<2x512xf32> to vector<2x1x512xf32>
    %205 = vector.broadcast %204 : vector<2x1x512xf32> to vector<2x16x512xf32>
    %206 = arith.mulf %203, %205 : vector<2x16x512xf32>
    %c0_95 = arith.constant 0 : index
    %c0_96 = arith.constant 0 : index
    %207 = vector.load %arg22[%c0_95, %c0_96] : memref<1x512xf32, #tpu.memory_space<vmem>>, vector<1x512xf32>
    %208 = vector.shape_cast %207 : vector<1x512xf32> to vector<1x1x512xf32>
    %209 = vector.broadcast %208 : vector<1x1x512xf32> to vector<2x16x512xf32>
    %210 = arith.mulf %206, %209 : vector<2x16x512xf32>
    %c0_97 = arith.constant 0 : index
    %c0_98 = arith.constant 0 : index
    %211 = vector.load %arg23[%c0_97, %c0_98] : memref<1x512xf32, #tpu.memory_space<vmem>>, vector<1x512xf32>
    %212 = vector.shape_cast %211 : vector<1x512xf32> to vector<1x1x512xf32>
    %213 = vector.broadcast %212 : vector<1x1x512xf32> to vector<2x16x512xf32>
    %214 = arith.addf %210, %213 : vector<2x16x512xf32>
    %cst_99 = arith.constant 0.000000e+00 : f32
    %215 = vector.broadcast %cst_99 : f32 to vector<2x16x512xf32>
    %216 = arith.maximumf %214, %215 : vector<2x16x512xf32>
    %217 = vector.shape_cast %216 : vector<2x16x512xf32> to vector<32x512xf32>
    %218 = vector.shape_cast %217 : vector<32x512xf32> to vector<2x16x512xf32>
    %c0_100 = arith.constant 0 : index
    %c0_101 = arith.constant 0 : index
    %c0_102 = arith.constant 0 : index
    %219 = vector.load %arg26[%c0_100, %c0_101, %c0_102] : memref<2x16x512xf32, #tpu.memory_space<vmem>>, vector<2x16x512xf32>
    tpu.vector_store %arg26[%c0_100, %c0_101, %c0_102], %218 {strides = array<i32>} : memref<2x16x512xf32, #tpu.memory_space<vmem>>, vector<2x16x512xf32>,
    return
  }
  func.func @transform_0(%arg0: i32) -> (i32, i32, i32) {
    %c0_i32 = arith.constant 0 : i32
    %c0_i32_0 = arith.constant 0 : i32
    %c0_i32_1 = arith.constant 0 : i32
    return %arg0, %c0_i32, %c0_i32_0 : i32, i32, i32
  }
  func.func @transform_1(%arg0: i32) -> (i32, i32) {
    %c0_i32 = arith.constant 0 : i32
    %c0_i32_0 = arith.constant 0 : i32
    %c0_i32_1 = arith.constant 0 : i32
    return %c0_i32, %c0_i32_0 : i32, i32
  }
  func.func @transform_2(%arg0: i32) -> (i32, i32) {
    %c0_i32 = arith.constant 0 : i32
    %c0_i32_0 = arith.constant 0 : i32
    %c0_i32_1 = arith.constant 0 : i32
    return %c0_i32, %c0_i32_0 : i32, i32
  }
  func.func @transform_3(%arg0: i32) -> (i32, i32) {
    %c0_i32 = arith.constant 0 : i32
    %c0_i32_0 = arith.constant 0 : i32
    %c0_i32_1 = arith.constant 0 : i32
    return %c0_i32, %c0_i32_0 : i32, i32
  }
  func.func @transform_4(%arg0: i32) -> (i32, i32) {
    %c0_i32 = arith.constant 0 : i32
    %c0_i32_0 = arith.constant 0 : i32
    %c0_i32_1 = arith.constant 0 : i32
    return %c0_i32, %c0_i32_0 : i32, i32
  }
  func.func @transform_5(%arg0: i32) -> (i32, i32) {
    %c0_i32 = arith.constant 0 : i32
    %c0_i32_0 = arith.constant 0 : i32
    %c0_i32_1 = arith.constant 0 : i32
    return %c0_i32, %c0_i32_0 : i32, i32
  }
  func.func @transform_6(%arg0: i32) -> (i32, i32) {
    %c0_i32 = arith.constant 0 : i32
    %c0_i32_0 = arith.constant 0 : i32
    %c0_i32_1 = arith.constant 0 : i32
    return %c0_i32, %c0_i32_0 : i32, i32
  }
  func.func @transform_7(%arg0: i32) -> (i32, i32) {
    %c0_i32 = arith.constant 0 : i32
    %c0_i32_0 = arith.constant 0 : i32
    %c0_i32_1 = arith.constant 0 : i32
    return %c0_i32, %c0_i32_0 : i32, i32
  }
  func.func @transform_8(%arg0: i32) -> (i32, i32) {
    %c0_i32 = arith.constant 0 : i32
    %c0_i32_0 = arith.constant 0 : i32
    %c0_i32_1 = arith.constant 0 : i32
    return %c0_i32, %c0_i32_0 : i32, i32
  }
  func.func @transform_9(%arg0: i32) -> (i32, i32) {
    %c0_i32 = arith.constant 0 : i32
    %c0_i32_0 = arith.constant 0 : i32
    %c0_i32_1 = arith.constant 0 : i32
    return %c0_i32, %c0_i32_0 : i32, i32
  }
  func.func @transform_10(%arg0: i32) -> (i32, i32) {
    %c0_i32 = arith.constant 0 : i32
    %c0_i32_0 = arith.constant 0 : i32
    %c0_i32_1 = arith.constant 0 : i32
    return %c0_i32, %c0_i32_0 : i32, i32
  }
  func.func @transform_11(%arg0: i32) -> (i32, i32) {
    %c0_i32 = arith.constant 0 : i32
    %c0_i32_0 = arith.constant 0 : i32
    %c0_i32_1 = arith.constant 0 : i32
    return %c0_i32, %c0_i32_0 : i32, i32
  }
  func.func @transform_12(%arg0: i32) -> (i32, i32) {
    %c0_i32 = arith.constant 0 : i32
    %c0_i32_0 = arith.constant 0 : i32
    %c0_i32_1 = arith.constant 0 : i32
    return %c0_i32, %c0_i32_0 : i32, i32
  }
  func.func @transform_13(%arg0: i32) -> (i32, i32) {
    %c0_i32 = arith.constant 0 : i32
    %c0_i32_0 = arith.constant 0 : i32
    %c0_i32_1 = arith.constant 0 : i32
    return %c0_i32, %c0_i32_0 : i32, i32
  }
  func.func @transform_14(%arg0: i32) -> (i32, i32) {
    %c0_i32 = arith.constant 0 : i32
    %c0_i32_0 = arith.constant 0 : i32
    %c0_i32_1 = arith.constant 0 : i32
    return %c0_i32, %c0_i32_0 : i32, i32
  }
  func.func @transform_15(%arg0: i32) -> (i32, i32) {
    %c0_i32 = arith.constant 0 : i32
    %c0_i32_0 = arith.constant 0 : i32
    %c0_i32_1 = arith.constant 0 : i32
    return %c0_i32, %c0_i32_0 : i32, i32
  }
  func.func @transform_16(%arg0: i32) -> (i32, i32) {
    %c0_i32 = arith.constant 0 : i32
    %c0_i32_0 = arith.constant 0 : i32
    %c0_i32_1 = arith.constant 0 : i32
    return %c0_i32, %c0_i32_0 : i32, i32
  }
  func.func @transform_17(%arg0: i32) -> (i32, i32) {
    %c0_i32 = arith.constant 0 : i32
    %c0_i32_0 = arith.constant 0 : i32
    %c0_i32_1 = arith.constant 0 : i32
    return %c0_i32, %c0_i32_0 : i32, i32
  }
  func.func @transform_18(%arg0: i32) -> (i32, i32) {
    %c0_i32 = arith.constant 0 : i32
    %c0_i32_0 = arith.constant 0 : i32
    %c0_i32_1 = arith.constant 0 : i32
    return %c0_i32, %c0_i32_0 : i32, i32
  }
  func.func @transform_19(%arg0: i32) -> (i32, i32) {
    %c0_i32 = arith.constant 0 : i32
    %c0_i32_0 = arith.constant 0 : i32
    %c0_i32_1 = arith.constant 0 : i32
    return %c0_i32, %c0_i32_0 : i32, i32
  }
  func.func @transform_20(%arg0: i32) -> (i32, i32) {
    %c0_i32 = arith.constant 0 : i32
    %c0_i32_0 = arith.constant 0 : i32
    %c0_i32_1 = arith.constant 0 : i32
    return %c0_i32, %c0_i32_0 : i32, i32
  }
  func.func @transform_21(%arg0: i32) -> (i32, i32) {
    %c0_i32 = arith.constant 0 : i32
    %c0_i32_0 = arith.constant 0 : i32
    %c0_i32_1 = arith.constant 0 : i32
    return %c0_i32, %c0_i32_0 : i32, i32
  }
  func.func @transform_22(%arg0: i32) -> (i32, i32) {
    %c0_i32 = arith.constant 0 : i32
    %c0_i32_0 = arith.constant 0 : i32
    %c0_i32_1 = arith.constant 0 : i32
    return %c0_i32, %c0_i32_0 : i32, i32
  }
  func.func @transform_23(%arg0: i32) -> (i32, i32) {
    %c0_i32 = arith.constant 0 : i32
    %c0_i32_0 = arith.constant 0 : i32
    %c0_i32_1 = arith.constant 0 : i32
    return %c0_i32, %c0_i32_0 : i32, i32
  }
  func.func @transform_24(%arg0: i32) -> (i32, i32) {
    %c0_i32 = arith.constant 0 : i32
    %c0_i32_0 = arith.constant 0 : i32
    %c0_i32_1 = arith.constant 0 : i32
    return %c0_i32, %c0_i32_0 : i32, i32
  }
  func.func @transform_25(%arg0: i32) -> (i32, i32, i32) {
    %c0_i32 = arith.constant 0 : i32
    %c0_i32_0 = arith.constant 0 : i32
    %c0_i32_1 = arith.constant 0 : i32
    return %arg0, %c0_i32, %c0_i32_0 : i32, i32, i32
  }
}

</mosaic_0001>

<bundles_post_ra>
// kernel: tpu_custom_call.1
= control target key start
LH: loop header
LB: loop body
LE: loop exit
PB: predicated region body
PF: predicated region fallthrough
CT: control target
= control target key end

     0   :  { %s7179_s0 = inlined_call_operand.vmem [shape: f32[2,16,4], index: 0, kind: input, shape index: {}]   ;;  %s7180_s1 = inlined_call_operand.vmem [shape: f32[4,128], index: 1, kind: input, shape index: {}]   ;;  %s7181_s2 = inlined_call_operand.vmem [shape: f32[4,128], index: 2, kind: input, shape index: {}]   ;;  %s7182_s3 = inlined_call_operand.hbm [shape: f32[4,128], index: 3, kind: input, shape index: {}]   ;;  %s7183_s4 = inlined_call_operand.hbm [shape: f32[1,128], index: 4, kind: input, shape index: {}]   ;;  %s7184_s5 = inlined_call_operand.hbm [shape: f32[1,128], index: 5, kind: input, shape index: {}]   ;;  %s7185_s6 = inlined_call_operand.hbm [shape: f32[1,128], index: 6, kind: input, shape index: {}]   ;;  %s7186_s7 = inlined_call_operand.vmem [shape: f32[128,32], index: 7, kind: input, shape index: {}]   ;;  %s7187_s8 = inlined_call_operand.hbm [shape: f32[32,128], index: 8, kind: input, shape index: {}]   ;;  %s7188_s9 = inlined_call_operand.hbm [shape: bf16[128,256], index: 9, kind: input, shape index: {}]   ;;  %s7189_s10 = inlined_call_operand.hbm [shape: bf16[128,256], index: 10, kind: input, shape index: {}]   ;;  %s7190_s11 = inlined_call_operand.hbm [shape: bf16[128,256], index: 11, kind: input, shape index: {}]   ;;  %s7191_s12 = inlined_call_operand.hbm [shape: f32[1,256], index: 12, kind: input, shape index: {}]   ;;  %s7192_s13 = inlined_call_operand.hbm [shape: f32[1,256], index: 13, kind: input, shape index: {}]   ;;  %s7193_s14 = inlined_call_operand.vmem [shape: f32[1,256], index: 14, kind: input, shape index: {}]   ;;  %s7194_s15 = inlined_call_operand.vmem [shape: f32[256,32], index: 15, kind: input, shape index: {}]   ;;  %s7195_s16 = inlined_call_operand.hbm [shape: f32[32,256], index: 16, kind: input, shape index: {}]   ;;  %s7196_s17 = inlined_call_operand.vmem [shape: bf16[256,512], index: 17, kind: input, shape index: {}]   ;;  %s7197_s18 = inlined_call_operand.vmem [shape: bf16[256,512], index: 18, kind: input, shape index: {}]   ;;  %s7198_s19 = inlined_call_operand.hbm [shape: bf16[256,512], index: 19, kind: input, shape index: {}]   ;;  %s7199_s20 = inlined_call_operand.vmem [shape: f32[1,512], index: 20, kind: input, shape index: {}]   ;;  %s7200_s21 = inlined_call_operand.vmem [shape: f32[1,512], index: 21, kind: input, shape index: {}]   ;;  %s7201_s22 = inlined_call_operand.vmem [shape: f32[1,512], index: 22, kind: input, shape index: {}]   ;;  %s7202_s23 = inlined_call_operand.vmem [shape: f32[512,32], index: 23, kind: input, shape index: {}]   ;;  %s7203_s24 = inlined_call_operand.hbm [shape: f32[32,512], index: 24, kind: input, shape index: {}]   ;;  %s7204_s25 = inlined_call_operand.hbm [shape: f32[2,16,512], index: 25, kind: output, shape index: {}]  }
   0x1   :  { %7209 = sst [smem:[#allocation32_spill]] %s7179_s0 }
   0x2   :  { %7210 = sst [smem:[#allocation33_spill]] %s7180_s1 }
   0x3   :  { %7211 = sst [smem:[#allocation34_spill]] %s7181_s2 }
   0x4   :  { %7212 = sst [smem:[#allocation35_spill]] %s7182_s3 }
   0x5   :  { %7213 = sst [smem:[#allocation36_spill]] %s7183_s4 }
   0x6   :  { %7214 = sst [smem:[#allocation37_spill]] %s7184_s5 }
   0x7   :  { %7215 = sst [smem:[#allocation38_spill]] %s7185_s6 }
   0x8   :  { %7216 = sst [smem:[#allocation39_spill]] %s7186_s7 }
   0x9   :  { %7217 = sst [smem:[#allocation40_spill]] %s7187_s8 }
   0xa   :  { %7218 = sst [smem:[#allocation41_spill]] %s7188_s9 }
   0xb   :  { %30 = vsyncpa [#allocation3], 0 }
   0xc   :  { %31 = vsyncpa [#allocation6], 0 }
   0xd   :  { %32 = vsyncpa [#allocation9], 0 }
   0xe   :  { %33 = vsyncpa [#allocation12], 0 }
   0xf   :  { %34 = vsyncpa [#allocation15], 0 }
  0x10   :  { %35 = vsyncpa [#allocation18], 0 }
  0x11   :  { %36 = vsyncpa [#allocation21], 0 }
  0x12   :  { %37 = vsyncpa [#allocation4], 0  ;;  %s5530_s29 = smov [#allocation5]   ;;  %s5531_s6 = smov [#allocation8]  }
  0x13   :  { %s60_s2 = sshll.u32 %s5530_s29, 4  ;;  %s80_s30 = sshll.u32 %s5531_s6, 4  ;;  %s61_s2 = int_to_ptr.vmem [resolvable:$true] %s60_s2  ;;  %s81_s30 = int_to_ptr.vmem [resolvable:$true] %s80_s30 }
  0x14   :  { %s5242_s7 = scalar_lea.vmem %s61_s2, 16  ;;  %s5246_s3 = scalar_lea.vmem %s61_s2, 32 }
  0x15   :  { %p5243_p0 = scmp.ne.s32.totalorder %s61_s2, %s5242_s7  ;;  %p5247_p1 = scmp.lt.s32.totalorder %s61_s2, %s61_s2 }
  0x16   :  { %p5248_p2 = scmp.lt.s32.totalorder %s5246_s3, %s5242_s7 }
  0x18   :  { %p5249_p3 = por %p5248_p2, %p5247_p1 }
  0x1a   :  { %p5250_p4 = pnand %p5249_p3, %p5243_p0 }
  0x1c   :  { %5253 = shalt.err (!%p5250_p4)
}
  0x1d   :  { %s7219_s8 = sld [smem:[#allocation36_spill]]  ;;  %s5262_s27 = scalar_lea.vmem %s81_s30, 16 }
  0x1e   :  { %p5263_p5 = scmp.ne.s32.totalorder %s81_s30, %s5262_s27  ;;  %s5266_s4 = scalar_lea.vmem %s81_s30, 32 }
  0x1f   :  { %p5267_p6 = scmp.lt.s32.totalorder %s81_s30, %s81_s30  ;;  %p5268_p7 = scmp.lt.s32.totalorder %s5266_s4, %s5262_s27 }
  0x21   :  { %p5269_p8 = por %p5268_p7, %p5267_p6 }
  0x23   :  { %63 = dma.hbm_to_vmem [thread:$0]  %s7219_s8, 16, %s61_s2, [#allocation6]  }
  0x24   :  { %p5270_p9 = pnand %p5269_p8, %p5263_p5 }
  0x26   :  { %5273 = shalt.err (!%p5270_p9)
}
  0x27   :  { %s7220_s5 = sld [smem:[#allocation38_spill]]  ;;  %s5532_s0 = smov [#allocation11]  }
  0x28   :  { %s103_s29 = sshll.u32 %s5532_s0, 4  ;;  %s5533_s6 = smov [#allocation14]   ;;  %s104_s29 = int_to_ptr.vmem [resolvable:$true] %s103_s29 }
  0x29   :  { %s127_s7 = sshll.u32 %s5533_s6, 4  ;;  %s5282_s3 = scalar_lea.vmem %s104_s29, 2048  ;;  %s128_s7 = int_to_ptr.vmem [resolvable:$true] %s127_s7 }
  0x2a   :  { %p5283_p10 = scmp.ne.s32.totalorder %s104_s29, %s5282_s3  ;;  %p5287_p11 = scmp.lt.s32.totalorder %s104_s29, %s104_s29 }
  0x2b   :  { %p5288_p12 = scmp.lt.s32.totalorder %s5282_s3, %s5282_s3 }
  0x2d   :  { %83 = dma.hbm_to_vmem [thread:$0]  %s7220_s5, 16, %s81_s30, [#allocation9]  }
  0x2e   :  { %p5289_p13 = por %p5288_p12, %p5287_p11 }
  0x30   :  { %p5290_p0 = pnand %p5289_p13, %p5283_p10 }
  0x32   :  { %5293 = shalt.err (!%p5290_p0)
}
  0x33   :  { %s5534_s2 = smov 128   ;;  %s5535_s26 = smov 8  }
  0x34   :  { %s7221_s8 = sld [smem:[#allocation41_spill]]  ;;  %s5302_s27 = scalar_lea.vmem %s128_s7, 2048 }
  0x35   :  { %p5303_p1 = scmp.ne.s32.totalorder %s128_s7, %s5302_s27  ;;  %p5307_p2 = scmp.lt.s32.totalorder %s128_s7, %s128_s7 }
  0x36   :  { %p5308_p3 = scmp.lt.s32.totalorder %s5302_s27, %s5302_s27 }
  0x38   :  { %p5309_p4 = por %p5308_p3, %p5307_p2 }
  0x3a   :  { %109 = dma.hbm_to_vmem [thread:$0]  %s7221_s8, 2048, %s104_s29, [#allocation12], %s5534_s2, %s5534_s2, %s5535_s26  }
  0x3b   :  { %p5310_p5 = pnand %p5309_p4, %p5303_p1 }
  0x3d   :  { %5313 = shalt.err (!%p5310_p5)
}
  0x3e   :  { %133 = dma.hbm_to_vmem [thread:$0]  %s7190_s11, 2048, %s128_s7, [#allocation15], %s5534_s2, %s5534_s2, %s5535_s26  }
  0x3f   :  { %s5536_s9 = smov [#allocation17]  }
  0x40   :  { %s150_s5 = sshll.u32 %s5536_s9, 4  ;;  %s151_s5 = int_to_ptr.vmem [resolvable:$true] %s150_s5 }
  0x41   :  { %s5322_s0 = scalar_lea.vmem %s151_s5, 32  ;;  %p5327_p7 = scmp.lt.s32.totalorder %s151_s5, %s151_s5 }
  0x42   :  { %p5323_p6 = scmp.ne.s32.totalorder %s151_s5, %s5322_s0  ;;  %p5328_p8 = scmp.lt.s32.totalorder %s5322_s0, %s5322_s0 }
  0x44   :  { %p5329_p9 = por %p5328_p8, %p5327_p7 }
  0x46   :  { %p5330_p10 = pnand %p5329_p9, %p5323_p6 }
  0x48   :  { %5333 = shalt.err (!%p5330_p10)
}
  0x49   :  { %153 = dma.hbm_to_vmem [thread:$0]  %s7192_s13, 32, %s151_s5, [#allocation18]  }
  0x4a   :  { %s5537_s3 = smov [#allocation20]   ;;  %s5538_s30 = smov [#allocation2]  }
  0x4b   :  { %s179_s1 = sshll.u32 %s5537_s3, 4  ;;  %s50_s8 = sshll.u32 %s5538_s30, 4  ;;  %s180_s1 = int_to_ptr.vmem [resolvable:$true] %s179_s1  ;;  %s51_s8 = int_to_ptr.vmem [resolvable:$true] %s50_s8 }
  0x4c   :  { %s5342_s11 = scalar_lea.vmem %s180_s1, 8192  ;;  %p5347_p12 = scmp.lt.s32.totalorder %s180_s1, %s180_s1 }
  0x4d   :  { %p5343_p11 = scmp.ne.s32.totalorder %s180_s1, %s5342_s11  ;;  %p5348_p13 = scmp.lt.s32.totalorder %s5342_s11, %s5342_s11 }
  0x4f   :  { %p5349_p0 = por %p5348_p13, %p5347_p12 }
  0x51   :  { %p5350_p1 = pnand %p5349_p0, %p5343_p11 }
  0x53   :  { %5353 = shalt.err (!%p5350_p1)
}
  0x54   :  { %s5539_s7 = smov 256   ;;  %s5540_s27 = smov 16  }
  0x55   :  { %185 = dma.hbm_to_vmem [thread:$0]  %s7198_s19, 8192, %s180_s1, [#allocation21], %s5539_s7, %s5539_s7, %s5540_s27  }
  0x56   :  { %s5362_s13 = scalar_lea.vmem %s51_s8, 64  ;;  %p5367_p3 = scmp.lt.s32.totalorder %s51_s8, %s51_s8 }
  0x57   :  { %p5363_p2 = scmp.ne.s32.totalorder %s51_s8, %s5362_s13  ;;  %p5368_p4 = scmp.lt.s32.totalorder %s5362_s13, %s5362_s13 }
  0x59   :  { %p5369_p5 = por %p5368_p4, %p5367_p3 }
  0x5b   :  { %p5370_p6 = pnand %p5369_p5, %p5363_p2 }
  0x5d   :  { %5373 = shalt.err (!%p5370_p6)
}
  0x5e   :  { %s7222_s0 = sld [smem:[#allocation35_spill]]  ;;  %s5541_s29 = smov [#allocation7]  }
  0x5f   :  { %s70_s6 = sshll.u32 %s5541_s29, 4  ;;  %s5542_s3 = smov [#allocation10]   ;;  %s71_s6 = int_to_ptr.vmem [resolvable:$true] %s70_s6 }
  0x60   :  { %s91_s30 = sshll.u32 %s5542_s3, 4  ;;  %s5382_s11 = scalar_lea.vmem %s71_s6, 16  ;;  %s92_s30 = int_to_ptr.vmem [resolvable:$true] %s91_s30 }
  0x61   :  { %p5383_p7 = scmp.ne.s32.totalorder %s71_s6, %s5382_s11  ;;  %s5386_s19 = scalar_lea.vmem %s71_s6, 32 }
  0x62   :  { %p5387_p8 = scmp.lt.s32.totalorder %s71_s6, %s71_s6  ;;  %p5388_p9 = scmp.lt.s32.totalorder %s5386_s19, %s5382_s11 }
  0x64   :  { %53 = dma.hbm_to_vmem [thread:$0]  %s7222_s0, 64, %s51_s8, [#allocation3]  }
  0x65   :  { %p5389_p10 = por %p5388_p9, %p5387_p8 }
  0x67   :  { %p5390_p11 = pnand %p5389_p10, %p5383_p7 }
  0x69   :  { %5393 = shalt.err (!%p5390_p11)
}
  0x6a   :  { %s7223_s28 = sld [smem:[#allocation37_spill]]  ;;  %s5402_s13 = scalar_lea.vmem %s92_s30, 512 }
  0x6b   :  { %p5403_p12 = scmp.ne.s32.totalorder %s92_s30, %s5402_s13  ;;  %p5407_p13 = scmp.lt.s32.totalorder %s92_s30, %s92_s30 }
  0x6c   :  { %p5408_p0 = scmp.lt.s32.totalorder %s5402_s13, %s5402_s13 }
  0x6e   :  { %p5409_p1 = por %p5408_p0, %p5407_p13 }
  0x70   :  { %73 = dma.hbm_to_vmem [thread:$0]  %s7223_s28, 16, %s71_s6, [#allocation6]  }
  0x71   :  { %p5410_p2 = pnand %p5409_p1, %p5403_p12 }
  0x73   :  { %5413 = shalt.err (!%p5410_p2)
}
  0x74   :  { %s7224_s5 = sld [smem:[#allocation40_spill]]  ;;  %s5543_s0 = smov [#allocation13]  }
  0x75   :  { %s115_s29 = sshll.u32 %s5543_s0, 4  ;;  %s5544_s3 = smov [#allocation16]   ;;  %s116_s29 = int_to_ptr.vmem [resolvable:$true] %s115_s29 }
  0x76   :  { %s140_s6 = sshll.u32 %s5544_s3, 4  ;;  %s5422_s11 = scalar_lea.vmem %s116_s29, 2048  ;;  %s141_s6 = int_to_ptr.vmem [resolvable:$true] %s140_s6 }
  0x77   :  { %p5423_p3 = scmp.ne.s32.totalorder %s116_s29, %s5422_s11  ;;  %p5427_p4 = scmp.lt.s32.totalorder %s116_s29, %s116_s29 }
  0x78   :  { %p5428_p5 = scmp.lt.s32.totalorder %s5422_s11, %s5422_s11 }
  0x7a   :  { %97 = dma.hbm_to_vmem [thread:$0]  %s7224_s5, 512, %s92_s30, [#allocation9], %s5534_s2, %s5534_s2, %s5535_s26  }
  0x7b   :  { %p5429_p6 = por %p5428_p5, %p5427_p4 }
  0x7d   :  { %p5430_p7 = pnand %p5429_p6, %p5423_p3 }
  0x7f   :  { %5433 = shalt.err (!%p5430_p7)
}
  0x80   :  { %121 = dma.hbm_to_vmem [thread:$0]  %s7189_s10, 2048, %s116_s29, [#allocation12], %s5534_s2, %s5534_s2, %s5535_s26  }
  0x81   :  { %s5442_s30 = scalar_lea.vmem %s141_s6, 32  ;;  %p5447_p9 = scmp.lt.s32.totalorder %s141_s6, %s141_s6 }
  0x82   :  { %p5443_p8 = scmp.ne.s32.totalorder %s141_s6, %s5442_s30  ;;  %p5448_p10 = scmp.lt.s32.totalorder %s5442_s30, %s5442_s30 }
  0x84   :  { %p5449_p11 = por %p5448_p10, %p5447_p9 }
  0x86   :  { %p5450_p12 = pnand %p5449_p11, %p5443_p8 }
  0x88   :  { %5453 = shalt.err (!%p5450_p12)
}
  0x89   :  { %143 = dma.hbm_to_vmem [thread:$0]  %s7191_s12, 32, %s141_s6, [#allocation15]  }
  0x8a   :  { %s5545_s13 = smov [#allocation19]   ;;  %s5546_s9 = smov [#allocation22]  }
  0x8b   :  { %s163_s8 = sshll.u32 %s5545_s13, 4  ;;  %s199_s5 = sshll.u32 %s5546_s9, 4  ;;  %s164_s8 = int_to_ptr.vmem [resolvable:$true] %s163_s8  ;;  %s200_s5 = int_to_ptr.vmem [resolvable:$true] %s199_s5 }
  0x8c   :  { %s5462_s0 = scalar_lea.vmem %s164_s8, 1024  ;;  %p5467_p0 = scmp.lt.s32.totalorder %s164_s8, %s164_s8 }
  0x8d   :  { %p5463_p13 = scmp.ne.s32.totalorder %s164_s8, %s5462_s0  ;;  %p5468_p1 = scmp.lt.s32.totalorder %s5462_s0, %s5462_s0 }
  0x8f   :  { %p5469_p2 = por %p5468_p1, %p5467_p0 }
  0x91   :  { %p5470_p3 = pnand %p5469_p2, %p5463_p13 }
  0x93   :  { %5473 = shalt.err (!%p5470_p3)
}
  0x94   :  { %169 = dma.hbm_to_vmem [thread:$0]  %s7195_s16, 1024, %s164_s8, [#allocation18], %s5539_s7, %s5539_s7, %s5540_s27  }
  0x95   :  { %s5482_s12 = scalar_lea.vmem %s200_s5, 2048  ;;  %p5487_p5 = scmp.lt.s32.totalorder %s200_s5, %s200_s5 }
  0x96   :  { %p5483_p4 = scmp.ne.s32.totalorder %s200_s5, %s5482_s12  ;;  %p5488_p6 = scmp.lt.s32.totalorder %s5482_s12, %s5482_s12 }
  0x98   :  { %p5489_p7 = por %p5488_p6, %p5487_p5 }
  0x9a   :  { %p5490_p8 = pnand %p5489_p7, %p5483_p4 }
  0x9c   :  { %5493 = shalt.err (!%p5490_p8)
}
  0x9d   :  { %s5547_s26 = smov 512   ;;  %s5548_s29 = smov 32  }
  0x9e   :  { %205 = dma.hbm_to_vmem [thread:$0]  %s7203_s24, 2048, %s200_s5, [#allocation21], %s5547_s26, %s5547_s26, %s5548_s29  }
  0x9f   :  { %5514 = dma.done.wait [#allocation3], 64  }
  0xa0   :  { %5515 = vsyncadd [#allocation3], 4294967232 }
  0xa1   :  { %5516 = dma.done.wait [#allocation6], 32  }
  0xa2   :  { %5517 = vsyncadd [#allocation6], 4294967264 }
  0xa3   :  { %5518 = dma.done.wait [#allocation9], 528  }
  0xa4   :  { %5519 = vsyncadd [#allocation9], 4294966768 }
  0xa5   :  { %5520 = dma.done.wait [#allocation12], 4096  }
  0xa6   :  { %5521 = vsyncadd [#allocation12], 4294963200 }
  0xa7   :  { %5522 = dma.done.wait [#allocation15], 2080  }
  0xa8   :  { %5523 = vsyncadd [#allocation15], 4294965216 }
  0xa9   :  { %5524 = dma.done.wait [#allocation18], 1056  }
  0xaa   :  { %5525 = vsyncadd [#allocation18], 4294966240 }
  0xab   :  { %5526 = dma.done.wait [#allocation21], 10240  }
  0xac   :  { %5527 = vsyncadd [#allocation21], 4294957056  ;;  %v246_v0 = vlaneseq  ;;  %vm368_vm0 = vcmask 1043456   ;;  %vm355_vm1 = vcmask 31744   ;;  %s7225_s7 = sld [smem:[#allocation34_spill]]  ;;  %v7207_v40 = vmov 0.0  }
  0xad   :  { %s7226_s19 = sld [smem:[#allocation32_spill]]  ;;  %v557_v15 = vld [vmem:[#allocation2] sm:$0xf]  ;;  %vm5550_vm8 = vmmov 0   ;;  %vm707_vm9 = vcmask 1041409   ;;  %vm712_vm10 = vcmask 1043459  }
  0xae   :  { %v5745_v1 = vshrl.u32 %v246_v0, 7  ;;  %s7227_s13 = sld [smem:[#allocation33_spill]]  ;;  %vm715_vm11 = vcmask 1041408   ;;  %vm818_vm12 = vcmask 261120   ;;  %vm5553_vm14 = vmmov 1   ;;  %v1589_v37 = vld [vmem:[%s7194_s15 + $0xf8] sm:$0xff] }
  0xaf   :  { %s7236_s12 = sld [smem:[#allocation39_spill]]  ;;  %v4925_v24 = vld [vmem:[#allocation14 + $0x40] ss:$8 sps:$4 sm:$0xff]  }
  0xb0   :  { %v249_v2 = vadd.s32 16, %v5745_v1  ;;  %v248_v3 = vadd.s32 8, %v5745_v1  ;;  %v255_v4 = vand.u32 15, %v5745_v1  ;;  %v250_v5 = vadd.s32 24, %v5745_v1 }
  0xb1   :  { %vm315_vm2 = vcmp.lt.s32.totalorder %v5745_v1, 1  ;;  %vm336_vm3 = vcmp.lt.s32.totalorder %v5745_v1, 7 }
  0xb2   :  { %v354_v6 = vld [vmem:[%s7225_s7] sm:$0xf]  ;;  %v269_v9 = vand.u32 15, %v249_v2  ;;  %v262_v10 = vand.u32 15, %v248_v3  ;;  %vm5773_vm4 = vcmp.eq.s32.totalorder %v255_v4, 0  ;;  %v276_v21 = vand.u32 15, %v250_v5 }
  0xb3   :  { %v307_v7 = vld [vmem:[%s7226_s19] sm:$0xff]  ;;  %v308_v8 = vld [vmem:[%s7226_s19 + $0x8] sm:$0xff]  ;;  %4773 = vmatprep.subr.msk.mxu0 %vm368_vm0, %v354_v6  ;;  %v310_v17 = vld [vmem:[%s7226_s19 + $0x18] sm:$0xff] }
  0xb4   :  { %v311_v11 = vrot.slane %v307_v7, 7  ;;  %v332_v12 = vrot.slane %v307_v7, 1  ;;  %4775 = vmatprep.mubr.msk.f32.mxu0 %vm355_vm1, %v307_v7  ;;  %v312_v13 = vrot.slane %v308_v8, 7  ;;  %v333_v14 = vrot.slane %v308_v8, 1  ;;  %4774 = vmatpush3.msk.msra.mxu0 %vm368_vm0, %v354_v6  ;;  %v353_v16 = vld [vmem:[%s7227_s13] sm:$0xf]  ;;  %vm4340_vm13 = vmneg %vm5773_vm4 }
  0xb5   :  { %4776 = vmatmul.mubr.msk.f32.vlgmr.msra.gmra.mxu0 %vm355_vm1, %v308_v8  ;;  %4789 = vmatprep.subr.msk.mxu0 %vm368_vm0, %v557_v15  ;;  %v314_v19 = vrot.slane %v310_v17, 7  ;;  %v309_v20 = vld [vmem:[%s7226_s19 + $0x10] sm:$0xff]  ;;  %vm5782_vm5 = vcmp.eq.s32.totalorder %v269_v9, 0  ;;  %vm5786_vm6 = vcmp.eq.s32.totalorder %v262_v10, 15  ;;  %v335_v29 = vrot.slane %v310_v17, 1  ;;  %v732_v41 = vld [vmem:[%s7236_s12 + $0x78] sm:$0xff]  ;;  %vm5957_vm15 = vmpackc.low %vm5553_vm14, %vm4340_vm13 }
  0xb6   :  { %4781 = vmatprep.subr.msk.mxu1 %vm368_vm0, %v353_v16  ;;  %4790 = vmatpush3.msk.msra.mxu0 %vm368_vm0, %v557_v15  ;;  %v313_v22 = vrot.slane %v309_v20, 7  ;;  %v334_v23 = vrot.slane %v309_v20, 1  ;;  %v318_v27 = vsel %vm315_vm2, %v311_v11, %v312_v13  ;;  %v339_v28 = vsel %vm336_vm3, %v332_v12, %v333_v14  ;;  %v731_v42 = vld [vmem:[%s7236_s12 + $0x70] sm:$0xff]  ;;  %v730_v43 = vld [vmem:[%s7236_s12 + $0x68] sm:$0xff]  ;;  %v729_v44 = vld [vmem:[%s7236_s12 + $0x60] sm:$0xff] }
  0xb7   :  { %4782 = vmatpush3.msk.msra.mxu1 %vm368_vm0, %v353_v16  ;;  %v319_v26 = vsel %vm315_vm2, %v314_v19, %v311_v11  ;;  %4778 = vmatprep.mubr.msk.f32.mxu0 %vm355_vm1, %v309_v20  ;;  %vm5817_vm7 = vcmp.eq.s32.totalorder %v276_v21, 15  ;;  %v340_v38 = vsel %vm336_vm3, %v335_v29, %v332_v12  ;;  %v728_v45 = vld [vmem:[%s7236_s12 + $0x58] sm:$0xff]  ;;  %v727_v46 = vld [vmem:[%s7236_s12 + $0x50] sm:$0xff]  ;;  %v726_v47 = vld [vmem:[%s7236_s12 + $0x48] sm:$0xff] }
  0xb8   :  { %v328_v30 = vsel %vm5773_vm4, 0.0, %v319_v26  ;;  %v317_v31 = vsel %vm315_vm2, %v312_v13, %v313_v22  ;;  %v338_v32 = vsel %vm336_vm3, %v333_v14, %v334_v23  ;;  %v316_v35 = vsel %vm315_vm2, %v313_v22, %v314_v19  ;;  %4797 = vmatprep.subr.mxu1 %v7207_v40  ;;  %4832 = vmatprep.subr.mxu0 %v7207_v40  ;;  %v725_v48 = vld [vmem:[%s7236_s12 + $0x40] sm:$0xff]  ;;  %v724_v49 = vld [vmem:[%s7236_s12 + $0x38] sm:$0xff]  ;;  %v723_v50 = vld [vmem:[%s7236_s12 + $0x30] sm:$0xff] }
  0xb9   :  { %4783 = vmatprep.mubr.msk.f32.mxu1 %vm355_vm1, %v328_v30  ;;  %4779 = vmatmul.mubr.msk.f32.gmra.mxu0 %vm355_vm1, %v310_v17  ;;  %v330_v33 = vsel %vm5782_vm5, 0.0, %v317_v31  ;;  %v350_v34 = vsel %vm5786_vm6, 0.0, %v338_v32  ;;  %v337_v36 = vsel %vm336_vm3, %v334_v23, %v335_v29  ;;  %v352_v39 = vsel %vm5817_vm7, 0.0, %v340_v38  ;;  %v722_v51 = vld [vmem:[%s7236_s12 + $0x28] sm:$0xff]  ;;  %v721_v52 = vld [vmem:[%s7236_s12 + $0x20] sm:$0xff]  ;;  %v720_v53 = vld [vmem:[%s7236_s12 + $0x18] sm:$0xff] }
  0xba   :  { %4784 = vmatmul.mubr.msk.f32.vlgmr.msra.gmra.mxu1 %vm355_vm1, %v318_v27  ;;  %4791 = vmatprep.mubr.msk.f32.mxu0 %vm355_vm1, %v339_v28  ;;  %v719_v54 = vld [vmem:[%s7236_s12 + $0x10] sm:$0xff]  ;;  %v718_v55 = vld [vmem:[%s7236_s12 + $0x8] sm:$0xff]  ;;  %v717_v56 = vld [vmem:[%s7236_s12] sm:$0xff] }
  0xbb   :  { %4786 = vmatprep.mubr.msk.f32.mxu1 %vm355_vm1, %v330_v33  ;;  %4798 = vmatpush3.msra.mxu1 %v732_v41  ;;  %v4304_v2 = vld [vmem:[#allocation5] ss:$0 sm:$0xff]  ;;  %vm4344_vm0 = vmneg %vm5782_vm5 }
  0xbc   :  { %4799 = vmatprep.subr.mxu1 %v7207_v40  ;;  %vm4364_vm4 = vmneg %vm5786_vm6 }
  0xbd   :  { %4792 = vmatmul.mubr.msk.f32.vlgmr.msra.gmra.mxu0 %vm355_vm1, %v350_v34  ;;  %4800 = vmatpush3.msra.mxu1 %v731_v42  ;;  %vm5993_vm5 = vmpackc.low %vm4364_vm4, %vm5553_vm14 }
  0xbe   :  { %4787 = vmatmul.mubr.msk.f32.gmra.mxu1 %vm355_vm1, %v316_v35  ;;  %4794 = vmatprep.mubr.msk.f32.mxu0 %vm355_vm1, %v337_v36  ;;  %vm4368_vm6 = vmneg %vm5817_vm7 }
  0xbf   :  { %4801 = vmatprep.subr.mxu1 %v7207_v40  ;;  %4829 = vmatprep.mubr.msk.f32.mxu1 %vm5550_vm8, %v7207_v40 }
  0xc0   :  { %4802 = vmatpush3.msra.mxu1 %v730_v43 }
  0xc1   :  { %4795 = vmatmul.mubr.msk.f32.gmra.mxu0 %vm355_vm1, %v352_v39  ;;  %4803 = vmatprep.subr.mxu1 %v7207_v40  ;;  %vm5977_vm1 = vmpackc.low %vm5553_vm14, %vm4344_vm0 }
  0xc2   :  { %4804 = vmatpush3.msra.mxu1 %v729_v44  ;;  %4840 = vmatprep.mubr.msk.f32.mxu0 %vm5550_vm8, %v7207_v40  ;;  %vm6008_vm8 = vmpackc.low %vm4368_vm6, %vm5553_vm14 }
  0xc3   :  { %4805 = vmatprep.subr.mxu1 %v7207_v40 }
  0xc4   :  { %4806 = vmatpush3.msra.mxu1 %v728_v45 }
  0xc5   :  { %4807 = vmatprep.subr.mxu1 %v7207_v40 }
  0xc6   :  { %4808 = vmatpush3.msra.mxu1 %v727_v46 }
  0xc7   :  { %4809 = vmatprep.subr.mxu1 %v7207_v40 }
  0xc8   :  { %4810 = vmatpush3.msra.mxu1 %v726_v47 }
  0xc9   :  { %4811 = vmatprep.subr.mxu1 %v7207_v40 }
  0xca   :  { %4812 = vmatpush3.msra.mxu1 %v725_v48 }
  0xcb   :  { %4813 = vmatprep.subr.mxu1 %v7207_v40 }
  0xcc   :  { %4814 = vmatpush3.msra.mxu1 %v724_v49 }
  0xcd   :  { %4815 = vmatprep.subr.mxu1 %v7207_v40 }
  0xce   :  { %4816 = vmatpush3.msra.mxu1 %v723_v50 }
  0xcf   :  { %4817 = vmatprep.subr.mxu1 %v7207_v40 }
  0xd0   :  { %4818 = vmatpush3.msra.mxu1 %v722_v51 }
  0xd1   :  { %4819 = vmatprep.subr.mxu1 %v7207_v40 }
  0xd2   :  { %4820 = vmatpush3.msra.mxu1 %v721_v52 }
  0xd3   :  { %4821 = vmatprep.subr.mxu1 %v7207_v40 }
  0xd4   :  { %4822 = vmatpush3.msra.mxu1 %v720_v53 }
  0xd5   :  { %4823 = vmatprep.subr.mxu1 %v7207_v40 }
  0xd6   :  { %4824 = vmatpush3.msra.mxu1 %v719_v54 }
  0xd7   :  { %4825 = vmatprep.subr.mxu1 %v7207_v40 }
  0xd8   :  { %4826 = vmatpush3.msra.mxu1 %v718_v55 }
  0xd9   :  { %4827 = vmatprep.subr.mxu1 %v7207_v40 }
  0xda   :  { %4828 = vmatpush3.msra.mxu1 %v717_v56 }
 0x175   :  { %v4777_v57 = vpop.f32.mrf.mxu0 }
 0x177   :  { %v438_v58 = vpop.f32.mrf.mxu0 }
 0x179   :  { %v4780_v59 = vpop.f32.mrf.mxu0 }
 0x17a   :  { %v4785_v60 = vpop.f32.mrf.mxu1 }
 0x17b   :  { %v448_v61 = vpop.f32.mrf.mxu0  ;;  %v544_v62 = vadd.f32 %v4785_v60, %v4777_v57  ;;  %v816_v60 = vld [vmem:[#allocation10 + $0x10] sm:$0xff] }
 0x17c   :  { %v538_v63 = vpop.f32.mrf.mxu1 }
 0x17d   :  { %v4793_v0 = vpop.f32.mrf.mxu0  ;;  %v539_v3 = vadd.f32 %v538_v63, %v438_v58  ;;  %v4870_v63 = vld [vmem:[#allocation13 + $0x74] ss:$8 sps:$4 sm:$0xff]  }
 0x17e   :  { %v4788_v4 = vpop.f32.mrf.mxu1  ;;  %v659_v5 = vadd.f32 %v4793_v0, %v544_v62  ;;  %v814_v62 = vld [vmem:[#allocation10] sm:$0xff]  ;;  %v4874_v0 = vld [vmem:[#allocation11 + $0x70] ss:$8 sps:$4 sm:$0xff]  }
 0x17f   :  { %v639_v6 = vpop.f32.mrf.mxu0  ;;  %v554_v7 = vadd.f32 %v4788_v4, %v4780_v59  ;;  %v817_v59 = vld [vmem:[#allocation10 + $0x18] sm:$0xff]  ;;  %v4882_v4 = vld [vmem:[#allocation11 + $0x64] ss:$8 sps:$4 sm:$0xff]  }
 0x180   :  { %v5896_v8 = vadd.f32 %v4304_v2, %v659_v5  ;;  %v548_v9 = vpop.f32.mrf.mxu1  ;;  %v658_v10 = vadd.f32 %v639_v6, %v539_v3  ;;  %4833 = vmatpush3.msra.mxu0 %v817_v59  ;;  %v4880_v3 = vld [vmem:[#allocation11 + $0x60] ss:$8 sps:$4 sm:$0xff]  }
 0x181   :  { %v4796_v11 = vpop.f32.mrf.mxu0  ;;  %v549_v12 = vadd.f32 %v548_v9, %v448_v61  ;;  %4834 = vmatprep.subr.mxu0 %v7207_v40  ;;  %v815_v61 = vld [vmem:[#allocation10 + $0x8] sm:$0xff] }
 0x182   :  { %v5898_v13 = vadd.f32 %v4304_v2, %v658_v10  ;;  %v661_v14 = vadd.f32 %v4796_v11, %v554_v7  ;;  %v688_v15 = vmul.f32 %v5896_v8, %v5896_v8  ;;  %4835 = vmatpush3.msra.mxu0 %v816_v60 }
 0x183   :  { %v649_v16 = vpop.f32.mrf.mxu0  ;;  %4836 = vmatprep.subr.mxu0 %v7207_v40 }
 0x184   :  { %v673_v17 = vadd.f32 %v5896_v8, %v5898_v13  ;;  %v687_v19 = vmul.f32 %v5898_v13, %v5898_v13  ;;  %v5906_v20 = vadd.f32 %v4304_v2, %v661_v14  ;;  %v660_v21 = vadd.f32 %v649_v16, %v549_v12  ;;  %4837 = vmatpush3.msra.mxu0 %v815_v61 }
 0x185   :  { %4838 = vmatprep.subr.mxu0 %v7207_v40 }
 0x186   :  { %v674_v22 = vrot.slane %v673_v17, 4  ;;  %v691_v23 = vadd.f32 %v688_v15, %v687_v19  ;;  %v5908_v26 = vadd.f32 %v4304_v2, %v660_v21  ;;  %v690_v27 = vmul.f32 %v5906_v20, %v5906_v20  ;;  %4839 = vmatpush3.msra.mxu0 %v814_v62  ;;  %v4876_v2 = vld [vmem:[#allocation11 + $0x74] ss:$8 sps:$4 sm:$0xff]   ;;  %v4868_v15 = vld [vmem:[#allocation13 + $0x70] ss:$8 sps:$4 sm:$0xff]  }
 0x187   :  { %1111 = vmatprep.subr.bf16.mxu0 %v4870_v63  ;;  %1244 = vmatprep.subr.bf16.mxu1 %v4876_v2  ;;  %v4871_v21 = vld [vmem:[#allocation13 + $0x60] ss:$8 sps:$4 sm:$0xff]  }
 0x188   :  { %v675_v28 = vadd.f32 %v674_v22, %v673_v17  ;;  %v692_v29 = vrot.slane %v691_v23, 4  ;;  %v680_v30 = vadd.f32 %v5906_v20, %v5908_v26  ;;  %v689_v31 = vmul.f32 %v5908_v26, %v5908_v26  ;;  %v4873_v17 = vld [vmem:[#allocation13 + $0x64] ss:$8 sps:$4 sm:$0xff]   ;;  %v4879_v22 = vld [vmem:[#allocation13 + $0x54] ss:$8 sps:$4 sm:$0xff]  }
 0x18a   :  { %v676_v32 = vrot.slane %v675_v28, 2  ;;  %v693_v33 = vadd.f32 %v692_v29, %v691_v23  ;;  %v681_v34 = vrot.slane %v680_v30, 4  ;;  %v698_v35 = vadd.f32 %v690_v27, %v689_v31  ;;  %v4877_v23 = vld [vmem:[#allocation13 + $0x50] ss:$8 sps:$4 sm:$0xff]   ;;  %v4885_v27 = vld [vmem:[#allocation13 + $0x44] ss:$8 sps:$4 sm:$0xff]  }
 0x18b   :  { %v4888_v29 = vld [vmem:[#allocation11 + $0x54] ss:$8 sps:$4 sm:$0xff]  }
 0x18c   :  { %v694_v36 = vrot.slane %v693_v33, 2  ;;  %v682_v38 = vadd.f32 %v681_v34, %v680_v30  ;;  %v699_v39 = vrot.slane %v698_v35, 4  ;;  %v677_v41 = vadd.f32 %v676_v32, %v675_v28  ;;  %v4883_v28 = vld [vmem:[#allocation13 + $0x40] ss:$8 sps:$4 sm:$0xff]   ;;  %v4886_v30 = vld [vmem:[#allocation11 + $0x50] ss:$8 sps:$4 sm:$0xff]  }
 0x18d   :  { %v4891_v31 = vld [vmem:[#allocation13 + $0x34] ss:$8 sps:$4 sm:$0xff]   ;;  %v4889_v32 = vld [vmem:[#allocation13 + $0x30] ss:$8 sps:$4 sm:$0xff]   ;;  %v4892_v34 = vld [vmem:[#allocation11 + $0x40] ss:$8 sps:$4 sm:$0xff]  }
 0x18e   :  { %v695_v42 = vadd.f32 %v694_v36, %v693_v33  ;;  %v683_v43 = vrot.slane %v682_v38, 2  ;;  %v700_v44 = vadd.f32 %v699_v39, %v698_v35  ;;  %v678_v47 = vrot.slane %v677_v41, 1  ;;  %v4894_v33 = vld [vmem:[#allocation11 + $0x44] ss:$8 sps:$4 sm:$0xff]   ;;  %v4895_v36 = vld [vmem:[#allocation13 + $0x20] ss:$8 sps:$4 sm:$0xff]  }
 0x18f   :  { %v4897_v35 = vld [vmem:[#allocation13 + $0x24] ss:$8 sps:$4 sm:$0xff]   ;;  %v4898_v39 = vld [vmem:[#allocation11 + $0x30] ss:$8 sps:$4 sm:$0xff]  }
 0x190   :  { %v684_v45 = vadd.f32 %v683_v43, %v682_v38  ;;  %v701_v46 = vrot.slane %v700_v44, 2  ;;  %v696_v50 = vrot.slane %v695_v42, 1  ;;  %v679_v53 = vadd.f32 %v678_v47, %v677_v41  ;;  %v4900_v38 = vld [vmem:[#allocation11 + $0x34] ss:$8 sps:$4 sm:$0xff]   ;;  %v4906_v43 = vld [vmem:[#allocation11 + $0x24] ss:$8 sps:$4 sm:$0xff]  }
 0x191   :  { %v4903_v41 = vld [vmem:[#allocation13 + $0x14] ss:$8 sps:$4 sm:$0xff]  }
 0x192   :  { %v685_v48 = vrot.slane %v684_v45, 1  ;;  %v702_v49 = vadd.f32 %v701_v46, %v700_v44  ;;  %v697_v54 = vadd.f32 %v696_v50, %v695_v42  ;;  %v4901_v42 = vld [vmem:[#allocation13 + $0x10] ss:$8 sps:$4 sm:$0xff]   ;;  %v4904_v44 = vld [vmem:[#allocation11 + $0x20] ss:$8 sps:$4 sm:$0xff]  }
 0x193   :  { %v4907_v46 = vld [vmem:[#allocation13] ss:$8 sps:$4 sm:$0xff]   ;;  %v4912_v47 = vld [vmem:[#allocation11 + $0x14] ss:$8 sps:$4 sm:$0xff]  }
 0x194   :  { %v686_v51 = vadd.f32 %v685_v48, %v684_v45  ;;  %v703_v52 = vrot.slane %v702_v49, 1  ;;  %v4909_v45 = vld [vmem:[#allocation13 + $0x4] ss:$8 sps:$4 sm:$0xff]   ;;  %v4910_v48 = vld [vmem:[#allocation11 + $0x10] ss:$8 sps:$4 sm:$0xff]  }
 0x195   :  { %v4915_v50 = vld [vmem:[#allocation14 + $0x74] ss:$8 sps:$4 sm:$0xff]  }
 0x196   :  { %v704_v55 = vadd.f32 %v703_v52, %v702_v49  ;;  %v708_v56 = vsel %vm707_vm9, %v686_v51, %v679_v53  ;;  %v5551_v49 = vmov 0   ;;  %v4918_v51 = vld [vmem:[#allocation11 + $0x4] ss:$8 sps:$4 sm:$0xff]   ;;  %v4916_v52 = vld [vmem:[#allocation11] ss:$8 sps:$4 sm:$0xff]  }
 0x197   :  { %v5552_v53 = vmov 1966171168  }
 0x198   :  { %v713_v57 = vsel %vm712_vm10, %v704_v55, %v697_v54  ;;  %v894_v54 = vunpack.c.l.s4 %v5552_v53 }
 0x199   :  { %v716_v58 = vsel %vm715_vm11, %v708_v56, %v713_v57 }
 0x19a   :  { %4830 = vmatmul.mubr.f32.vlgmr.msra.gmra.mxu1 %v716_v58  ;;  %v895_v55 = vunpack.c.0.s8 %v894_v54  ;;  %v5930_v58 = vsub.s32 0, %v5745_v1  ;;  %v4930_v54 = vld [vmem:[#allocation14 + $0x34] ss:$8 sps:$4 sm:$0xff]  }
 0x19b   :  { %1245 = vmatpush1.bf16.msra.mxu1 %v4874_v0  ;;  %1276 = vmatprep.mubr.bf16.mxu1 %v5551_v49 }
 0x19c   :  { %1246 = vmatprep.subr.bf16.mxu1 %v4882_v4  ;;  %v5927_v56 = vsub.s32 %v895_v55, %v5745_v1  ;;  %v4928_v55 = vld [vmem:[#allocation14 + $0x30] ss:$8 sps:$4 sm:$0xff]  }
 0x19f   :  { %1247 = vmatpush1.bf16.msra.mxu1 %v4880_v3 }
 0x1a0   :  { %1248 = vmatprep.subr.bf16.mxu1 %v4888_v29 }
 0x1a3   :  { %1249 = vmatpush1.bf16.msra.mxu1 %v4886_v30 }
 0x1a4   :  { %1250 = vmatprep.subr.bf16.mxu1 %v4894_v33 }
 0x1a7   :  { %1251 = vmatpush1.bf16.msra.mxu1 %v4892_v34 }
 0x1a8   :  { %1252 = vmatprep.subr.bf16.mxu1 %v4900_v38 }
 0x1ab   :  { %1253 = vmatpush1.bf16.msra.mxu1 %v4898_v39  ;;  %v5146_v39 = vld [vmem:[#allocation20 + $0xa4] ss:$16 sps:$4 sm:$0xff]  }
 0x1ac   :  { %1254 = vmatprep.subr.bf16.mxu1 %v4906_v43 }
 0x1af   :  { %1255 = vmatpush1.bf16.msra.mxu1 %v4904_v44  ;;  %v4924_v44 = vld [vmem:[#allocation14 + $0x54] ss:$8 sps:$4 sm:$0xff]  }
 0x1b0   :  { %1256 = vmatprep.subr.bf16.mxu1 %v4912_v47 }
 0x1b3   :  { %1257 = vmatpush1.bf16.msra.mxu1 %v4910_v48  ;;  %v4927_v48 = vld [vmem:[#allocation14 + $0x44] ss:$8 sps:$4 sm:$0xff]  }
 0x1b4   :  { %1258 = vmatprep.subr.bf16.mxu1 %v4918_v51 }
 0x1b7   :  { %1259 = vmatpush1.bf16.msra.mxu1 %v4916_v52  ;;  %v5156_v52 = vld [vmem:[#allocation20 + $0x60] ss:$16 sps:$4 sm:$0xff]  }
 0x1b8   :  { %4668 = vmatprep.subr.mxu1 %v1589_v37 }
 0x25a   :  { %v799_v5 = vpop.f32.mrf.mxu1 }
 0x25b   :  { %v804_v6 = vmul.f32 0.015625, %v799_v5 }
 0x25c   :  { %v4831_v7 = vpop.f32.mrf.mxu1 }
 0x25d   :  { %v805_v9 = vmul.f32 %v804_v6, %v804_v6 }
 0x25f   :  { %v807_v10 = vrot.slane %v805_v9, 6 }
 0x261   :  { %v809_v11 = vsub.f32 %v804_v6, %v807_v10 }
 0x263   :  { %v810_v12 = vmax.f32 %v809_v11, 0.0 }
 0x265   :  { %v811_v14 = vadd.f32 1e-05, %v810_v12  ;;  %v4306_v12 = vld [vmem:[#allocation7] ss:$0 sm:$0xff] }
 0x267   :  { %5228 = vrsqrt.f32 %v811_v14 }
 0x274   :  { %v5229_v16 = vpop.eup %5228 }
 0x275   :  { %v813_v19 = vsel %vm715_vm11, %v804_v6, %v5229_v16 }
 0x276   :  { %4841 = vmatmul.mubr.msk.f32.vlgmr.msra.gmra.mxu0 %vm818_vm12, %v813_v19  ;;  %v4307_v19 = vld [vmem:[#allocation8] ss:$0 sm:$0xff] }
 0x277   :  { %1112 = vmatpush1.bf16.msra.mxu0 %v4868_v15  ;;  %1143 = vmatprep.mubr.bf16.mxu0 %v5551_v49 }
 0x278   :  { %1113 = vmatprep.subr.bf16.mxu0 %v4873_v17 }
 0x27b   :  { %1114 = vmatpush1.bf16.msra.mxu0 %v4871_v21 }
 0x27c   :  { %1115 = vmatprep.subr.bf16.mxu0 %v4879_v22 }
 0x27f   :  { %1116 = vmatpush1.bf16.msra.mxu0 %v4877_v23 }
 0x280   :  { %1117 = vmatprep.subr.bf16.mxu0 %v4885_v27 }
 0x283   :  { %1118 = vmatpush1.bf16.msra.mxu0 %v4883_v28 }
 0x284   :  { %1119 = vmatprep.subr.bf16.mxu0 %v4891_v31  ;;  %v4913_v31 = vld [vmem:[#allocation14 + $0x70] ss:$8 sps:$4 sm:$0xff]  }
 0x287   :  { %1120 = vmatpush1.bf16.msra.mxu0 %v4889_v32 }
 0x288   :  { %1121 = vmatprep.subr.bf16.mxu0 %v4897_v35  ;;  %v4921_v35 = vld [vmem:[#allocation14 + $0x64] ss:$8 sps:$4 sm:$0xff]  }
 0x28b   :  { %1122 = vmatpush1.bf16.msra.mxu0 %v4895_v36 }
 0x28c   :  { %1123 = vmatprep.subr.bf16.mxu0 %v4903_v41 }
 0x28f   :  { %1124 = vmatpush1.bf16.msra.mxu0 %v4901_v42  ;;  %v4919_v42 = vld [vmem:[#allocation14 + $0x60] ss:$8 sps:$4 sm:$0xff]  }
 0x290   :  { %1125 = vmatprep.subr.bf16.mxu0 %v4909_v45 }
 0x293   :  { %1126 = vmatpush1.bf16.msra.mxu0 %v4907_v46  ;;  %v4922_v46 = vld [vmem:[#allocation14 + $0x50] ss:$8 sps:$4 sm:$0xff]  }
 0x294   :  { %1395 = vmatprep.subr.bf16.mxu0 %v4915_v50 }
 0x336   :  { %v888_v57 = vpop.f32.mrf.mxu0 }
 0x337   :  { %v899_v59 = vrot.slane %v888_v57, %v5927_v56  ;;  %v4933_v57 = vld [vmem:[#allocation14 + $0x24] ss:$8 sps:$4 sm:$0xff]  }
 0x338   :  { %v4842_v60 = vpop.f32.mrf.mxu0 }
 0x339   :  { %v900_v61 = vcombine.high %v899_v59, %v899_v59  ;;  %v907_v62 = vrot.slane %v899_v59, %v5927_v56  ;;  %v4931_v59 = vld [vmem:[#allocation14 + $0x20] ss:$8 sps:$4 sm:$0xff]   ;;  %v4936_v60 = vld [vmem:[#allocation14 + $0x14] ss:$8 sps:$4 sm:$0xff]  }
 0x33b   :  { %v914_v63 = vrot.slane %v900_v61, %v5927_v56  ;;  %v918_v0 = vrot.slane %v907_v62, %v5930_v58  ;;  %v929_v2 = vcombine.high %v907_v62, %v907_v62  ;;  %v4934_v61 = vld [vmem:[#allocation14 + $0x10] ss:$8 sps:$4 sm:$0xff]   ;;  %v4939_v62 = vld [vmem:[#allocation14 + $0x4] ss:$8 sps:$4 sm:$0xff]  }
 0x33d   :  { %v922_v3 = vrot.slane %v914_v63, %v5930_v58  ;;  %v925_v4 = vsub.f32 %v5898_v13, %v918_v0  ;;  %v926_v5 = vsub.f32 %v5896_v8, %v918_v0  ;;  %v930_v6 = vcombine.high %v914_v63, %v914_v63 }
 0x33e   :  { %v934_v7 = vrot.slane %v929_v2, %v5930_v58 }
 0x33f   :  { %v927_v9 = vsub.f32 %v5908_v26, %v922_v3  ;;  %v928_v10 = vsub.f32 %v5906_v20, %v922_v3  ;;  %v938_v11 = vrot.slane %v930_v6, %v5930_v58  ;;  %v4937_v3 = vld [vmem:[#allocation14] ss:$8 sps:$4 sm:$0xff]   ;;  %v3663_v6 = vld [vmem:[%s7202_s23 + $0xf8] sm:$0xff] }
 0x340   :  { %v941_v14 = vmul.f32 %v934_v7, %v925_v4  ;;  %v942_v15 = vmul.f32 %v934_v7, %v926_v5 }
 0x341   :  { %v943_v16 = vmul.f32 %v938_v11, %v927_v9  ;;  %v944_v17 = vmul.f32 %v938_v11, %v928_v10  ;;  %v3662_v11 = vld [vmem:[%s7202_s23 + $0xf0] sm:$0xff] }
 0x342   :  { %v952_v21 = vmul.f32 %v4306_v12, %v941_v14  ;;  %v953_v22 = vmul.f32 %v4306_v12, %v942_v15  ;;  %v1588_v14 = vld [vmem:[%s7194_s15 + $0xf0] sm:$0xff] }
 0x343   :  { %v955_v13 = vmul.f32 %v4306_v12, %v944_v17  ;;  %v954_v23 = vmul.f32 %v4306_v12, %v943_v16  ;;  %v1572_v15 = vld [vmem:[%s7194_s15 + $0x70] sm:$0xff]  ;;  %v1587_v16 = vld [vmem:[%s7194_s15 + $0xe8] sm:$0xff] }
 0x344   :  { %v963_v8 = vadd.f32 %v4307_v19, %v952_v21  ;;  %v964_v27 = vadd.f32 %v4307_v19, %v953_v22  ;;  %v1571_v17 = vld [vmem:[%s7194_s15 + $0x68] sm:$0xff]  ;;  %v1570_v21 = vld [vmem:[%s7194_s15 + $0x60] sm:$0xff]  ;;  %v1585_v22 = vld [vmem:[%s7194_s15 + $0xd8] sm:$0xff] }
 0x345   :  { %v966_v28 = vadd.f32 %v4307_v19, %v955_v13  ;;  %v965_v29 = vadd.f32 %v4307_v19, %v954_v23  ;;  %v1586_v19 = vld [vmem:[%s7194_s15 + $0xe0] sm:$0xff]  ;;  %v1569_v13 = vld [vmem:[%s7194_s15 + $0x58] sm:$0xff]  ;;  %v1584_v23 = vld [vmem:[%s7194_s15 + $0xd0] sm:$0xff] }
 0x346   :  { %v5943_v30 = vmax.f32 %v963_v8, 0.0  ;;  %v5945_v26 = vmax.f32 %v964_v27, 0.0  ;;  %v1568_v8 = vld [vmem:[%s7194_s15 + $0x50] sm:$0xff]  ;;  %v1583_v27 = vld [vmem:[%s7194_s15 + $0xc8] sm:$0xff] }
 0x347   :  { %v5947_v20 = vmax.f32 %v966_v28, 0.0  ;;  %v969_v38 = vmax.f32 %v965_v29, 0.0  ;;  %v1567_v28 = vld [vmem:[%s7194_s15 + $0x48] sm:$0xff]  ;;  %v1582_v29 = vld [vmem:[%s7194_s15 + $0xc0] sm:$0xff] }
 0x348   :  { %v971_v32 = vrot.slane %v5943_v30, 7  ;;  %v972_v33 = vrot.slane %v5945_v26, 7  ;;  %v1013_v34 = vpack.c.bf16 %v5945_v26, %v5943_v30  ;;  %v983_v0 = vrot.slane %v5943_v30, 1  ;;  %v1566_v30 = vld [vmem:[%s7194_s15 + $0x40] sm:$0xff] }
 0x349   :  { %v974_v36 = vrot.slane %v5947_v20, 7  ;;  %v973_v45 = vrot.slane %v969_v38, 7  ;;  %v1014_v47 = vpack.c.bf16 %v5947_v20, %v969_v38  ;;  %v985_v63 = vrot.slane %v969_v38, 1  ;;  %v1577_v38 = vld [vmem:[%s7194_s15 + $0x98] sm:$0xff] }
 0x34a   :  { %1144 = vmatmul.mubr.bf16.vlgmr.msra.gmra.mxu0 %v1013_v34  ;;  %v977_v18 = vsel %vm315_vm2, %v971_v32, %v972_v33  ;;  %v984_v2 = vrot.slane %v5945_v26, 1  ;;  %v986_v9 = vrot.slane %v5947_v20, 1  ;;  %v1581_v26 = vld [vmem:[%s7194_s15 + $0xb8] sm:$0xff]  ;;  %v1563_v34 = vld [vmem:[%s7194_s15 + $0x28] sm:$0xff] }
 0x34b   :  { %v978_v41 = vsel %vm315_vm2, %v974_v36, %v971_v32  ;;  %1396 = vmatpush1.bf16.msra.mxu0 %v4913_v31  ;;  %1153 = vmatprep.mubr.bf16.mxu0 %v5551_v49  ;;  %v975_v50 = vsel %vm315_vm2, %v973_v45, %v974_v36  ;;  %v976_v51 = vsel %vm315_vm2, %v972_v33, %v973_v45  ;;  %v1565_v20 = vld [vmem:[%s7194_s15 + $0x38] sm:$0xff]  ;;  %v1580_v31 = vld [vmem:[%s7194_s15 + $0xb0] sm:$0xff]  ;;  %v1579_v33 = vld [vmem:[%s7194_s15 + $0xa8] sm:$0xff] }
 0x34c   :  { %v4342_v43 = vpack.c.bf16 %v977_v18, %v978_v41  ;;  %1397 = vmatprep.subr.bf16.mxu0 %v4921_v35  ;;  %v4346_v53 = vpack.c.bf16 %v975_v50, %v976_v51  ;;  %v988_v4 = vsel %vm336_vm3, %v984_v2, %v985_v63  ;;  %v989_v5 = vsel %vm336_vm3, %v983_v0, %v984_v2  ;;  %v1564_v32 = vld [vmem:[%s7194_s15 + $0x30] sm:$0xff]  ;;  %v1578_v35 = vld [vmem:[%s7194_s15 + $0xa0] sm:$0xff]  ;;  %v1561_v18 = vld [vmem:[%s7194_s15 + $0x18] sm:$0xff] }
 0x34d   :  { %v4366_v7 = vpack.c.bf16 %v988_v4, %v989_v5  ;;  %v987_v25 = vsel %vm336_vm3, %v985_v63, %v986_v9  ;;  %v990_v10 = vsel %vm336_vm3, %v986_v9, %v983_v0  ;;  %v1562_v36 = vld [vmem:[%s7194_s15 + $0x20] sm:$0xff]  ;;  %v1576_v41 = vld [vmem:[%s7194_s15 + $0x90] sm:$0xff]  ;;  %v6112_v63 = vsub.s32 1, %v5745_v1 }
 0x34e   :  { %4343 = vmatmul.mubr.msk.bf16.vlgmr.msra.gmra.mxu1 %vm5957_vm15, %v4342_v43  ;;  %v4370_v12 = vpack.c.bf16 %v990_v10, %v987_v25  ;;  %v1575_v43 = vld [vmem:[%s7194_s15 + $0x88] sm:$0xff]  ;;  %v1574_v45 = vld [vmem:[%s7194_s15 + $0x80] sm:$0xff] }
 0x34f   :  { %1286 = vmatprep.mubr.bf16.mxu1 %v5551_v49  ;;  %1398 = vmatpush1.bf16.msra.mxu0 %v4919_v42  ;;  %v1560_v42 = vld [vmem:[%s7194_s15 + $0x10] sm:$0xff] }
 0x350   :  { %1399 = vmatprep.subr.bf16.mxu0 %v4924_v44  ;;  %v1559_v44 = vld [vmem:[%s7194_s15 + $0x8] sm:$0xff] }
 0x352   :  { %1154 = vmatmul.mubr.bf16.gmra.mxu0 %v1014_v47 }
 0x353   :  { %1400 = vmatpush1.bf16.msra.mxu0 %v4922_v46  ;;  %1427 = vmatprep.mubr.bf16.mxu0 %v5551_v49  ;;  %v1558_v46 = vld [vmem:[%s7194_s15] sm:$0xff] }
 0x354   :  { %1401 = vmatprep.subr.bf16.mxu0 %v4927_v48 }
 0x356   :  { %4347 = vmatmul.mubr.msk.bf16.gmra.mxu1 %vm5977_vm1, %v4346_v53 }
 0x357   :  { %1402 = vmatpush1.bf16.msra.mxu0 %v4925_v24 }
 0x358   :  { %1403 = vmatprep.subr.bf16.mxu0 %v4930_v54 }
 0x35b   :  { %1404 = vmatpush1.bf16.msra.mxu0 %v4928_v55 }
 0x35c   :  { %1405 = vmatprep.subr.bf16.mxu0 %v4933_v57 }
 0x35f   :  { %1406 = vmatpush1.bf16.msra.mxu0 %v4931_v59 }
 0x360   :  { %1407 = vmatprep.subr.bf16.mxu0 %v4936_v60 }
 0x363   :  { %1408 = vmatpush1.bf16.msra.mxu0 %v4934_v61 }
 0x364   :  { %1409 = vmatprep.subr.bf16.mxu0 %v4939_v62  ;;  %v1456_v62 = vld [vmem:[#allocation16] sm:$0x3] }
 0x365   :  { %v1465_v25 = vrot.slane %v1456_v62, %v6112_v63 }
 0x367   :  { %1410 = vmatpush1.bf16.msra.mxu0 %v4937_v3 }
 0x36a   :  { %4367 = vmatmul.mubr.msk.bf16.vlgmr.msra.gmra.mxu0 %vm5993_vm5, %v4366_v7  ;;  %v1461_v7 = vrot.slane %v1456_v62, %v5930_v58 }
 0x36b   :  { %1437 = vmatprep.mubr.bf16.mxu0 %v5551_v49  ;;  %v1573_v49 = vld [vmem:[%s7194_s15 + $0x78] sm:$0xff] }
 0x36c   :  { %4669 = vmatpush3.msra.mxu1 %v1573_v49 }
 0x36d   :  { %4670 = vmatprep.subr.mxu1 %v1588_v14 }
 0x36e   :  { %4671 = vmatpush3.msra.mxu1 %v1572_v15 }
 0x36f   :  { %4672 = vmatprep.subr.mxu1 %v1587_v16 }
 0x370   :  { %4673 = vmatpush3.msra.mxu1 %v1571_v17 }
 0x371   :  { %4674 = vmatprep.subr.mxu1 %v1586_v19 }
 0x372   :  { %4371 = vmatmul.mubr.msk.bf16.gmra.mxu0 %vm6008_vm8, %v4370_v12  ;;  %4675 = vmatpush3.msra.mxu1 %v1570_v21 }
 0x373   :  { %1746 = vmatprep.mubr.f32.mxu0 %v7207_v40  ;;  %4676 = vmatprep.subr.mxu1 %v1585_v22 }
 0x374   :  { %4677 = vmatpush3.msra.mxu1 %v1569_v13 }
 0x375   :  { %4678 = vmatprep.subr.mxu1 %v1584_v23 }
 0x376   :  { %4679 = vmatpush3.msra.mxu1 %v1568_v8 }
 0x377   :  { %4680 = vmatprep.subr.mxu1 %v1583_v27 }
 0x378   :  { %4681 = vmatpush3.msra.mxu1 %v1567_v28 }
 0x379   :  { %4682 = vmatprep.subr.mxu1 %v1582_v29 }
 0x37a   :  { %4683 = vmatpush3.msra.mxu1 %v1566_v30 }
 0x37b   :  { %4684 = vmatprep.subr.mxu1 %v1581_v26 }
 0x37c   :  { %4685 = vmatpush3.msra.mxu1 %v1565_v20 }
 0x37d   :  { %4686 = vmatprep.subr.mxu1 %v1580_v31 }
 0x37e   :  { %4687 = vmatpush3.msra.mxu1 %v1564_v32 }
 0x37f   :  { %4688 = vmatprep.subr.mxu1 %v1579_v33 }
 0x380   :  { %4689 = vmatpush3.msra.mxu1 %v1563_v34 }
 0x381   :  { %4690 = vmatprep.subr.mxu1 %v1578_v35 }
 0x382   :  { %4691 = vmatpush3.msra.mxu1 %v1562_v36 }
 0x383   :  { %4692 = vmatprep.subr.mxu1 %v1577_v38 }
 0x384   :  { %4693 = vmatpush3.msra.mxu1 %v1561_v18 }
 0x385   :  { %4694 = vmatprep.subr.mxu1 %v1576_v41 }
 0x386   :  { %4695 = vmatpush3.msra.mxu1 %v1560_v42 }
 0x387   :  { %4696 = vmatprep.subr.mxu1 %v1575_v43 }
 0x388   :  { %4697 = vmatpush3.msra.mxu1 %v1559_v44 }
 0x389   :  { %4698 = vmatprep.subr.mxu1 %v1574_v45 }
 0x38a   :  { %4699 = vmatpush3.msra.mxu1 %v1558_v46 }
 0x40a   :  { %v1145_v47 = vpop.f32.mrf.mxu0 }
 0x40c   :  { %v1147_v48 = vpop.f32.mrf.mxu0 }
 0x40e   :  { %v1149_v50 = vpop.f32.mrf.mxu0  ;;  %v1278_v24 = vpop.f32.mrf.mxu1 }
 0x40f   :  { %v1279_v0 = vadd.f32 %v1278_v24, %v1145_v47 }
 0x410   :  { %v1151_v51 = vpop.f32.mrf.mxu0  ;;  %v1280_v54 = vpop.f32.mrf.mxu1 }
 0x411   :  { %v1281_v4 = vadd.f32 %v1280_v54, %v1147_v48 }
 0x412   :  { %v1155_v53 = vpop.f32.mrf.mxu0  ;;  %v1282_v57 = vpop.f32.mrf.mxu1 }
 0x413   :  { %v1283_v10 = vadd.f32 %v1282_v57, %v1149_v50 }
 0x414   :  { %v1157_v55 = vpop.f32.mrf.mxu0  ;;  %v1284_v60 = vpop.f32.mrf.mxu1 }
 0x415   :  { %v1285_v14 = vadd.f32 %v1284_v60, %v1151_v51 }
 0x416   :  { %v1159_v59 = vpop.f32.mrf.mxu0  ;;  %v1288_v2 = vpop.f32.mrf.mxu1 }
 0x417   :  { %v1289_v23 = vadd.f32 %v1288_v2, %v1155_v53 }
 0x418   :  { %v1161_v61 = vpop.f32.mrf.mxu0  ;;  %v1290_v12 = vpop.f32.mrf.mxu1 }
 0x419   :  { %v1291_v30 = vadd.f32 %v1290_v12, %v1157_v55 }
 0x41a   :  { %v1292_v21 = vpop.f32.mrf.mxu1 }
 0x41b   :  { %v1293_v38 = vadd.f32 %v1292_v21, %v1159_v59 }
 0x41c   :  { %v1294_v32 = vpop.f32.mrf.mxu1 }
 0x41d   :  { %v1295_v45 = vadd.f32 %v1294_v32, %v1161_v61 }
 0x42a   :  { %v1429_v3 = vpop.f32.mrf.mxu0 }
 0x42b   :  { %v1448_v5 = vadd.f32 %v1429_v3, %v1279_v0 }
 0x42c   :  { %v1431_v9 = vpop.f32.mrf.mxu0 }
 0x42d   :  { %v1449_v37 = vadd.f32 %v1431_v9, %v1281_v4  ;;  %v6116_v15 = vadd.f32 %v1461_v7, %v1448_v5 }
 0x42e   :  { %v1433_v49 = vpop.f32.mrf.mxu0 }
 0x42f   :  { %v1450_v16 = vadd.f32 %v1433_v49, %v1283_v10  ;;  %v6118_v17 = vadd.f32 %v1465_v25, %v1449_v37  ;;  %v1504_v27 = vmul.f32 %v6116_v15, %v6116_v15 }
 0x430   :  { %v1435_v19 = vpop.f32.mrf.mxu0 }
 0x431   :  { %v6120_v22 = vadd.f32 %v1461_v7, %v1450_v16  ;;  %v1451_v13 = vadd.f32 %v1435_v19, %v1285_v14  ;;  %v1505_v26 = vmul.f32 %v6118_v17, %v6118_v17 }
 0x432   :  { %v1439_v8 = vpop.f32.mrf.mxu0 }
 0x433   :  { %v1506_v28 = vmul.f32 %v6120_v22, %v6120_v22  ;;  %v6126_v29 = vadd.f32 %v1465_v25, %v1451_v13  ;;  %v1452_v20 = vadd.f32 %v1439_v8, %v1289_v23  ;;  %v1476_v33 = vadd.f32 %v6120_v22, %v6116_v15 }
 0x434   :  { %v1441_v31 = vpop.f32.mrf.mxu0 }
 0x435   :  { %v1512_v34 = vadd.f32 %v1506_v28, %v1504_v27  ;;  %v1483_v35 = vadd.f32 %v6126_v29, %v6118_v17  ;;  %v1507_v36 = vmul.f32 %v6126_v29, %v6126_v29  ;;  %v1453_v18 = vadd.f32 %v1441_v31, %v1291_v30 }
 0x436   :  { %v1443_v41 = vpop.f32.mrf.mxu0  ;;  %v6136_v46 = vadd.f32 %v1461_v7, %v1452_v20  ;;  %v1477_v50 = vrot.slane %v1476_v33, 4 }
 0x437   :  { %v1513_v42 = vrot.slane %v1512_v34, 4  ;;  %v1484_v43 = vrot.slane %v1483_v35, 4  ;;  %v1519_v44 = vadd.f32 %v1507_v36, %v1505_v26  ;;  %v1454_v47 = vadd.f32 %v1443_v41, %v1293_v38 }
 0x438   :  { %v1445_v48 = vpop.f32.mrf.mxu0  ;;  %v6138_v24 = vadd.f32 %v1465_v25, %v1453_v18  ;;  %v1508_v60 = vmul.f32 %v6136_v46, %v6136_v46  ;;  %v1478_v2 = vadd.f32 %v1477_v50, %v1476_v33 }
 0x439   :  { %v1520_v51 = vrot.slane %v1519_v44, 4  ;;  %v6140_v53 = vadd.f32 %v1461_v7, %v1454_v47  ;;  %v1455_v54 = vadd.f32 %v1445_v48, %v1295_v45  ;;  %v1514_v55 = vadd.f32 %v1513_v42, %v1512_v34 }
 0x43a   :  { %v1485_v57 = vadd.f32 %v1484_v43, %v1483_v35  ;;  %v1509_v3 = vmul.f32 %v6138_v24, %v6138_v24  ;;  %v1479_v19 = vrot.slane %v1478_v2, 2 }
 0x43b   :  { %v1521_v59 = vadd.f32 %v1520_v51, %v1519_v44  ;;  %v1490_v61 = vadd.f32 %v6140_v53, %v6136_v46  ;;  %v1510_v62 = vmul.f32 %v6140_v53, %v6140_v53  ;;  %v6148_v0 = vadd.f32 %v1465_v25, %v1455_v54 }
 0x43c   :  { %v1515_v10 = vrot.slane %v1514_v55, 2  ;;  %v1486_v12 = vrot.slane %v1485_v57, 2  ;;  %v1480_v33 = vadd.f32 %v1479_v19, %v1478_v2  ;;  %v4942_v19 = vld [vmem:[%s7197_s18 + $0xe4] ss:$16 sps:$4 sm:$0xff]  }
 0x43d   :  { %v1491_v4 = vrot.slane %v1490_v61, 4  ;;  %v1526_v5 = vadd.f32 %v1510_v62, %v1508_v60  ;;  %v1497_v7 = vadd.f32 %v6148_v0, %v6138_v24  ;;  %v1511_v9 = vmul.f32 %v6148_v0, %v6148_v0 }
 0x43e   :  { %v1522_v37 = vrot.slane %v1521_v59, 2  ;;  %v1516_v27 = vadd.f32 %v1515_v10, %v1514_v55  ;;  %v1487_v28 = vadd.f32 %v1486_v12, %v1485_v57  ;;  %v1481_v47 = vrot.slane %v1480_v33, 1  ;;  %v1677_v10 = vld [vmem:[#allocation19 + $0x30] sm:$0xff]  ;;  %v1676_v12 = vld [vmem:[#allocation19 + $0x28] sm:$0xff] }
 0x43f   :  { %v1492_v49 = vadd.f32 %v1491_v4, %v1490_v61  ;;  %v1527_v14 = vrot.slane %v1526_v5, 4  ;;  %v1498_v16 = vrot.slane %v1497_v7, 4  ;;  %v1533_v25 = vadd.f32 %v1511_v9, %v1509_v3  ;;  %v1678_v9 = vld [vmem:[#allocation19 + $0x38] sm:$0xff] }
 0x440   :  { %v1523_v30 = vadd.f32 %v1522_v37, %v1521_v59  ;;  %v1488_v18 = vrot.slane %v1487_v28, 1  ;;  %v1517_v41 = vrot.slane %v1516_v27, 1  ;;  %v1482_v61 = vadd.f32 %v1481_v47, %v1480_v33  ;;  %1706 = vmatprep.subr.mxu0 %v1678_v9  ;;  %v1675_v37 = vld [vmem:[#allocation19 + $0x20] sm:$0xff]  ;;  %v4973_v33 = vld [vmem:[%s7197_s18 + $0x48] ss:$16 sps:$4 sm:$0xff]  }
 0x441   :  { %v1493_v21 = vrot.slane %v1492_v49, 2  ;;  %v1528_v13 = vadd.f32 %v1527_v14, %v1526_v5  ;;  %v1499_v23 = vadd.f32 %v1498_v16, %v1497_v7  ;;  %v1534_v8 = vrot.slane %v1533_v25, 4  ;;  %1707 = vmatpush1.msra.mxu0 %v1677_v10  ;;  %v1673_v14 = vld [vmem:[#allocation19 + $0x10] sm:$0xff]  ;;  %v1672_v16 = vld [vmem:[#allocation19 + $0x8] sm:$0xff] }
 0x442   :  { %v1524_v43 = vrot.slane %v1523_v30, 1  ;;  %v1518_v55 = vadd.f32 %v1517_v41, %v1516_v27  ;;  %v1489_v57 = vadd.f32 %v1488_v18, %v1487_v28  ;;  %1708 = vmatprep.subr.mxu0 %v1676_v12  ;;  %v4957_v27 = vld [vmem:[%s7197_s18 + $0xac] ss:$16 sps:$4 sm:$0xff]   ;;  %v4955_v28 = vld [vmem:[%s7197_s18 + $0xa8] ss:$16 sps:$4 sm:$0xff]  }
 0x443   :  { %v1494_v26 = vadd.f32 %v1493_v21, %v1492_v49  ;;  %v1529_v20 = vrot.slane %v1528_v13, 2  ;;  %v1500_v31 = vrot.slane %v1499_v23, 2  ;;  %v1535_v32 = vadd.f32 %v1534_v8, %v1533_v25  ;;  %1709 = vmatpush1.msra.mxu0 %v1675_v37  ;;  %v1674_v49 = vld [vmem:[#allocation19 + $0x18] sm:$0xff]  ;;  %v1671_v25 = vld [vmem:[#allocation19] sm:$0xff] }
 0x444   :  { %v1525_v59 = vadd.f32 %v1524_v43, %v1523_v30  ;;  %1710 = vmatprep.subr.mxu0 %v1674_v49  ;;  %v4943_v21 = vld [vmem:[%s7197_s18 + $0xe8] ss:$16 sps:$4 sm:$0xff]   ;;  %v4963_v30 = vld [vmem:[%s7197_s18 + $0x8c] ss:$16 sps:$4 sm:$0xff]   ;;  %v4960_v9 = vld [vmem:[%s7197_s18 + $0x84] ss:$16 sps:$4 sm:$0xff]  }
 0x445   :  { %v1530_v34 = vadd.f32 %v1529_v20, %v1528_v13  ;;  %v1501_v35 = vadd.f32 %v1500_v31, %v1499_v23  ;;  %v1536_v36 = vrot.slane %v1535_v32, 2  ;;  %v1495_v38 = vrot.slane %v1494_v26, 1  ;;  %1711 = vmatpush1.msra.mxu0 %v1673_v14  ;;  %v4945_v13 = vld [vmem:[%s7197_s18 + $0xec] ss:$16 sps:$4 sm:$0xff]   ;;  %v4949_v8 = vld [vmem:[%s7197_s18 + $0xc8] ss:$16 sps:$4 sm:$0xff]  }
 0x446   :  { %1712 = vmatprep.subr.mxu0 %v1672_v16  ;;  %v4951_v23 = vld [vmem:[%s7197_s18 + $0xcc] ss:$16 sps:$4 sm:$0xff]   ;;  %2441 = vmatprep.subr.bf16.mxu1 %v4945_v13  ;;  %v4967_v31 = vld [vmem:[%s7197_s18 + $0x68] ss:$16 sps:$4 sm:$0xff]   ;;  %v4958_v10 = vld [vmem:[%s7197_s18 + $0x80] ss:$16 sps:$4 sm:$0xff]  }
 0x447   :  { %v1502_v42 = vrot.slane %v1501_v35, 1  ;;  %v1537_v44 = vadd.f32 %v1536_v36, %v1535_v32  ;;  %v1531_v45 = vrot.slane %v1530_v34, 1  ;;  %v1496_v54 = vadd.f32 %v1495_v38, %v1494_v26  ;;  %1713 = vmatpush1.msra.mxu0 %v1671_v25  ;;  %v4961_v26 = vld [vmem:[%s7197_s18 + $0x88] ss:$16 sps:$4 sm:$0xff]   ;;  %v4969_v20 = vld [vmem:[%s7197_s18 + $0x6c] ss:$16 sps:$4 sm:$0xff]  }
 0x448   :  { %2388 = vmatprep.subr.bf16.mxu0 %v4942_v19  ;;  %v4975_v32 = vld [vmem:[%s7197_s18 + $0x4c] ss:$16 sps:$4 sm:$0xff]   ;;  %v4985_v38 = vld [vmem:[%s7197_s18 + $0x8] ss:$16 sps:$4 sm:$0xff]   ;;  %v4966_v12 = vld [vmem:[%s7197_s18 + $0x64] ss:$16 sps:$4 sm:$0xff]  }
 0x449   :  { %v1503_v48 = vadd.f32 %v1502_v42, %v1501_v35  ;;  %v1538_v50 = vrot.slane %v1537_v44, 1  ;;  %v1532_v51 = vadd.f32 %v1531_v45, %v1530_v34  ;;  %v1544_v5 = vsel %vm707_vm9, %v1496_v54, %v1482_v61  ;;  %v4981_v34 = vld [vmem:[%s7197_s18 + $0x2c] ss:$16 sps:$4 sm:$0xff]   ;;  %v4979_v35 = vld [vmem:[%s7197_s18 + $0x28] ss:$16 sps:$4 sm:$0xff]  }
 0x44a   :  { %v4987_v36 = vld [vmem:[%s7197_s18 + $0xc] ss:$16 sps:$4 sm:$0xff]   ;;  %v4991_v41 = vld [vmem:[%s7197_s18 + $0x1e8] ss:$16 sps:$4 sm:$0xff]   ;;  %v4940_v61 = vld [vmem:[%s7197_s18 + $0xe0] ss:$16 sps:$4 sm:$0xff]  }
 0x44b   :  { %v1539_v60 = vadd.f32 %v1538_v50, %v1537_v44  ;;  %v1552_v62 = vsel %vm712_vm10, %v1532_v51, %v1518_v55  ;;  %v1545_v2 = vsel %vm707_vm9, %v1503_v48, %v1489_v57  ;;  %v4993_v18 = vld [vmem:[%s7197_s18 + $0x1ec] ss:$16 sps:$4 sm:$0xff]   ;;  %v4997_v43 = vld [vmem:[%s7197_s18 + $0x1c8] ss:$16 sps:$4 sm:$0xff]   ;;  %v4964_v37 = vld [vmem:[%s7197_s18 + $0x60] ss:$16 sps:$4 sm:$0xff]  }
 0x44c   :  { %v1556_v7 = vsel %vm715_vm11, %v1544_v5, %v1552_v62  ;;  %v4999_v42 = vld [vmem:[%s7197_s18 + $0x1cc] ss:$16 sps:$4 sm:$0xff]   ;;  %v5003_v45 = vld [vmem:[%s7197_s18 + $0x1a8] ss:$16 sps:$4 sm:$0xff]   ;;  %v4954_v5 = vld [vmem:[%s7197_s18 + $0xa4] ss:$16 sps:$4 sm:$0xff]  }
 0x44d   :  { %v1553_v3 = vsel %vm712_vm10, %v1539_v60, %v1525_v59  ;;  %v5005_v44 = vld [vmem:[%s7197_s18 + $0x1ac] ss:$16 sps:$4 sm:$0xff]   ;;  %v4972_v49 = vld [vmem:[%s7197_s18 + $0x44] ss:$16 sps:$4 sm:$0xff]   ;;  %v4970_v14 = vld [vmem:[%s7197_s18 + $0x40] ss:$16 sps:$4 sm:$0xff]  }
 0x44e   :  { %v1557_v4 = vsel %vm715_vm11, %v1545_v2, %v1553_v3  ;;  %v4948_v2 = vld [vmem:[%s7197_s18 + $0xc4] ss:$16 sps:$4 sm:$0xff]   ;;  %v4976_v25 = vld [vmem:[%s7197_s18 + $0x20] ss:$16 sps:$4 sm:$0xff]  }
 0x44f   :  { %1654 = vmatprep.mubr.f32.mxu1 %v1557_v4  ;;  %v4946_v4 = vld [vmem:[%s7197_s18 + $0xc0] ss:$16 sps:$4 sm:$0xff]   ;;  %v4978_v16 = vld [vmem:[%s7197_s18 + $0x24] ss:$16 sps:$4 sm:$0xff]  }
 0x450   :  { %1655 = vmatmul.mubr.f32.vlgmr.msra.gmra.mxu1 %v1556_v7  ;;  %v4952_v7 = vld [vmem:[%s7197_s18 + $0xa0] ss:$16 sps:$4 sm:$0xff]   ;;  %v4984_v19 = vld [vmem:[%s7197_s18 + $0x4] ss:$16 sps:$4 sm:$0xff]  }
 0x451   :  { %2442 = vmatpush1.bf16.msra.mxu1 %v4943_v21  ;;  %v4982_v21 = vld [vmem:[%s7197_s18] ss:$16 sps:$4 sm:$0xff]   ;;  %v4990_v13 = vld [vmem:[%s7197_s18 + $0x1e4] ss:$16 sps:$4 sm:$0xff]  }
 0x452   :  { %2443 = vmatprep.subr.bf16.mxu1 %v4951_v23  ;;  %v4988_v23 = vld [vmem:[%s7197_s18 + $0x1e0] ss:$16 sps:$4 sm:$0xff]  }
 0x455   :  { %2444 = vmatpush1.bf16.msra.mxu1 %v4949_v8  ;;  %v4996_v8 = vld [vmem:[%s7197_s18 + $0x1c4] ss:$16 sps:$4 sm:$0xff]  }
 0x456   :  { %2445 = vmatprep.subr.bf16.mxu1 %v4957_v27  ;;  %v4994_v27 = vld [vmem:[%s7197_s18 + $0x1c0] ss:$16 sps:$4 sm:$0xff]  }
 0x459   :  { %2446 = vmatpush1.bf16.msra.mxu1 %v4955_v28  ;;  %v5002_v28 = vld [vmem:[%s7197_s18 + $0x1a4] ss:$16 sps:$4 sm:$0xff]  }
 0x45a   :  { %2447 = vmatprep.subr.bf16.mxu1 %v4963_v30  ;;  %v5000_v30 = vld [vmem:[%s7197_s18 + $0x1a0] ss:$16 sps:$4 sm:$0xff]  }
 0x45d   :  { %2448 = vmatpush1.bf16.msra.mxu1 %v4961_v26  ;;  %v5008_v26 = vld [vmem:[%s7197_s18 + $0x184] ss:$16 sps:$4 sm:$0xff]  }
 0x45e   :  { %2449 = vmatprep.subr.bf16.mxu1 %v4969_v20  ;;  %v5011_v20 = vld [vmem:[%s7197_s18 + $0x18c] ss:$16 sps:$4 sm:$0xff]  }
 0x461   :  { %2450 = vmatpush1.bf16.msra.mxu1 %v4967_v31  ;;  %v5006_v31 = vld [vmem:[%s7197_s18 + $0x180] ss:$16 sps:$4 sm:$0xff]  }
 0x462   :  { %2451 = vmatprep.subr.bf16.mxu1 %v4975_v32  ;;  %v5009_v32 = vld [vmem:[%s7197_s18 + $0x188] ss:$16 sps:$4 sm:$0xff]  }
 0x465   :  { %2452 = vmatpush1.bf16.msra.mxu1 %v4973_v33  ;;  %v5014_v33 = vld [vmem:[%s7197_s18 + $0x164] ss:$16 sps:$4 sm:$0xff]  }
 0x466   :  { %2453 = vmatprep.subr.bf16.mxu1 %v4981_v34  ;;  %v5017_v34 = vld [vmem:[%s7197_s18 + $0x16c] ss:$16 sps:$4 sm:$0xff]  }
 0x469   :  { %2454 = vmatpush1.bf16.msra.mxu1 %v4979_v35  ;;  %v5012_v35 = vld [vmem:[%s7197_s18 + $0x160] ss:$16 sps:$4 sm:$0xff]  }
 0x46a   :  { %2455 = vmatprep.subr.bf16.mxu1 %v4987_v36  ;;  %v5015_v36 = vld [vmem:[%s7197_s18 + $0x168] ss:$16 sps:$4 sm:$0xff]  }
 0x46d   :  { %2456 = vmatpush1.bf16.msra.mxu1 %v4985_v38  ;;  %v5020_v38 = vld [vmem:[%s7197_s18 + $0x144] ss:$16 sps:$4 sm:$0xff]  }
 0x46e   :  { %2457 = vmatprep.subr.bf16.mxu1 %v4993_v18  ;;  %v5023_v18 = vld [vmem:[%s7197_s18 + $0x14c] ss:$16 sps:$4 sm:$0xff]  }
 0x471   :  { %2458 = vmatpush2.bf16.msra.mxu1 %v4991_v41  ;;  %v5018_v41 = vld [vmem:[%s7197_s18 + $0x140] ss:$16 sps:$4 sm:$0xff]  }
 0x472   :  { %2459 = vmatprep.subr.bf16.mxu1 %v4999_v42  ;;  %v5021_v42 = vld [vmem:[%s7197_s18 + $0x148] ss:$16 sps:$4 sm:$0xff]  }
 0x475   :  { %2460 = vmatpush2.bf16.msra.mxu1 %v4997_v43  ;;  %v5024_v43 = vld [vmem:[%s7197_s18 + $0x120] ss:$16 sps:$4 sm:$0xff]  }
 0x476   :  { %2461 = vmatprep.subr.bf16.mxu1 %v5005_v44  ;;  %v5026_v44 = vld [vmem:[%s7197_s18 + $0x124] ss:$16 sps:$4 sm:$0xff]  }
 0x479   :  { %2462 = vmatpush2.bf16.msra.mxu1 %v5003_v45  ;;  %v5027_v45 = vld [vmem:[%s7197_s18 + $0x128] ss:$16 sps:$4 sm:$0xff]  }
 0x47a   :  { %2463 = vmatprep.subr.bf16.mxu1 %v5011_v20 }
 0x47d   :  { %2464 = vmatpush2.bf16.msra.mxu1 %v5009_v32 }
 0x47e   :  { %2465 = vmatprep.subr.bf16.mxu1 %v5017_v34 }
 0x481   :  { %2466 = vmatpush2.bf16.msra.mxu1 %v5015_v36 }
 0x482   :  { %2467 = vmatprep.subr.bf16.mxu1 %v5023_v18 }
 0x485   :  { %2468 = vmatpush2.bf16.msra.mxu1 %v5021_v42 }
 0x510   :  { %v4700_v47 = vpop.f32.mrf.mxu1 }
 0x512   :  { %v4701_v48 = vpop.f32.mrf.mxu1 }
 0x513   :  { %v4702_v50 = vadd.f32 %v4701_v48, %v4700_v47  ;;  %v5029_v47 = vld [vmem:[%s7197_s18 + $0x12c] ss:$16 sps:$4 sm:$0xff]   ;;  %v5032_v48 = vld [vmem:[%s7197_s18 + $0x104] ss:$16 sps:$4 sm:$0xff]  }
 0x514   :  { %2469 = vmatprep.subr.bf16.mxu1 %v5029_v47 }
 0x515   :  { %v1661_v51 = vmul.f32 0.0078125, %v4702_v50  ;;  %v5035_v50 = vld [vmem:[%s7197_s18 + $0x10c] ss:$16 sps:$4 sm:$0xff]   ;;  %2470 = vmatpush2.bf16.msra.mxu1 %v5027_v45 }
 0x516   :  { %2471 = vmatprep.subr.bf16.mxu1 %v5035_v50 }
 0x517   :  { %v1662_v54 = vmul.f32 %v1661_v51, %v1661_v51 }
 0x519   :  { %v1664_v55 = vrot.slane %v1662_v54, 6  ;;  %v5033_v54 = vld [vmem:[%s7197_s18 + $0x108] ss:$16 sps:$4 sm:$0xff]  }
 0x51a   :  { %2472 = vmatpush2.bf16.msra.mxu1 %v5033_v54 }
 0x51b   :  { %v1666_v57 = vsub.f32 %v1661_v51, %v1664_v55  ;;  %v5038_v55 = vld [vmem:[%s7196_s17 + $0xe4] ss:$16 sps:$4 sm:$0xff]  }
 0x51d   :  { %v1667_v59 = vmax.f32 %v1666_v57, 0.0  ;;  %v5041_v57 = vld [vmem:[%s7196_s17 + $0xec] ss:$16 sps:$4 sm:$0xff]  }
 0x51e   :  { %2867 = vmatprep.subr.bf16.mxu1 %v5041_v57 }
 0x51f   :  { %v1668_v60 = vadd.f32 1e-05, %v1667_v59 }
 0x521   :  { %5230 = vrsqrt.f32 %v1668_v60 }
 0x52e   :  { %v5231_v62 = vpop.eup %5230 }
 0x52f   :  { %v1670_v3 = vsel %vm715_vm11, %v1661_v51, %v5231_v62  ;;  %v5030_v51 = vld [vmem:[%s7197_s18 + $0x100] ss:$16 sps:$4 sm:$0xff]  }
 0x530   :  { %4372 = vmatmul.mubr.msk.f32.vlgmr.msra.gmra.mxu0 %vm818_vm12, %v1670_v3 }
 0x531   :  { %2389 = vmatpush1.bf16.msra.mxu0 %v4940_v61 }
 0x532   :  { %2390 = vmatprep.subr.bf16.mxu0 %v4948_v2 }
 0x535   :  { %2391 = vmatpush1.bf16.msra.mxu0 %v4946_v4  ;;  %v1836_v4 = vld [vmem:[#allocation17] sm:$0x3] }
 0x536   :  { %2392 = vmatprep.subr.bf16.mxu0 %v4954_v5  ;;  %v1856_v5 = vld [vmem:[%s7193_s14] sm:$0x3] }
 0x539   :  { %2393 = vmatpush1.bf16.msra.mxu0 %v4952_v7 }
 0x53a   :  { %2394 = vmatprep.subr.bf16.mxu0 %v4960_v9 }
 0x53d   :  { %2395 = vmatpush1.bf16.msra.mxu0 %v4958_v10 }
 0x53e   :  { %2396 = vmatprep.subr.bf16.mxu0 %v4966_v12 }
 0x541   :  { %2397 = vmatpush1.bf16.msra.mxu0 %v4964_v37  ;;  %v1841_v37 = vrot.slane %v1836_v4, %v5930_v58 }
 0x542   :  { %2398 = vmatprep.subr.bf16.mxu0 %v4972_v49  ;;  %v1845_v49 = vrot.slane %v1836_v4, %v6112_v63 }
 0x545   :  { %2399 = vmatpush1.bf16.msra.mxu0 %v4970_v14  ;;  %v1861_v14 = vrot.slane %v1856_v5, %v5930_v58 }
 0x546   :  { %2400 = vmatprep.subr.bf16.mxu0 %v4978_v16 }
 0x549   :  { %2401 = vmatpush1.bf16.msra.mxu0 %v4976_v25 }
 0x54a   :  { %2402 = vmatprep.subr.bf16.mxu0 %v4984_v19 }
 0x54d   :  { %2403 = vmatpush1.bf16.msra.mxu0 %v4982_v21 }
 0x54e   :  { %2404 = vmatprep.subr.bf16.mxu0 %v4990_v13 }
 0x551   :  { %2405 = vmatpush2.bf16.msra.mxu0 %v4988_v23 }
 0x552   :  { %2406 = vmatprep.subr.bf16.mxu0 %v4996_v8 }
 0x555   :  { %2407 = vmatpush2.bf16.msra.mxu0 %v4994_v27 }
 0x556   :  { %2408 = vmatprep.subr.bf16.mxu0 %v5002_v28 }
 0x559   :  { %2409 = vmatpush2.bf16.msra.mxu0 %v5000_v30 }
 0x55a   :  { %2410 = vmatprep.subr.bf16.mxu0 %v5008_v26 }
 0x55d   :  { %2411 = vmatpush2.bf16.msra.mxu0 %v5006_v31 }
 0x55e   :  { %2412 = vmatprep.subr.bf16.mxu0 %v5014_v33 }
 0x561   :  { %2413 = vmatpush2.bf16.msra.mxu0 %v5012_v35 }
 0x562   :  { %2414 = vmatprep.subr.bf16.mxu0 %v5020_v38 }
 0x565   :  { %2415 = vmatpush2.bf16.msra.mxu0 %v5018_v41 }
 0x566   :  { %2416 = vmatprep.subr.bf16.mxu0 %v5026_v44 }
 0x569   :  { %2417 = vmatpush2.bf16.msra.mxu0 %v5024_v43 }
 0x56a   :  { %2418 = vmatprep.subr.bf16.mxu0 %v5032_v48 }
 0x56d   :  { %2419 = vmatpush2.bf16.msra.mxu0 %v5030_v51 }
 0x56e   :  { %2814 = vmatprep.subr.bf16.mxu0 %v5038_v55 }
 0x5f0   :  { %v1748_v59 = vpop.f32.mrf.mxu0 }
 0x5f2   :  { %v1750_v60 = vpop.f32.mrf.mxu0 }
 0x5f3   :  { %v1755_v61 = vcombine.low %v1748_v59, %v1750_v60 }
 0x5f5   :  { %v1762_v62 = vrot.slane %v1755_v61, %v5927_v56 }
 0x5f7   :  { %v1763_v2 = vcombine.high %v1762_v62, %v1762_v62  ;;  %v1770_v3 = vrot.slane %v1762_v62, %v5927_v56 }
 0x5f9   :  { %v1777_v7 = vrot.slane %v1763_v2, %v5927_v56  ;;  %v1781_v9 = vrot.slane %v1770_v3, %v5930_v58  ;;  %v1785_v10 = vrot.slane %v1770_v3, %v6112_v63  ;;  %v1806_v12 = vcombine.high %v1770_v3, %v1770_v3 }
 0x5fb   :  { %v1789_v16 = vrot.slane %v1777_v7, %v5930_v58  ;;  %v1793_v25 = vrot.slane %v1777_v7, %v6112_v63  ;;  %v1798_v19 = vsub.f32 %v6116_v15, %v1781_v9  ;;  %v1799_v21 = vsub.f32 %v6118_v17, %v1785_v10 }
 0x5fc   :  { %v1800_v13 = vsub.f32 %v6120_v22, %v1781_v9  ;;  %v1801_v23 = vsub.f32 %v6126_v29, %v1785_v10  ;;  %v1807_v8 = vcombine.high %v1777_v7, %v1777_v7  ;;  %v1811_v27 = vrot.slane %v1806_v12, %v5930_v58  ;;  %v5039_v7 = vld [vmem:[%s7196_s17 + $0xe8] ss:$16 sps:$4 sm:$0xff]  }
 0x5fd   :  { %v1802_v28 = vsub.f32 %v6136_v46, %v1789_v16  ;;  %v1803_v30 = vsub.f32 %v6138_v24, %v1793_v25  ;;  %v1804_v26 = vsub.f32 %v6140_v53, %v1789_v16  ;;  %v1805_v20 = vsub.f32 %v6148_v0, %v1793_v25 }
 0x5fe   :  { %v1815_v31 = vrot.slane %v1806_v12, %v6112_v63  ;;  %v1819_v15 = vrot.slane %v1807_v8, %v5930_v58  ;;  %v1823_v17 = vrot.slane %v1807_v8, %v6112_v63  ;;  %v1828_v22 = vmul.f32 %v1811_v27, %v1798_v19  ;;  %v5042_v19 = vld [vmem:[%s7196_s17 + $0xc0] ss:$16 sps:$4 sm:$0xff]  }
 0x5ff   :  { %v1830_v32 = vmul.f32 %v1811_v27, %v1800_v13  ;;  %v1865_v29 = vrot.slane %v1856_v5, %v6112_v63  ;;  %v5036_v5 = vld [vmem:[%s7196_s17 + $0xe0] ss:$16 sps:$4 sm:$0xff]   ;;  %v5045_v13 = vld [vmem:[%s7196_s17 + $0xc8] ss:$16 sps:$4 sm:$0xff]  }
 0x600   :  { %v1829_v33 = vmul.f32 %v1815_v31, %v1799_v21  ;;  %v1831_v34 = vmul.f32 %v1815_v31, %v1801_v23  ;;  %v1848_v35 = vmul.f32 %v1841_v37, %v1828_v22  ;;  %v1833_v46 = vmul.f32 %v1823_v17, %v1803_v30  ;;  %v5050_v30 = vld [vmem:[%s7196_s17 + $0xa4] ss:$16 sps:$4 sm:$0xff]  }
 0x601   :  { %v1850_v36 = vmul.f32 %v1841_v37, %v1830_v32  ;;  %v1835_v24 = vmul.f32 %v1823_v17, %v1805_v20  ;;  %v1832_v38 = vmul.f32 %v1819_v15, %v1802_v28  ;;  %v1834_v53 = vmul.f32 %v1819_v15, %v1804_v26  ;;  %v5053_v26 = vld [vmem:[%s7196_s17 + $0xac] ss:$16 sps:$4 sm:$0xff]  }
 0x602   :  { %v1849_v18 = vmul.f32 %v1845_v49, %v1829_v33  ;;  %v1851_v0 = vmul.f32 %v1845_v49, %v1831_v34  ;;  %v1868_v41 = vadd.f32 %v1861_v14, %v1848_v35  ;;  %v1853_v42 = vmul.f32 %v1845_v49, %v1833_v46  ;;  %v5048_v33 = vld [vmem:[%s7196_s17 + $0xa0] ss:$16 sps:$4 sm:$0xff]   ;;  %v5051_v34 = vld [vmem:[%s7196_s17 + $0xa8] ss:$16 sps:$4 sm:$0xff]  }
 0x603   :  { %v1870_v43 = vadd.f32 %v1861_v14, %v1850_v36  ;;  %v1855_v44 = vmul.f32 %v1845_v49, %v1835_v24  ;;  %v1852_v45 = vmul.f32 %v1841_v37, %v1832_v38  ;;  %v1854_v47 = vmul.f32 %v1841_v37, %v1834_v53  ;;  %v5044_v49 = vld [vmem:[%s7196_s17 + $0xc4] ss:$16 sps:$4 sm:$0xff]  }
 0x604   :  { %v1869_v48 = vadd.f32 %v1865_v29, %v1849_v18  ;;  %v1871_v50 = vadd.f32 %v1865_v29, %v1851_v0  ;;  %v6388_v51 = vmax.f32 %v1868_v41, 0.0  ;;  %v1873_v54 = vadd.f32 %v1865_v29, %v1853_v42  ;;  %v5056_v41 = vld [vmem:[%s7196_s17 + $0x84] ss:$16 sps:$4 sm:$0xff]   ;;  %v5059_v42 = vld [vmem:[%s7196_s17 + $0x8c] ss:$16 sps:$4 sm:$0xff]  }
 0x605   :  { %v6390_v55 = vmax.f32 %v1870_v43, 0.0  ;;  %v1875_v57 = vadd.f32 %v1865_v29, %v1855_v44  ;;  %v1872_v59 = vadd.f32 %v1861_v14, %v1852_v45  ;;  %v1874_v3 = vadd.f32 %v1861_v14, %v1854_v47  ;;  %v5047_v14 = vld [vmem:[%s7196_s17 + $0xcc] ss:$16 sps:$4 sm:$0xff]  }
 0x606   :  { %v1877_v60 = vmax.f32 %v1869_v48, 0.0  ;;  %v6392_v61 = vmax.f32 %v1871_v50, 0.0  ;;  %v6396_v2 = vmax.f32 %v1873_v54, 0.0  ;;  %v1908_v25 = vrot.slane %v6388_v51, 1  ;;  %v5054_v50 = vld [vmem:[%s7196_s17 + $0x80] ss:$16 sps:$4 sm:$0xff]  }
 0x607   :  { %v2000_v62 = vpack.c.bf16 %v6390_v55, %v6388_v51  ;;  %v6405_v9 = vmax.f32 %v1875_v57, 0.0  ;;  %v6407_v10 = vmax.f32 %v1872_v59, 0.0  ;;  %v1910_v12 = vrot.slane %v6390_v55, 1  ;;  %v5057_v54 = vld [vmem:[%s7196_s17 + $0x88] ss:$16 sps:$4 sm:$0xff]  }
 0x608   :  { %v2001_v4 = vpack.c.bf16 %v6392_v61, %v1877_v60  ;;  %v6423_v21 = vmax.f32 %v1874_v3, 0.0  ;;  %v1909_v27 = vrot.slane %v1877_v60, 1  ;;  %v1911_v28 = vrot.slane %v6392_v61, 1  ;;  %v5062_v57 = vld [vmem:[%s7196_s17 + $0x64] ss:$16 sps:$4 sm:$0xff]  }
 0x609   :  { %v2003_v37 = vpack.c.bf16 %v6405_v9, %v6396_v2  ;;  %v1912_v16 = vrot.slane %v6407_v10, 1  ;;  %v1891_v8 = vrot.slane %v6405_v9, 7  ;;  %v1913_v20 = vrot.slane %v6396_v2, 1  ;;  %v5065_v59 = vld [vmem:[%s7196_s17 + $0x6c] ss:$16 sps:$4 sm:$0xff]  }
 0x60a   :  { %2420 = vmatprep.mubr.bf16.mxu0 %v2001_v4  ;;  %2473 = vmatprep.mubr.bf16.mxu1 %v2001_v4  ;;  %v1885_v31 = vrot.slane %v1877_v60, 7  ;;  %v1887_v15 = vrot.slane %v6392_v61, 7  ;;  %v1915_v17 = vrot.slane %v6405_v9, 1  ;;  %v1921_v32 = vsel %vm336_vm3, %v1909_v27, %v1911_v28  ;;  %v5060_v60 = vld [vmem:[%s7196_s17 + $0x60] ss:$16 sps:$4 sm:$0xff]  }
 0x60b   :  { %2421 = vmatmul.mubr.bf16.vlgmr.msra.gmra.mxu0 %v2000_v62  ;;  %2474 = vmatmul.mubr.bf16.vlgmr.msra.gmra.mxu1 %v2000_v62  ;;  %v1918_v23 = vsel %vm336_vm3, %v1910_v12, %v1912_v16  ;;  %v1919_v22 = vsel %vm336_vm3, %v1911_v28, %v1913_v20  ;;  %v1920_v29 = vsel %vm336_vm3, %v1908_v25, %v1910_v12  ;;  %v1914_v24 = vrot.slane %v6423_v21, 1  ;;  %v5063_v62 = vld [vmem:[%s7196_s17 + $0x68] ss:$16 sps:$4 sm:$0xff]   ;;  %v5068_v3 = vld [vmem:[%s7196_s17 + $0x44] ss:$16 sps:$4 sm:$0xff]  }
 0x60c   :  { %2815 = vmatpush1.bf16.msra.mxu0 %v5036_v5  ;;  %2868 = vmatpush1.bf16.msra.mxu1 %v5039_v7  ;;  %v1899_v35 = vsel %vm315_vm2, %v1891_v8, %v1885_v31  ;;  %v6457_v46 = vpack.c.bf16 %v1919_v22, %v1921_v32  ;;  %v6459_v36 = vpack.c.bf16 %v1918_v23, %v1920_v29  ;;  %v5071_v4 = vld [vmem:[%s7196_s17 + $0x4c] ss:$16 sps:$4 sm:$0xff]   ;;  %v5066_v5 = vld [vmem:[%s7196_s17 + $0x40] ss:$16 sps:$4 sm:$0xff]   ;;  %v5069_v7 = vld [vmem:[%s7196_s17 + $0x48] ss:$16 sps:$4 sm:$0xff]  }
 0x60d   :  { %2430 = vmatprep.mubr.bf16.mxu0 %v2003_v37  ;;  %2483 = vmatprep.mubr.bf16.mxu1 %v2003_v37  ;;  %v2002_v38 = vpack.c.bf16 %v6423_v21, %v6407_v10  ;;  %v1917_v53 = vsel %vm336_vm3, %v1913_v20, %v1915_v17  ;;  %v1923_v18 = vsel %vm336_vm3, %v1915_v17, %v1909_v27  ;;  %v5074_v12 = vld [vmem:[%s7196_s17 + $0x24] ss:$16 sps:$4 sm:$0xff]   ;;  %v5077_v37 = vld [vmem:[%s7196_s17 + $0x2c] ss:$16 sps:$4 sm:$0xff]   ;;  %v5084_v28 = vld [vmem:[%s7196_s17 + $0x1e0] ss:$16 sps:$4 sm:$0xff]  }
 0x60e   :  { %2816 = vmatprep.subr.bf16.mxu0 %v5044_v49  ;;  %2869 = vmatprep.subr.bf16.mxu1 %v5047_v14  ;;  %v1897_v0 = vsel %vm315_vm2, %v1885_v31, %v1887_v15  ;;  %v6478_v43 = vpack.c.bf16 %v1923_v18, %v1917_v53  ;;  %v1916_v44 = vsel %vm336_vm3, %v1912_v16, %v1914_v24  ;;  %v5072_v49 = vld [vmem:[%s7196_s17 + $0x20] ss:$16 sps:$4 sm:$0xff]   ;;  %v5075_v14 = vld [vmem:[%s7196_s17 + $0x28] ss:$16 sps:$4 sm:$0xff]   ;;  %v5080_v16 = vld [vmem:[%s7196_s17 + $0x4] ss:$16 sps:$4 sm:$0xff]  }
 0x60f   :  { %v1922_v45 = vsel %vm336_vm3, %v1914_v24, %v1908_v25  ;;  %v4503_v47 = vpack.c.bf16 %v1897_v0, %v1899_v35  ;;  %v5083_v25 = vld [vmem:[%s7196_s17 + $0xc] ss:$16 sps:$4 sm:$0xff]   ;;  %v5086_v23 = vld [vmem:[%s7196_s17 + $0x1e4] ss:$16 sps:$4 sm:$0xff]   ;;  %v5090_v31 = vld [vmem:[%s7196_s17 + $0x1c0] ss:$16 sps:$4 sm:$0xff]  }
 0x610   :  { %2817 = vmatpush1.bf16.msra.mxu0 %v5042_v19  ;;  %2870 = vmatpush1.bf16.msra.mxu1 %v5045_v13  ;;  %v6484_v48 = vpack.c.bf16 %v1922_v45, %v1916_v44  ;;  %v5078_v19 = vld [vmem:[%s7196_s17] ss:$16 sps:$4 sm:$0xff]   ;;  %v5081_v13 = vld [vmem:[%s7196_s17 + $0x8] ss:$16 sps:$4 sm:$0xff]   ;;  %v5089_v27 = vld [vmem:[%s7196_s17 + $0x1ec] ss:$16 sps:$4 sm:$0xff]  }
 0x611   :  { %2818 = vmatprep.subr.bf16.mxu0 %v5050_v30  ;;  %2871 = vmatprep.subr.bf16.mxu1 %v5053_v26  ;;  %v5087_v30 = vld [vmem:[%s7196_s17 + $0x1e8] ss:$16 sps:$4 sm:$0xff]   ;;  %v5092_v26 = vld [vmem:[%s7196_s17 + $0x1c4] ss:$16 sps:$4 sm:$0xff]   ;;  %v5095_v20 = vld [vmem:[%s7196_s17 + $0x1cc] ss:$16 sps:$4 sm:$0xff]  }
 0x612   :  { %v5093_v17 = vld [vmem:[%s7196_s17 + $0x1c8] ss:$16 sps:$4 sm:$0xff]   ;;  %v5098_v22 = vld [vmem:[%s7196_s17 + $0x1a4] ss:$16 sps:$4 sm:$0xff]   ;;  %v5101_v32 = vld [vmem:[%s7196_s17 + $0x1ac] ss:$16 sps:$4 sm:$0xff]  }
 0x613   :  { %2431 = vmatmul.mubr.bf16.gmra.mxu0 %v2002_v38  ;;  %2484 = vmatmul.mubr.bf16.gmra.mxu1 %v2002_v38  ;;  %v5096_v29 = vld [vmem:[%s7196_s17 + $0x1a0] ss:$16 sps:$4 sm:$0xff]   ;;  %v5107_v35 = vld [vmem:[%s7196_s17 + $0x18c] ss:$16 sps:$4 sm:$0xff]   ;;  %v5105_v38 = vld [vmem:[%s7196_s17 + $0x188] ss:$16 sps:$4 sm:$0xff]  }
 0x614   :  { %2819 = vmatpush1.bf16.msra.mxu0 %v5048_v33  ;;  %2872 = vmatpush1.bf16.msra.mxu1 %v5051_v34  ;;  %v5099_v33 = vld [vmem:[%s7196_s17 + $0x1a8] ss:$16 sps:$4 sm:$0xff]   ;;  %v5104_v34 = vld [vmem:[%s7196_s17 + $0x184] ss:$16 sps:$4 sm:$0xff]   ;;  %v5102_v24 = vld [vmem:[%s7196_s17 + $0x180] ss:$16 sps:$4 sm:$0xff]  }
 0x615   :  { %4504 = vmatprep.mubr.msk.bf16.mxu0 %vm5957_vm15, %v4503_v47  ;;  %4520 = vmatprep.mubr.msk.bf16.mxu1 %vm5957_vm15, %v4503_v47  ;;  %v5110_v53 = vld [vmem:[%s7196_s17 + $0x164] ss:$16 sps:$4 sm:$0xff]   ;;  %v5113_v18 = vld [vmem:[%s7196_s17 + $0x16c] ss:$16 sps:$4 sm:$0xff]   ;;  %v5108_v0 = vld [vmem:[%s7196_s17 + $0x160] ss:$16 sps:$4 sm:$0xff]  }
 0x616   :  { %2820 = vmatprep.subr.bf16.mxu0 %v5056_v41  ;;  %2873 = vmatprep.subr.bf16.mxu1 %v5059_v42  ;;  %v5111_v41 = vld [vmem:[%s7196_s17 + $0x168] ss:$16 sps:$4 sm:$0xff]   ;;  %v5116_v42 = vld [vmem:[%s7196_s17 + $0x144] ss:$16 sps:$4 sm:$0xff]   ;;  %v5119_v44 = vld [vmem:[%s7196_s17 + $0x14c] ss:$16 sps:$4 sm:$0xff]  }
 0x617   :  { %v5114_v45 = vld [vmem:[%s7196_s17 + $0x140] ss:$16 sps:$4 sm:$0xff]   ;;  %v5117_v47 = vld [vmem:[%s7196_s17 + $0x148] ss:$16 sps:$4 sm:$0xff]  }
 0x618   :  { %2821 = vmatpush1.bf16.msra.mxu0 %v5054_v50  ;;  %2874 = vmatpush1.bf16.msra.mxu1 %v5057_v54  ;;  %v5122_v50 = vld [vmem:[%s7196_s17 + $0x124] ss:$16 sps:$4 sm:$0xff]   ;;  %v5125_v54 = vld [vmem:[%s7196_s17 + $0x12c] ss:$16 sps:$4 sm:$0xff]  }
 0x619   :  { %2822 = vmatprep.subr.bf16.mxu0 %v5062_v57  ;;  %2875 = vmatprep.subr.bf16.mxu1 %v5065_v59  ;;  %v5120_v57 = vld [vmem:[%s7196_s17 + $0x120] ss:$16 sps:$4 sm:$0xff]   ;;  %v5123_v59 = vld [vmem:[%s7196_s17 + $0x128] ss:$16 sps:$4 sm:$0xff]  }
 0x61a   :  { %v5140_v9 = vld [vmem:[#allocation20 + $0xc4] ss:$16 sps:$4 sm:$0xff]   ;;  %v5138_v61 = vld [vmem:[#allocation20 + $0xc0] ss:$16 sps:$4 sm:$0xff]  }
 0x61c   :  { %2823 = vmatpush1.bf16.msra.mxu0 %v5060_v60  ;;  %2876 = vmatpush1.bf16.msra.mxu1 %v5063_v62  ;;  %v5128_v60 = vld [vmem:[%s7196_s17 + $0x104] ss:$16 sps:$4 sm:$0xff]   ;;  %v5131_v62 = vld [vmem:[%s7196_s17 + $0x10c] ss:$16 sps:$4 sm:$0xff]  }
 0x61d   :  { %2824 = vmatprep.subr.bf16.mxu0 %v5068_v3  ;;  %2877 = vmatprep.subr.bf16.mxu1 %v5071_v4  ;;  %v1890_v3 = vrot.slane %v6423_v21, 7  ;;  %v1889_v4 = vrot.slane %v6396_v2, 7  ;;  %v5137_v21 = vld [vmem:[#allocation20 + $0xec] ss:$16 sps:$4 sm:$0xff]  }
 0x620   :  { %2825 = vmatpush1.bf16.msra.mxu0 %v5066_v5  ;;  %2878 = vmatpush1.bf16.msra.mxu1 %v5069_v7  ;;  %v1884_v5 = vrot.slane %v6388_v51, 7  ;;  %v1886_v7 = vrot.slane %v6390_v55, 7  ;;  %v1893_v51 = vsel %vm315_vm2, %v1889_v4, %v1891_v8  ;;  %v1895_v55 = vsel %vm315_vm2, %v1887_v15, %v1889_v4  ;;  %v5141_v15 = vld [vmem:[#allocation20 + $0xc8] ss:$16 sps:$4 sm:$0xff]  }
 0x621   :  { %2826 = vmatprep.subr.bf16.mxu0 %v5074_v12  ;;  %2879 = vmatprep.subr.bf16.mxu1 %v5077_v37  ;;  %v5126_v12 = vld [vmem:[%s7196_s17 + $0x100] ss:$16 sps:$4 sm:$0xff]   ;;  %v5129_v37 = vld [vmem:[%s7196_s17 + $0x108] ss:$16 sps:$4 sm:$0xff]   ;;  %v1888_v8 = vrot.slane %v6407_v10, 7 }
 0x622   :  { %v1898_v2 = vsel %vm315_vm2, %v1890_v3, %v1884_v5  ;;  %v5189_v4 = vld [vmem:[#allocation20 + $0x1c8] ss:$16 sps:$4 sm:$0xff]  }
 0x623   :  { %v1892_v10 = vsel %vm315_vm2, %v1888_v8, %v1890_v3  ;;  %v5186_v3 = vld [vmem:[#allocation20 + $0x1c0] ss:$16 sps:$4 sm:$0xff]  }
 0x624   :  { %2827 = vmatpush1.bf16.msra.mxu0 %v5072_v49  ;;  %2880 = vmatpush1.bf16.msra.mxu1 %v5075_v14  ;;  %v5134_v49 = vld [vmem:[#allocation20 + $0xe4] ss:$16 sps:$4 sm:$0xff]   ;;  %v1896_v14 = vsel %vm315_vm2, %v1884_v5, %v1886_v7 }
 0x625   :  { %2828 = vmatprep.subr.bf16.mxu0 %v5080_v16  ;;  %2881 = vmatprep.subr.bf16.mxu1 %v5083_v25  ;;  %v4507_v16 = vpack.c.bf16 %v1896_v14, %v1898_v2  ;;  %v5132_v25 = vld [vmem:[#allocation20 + $0xe0] ss:$16 sps:$4 sm:$0xff]   ;;  %v5194_v5 = vld [vmem:[#allocation20 + $0x1a4] ss:$16 sps:$4 sm:$0xff]   ;;  %v5209_v14 = vld [vmem:[#allocation20 + $0x16c] ss:$16 sps:$4 sm:$0xff]  }
 0x626   :  { %v5198_v2 = vld [vmem:[#allocation20 + $0x180] ss:$16 sps:$4 sm:$0xff]  }
 0x628   :  { %2829 = vmatpush1.bf16.msra.mxu0 %v5078_v19  ;;  %2882 = vmatpush1.bf16.msra.mxu1 %v5081_v13  ;;  %v5135_v19 = vld [vmem:[#allocation20 + $0xe8] ss:$16 sps:$4 sm:$0xff]   ;;  %v4511_v13 = vpack.c.bf16 %v1893_v51, %v1895_v55  ;;  %v5206_v55 = vld [vmem:[#allocation20 + $0x164] ss:$16 sps:$4 sm:$0xff]  }
 0x629   :  { %2830 = vmatprep.subr.bf16.mxu0 %v5086_v23  ;;  %2883 = vmatprep.subr.bf16.mxu1 %v5089_v27  ;;  %v5143_v23 = vld [vmem:[#allocation20 + $0xcc] ss:$16 sps:$4 sm:$0xff]   ;;  %v1894_v27 = vsel %vm315_vm2, %v1886_v7, %v1888_v8  ;;  %v5201_v51 = vld [vmem:[#allocation20 + $0x188] ss:$16 sps:$4 sm:$0xff]   ;;  %v5218_v8 = vld [vmem:[#allocation20 + $0x124] ss:$16 sps:$4 sm:$0xff]  }
 0x62a   :  { %v5197_v7 = vld [vmem:[#allocation20 + $0x1ac] ss:$16 sps:$4 sm:$0xff]  }
 0x62c   :  { %2831 = vmatpush2.bf16.msra.mxu0 %v5084_v28  ;;  %2884 = vmatpush2.bf16.msra.mxu1 %v5087_v30  ;;  %v5149_v28 = vld [vmem:[#allocation20 + $0xac] ss:$16 sps:$4 sm:$0xff]   ;;  %v4515_v30 = vpack.c.bf16 %v1892_v10, %v1894_v27  ;;  %v5219_v10 = vld [vmem:[#allocation20 + $0x128] ss:$16 sps:$4 sm:$0xff]   ;;  %v5224_v27 = vld [vmem:[#allocation20 + $0x104] ss:$16 sps:$4 sm:$0xff]  }
 0x62d   :  { %2832 = vmatprep.subr.bf16.mxu0 %v5092_v26  ;;  %2885 = vmatprep.subr.bf16.mxu1 %v5095_v20  ;;  %v5144_v26 = vld [vmem:[#allocation20 + $0xa0] ss:$16 sps:$4 sm:$0xff]   ;;  %v5147_v20 = vld [vmem:[#allocation20 + $0xa8] ss:$16 sps:$4 sm:$0xff]  }
 0x630   :  { %2833 = vmatpush2.bf16.msra.mxu0 %v5090_v31  ;;  %2886 = vmatpush2.bf16.msra.mxu1 %v5093_v17  ;;  %v5152_v31 = vld [vmem:[#allocation20 + $0x84] ss:$16 sps:$4 sm:$0xff]   ;;  %v5155_v17 = vld [vmem:[#allocation20 + $0x8c] ss:$16 sps:$4 sm:$0xff]  }
 0x631   :  { %2834 = vmatprep.subr.bf16.mxu0 %v5098_v22  ;;  %2887 = vmatprep.subr.bf16.mxu1 %v5101_v32  ;;  %v5150_v22 = vld [vmem:[#allocation20 + $0x80] ss:$16 sps:$4 sm:$0xff]   ;;  %v5153_v32 = vld [vmem:[#allocation20 + $0x88] ss:$16 sps:$4 sm:$0xff]  }
 0x634   :  { %2835 = vmatpush2.bf16.msra.mxu0 %v5096_v29  ;;  %2888 = vmatpush2.bf16.msra.mxu1 %v5099_v33  ;;  %v5158_v29 = vld [vmem:[#allocation20 + $0x64] ss:$16 sps:$4 sm:$0xff]   ;;  %v5161_v33 = vld [vmem:[#allocation20 + $0x6c] ss:$16 sps:$4 sm:$0xff]  }
 0x635   :  { %2836 = vmatprep.subr.bf16.mxu0 %v5104_v34  ;;  %2889 = vmatprep.subr.bf16.mxu1 %v5107_v35  ;;  %v5159_v34 = vld [vmem:[#allocation20 + $0x68] ss:$16 sps:$4 sm:$0xff]   ;;  %v5164_v35 = vld [vmem:[#allocation20 + $0x44] ss:$16 sps:$4 sm:$0xff]  }
 0x638   :  { %2837 = vmatpush2.bf16.msra.mxu0 %v5102_v24  ;;  %2890 = vmatpush2.bf16.msra.mxu1 %v5105_v38  ;;  %v5167_v24 = vld [vmem:[#allocation20 + $0x4c] ss:$16 sps:$4 sm:$0xff]   ;;  %v5162_v38 = vld [vmem:[#allocation20 + $0x40] ss:$16 sps:$4 sm:$0xff]  }
 0x639   :  { %2838 = vmatprep.subr.bf16.mxu0 %v5110_v53  ;;  %2891 = vmatprep.subr.bf16.mxu1 %v5113_v18  ;;  %v5170_v53 = vld [vmem:[#allocation20 + $0x24] ss:$16 sps:$4 sm:$0xff]   ;;  %v5173_v18 = vld [vmem:[#allocation20 + $0x2c] ss:$16 sps:$4 sm:$0xff]  }
 0x63c   :  { %2839 = vmatpush2.bf16.msra.mxu0 %v5108_v0  ;;  %2892 = vmatpush2.bf16.msra.mxu1 %v5111_v41  ;;  %v5168_v0 = vld [vmem:[#allocation20 + $0x20] ss:$16 sps:$4 sm:$0xff]   ;;  %v5171_v41 = vld [vmem:[#allocation20 + $0x28] ss:$16 sps:$4 sm:$0xff]  }
 0x63d   :  { %2840 = vmatprep.subr.bf16.mxu0 %v5116_v42  ;;  %2893 = vmatprep.subr.bf16.mxu1 %v5119_v44  ;;  %v5176_v42 = vld [vmem:[#allocation20 + $0x4] ss:$16 sps:$4 sm:$0xff]   ;;  %v5179_v44 = vld [vmem:[#allocation20 + $0xc] ss:$16 sps:$4 sm:$0xff]  }
 0x640   :  { %2841 = vmatpush2.bf16.msra.mxu0 %v5114_v45  ;;  %2894 = vmatpush2.bf16.msra.mxu1 %v5117_v47  ;;  %v5174_v45 = vld [vmem:[#allocation20] ss:$16 sps:$4 sm:$0xff]   ;;  %v5177_v47 = vld [vmem:[#allocation20 + $0x8] ss:$16 sps:$4 sm:$0xff]  }
 0x641   :  { %2842 = vmatprep.subr.bf16.mxu0 %v5122_v50  ;;  %2895 = vmatprep.subr.bf16.mxu1 %v5125_v54  ;;  %v5182_v50 = vld [vmem:[#allocation20 + $0x1e4] ss:$16 sps:$4 sm:$0xff]   ;;  %v5185_v54 = vld [vmem:[#allocation20 + $0x1ec] ss:$16 sps:$4 sm:$0xff]  }
 0x644   :  { %2843 = vmatpush2.bf16.msra.mxu0 %v5120_v57  ;;  %2896 = vmatpush2.bf16.msra.mxu1 %v5123_v59  ;;  %v5180_v57 = vld [vmem:[#allocation20 + $0x1e0] ss:$16 sps:$4 sm:$0xff]   ;;  %v5183_v59 = vld [vmem:[#allocation20 + $0x1e8] ss:$16 sps:$4 sm:$0xff]  }
 0x645   :  { %2844 = vmatprep.subr.bf16.mxu0 %v5128_v60  ;;  %2897 = vmatprep.subr.bf16.mxu1 %v5131_v62  ;;  %v5188_v60 = vld [vmem:[#allocation20 + $0x1c4] ss:$16 sps:$4 sm:$0xff]   ;;  %v5191_v62 = vld [vmem:[#allocation20 + $0x1cc] ss:$16 sps:$4 sm:$0xff]  }
 0x648   :  { %2845 = vmatpush2.bf16.msra.mxu0 %v5126_v12  ;;  %2898 = vmatpush2.bf16.msra.mxu1 %v5129_v37  ;;  %v5192_v12 = vld [vmem:[#allocation20 + $0x1a0] ss:$16 sps:$4 sm:$0xff]   ;;  %v5195_v37 = vld [vmem:[#allocation20 + $0x1a8] ss:$16 sps:$4 sm:$0xff]  }
 0x649   :  { %3308 = vmatprep.subr.bf16.mxu0 %v5134_v49  ;;  %3361 = vmatprep.subr.bf16.mxu1 %v5137_v21  ;;  %v5200_v49 = vld [vmem:[#allocation20 + $0x184] ss:$16 sps:$4 sm:$0xff]   ;;  %v5203_v21 = vld [vmem:[#allocation20 + $0x18c] ss:$16 sps:$4 sm:$0xff]  }
 0x64b   :  { %4508 = vmatmul.mubr.msk.bf16.vlgmr.msra.gmra.mxu0 %vm5957_vm15, %v4507_v16  ;;  %4524 = vmatmul.mubr.msk.bf16.vlgmr.msra.gmra.mxu1 %vm5957_vm15, %v4507_v16  ;;  %v5204_v16 = vld [vmem:[#allocation20 + $0x160] ss:$16 sps:$4 sm:$0xff]  }
 0x64c   :  { %4512 = vmatprep.mubr.msk.bf16.mxu0 %vm5977_vm1, %v4511_v13  ;;  %4528 = vmatprep.mubr.msk.bf16.mxu1 %vm5977_vm1, %v4511_v13  ;;  %v5215_v13 = vld [vmem:[#allocation20 + $0x14c] ss:$16 sps:$4 sm:$0xff]  }
 0x64d   :  { %3309 = vmatpush1.bf16.msra.mxu0 %v5132_v25  ;;  %3362 = vmatpush1.bf16.msra.mxu1 %v5135_v19  ;;  %v5207_v25 = vld [vmem:[#allocation20 + $0x168] ss:$16 sps:$4 sm:$0xff]   ;;  %v5212_v19 = vld [vmem:[#allocation20 + $0x144] ss:$16 sps:$4 sm:$0xff]  }
 0x64e   :  { %3310 = vmatprep.subr.bf16.mxu0 %v5140_v9  ;;  %3363 = vmatprep.subr.bf16.mxu1 %v5143_v23  ;;  %v5210_v9 = vld [vmem:[#allocation20 + $0x140] ss:$16 sps:$4 sm:$0xff]   ;;  %v5213_v23 = vld [vmem:[#allocation20 + $0x148] ss:$16 sps:$4 sm:$0xff]  }
 0x651   :  { %3311 = vmatpush1.bf16.msra.mxu0 %v5138_v61  ;;  %3364 = vmatpush1.bf16.msra.mxu1 %v5141_v15  ;;  %v5221_v61 = vld [vmem:[#allocation20 + $0x12c] ss:$16 sps:$4 sm:$0xff]   ;;  %v5216_v15 = vld [vmem:[#allocation20 + $0x120] ss:$16 sps:$4 sm:$0xff]  }
 0x652   :  { %3312 = vmatprep.subr.bf16.mxu0 %v5146_v39  ;;  %3365 = vmatprep.subr.bf16.mxu1 %v5149_v28  ;;  %v5227_v39 = vld [vmem:[#allocation20 + $0x10c] ss:$16 sps:$4 sm:$0xff]   ;;  %v5222_v28 = vld [vmem:[#allocation20 + $0x100] ss:$16 sps:$4 sm:$0xff]  }
 0x653   :  { %4516 = vmatmul.mubr.msk.bf16.gmra.mxu0 %vm5977_vm1, %v4515_v30  ;;  %4532 = vmatmul.mubr.msk.bf16.gmra.mxu1 %vm5977_vm1, %v4515_v30  ;;  %v5225_v30 = vld [vmem:[#allocation20 + $0x108] ss:$16 sps:$4 sm:$0xff]  }
 0x654   :  { %4600 = vmatprep.mubr.msk.bf16.mxu0 %vm5993_vm5, %v6457_v46  ;;  %4616 = vmatprep.mubr.msk.bf16.mxu1 %vm5993_vm5, %v6457_v46  ;;  %v5165_v46 = vld [vmem:[#allocation20 + $0x48] ss:$16 sps:$4 sm:$0xff]  }
 0x655   :  { %3313 = vmatpush1.bf16.msra.mxu0 %v5144_v26  ;;  %3366 = vmatpush1.bf16.msra.mxu1 %v5147_v20  ;;  %v3679_v26 = vld [vmem:[%s7202_s23 + $0x178] sm:$0xff]  ;;  %v3646_v20 = vld [vmem:[%s7202_s23 + $0x70] sm:$0xff] }
 0x656   :  { %3314 = vmatprep.subr.bf16.mxu0 %v5152_v31  ;;  %3367 = vmatprep.subr.bf16.mxu1 %v5155_v17  ;;  %v3678_v31 = vld [vmem:[%s7202_s23 + $0x170] sm:$0xff]  ;;  %v3661_v17 = vld [vmem:[%s7202_s23 + $0xe8] sm:$0xff] }
 0x659   :  { %3315 = vmatpush1.bf16.msra.mxu0 %v5150_v22  ;;  %3368 = vmatpush1.bf16.msra.mxu1 %v5153_v32  ;;  %v3693_v22 = vld [vmem:[%s7202_s23 + $0x1e8] sm:$0xff] }
 0x65a   :  { %3316 = vmatprep.subr.bf16.mxu0 %v5158_v29  ;;  %3369 = vmatprep.subr.bf16.mxu1 %v5161_v33  ;;  %v3645_v32 = vld [vmem:[%s7202_s23 + $0x68] sm:$0xff]  ;;  %v3660_v33 = vld [vmem:[%s7202_s23 + $0xe0] sm:$0xff] }
 0x65b   :  { %v3677_v29 = vld [vmem:[%s7202_s23 + $0x168] sm:$0xff] }
 0x65d   :  { %3317 = vmatpush1.bf16.msra.mxu0 %v5156_v52  ;;  %3370 = vmatpush1.bf16.msra.mxu1 %v5159_v34  ;;  %v3692_v52 = vld [vmem:[%s7202_s23 + $0x1e0] sm:$0xff] }
 0x65e   :  { %3318 = vmatprep.subr.bf16.mxu0 %v5164_v35  ;;  %3371 = vmatprep.subr.bf16.mxu1 %v5167_v24  ;;  %v3644_v34 = vld [vmem:[%s7202_s23 + $0x60] sm:$0xff]  ;;  %v3659_v24 = vld [vmem:[%s7202_s23 + $0xd8] sm:$0xff] }
 0x65f   :  { %v3676_v35 = vld [vmem:[%s7202_s23 + $0x160] sm:$0xff] }
 0x661   :  { %3319 = vmatpush1.bf16.msra.mxu0 %v5162_v38  ;;  %3372 = vmatpush1.bf16.msra.mxu1 %v5165_v46  ;;  %v3691_v38 = vld [vmem:[%s7202_s23 + $0x1d8] sm:$0xff] }
 0x662   :  { %3320 = vmatprep.subr.bf16.mxu0 %v5170_v53  ;;  %3373 = vmatprep.subr.bf16.mxu1 %v5173_v18  ;;  %v3643_v46 = vld [vmem:[%s7202_s23 + $0x58] sm:$0xff]  ;;  %v3658_v18 = vld [vmem:[%s7202_s23 + $0xd0] sm:$0xff] }
 0x663   :  { %v3675_v53 = vld [vmem:[%s7202_s23 + $0x158] sm:$0xff] }
 0x665   :  { %3321 = vmatpush1.bf16.msra.mxu0 %v5168_v0  ;;  %3374 = vmatpush1.bf16.msra.mxu1 %v5171_v41  ;;  %v3690_v0 = vld [vmem:[%s7202_s23 + $0x1d0] sm:$0xff] }
 0x666   :  { %3322 = vmatprep.subr.bf16.mxu0 %v5176_v42  ;;  %3375 = vmatprep.subr.bf16.mxu1 %v5179_v44  ;;  %v3642_v41 = vld [vmem:[%s7202_s23 + $0x50] sm:$0xff]  ;;  %v3657_v44 = vld [vmem:[%s7202_s23 + $0xc8] sm:$0xff] }
 0x667   :  { %v3674_v42 = vld [vmem:[%s7202_s23 + $0x150] sm:$0xff] }
 0x669   :  { %3323 = vmatpush1.bf16.msra.mxu0 %v5174_v45  ;;  %3376 = vmatpush1.bf16.msra.mxu1 %v5177_v47  ;;  %v3689_v45 = vld [vmem:[%s7202_s23 + $0x1c8] sm:$0xff] }
 0x66a   :  { %3324 = vmatprep.subr.bf16.mxu0 %v5182_v50  ;;  %3377 = vmatprep.subr.bf16.mxu1 %v5185_v54  ;;  %v3641_v47 = vld [vmem:[%s7202_s23 + $0x48] sm:$0xff]  ;;  %v3656_v54 = vld [vmem:[%s7202_s23 + $0xc0] sm:$0xff] }
 0x66b   :  { %v3673_v50 = vld [vmem:[%s7202_s23 + $0x148] sm:$0xff] }
 0x66d   :  { %3325 = vmatpush2.bf16.msra.mxu0 %v5180_v57  ;;  %3378 = vmatpush2.bf16.msra.mxu1 %v5183_v59  ;;  %v3688_v57 = vld [vmem:[%s7202_s23 + $0x1c0] sm:$0xff] }
 0x66e   :  { %3326 = vmatprep.subr.bf16.mxu0 %v5188_v60  ;;  %3379 = vmatprep.subr.bf16.mxu1 %v5191_v62  ;;  %v3640_v59 = vld [vmem:[%s7202_s23 + $0x40] sm:$0xff]  ;;  %v3655_v62 = vld [vmem:[%s7202_s23 + $0xb8] sm:$0xff] }
 0x66f   :  { %v3672_v60 = vld [vmem:[%s7202_s23 + $0x140] sm:$0xff] }
 0x671   :  { %3327 = vmatpush2.bf16.msra.mxu0 %v5186_v3  ;;  %3380 = vmatpush2.bf16.msra.mxu1 %v5189_v4  ;;  %v3687_v3 = vld [vmem:[%s7202_s23 + $0x1b8] sm:$0xff] }
 0x672   :  { %3328 = vmatprep.subr.bf16.mxu0 %v5194_v5  ;;  %3381 = vmatprep.subr.bf16.mxu1 %v5197_v7  ;;  %v3639_v4 = vld [vmem:[%s7202_s23 + $0x38] sm:$0xff]  ;;  %v3654_v7 = vld [vmem:[%s7202_s23 + $0xb0] sm:$0xff] }
 0x673   :  { %v3671_v5 = vld [vmem:[%s7202_s23 + $0x138] sm:$0xff] }
 0x675   :  { %3329 = vmatpush2.bf16.msra.mxu0 %v5192_v12  ;;  %3382 = vmatpush2.bf16.msra.mxu1 %v5195_v37  ;;  %v3686_v12 = vld [vmem:[%s7202_s23 + $0x1b0] sm:$0xff] }
 0x676   :  { %3330 = vmatprep.subr.bf16.mxu0 %v5200_v49  ;;  %3383 = vmatprep.subr.bf16.mxu1 %v5203_v21  ;;  %v3638_v37 = vld [vmem:[%s7202_s23 + $0x30] sm:$0xff]  ;;  %v3653_v21 = vld [vmem:[%s7202_s23 + $0xa8] sm:$0xff] }
 0x677   :  { %v3670_v49 = vld [vmem:[%s7202_s23 + $0x130] sm:$0xff] }
 0x679   :  { %3331 = vmatpush2.bf16.msra.mxu0 %v5198_v2  ;;  %3384 = vmatpush2.bf16.msra.mxu1 %v5201_v51  ;;  %v3685_v2 = vld [vmem:[%s7202_s23 + $0x1a8] sm:$0xff] }
 0x67a   :  { %3332 = vmatprep.subr.bf16.mxu0 %v5206_v55  ;;  %3385 = vmatprep.subr.bf16.mxu1 %v5209_v14  ;;  %v3637_v51 = vld [vmem:[%s7202_s23 + $0x28] sm:$0xff]  ;;  %v3652_v14 = vld [vmem:[%s7202_s23 + $0xa0] sm:$0xff] }
 0x67b   :  { %v3669_v55 = vld [vmem:[%s7202_s23 + $0x128] sm:$0xff] }
 0x67d   :  { %3333 = vmatpush2.bf16.msra.mxu0 %v5204_v16  ;;  %3386 = vmatpush2.bf16.msra.mxu1 %v5207_v25  ;;  %v3684_v16 = vld [vmem:[%s7202_s23 + $0x1a0] sm:$0xff] }
 0x67e   :  { %3334 = vmatprep.subr.bf16.mxu0 %v5212_v19  ;;  %3387 = vmatprep.subr.bf16.mxu1 %v5215_v13  ;;  %v3636_v25 = vld [vmem:[%s7202_s23 + $0x20] sm:$0xff]  ;;  %v3651_v13 = vld [vmem:[%s7202_s23 + $0x98] sm:$0xff] }
 0x67f   :  { %v3668_v19 = vld [vmem:[%s7202_s23 + $0x120] sm:$0xff] }
 0x681   :  { %3335 = vmatpush2.bf16.msra.mxu0 %v5210_v9  ;;  %3388 = vmatpush2.bf16.msra.mxu1 %v5213_v23  ;;  %v3683_v9 = vld [vmem:[%s7202_s23 + $0x198] sm:$0xff] }
 0x682   :  { %3336 = vmatprep.subr.bf16.mxu0 %v5218_v8  ;;  %3389 = vmatprep.subr.bf16.mxu1 %v5221_v61  ;;  %v3635_v23 = vld [vmem:[%s7202_s23 + $0x18] sm:$0xff]  ;;  %v3650_v61 = vld [vmem:[%s7202_s23 + $0x90] sm:$0xff] }
 0x683   :  { %v3667_v8 = vld [vmem:[%s7202_s23 + $0x118] sm:$0xff] }
 0x685   :  { %3337 = vmatpush2.bf16.msra.mxu0 %v5216_v15  ;;  %3390 = vmatpush2.bf16.msra.mxu1 %v5219_v10  ;;  %v3682_v15 = vld [vmem:[%s7202_s23 + $0x190] sm:$0xff] }
 0x686   :  { %3338 = vmatprep.subr.bf16.mxu0 %v5224_v27  ;;  %3391 = vmatprep.subr.bf16.mxu1 %v5227_v39  ;;  %v3634_v10 = vld [vmem:[%s7202_s23 + $0x10] sm:$0xff]  ;;  %v3649_v39 = vld [vmem:[%s7202_s23 + $0x88] sm:$0xff] }
 0x687   :  { %v3666_v27 = vld [vmem:[%s7202_s23 + $0x110] sm:$0xff] }
 0x689   :  { %3339 = vmatpush2.bf16.msra.mxu0 %v5222_v28  ;;  %3392 = vmatpush2.bf16.msra.mxu1 %v5225_v30  ;;  %v3681_v28 = vld [vmem:[%s7202_s23 + $0x188] sm:$0xff] }
 0x68a   :  { %4703 = vmatprep.subr.mxu0 %v3663_v6  ;;  %v3633_v30 = vld [vmem:[%s7202_s23 + $0x8] sm:$0xff] }
 0x68b   :  { %v3665_v6 = vld [vmem:[%s7202_s23 + $0x108] sm:$0xff] }
 0x68c   :  { %4604 = vmatmul.mubr.msk.bf16.vlgmr.msra.gmra.mxu0 %vm5993_vm5, %v6459_v36  ;;  %4620 = vmatmul.mubr.msk.bf16.vlgmr.msra.gmra.mxu1 %vm5993_vm5, %v6459_v36  ;;  %v3695_v36 = vld [vmem:[%s7202_s23 + $0x1f8] sm:$0xff] }
 0x68d   :  { %4608 = vmatprep.mubr.msk.bf16.mxu0 %vm6008_vm8, %v6478_v43  ;;  %4624 = vmatprep.mubr.msk.bf16.mxu1 %vm6008_vm8, %v6478_v43  ;;  %v3647_v43 = vld [vmem:[%s7202_s23 + $0x78] sm:$0xff] }
 0x68e   :  { %4738 = vmatprep.subr.mxu1 %v3695_v36  ;;  %4704 = vmatpush3.msra.mxu0 %v3647_v43  ;;  %v3648_v36 = vld [vmem:[%s7202_s23 + $0x80] sm:$0xff] }
 0x68f   :  { %4739 = vmatpush3.msra.mxu1 %v3679_v26  ;;  %4705 = vmatprep.subr.mxu0 %v3662_v11  ;;  %v3680_v43 = vld [vmem:[%s7202_s23 + $0x180] sm:$0xff] }
 0x690   :  { %4706 = vmatpush3.msra.mxu0 %v3646_v20  ;;  %v3632_v26 = vld [vmem:[%s7202_s23] sm:$0xff] }
 0x691   :  { %4707 = vmatprep.subr.mxu0 %v3661_v17  ;;  %v3664_v11 = vld [vmem:[%s7202_s23 + $0x100] sm:$0xff] }
 0x692   :  { %4708 = vmatpush3.msra.mxu0 %v3645_v32 }
 0x693   :  { %4709 = vmatprep.subr.mxu0 %v3660_v33 }
 0x694   :  { %4612 = vmatmul.mubr.msk.bf16.gmra.mxu0 %vm6008_vm8, %v6484_v48  ;;  %4628 = vmatmul.mubr.msk.bf16.gmra.mxu1 %vm6008_vm8, %v6484_v48  ;;  %v3694_v48 = vld [vmem:[%s7202_s23 + $0x1f0] sm:$0xff] }
 0x695   :  { %4740 = vmatprep.subr.mxu1 %v3694_v48  ;;  %4710 = vmatpush3.msra.mxu0 %v3644_v34 }
 0x696   :  { %4741 = vmatpush3.msra.mxu1 %v3678_v31  ;;  %4711 = vmatprep.subr.mxu0 %v3659_v24 }
 0x697   :  { %4742 = vmatprep.subr.mxu1 %v3693_v22  ;;  %4712 = vmatpush3.msra.mxu0 %v3643_v46 }
 0x698   :  { %4743 = vmatpush3.msra.mxu1 %v3677_v29  ;;  %4713 = vmatprep.subr.mxu0 %v3658_v18 }
 0x699   :  { %4744 = vmatprep.subr.mxu1 %v3692_v52  ;;  %4714 = vmatpush3.msra.mxu0 %v3642_v41 }
 0x69a   :  { %4745 = vmatpush3.msra.mxu1 %v3676_v35  ;;  %4715 = vmatprep.subr.mxu0 %v3657_v44 }
 0x69b   :  { %4746 = vmatprep.subr.mxu1 %v3691_v38  ;;  %4716 = vmatpush3.msra.mxu0 %v3641_v47 }
 0x69c   :  { %4747 = vmatpush3.msra.mxu1 %v3675_v53  ;;  %4717 = vmatprep.subr.mxu0 %v3656_v54 }
 0x69d   :  { %4748 = vmatprep.subr.mxu1 %v3690_v0  ;;  %4718 = vmatpush3.msra.mxu0 %v3640_v59 }
 0x69e   :  { %4749 = vmatpush3.msra.mxu1 %v3674_v42  ;;  %4719 = vmatprep.subr.mxu0 %v3655_v62 }
 0x69f   :  { %4750 = vmatprep.subr.mxu1 %v3689_v45  ;;  %4720 = vmatpush3.msra.mxu0 %v3639_v4 }
 0x6a0   :  { %4751 = vmatpush3.msra.mxu1 %v3673_v50  ;;  %4721 = vmatprep.subr.mxu0 %v3654_v7  ;;  %v3430_v7 = vld [vmem:[%s7199_s20] sm:$0xf] }
 0x6a1   :  { %4752 = vmatprep.subr.mxu1 %v3688_v57  ;;  %4722 = vmatpush3.msra.mxu0 %v3638_v37 }
 0x6a2   :  { %4753 = vmatpush3.msra.mxu1 %v3672_v60  ;;  %4723 = vmatprep.subr.mxu0 %v3653_v21 }
 0x6a3   :  { %4754 = vmatprep.subr.mxu1 %v3687_v3  ;;  %4724 = vmatpush3.msra.mxu0 %v3637_v51  ;;  %v6915_v51 = vrot.slane %v3430_v7, %v5930_v58 }
 0x6a4   :  { %4755 = vmatpush3.msra.mxu1 %v3671_v5  ;;  %4725 = vmatprep.subr.mxu0 %v3652_v14  ;;  %v6902_v5 = vsub.s32 2, %v5745_v1 }
 0x6a5   :  { %4756 = vmatprep.subr.mxu1 %v3686_v12  ;;  %4726 = vmatpush3.msra.mxu0 %v3636_v25  ;;  %v6908_v12 = vsub.s32 3, %v5745_v1  ;;  %v6921_v25 = vrot.slane %v3430_v7, %v6112_v63 }
 0x6a6   :  { %4757 = vmatpush3.msra.mxu1 %v3670_v49  ;;  %4727 = vmatprep.subr.mxu0 %v3651_v13 }
 0x6a7   :  { %4758 = vmatprep.subr.mxu1 %v3685_v2  ;;  %4728 = vmatpush3.msra.mxu0 %v3635_v23  ;;  %v6924_v1 = vrot.slane %v3430_v7, %v6908_v12 }
 0x6a8   :  { %4759 = vmatpush3.msra.mxu1 %v3669_v55  ;;  %4729 = vmatprep.subr.mxu0 %v3650_v61  ;;  %v6918_v55 = vrot.slane %v3430_v7, %v6902_v5 }
 0x6a9   :  { %4760 = vmatprep.subr.mxu1 %v3684_v16  ;;  %4730 = vmatpush3.msra.mxu0 %v3634_v10 }
 0x6aa   :  { %4761 = vmatpush3.msra.mxu1 %v3668_v19  ;;  %4731 = vmatprep.subr.mxu0 %v3649_v39 }
 0x6ab   :  { %4762 = vmatprep.subr.mxu1 %v3683_v9  ;;  %4732 = vmatpush3.msra.mxu0 %v3633_v30 }
 0x6ac   :  { %4763 = vmatpush3.msra.mxu1 %v3667_v8  ;;  %4733 = vmatprep.subr.mxu0 %v3648_v36 }
 0x6ad   :  { %4764 = vmatprep.subr.mxu1 %v3682_v15  ;;  %4734 = vmatpush3.msra.mxu0 %v3632_v26 }
 0x6ae   :  { %4765 = vmatpush3.msra.mxu1 %v3666_v27 }
 0x6af   :  { %4766 = vmatprep.subr.mxu1 %v3681_v28 }
 0x6b0   :  { %4767 = vmatpush3.msra.mxu1 %v3665_v6 }
 0x6b1   :  { %4768 = vmatprep.subr.mxu1 %v3680_v43 }
 0x6b2   :  { %4769 = vmatpush3.msra.mxu1 %v3664_v11 }
 0x6cb   :  { %v2422_v48 = vpop.f32.mrf.mxu0  ;;  %v2475_v20 = vpop.f32.mrf.mxu1 }
 0x6cd   :  { %v2424_v31 = vpop.f32.mrf.mxu0  ;;  %v2477_v17 = vpop.f32.mrf.mxu1 }
 0x6cf   :  { %v2426_v22 = vpop.f32.mrf.mxu0  ;;  %v2479_v32 = vpop.f32.mrf.mxu1 }
 0x6d1   :  { %v2428_v29 = vpop.f32.mrf.mxu0  ;;  %v2481_v33 = vpop.f32.mrf.mxu1 }
 0x6d3   :  { %v2432_v52 = vpop.f32.mrf.mxu0  ;;  %v2485_v34 = vpop.f32.mrf.mxu1 }
 0x6d5   :  { %v2434_v35 = vpop.f32.mrf.mxu0  ;;  %v2487_v24 = vpop.f32.mrf.mxu1 }
 0x6d7   :  { %v6889_v38 = vpop.f32.mrf.mxu0  ;;  %v6891_v46 = vpop.f32.mrf.mxu1 }
 0x6d9   :  { %v6893_v53 = vpop.f32.mrf.mxu0  ;;  %v6895_v18 = vpop.f32.mrf.mxu1 }
 0x70b   :  { %v2848_v0 = vpop.f32.mrf.mxu0  ;;  %v2901_v41 = vpop.f32.mrf.mxu1 }
 0x70c   :  { %v2849_v21 = vadd.f32 %v2848_v0, %v2422_v48  ;;  %v2902_v2 = vadd.f32 %v2901_v41, %v2475_v20 }
 0x70d   :  { %v2850_v42 = vpop.f32.mrf.mxu0  ;;  %v2903_v44 = vpop.f32.mrf.mxu1 }
 0x70e   :  { %v2851_v19 = vadd.f32 %v2850_v42, %v2424_v31  ;;  %v2904_v13 = vadd.f32 %v2903_v44, %v2477_v17 }
 0x70f   :  { %v2852_v45 = vpop.f32.mrf.mxu0  ;;  %v2905_v47 = vpop.f32.mrf.mxu1 }
 0x710   :  { %v2853_v28 = vadd.f32 %v2852_v45, %v2426_v22  ;;  %v2906_v30 = vadd.f32 %v2905_v47, %v2479_v32 }
 0x711   :  { %v2854_v50 = vpop.f32.mrf.mxu0  ;;  %v2907_v54 = vpop.f32.mrf.mxu1 }
 0x712   :  { %v2855_v6 = vadd.f32 %v2854_v50, %v2428_v29  ;;  %v2908_v36 = vadd.f32 %v2907_v54, %v2481_v33 }
 0x713   :  { %v2858_v57 = vpop.f32.mrf.mxu0  ;;  %v2911_v59 = vpop.f32.mrf.mxu1 }
 0x714   :  { %v2859_v11 = vadd.f32 %v2858_v57, %v2432_v52  ;;  %v2912_v48 = vadd.f32 %v2911_v59, %v2485_v34 }
 0x715   :  { %v2860_v60 = vpop.f32.mrf.mxu0  ;;  %v2913_v62 = vpop.f32.mrf.mxu1 }
 0x716   :  { %v2861_v17 = vadd.f32 %v2860_v60, %v2434_v35  ;;  %v2914_v0 = vadd.f32 %v2913_v62, %v2487_v24 }
 0x717   :  { %v6897_v3 = vpop.f32.mrf.mxu0  ;;  %v6899_v4 = vpop.f32.mrf.mxu1 }
 0x719   :  { %v6910_v37 = vpop.f32.mrf.mxu0  ;;  %v6912_v49 = vpop.f32.mrf.mxu1 }
 0x74c   :  { %v3342_v14 = vpop.f32.mrf.mxu0  ;;  %v3395_v16 = vpop.f32.mrf.mxu1 }
 0x74d   :  { %v3414_v9 = vadd.f32 %v3342_v14, %v2849_v21  ;;  %v3416_v23 = vadd.f32 %v3395_v16, %v2902_v2 }
 0x74e   :  { %v3344_v8 = vpop.f32.mrf.mxu0  ;;  %v3397_v61 = vpop.f32.mrf.mxu1 }
 0x74f   :  { %v6927_v15 = vadd.f32 %v6915_v51, %v3414_v9  ;;  %v6930_v10 = vadd.f32 %v6918_v55, %v3416_v23  ;;  %v3415_v27 = vadd.f32 %v3344_v8, %v2851_v19  ;;  %v3417_v39 = vadd.f32 %v3397_v61, %v2904_v13 }
 0x750   :  { %v3346_v43 = vpop.f32.mrf.mxu0  ;;  %v3399_v26 = vpop.f32.mrf.mxu1 }
 0x751   :  { %v6933_v20 = vadd.f32 %v6921_v25, %v3415_v27  ;;  %v6936_v31 = vadd.f32 %v6924_v1, %v3417_v39  ;;  %v3418_v41 = vadd.f32 %v3346_v43, %v2853_v28  ;;  %v3420_v42 = vadd.f32 %v3399_v26, %v2906_v30 }
 0x752   :  { %v3348_v44 = vpop.f32.mrf.mxu0  ;;  %v3401_v7 = vpop.f32.mrf.mxu1  ;;  %v3524_v22 = vmul.f32 %v6927_v15, %v6927_v15  ;;  %v3526_v32 = vmul.f32 %v6930_v10, %v6930_v10 }
 0x753   :  { %v3419_v29 = vadd.f32 %v3348_v44, %v2855_v6  ;;  %v3421_v33 = vadd.f32 %v3401_v7, %v2908_v36  ;;  %v3525_v52 = vmul.f32 %v6933_v20, %v6933_v20  ;;  %v3527_v34 = vmul.f32 %v6936_v31, %v6936_v31 }
 0x754   :  { %v6947_v35 = vadd.f32 %v6915_v51, %v3418_v41  ;;  %v6950_v24 = vadd.f32 %v6918_v55, %v3420_v42  ;;  %v3352_v45 = vpop.f32.mrf.mxu0  ;;  %v3405_v47 = vpop.f32.mrf.mxu1 }
 0x755   :  { %v6953_v50 = vadd.f32 %v6921_v25, %v3419_v29  ;;  %v6956_v54 = vadd.f32 %v6924_v1, %v3421_v33  ;;  %v3422_v57 = vadd.f32 %v3352_v45, %v2859_v11  ;;  %v3424_v59 = vadd.f32 %v3405_v47, %v2912_v48 }
 0x756   :  { %v3468_v60 = vadd.f32 %v6947_v35, %v6927_v15  ;;  %v3528_v62 = vmul.f32 %v6947_v35, %v6947_v35  ;;  %v3482_v21 = vadd.f32 %v6950_v24, %v6930_v10  ;;  %v3530_v2 = vmul.f32 %v6950_v24, %v6950_v24  ;;  %v3354_v9 = vpop.f32.mrf.mxu0  ;;  %v3407_v23 = vpop.f32.mrf.mxu1 }
 0x757   :  { %v3475_v14 = vadd.f32 %v6953_v50, %v6933_v20  ;;  %v3529_v16 = vmul.f32 %v6953_v50, %v6953_v50  ;;  %v3489_v19 = vadd.f32 %v6956_v54, %v6936_v31  ;;  %v3531_v13 = vmul.f32 %v6956_v54, %v6956_v54 }
 0x758   :  { %v3469_v8 = vrot.slane %v3468_v60, 4  ;;  %v3540_v61 = vadd.f32 %v3528_v62, %v3524_v22  ;;  %v3483_v27 = vrot.slane %v3482_v21, 4  ;;  %v3554_v39 = vadd.f32 %v3530_v2, %v3526_v32  ;;  %v3356_v29 = vpop.f32.mrf.mxu0  ;;  %v3409_v33 = vpop.f32.mrf.mxu1 }
 0x759   :  { %v3476_v28 = vrot.slane %v3475_v14, 4  ;;  %v3547_v30 = vadd.f32 %v3529_v16, %v3525_v52  ;;  %v3490_v6 = vrot.slane %v3489_v19, 4  ;;  %v3561_v36 = vadd.f32 %v3531_v13, %v3527_v34 }
 0x75a   :  { %v3470_v43 = vadd.f32 %v3469_v8, %v3468_v60  ;;  %v3541_v26 = vrot.slane %v3540_v61, 4  ;;  %v3484_v11 = vadd.f32 %v3483_v27, %v3482_v21  ;;  %v3555_v48 = vrot.slane %v3554_v39, 4 }
 0x75b   :  { %v3477_v41 = vadd.f32 %v3476_v28, %v3475_v14  ;;  %v3548_v42 = vrot.slane %v3547_v30, 4  ;;  %v6974_v44 = vadd.f32 %v3490_v6, %v3489_v19  ;;  %v3562_v7 = vrot.slane %v3561_v36, 4 }
 0x75c   :  { %v3471_v45 = vrot.slane %v3470_v43, 2  ;;  %v3542_v47 = vadd.f32 %v3541_v26, %v3540_v61  ;;  %v3485_v22 = vrot.slane %v3484_v11, 2  ;;  %v6976_v62 = vadd.f32 %v3555_v48, %v3554_v39 }
 0x75d   :  { %v2863_v32 = vadd.f32 %v6897_v3, %v6889_v38  ;;  %v2916_v52 = vadd.f32 %v6899_v4, %v6891_v46  ;;  %v2865_v34 = vadd.f32 %v6910_v37, %v6893_v53  ;;  %v2918_v60 = vadd.f32 %v6912_v49, %v6895_v18  ;;  %v3358_v46 = vpop.f32.mrf.mxu0  ;;  %v3411_v4 = vpop.f32.mrf.mxu1 }
 0x75e   :  { %v6986_v21 = vadd.f32 %v3471_v45, %v3470_v43  ;;  %v3543_v2 = vrot.slane %v3542_v47, 2  ;;  %v3478_v14 = vrot.slane %v3477_v41, 2  ;;  %v3549_v16 = vadd.f32 %v3548_v42, %v3547_v30 }
 0x75f   :  { %v6989_v19 = vadd.f32 %v6915_v51, %v3422_v57  ;;  %v6992_v13 = vadd.f32 %v6918_v55, %v3424_v59  ;;  %v3423_v38 = vadd.f32 %v3354_v9, %v2861_v17  ;;  %v3425_v3 = vadd.f32 %v3407_v23, %v2914_v0 }
 0x760   :  { %v6994_v8 = vadd.f32 %v3485_v22, %v3484_v11  ;;  %v3492_v18 = vrot.slane %v6974_v44, 2  ;;  %v6998_v37 = vadd.f32 %v3562_v7, %v3561_v36  ;;  %v7001_v61 = vadd.f32 %v3543_v2, %v3542_v47 }
 0x761   :  { %v7004_v57 = vadd.f32 %v6921_v25, %v3423_v38  ;;  %v7007_v17 = vadd.f32 %v6924_v1, %v3425_v3  ;;  %v3426_v0 = vadd.f32 %v3356_v29, %v2863_v32  ;;  %v3428_v59 = vadd.f32 %v3409_v33, %v2916_v52 }
 0x762   :  { %v3427_v9 = vadd.f32 %v3358_v46, %v2865_v34  ;;  %v3429_v23 = vadd.f32 %v3411_v4, %v2918_v60  ;;  %v3532_v27 = vmul.f32 %v6989_v19, %v6989_v19  ;;  %v3534_v39 = vmul.f32 %v6992_v13, %v6992_v13 }
 0x763   :  { %v3479_v28 = vadd.f32 %v3478_v14, %v3477_v41  ;;  %v3550_v30 = vrot.slane %v3549_v16, 2  ;;  %v7014_v6 = vadd.f32 %v6915_v51, %v3426_v0  ;;  %v7017_v36 = vadd.f32 %v6918_v55, %v3428_v59 }
 0x764   :  { %v7020_v43 = vadd.f32 %v6921_v25, %v3427_v9  ;;  %v7023_v26 = vadd.f32 %v6924_v1, %v3429_v23  ;;  %v3533_v11 = vmul.f32 %v7004_v57, %v7004_v57  ;;  %v3535_v48 = vmul.f32 %v7007_v17, %v7007_v17 }
 0x765   :  { %v3480_v41 = vrot.slane %v3479_v28, 1  ;;  %v3551_v42 = vadd.f32 %v3550_v30, %v3549_v16  ;;  %v3496_v51 = vadd.f32 %v7014_v6, %v6989_v19  ;;  %v3536_v55 = vmul.f32 %v7014_v6, %v7014_v6 }
 0x766   :  { %v3510_v25 = vadd.f32 %v7017_v36, %v6992_v13  ;;  %v3538_v1 = vmul.f32 %v7017_v36, %v7017_v36  ;;  %v3503_v7 = vadd.f32 %v7020_v43, %v7004_v57  ;;  %v3537_v29 = vmul.f32 %v7020_v43, %v7020_v43 }
 0x767   :  { %v3517_v33 = vadd.f32 %v7023_v26, %v7007_v17  ;;  %v3539_v45 = vmul.f32 %v7023_v26, %v7023_v26  ;;  %v3497_v47 = vrot.slane %v3496_v51, 4  ;;  %v3568_v22 = vadd.f32 %v3536_v55, %v3532_v27 }
 0x768   :  { %v3511_v32 = vrot.slane %v3510_v25, 4  ;;  %v3582_v52 = vadd.f32 %v3538_v1, %v3534_v39  ;;  %v3504_v34 = vrot.slane %v3503_v7, 4  ;;  %v3575_v60 = vadd.f32 %v3537_v29, %v3533_v11 }
 0x769   :  { %v3518_v2 = vrot.slane %v3517_v33, 4  ;;  %v3589_v14 = vadd.f32 %v3539_v45, %v3535_v48  ;;  %v3498_v16 = vadd.f32 %v3497_v47, %v3496_v51  ;;  %v3569_v38 = vrot.slane %v3568_v22, 4 }
 0x76a   :  { %v3512_v3 = vadd.f32 %v3511_v32, %v3510_v25  ;;  %v3583_v46 = vrot.slane %v3582_v52, 4  ;;  %v3505_v4 = vadd.f32 %v3504_v34, %v3503_v7  ;;  %v3576_v0 = vrot.slane %v3575_v60, 4 }
 0x76b   :  { %v3519_v59 = vadd.f32 %v3518_v2, %v3517_v33  ;;  %v3590_v9 = vrot.slane %v3589_v14, 4  ;;  %v3499_v23 = vrot.slane %v3498_v16, 2  ;;  %v3570_v30 = vadd.f32 %v3569_v38, %v3568_v22 }
 0x76c   :  { %v3513_v40 = vrot.slane %v3512_v3, 2  ;;  %v3584_v49 = vadd.f32 %v3583_v46, %v3582_v52  ;;  %v3506_v53 = vrot.slane %v3505_v4, 2  ;;  %v3577_v27 = vadd.f32 %v3576_v0, %v3575_v60 }
 0x76d   :  { %v3493_v39 = vadd.f32 %v3492_v18, %v6974_v44  ;;  %v3564_v11 = vrot.slane %v6998_v37, 2  ;;  %v3500_v55 = vadd.f32 %v3499_v23, %v3498_v16  ;;  %v3571_v48 = vrot.slane %v3570_v30, 2 }
 0x76e   :  { %v3520_v51 = vrot.slane %v3519_v59, 2  ;;  %v3591_v1 = vadd.f32 %v3590_v9, %v3589_v14  ;;  %v3514_v25 = vadd.f32 %v3513_v40, %v3512_v3  ;;  %v3585_v29 = vrot.slane %v3584_v49, 2 }
 0x76f   :  { %v3507_v7 = vadd.f32 %v3506_v53, %v3505_v4  ;;  %v3578_v45 = vrot.slane %v3577_v27, 2  ;;  %v3487_v33 = vrot.slane %v6994_v8, 1  ;;  %v7245_v47 = vrot.slane %v6976_v62, 2 }
 0x770   :  { %v3481_v32 = vadd.f32 %v3480_v41, %v3479_v28  ;;  %v3552_v52 = vrot.slane %v3551_v42, 1  ;;  %v3501_v34 = vrot.slane %v3500_v55, 1  ;;  %v3572_v44 = vadd.f32 %v3571_v48, %v3570_v30 }
 0x771   :  { %v3558_v22 = vadd.f32 %v7245_v47, %v6976_v62  ;;  %v3508_v18 = vrot.slane %v3507_v7, 1  ;;  %v3579_v60 = vadd.f32 %v3578_v45, %v3577_v27  ;;  %v3494_v2 = vrot.slane %v3493_v39, 1 }
 0x772   :  { %v3521_v16 = vadd.f32 %v3520_v51, %v3519_v59  ;;  %v3565_v14 = vadd.f32 %v3564_v11, %v6998_v37  ;;  %v3592_v40 = vrot.slane %v3591_v1, 2  ;;  %v3515_v38 = vrot.slane %v3514_v25, 1 }
 0x773   :  { %v3586_v53 = vadd.f32 %v3585_v29, %v3584_v49  ;;  %v3509_v3 = vadd.f32 %v3508_v18, %v3507_v7  ;;  %v3580_v46 = vrot.slane %v3579_v60, 1  ;;  %v3545_v62 = vrot.slane %v7001_v61, 1 }
 0x774   :  { %v3522_v4 = vrot.slane %v3521_v16, 1  ;;  %v3566_v0 = vrot.slane %v3565_v14, 1  ;;  %v3593_v9 = vadd.f32 %v3592_v40, %v3591_v1  ;;  %v3553_v28 = vadd.f32 %v3552_v52, %v3551_v42 }
 0x775   :  { %v3581_v41 = vadd.f32 %v3580_v46, %v3579_v60  ;;  %v3502_v23 = vadd.f32 %v3501_v34, %v3500_v55  ;;  %v3573_v30 = vrot.slane %v3572_v44, 1  ;;  %v3495_v48 = vadd.f32 %v3494_v2, %v3493_v39  ;;  %v3859_v46 = vld [vmem:[#allocation22 + $0x60] sm:$0xff] }
 0x776   :  { %v3523_v27 = vadd.f32 %v3522_v4, %v3521_v16  ;;  %v3594_v45 = vrot.slane %v3593_v9, 1  ;;  %v7246_v37 = vrot.slane %v6986_v21, 1  ;;  %v3605_v49 = vsel %vm707_vm9, %v3509_v3, %v3481_v32  ;;  %v3862_v3 = vld [vmem:[#allocation22 + $0x78] sm:$0xff]  ;;  %v3857_v4 = vld [vmem:[#allocation22 + $0x50] sm:$0xff] }
 0x777   :  { %v3621_v11 = vsel %vm712_vm10, %v3581_v41, %v3553_v28  ;;  %v3546_v51 = vadd.f32 %v3545_v62, %v7001_v61  ;;  %v3574_v1 = vadd.f32 %v3573_v30, %v3572_v44  ;;  %v3567_v42 = vadd.f32 %v3566_v0, %v3565_v14  ;;  %3961 = vmatprep.subr.mxu1 %v3862_v3  ;;  %v3852_v0 = vld [vmem:[#allocation22 + $0x28] sm:$0xff]  ;;  %v3851_v62 = vld [vmem:[#allocation22 + $0x20] sm:$0xff]  ;;  %v3853_v28 = vld [vmem:[#allocation22 + $0x30] sm:$0xff] }
 0x778   :  { %v3474_v59 = vadd.f32 %v7246_v37, %v6986_v21  ;;  %v3629_v29 = vsel %vm715_vm11, %v3605_v49, %v3621_v11  ;;  %v3595_v7 = vadd.f32 %v3594_v45, %v3593_v9  ;;  %v3559_v55 = vrot.slane %v3558_v22, 1  ;;  %v3854_v9 = vld [vmem:[#allocation22 + $0x38] sm:$0xff]  ;;  %v3848_v41 = vld [vmem:[#allocation22 + $0x8] sm:$0xff]  ;;  %v3847_v30 = vld [vmem:[#allocation22] sm:$0xff] }
 0x779   :  { %3760 = vmatprep.mubr.f32.mxu0 %v3629_v29  ;;  %v3620_v47 = vsel %vm712_vm10, %v3574_v1, %v3546_v51  ;;  %v3516_v52 = vadd.f32 %v3515_v38, %v3514_v25  ;;  %v3587_v34 = vrot.slane %v3586_v53, 1  ;;  %v3607_v21 = vsel %vm707_vm9, %v3523_v27, %v3495_v48  ;;  %v3860_v38 = vld [vmem:[#allocation22 + $0x68] sm:$0xff]  ;;  %v3849_v48 = vld [vmem:[#allocation22 + $0x10] sm:$0xff] }
 0x77a   :  { %v3604_v39 = vsel %vm707_vm9, %v3502_v23, %v3474_v59  ;;  %v3623_v32 = vsel %vm712_vm10, %v3595_v7, %v3567_v42  ;;  %v3488_v44 = vadd.f32 %v3487_v33, %v6994_v8  ;;  %v3560_v60 = vadd.f32 %v3559_v55, %v3558_v22  ;;  %3890 = vmatprep.subr.mxu0 %v3860_v38  ;;  %v3861_v8 = vld [vmem:[#allocation22 + $0x70] sm:$0xff]  ;;  %v3856_v33 = vld [vmem:[#allocation22 + $0x48] sm:$0xff]  ;;  %v3858_v22 = vld [vmem:[#allocation22 + $0x58] sm:$0xff] }
 0x77b   :  { %v3628_v18 = vsel %vm715_vm11, %v3604_v39, %v3620_v47  ;;  %v3631_v61 = vsel %vm715_vm11, %v3607_v21, %v3623_v32  ;;  %v3588_v2 = vadd.f32 %v3587_v34, %v3586_v53  ;;  %v7247_v16 = vmov 0.0   ;;  %v3855_v53 = vld [vmem:[#allocation22 + $0x40] sm:$0xff]  ;;  %v3850_v23 = vld [vmem:[#allocation22 + $0x18] sm:$0xff] }
 0x77c   :  { %3761 = vmatmul.mubr.f32.vlgmr.msra.gmra.mxu0 %v3628_v18  ;;  %3830 = vmatprep.mubr.f32.mxu1 %v3631_v61  ;;  %v3606_v14 = vsel %vm707_vm9, %v3516_v52, %v3488_v44 }
 0x77d   :  { %3930 = vmatprep.mubr.f32.mxu0 %v7247_v16  ;;  %v3622_v25 = vsel %vm712_vm10, %v3588_v2, %v3560_v60  ;;  %3891 = vmatpush1.msra.mxu0 %v3859_v46 }
 0x77e   :  { %v3630_v40 = vsel %vm715_vm11, %v3606_v14, %v3622_v25  ;;  %3892 = vmatprep.subr.mxu0 %v3856_v33  ;;  %v4158_v25 = vld [vmem:[%s7200_s21] sm:$0xf]  ;;  %s5554_s21 = smov [#allocation23]  }
 0x77f   :  { %3831 = vmatmul.mubr.f32.vlgmr.msra.gmra.mxu1 %v3630_v40  ;;  %3893 = vmatpush1.msra.mxu0 %v3855_v53  ;;  %v7083_v3 = vrot.slane %v4158_v25, %v5930_v58  ;;  %v7086_v46 = vrot.slane %v4158_v25, %v6112_v63 }
 0x780   :  { %4001 = vmatprep.mubr.f32.mxu1 %v7247_v16  ;;  %3962 = vmatpush1.msra.mxu1 %v3861_v8  ;;  %v4196_v8 = vld [vmem:[%s7201_s22] sm:$0xf]  ;;  %s4271_s22 = sshll.u32 %s5554_s21, 4  ;;  %s4272_s22 = int_to_ptr.vmem [resolvable:$true] %s4271_s22 }
 0x781   :  { %3963 = vmatprep.subr.mxu1 %v3858_v22  ;;  %3894 = vmatprep.subr.mxu0 %v3852_v0  ;;  %s5494_s2 = scalar_lea.vmem %s4272_s22, 2048  ;;  %p5499_p10 = scmp.lt.s32.totalorder %s4272_s22, %s4272_s22 }
 0x782   :  { %3964 = vmatpush1.msra.mxu1 %v3857_v4  ;;  %3895 = vmatpush1.msra.mxu0 %v3851_v62  ;;  %v7101_v62 = vrot.slane %v4158_v25, %v6908_v12  ;;  %p5495_p9 = scmp.ne.s32.totalorder %s4272_s22, %s5494_s2  ;;  %p5500_p11 = scmp.lt.s32.totalorder %s5494_s2, %s5494_s2 }
 0x783   :  { %3965 = vmatprep.subr.mxu1 %v3854_v9  ;;  %3896 = vmatprep.subr.mxu0 %v3848_v41  ;;  %v7098_v9 = vrot.slane %v4158_v25, %v6902_v5 }
 0x784   :  { %3966 = vmatpush1.msra.mxu1 %v3853_v28  ;;  %3897 = vmatpush1.msra.mxu0 %v3847_v30  ;;  %v7109_v30 = vrot.slane %v4196_v8, %v6112_v63  ;;  %p5501_p12 = por %p5500_p11, %p5499_p10 }
 0x785   :  { %3967 = vmatprep.subr.mxu1 %v3850_v23  ;;  %v7106_v23 = vrot.slane %v4196_v8, %v5930_v58 }
 0x786   :  { %3968 = vmatpush1.msra.mxu1 %v3849_v48  ;;  %p5502_p13 = pnand %p5501_p12, %p5495_p9 }
 0x83c   :  { %v4735_v27 = vpop.f32.mrf.mxu0 }
 0x83e   :  { %v4736_v45 = vpop.f32.mrf.mxu0 }
 0x83f   :  { %v4770_v37 = vpop.f32.mrf.mxu1  ;;  %v4737_v59 = vadd.f32 %v4736_v45, %v4735_v27  ;;  %v7114_v45 = vrot.slane %v4196_v8, %v6902_v5 }
 0x841   :  { %v4771_v49 = vpop.f32.mrf.mxu1 }
 0x842   :  { %v4772_v11 = vadd.f32 %v4771_v49, %v4770_v37  ;;  %v7117_v37 = vrot.slane %v4196_v8, %v6908_v12 }
 0x844   :  { %v3833_v51 = vadd.f32 %v4772_v11, %v4737_v59 }
 0x846   :  { %v3837_v1 = vmul.f32 0.00390625, %v3833_v51 }
 0x848   :  { %v3838_v29 = vmul.f32 %v3837_v1, %v3837_v1 }
 0x84a   :  { %v3840_v42 = vrot.slane %v3838_v29, 6 }
 0x84c   :  { %v3842_v7 = vsub.f32 %v3837_v1, %v3840_v42 }
 0x84e   :  { %v3843_v55 = vmax.f32 %v3842_v7, 0.0 }
 0x850   :  { %v3844_v39 = vadd.f32 1e-05, %v3843_v55 }
 0x852   :  { %5232 = vrsqrt.f32 %v3844_v39 }
 0x85f   :  { %v5233_v47 = vpop.eup %5232 }
 0x860   :  { %v3846_v52 = vsel %vm715_vm11, %v3837_v1, %v5233_v47 }
 0x861   :  { %4629 = vmatmul.mubr.msk.f32.vlgmr.msra.gmra.mxu0 %vm818_vm12, %v3846_v52  ;;  %4630 = vmatmul.mubr.msk.f32.vlgmr.msra.gmra.mxu1 %vm818_vm12, %v3846_v52 }
 0x921   :  { %v3932_v34 = vpop.f32.mrf.mxu0  ;;  %v4003_v21 = vpop.f32.mrf.mxu1 }
 0x923   :  { %v3934_v32 = vpop.f32.mrf.mxu0  ;;  %v4005_v18 = vpop.f32.mrf.mxu1 }
 0x924   :  { %v4012_v61 = vcombine.low %v3932_v34, %v3934_v32  ;;  %v4013_v44 = vcombine.low %v4003_v21, %v4005_v18 }
 0x926   :  { %v4020_v60 = vrot.slane %v4012_v61, %v5927_v56  ;;  %v4027_v2 = vrot.slane %v4013_v44, %v5927_v56 }
 0x928   :  { %v4028_v16 = vcombine.low %v4020_v60, %v4027_v2  ;;  %v4029_v14 = vcombine.high %v4020_v60, %v4027_v2 }
 0x92a   :  { %v4036_v40 = vrot.slane %v4028_v16, %v5927_v56  ;;  %v4043_v38 = vrot.slane %v4029_v14, %v5927_v56 }
 0x92c   :  { %v4047_v33 = vrot.slane %v4036_v40, %v5930_v58  ;;  %v4051_v22 = vrot.slane %v4036_v40, %v6112_v63  ;;  %v4055_v53 = vrot.slane %v4036_v40, %v6902_v5  ;;  %v4059_v4 = vrot.slane %v4036_v40, %v6908_v12 }
 0x92d   :  { %v4063_v56 = vrot.slane %v4043_v38, %v5930_v58  ;;  %v4067_v0 = vrot.slane %v4043_v38, %v6112_v63  ;;  %v4071_v28 = vrot.slane %v4043_v38, %v6902_v5  ;;  %v4075_v41 = vrot.slane %v4043_v38, %v6908_v12 }
 0x92e   :  { %v4084_v48 = vsub.f32 %v6927_v15, %v4047_v33  ;;  %v4085_v27 = vsub.f32 %v6933_v20, %v4051_v22  ;;  %v4086_v59 = vsub.f32 %v6930_v10, %v4055_v53  ;;  %v4087_v49 = vsub.f32 %v6936_v31, %v4059_v4 }
 0x92f   :  { %v4088_v11 = vsub.f32 %v6947_v35, %v4047_v33  ;;  %v4089_v51 = vsub.f32 %v6953_v50, %v4051_v22  ;;  %v4090_v1 = vsub.f32 %v6950_v24, %v4055_v53  ;;  %v4091_v15 = vsub.f32 %v6956_v54, %v4059_v4 }
 0x930   :  { %v4092_v20 = vsub.f32 %v6989_v19, %v4063_v56  ;;  %v4093_v29 = vsub.f32 %v7004_v57, %v4067_v0  ;;  %v4094_v42 = vsub.f32 %v6992_v13, %v4071_v28  ;;  %v4095_v7 = vsub.f32 %v7007_v17, %v4075_v41 }
 0x931   :  { %v4100_v55 = vcombine.high %v4036_v40, %v4036_v40  ;;  %v4101_v10 = vcombine.high %v4043_v38, %v4043_v38  ;;  %v4096_v31 = vsub.f32 %v7014_v6, %v4063_v56  ;;  %v4097_v35 = vsub.f32 %v7020_v43, %v4067_v0 }
 0x932   :  { %v4098_v50 = vsub.f32 %v7017_v36, %v4071_v28  ;;  %v4099_v24 = vsub.f32 %v7023_v26, %v4075_v41 }
 0x933   :  { %v4105_v54 = vrot.slane %v4100_v55, %v5930_v58  ;;  %v4109_v19 = vrot.slane %v4100_v55, %v6112_v63  ;;  %v4113_v57 = vrot.slane %v4100_v55, %v6902_v5  ;;  %v4117_v13 = vrot.slane %v4100_v55, %v6908_v12 }
 0x934   :  { %v4121_v17 = vrot.slane %v4101_v10, %v5930_v58  ;;  %v4125_v39 = vrot.slane %v4101_v10, %v6112_v63  ;;  %v4129_v6 = vrot.slane %v4101_v10, %v6902_v5  ;;  %v4133_v43 = vrot.slane %v4101_v10, %v6908_v12 }
 0x935   :  { %v4142_v47 = vmul.f32 %v4105_v54, %v4084_v48  ;;  %v4143_v36 = vmul.f32 %v4109_v19, %v4085_v27  ;;  %v4144_v52 = vmul.f32 %v4113_v57, %v4086_v59  ;;  %v4145_v26 = vmul.f32 %v4117_v13, %v4087_v49 }
 0x936   :  { %v4146_v34 = vmul.f32 %v4105_v54, %v4088_v11  ;;  %v4147_v21 = vmul.f32 %v4109_v19, %v4089_v51  ;;  %v4148_v32 = vmul.f32 %v4113_v57, %v4090_v1  ;;  %v4149_v18 = vmul.f32 %v4117_v13, %v4091_v15 }
 0x937   :  { %v4150_v61 = vmul.f32 %v4121_v17, %v4092_v20  ;;  %v4151_v44 = vmul.f32 %v4125_v39, %v4093_v29  ;;  %v4152_v60 = vmul.f32 %v4129_v6, %v4094_v42  ;;  %v4153_v2 = vmul.f32 %v4133_v43, %v4095_v7 }
 0x938   :  { %v4154_v16 = vmul.f32 %v4121_v17, %v4096_v31  ;;  %v4155_v58 = vmul.f32 %v4125_v39, %v4097_v35  ;;  %v4156_v14 = vmul.f32 %v4129_v6, %v4098_v50  ;;  %v4157_v63 = vmul.f32 %v4133_v43, %v4099_v24 }
 0x939   :  { %v4180_v5 = vmul.f32 %v7083_v3, %v4142_v47  ;;  %v4181_v12 = vmul.f32 %v7086_v46, %v4143_v36  ;;  %v4182_v25 = vmul.f32 %v7098_v9, %v4144_v52  ;;  %v4183_v40 = vmul.f32 %v7101_v62, %v4145_v26 }
 0x93a   :  { %v4184_v38 = vmul.f32 %v7083_v3, %v4146_v34  ;;  %v4185_v8 = vmul.f32 %v7086_v46, %v4147_v21  ;;  %v4186_v33 = vmul.f32 %v7098_v9, %v4148_v32  ;;  %v4187_v22 = vmul.f32 %v7101_v62, %v4149_v18 }
 0x93b   :  { %v4188_v53 = vmul.f32 %v7083_v3, %v4150_v61  ;;  %v4189_v4 = vmul.f32 %v7086_v46, %v4151_v44  ;;  %v4190_v56 = vmul.f32 %v7098_v9, %v4152_v60  ;;  %v4191_v0 = vmul.f32 %v7101_v62, %v4153_v2 }
 0x93c   :  { %v4192_v28 = vmul.f32 %v7083_v3, %v4154_v16  ;;  %v4193_v41 = vmul.f32 %v7086_v46, %v4155_v58  ;;  %v4194_v48 = vmul.f32 %v7098_v9, %v4156_v14  ;;  %v4195_v27 = vmul.f32 %v7101_v62, %v4157_v63 }
 0x93d   :  { %v4218_v59 = vadd.f32 %v7106_v23, %v4180_v5  ;;  %v4219_v49 = vadd.f32 %v7109_v30, %v4181_v12  ;;  %v4220_v11 = vadd.f32 %v7114_v45, %v4182_v25  ;;  %v4221_v51 = vadd.f32 %v7117_v37, %v4183_v40 }
 0x93e   :  { %v4222_v1 = vadd.f32 %v7106_v23, %v4184_v38  ;;  %v4223_v15 = vadd.f32 %v7109_v30, %v4185_v8  ;;  %v4224_v3 = vadd.f32 %v7114_v45, %v4186_v33  ;;  %v4225_v46 = vadd.f32 %v7117_v37, %v4187_v22 }
 0x93f   :  { %v4226_v9 = vadd.f32 %v7106_v23, %v4188_v53  ;;  %v4227_v62 = vadd.f32 %v7109_v30, %v4189_v4  ;;  %v4228_v20 = vadd.f32 %v7114_v45, %v4190_v56  ;;  %v4229_v29 = vadd.f32 %v7117_v37, %v4191_v0 }
 0x940   :  { %v4230_v42 = vadd.f32 %v7106_v23, %v4192_v28  ;;  %v4231_v7 = vadd.f32 %v7109_v30, %v4193_v41  ;;  %v4232_v55 = vadd.f32 %v7114_v45, %v4194_v48  ;;  %v4233_v10 = vadd.f32 %v7117_v37, %v4195_v27 }
 0x941   :  { %v4234_v31 = vmax.f32 %v4218_v59, 0.0  ;;  %v4235_v35 = vmax.f32 %v4219_v49, 0.0  ;;  %v4236_v50 = vmax.f32 %v4220_v11, 0.0  ;;  %v4237_v24 = vmax.f32 %v4221_v51, 0.0 }
 0x942   :  { %v4238_v54 = vmax.f32 %v4222_v1, 0.0  ;;  %v4239_v19 = vmax.f32 %v4223_v15, 0.0  ;;  %v4240_v57 = vmax.f32 %v4224_v3, 0.0  ;;  %v4241_v13 = vmax.f32 %v4225_v46, 0.0 }
 0x943   :  { %v4242_v17 = vmax.f32 %v4226_v9, 0.0  ;;  %v4243_v39 = vmax.f32 %v4227_v62, 0.0  ;;  %v4244_v6 = vmax.f32 %v4228_v20, 0.0  ;;  %v4245_v23 = vmax.f32 %v4229_v29, 0.0  ;;  %4250 = vst [vmem:[#allocation23] sm:$0xff] %v4234_v31  ;;  %4251 = vst [vmem:[#allocation23 + $0x8] sm:$0xff] %v4235_v35 }
 0x944   :  { %4252 = vst [vmem:[#allocation23 + $0x10] sm:$0xff] %v4236_v50  ;;  %4253 = vst [vmem:[#allocation23 + $0x18] sm:$0xff] %v4237_v24  ;;  %v4246_v30 = vmax.f32 %v4230_v42, 0.0  ;;  %v4247_v45 = vmax.f32 %v4231_v7, 0.0  ;;  %v4248_v37 = vmax.f32 %v4232_v55, 0.0  ;;  %v4249_v43 = vmax.f32 %v4233_v10, 0.0 }
 0x945   :  { %4254 = vst [vmem:[#allocation23 + $0x20] sm:$0xff] %v4238_v54  ;;  %4255 = vst [vmem:[#allocation23 + $0x28] sm:$0xff] %v4239_v19 }
 0x946   :  { %4256 = vst [vmem:[#allocation23 + $0x30] sm:$0xff] %v4240_v57  ;;  %4257 = vst [vmem:[#allocation23 + $0x38] sm:$0xff] %v4241_v13 }
 0x947   :  { %4258 = vst [vmem:[#allocation23 + $0x40] sm:$0xff] %v4242_v17  ;;  %4259 = vst [vmem:[#allocation23 + $0x48] sm:$0xff] %v4243_v39 }
 0x948   :  { %4260 = vst [vmem:[#allocation23 + $0x50] sm:$0xff] %v4244_v6  ;;  %4261 = vst [vmem:[#allocation23 + $0x58] sm:$0xff] %v4245_v23 }
 0x949   :  { %4262 = vst [vmem:[#allocation23 + $0x60] sm:$0xff] %v4246_v30  ;;  %4263 = vst [vmem:[#allocation23 + $0x68] sm:$0xff] %v4247_v45 }
 0x94a   :  { %4264 = vst [vmem:[#allocation23 + $0x70] sm:$0xff] %v4248_v37  ;;  %4265 = vst [vmem:[#allocation23 + $0x78] sm:$0xff] %v4249_v43 }
 0x94b   :  { %5505 = shalt.err (!%p5502_p13)
}
 0x94c   :  { %4277 = dma.vmem_to_hbm [thread:$0]  %s4272_s22, 2048, %s7204_s25, [#allocation4], %s5547_s26, %s5547_s26, %s5548_s29  }
 0x94d   :  { %5528 = dma.done.wait [#allocation4], 2048  }
 0x94e   :  { %5529 = vsyncadd [#allocation4], 4294965248 }
 0x94f   :  { %4281 = vsyncpa [#allocation3], 1 }
 0x950   :  { %4282 = vsyncpa [#allocation6], 1 }
 0x951   :  { %4283 = vsyncpa [#allocation9], 1 }
 0x952   :  { %4284 = vsyncpa [#allocation12], 1 }
 0x953   :  { %4285 = vsyncpa [#allocation15], 1 }
 0x954   :  { %4286 = vsyncpa [#allocation18], 1 }
 0x955   :  { %4287 = vsyncpa [#allocation21], 1 }
 0x956   :  { %4288 = vsyncpa [#allocation4], 1 }

// kernel: tpu_custom_call.1
= control target key start
LH: loop header
LB: loop body
LE: loop exit
PB: predicated region body
PF: predicated region fallthrough
CT: control target
= control target key end

     0   :  { %s7179_s0 = inlined_call_operand.vmem [shape: f32[2,16,4], index: 0, kind: input, shape index: {}]   ;;  %s7180_s1 = inlined_call_operand.vmem [shape: f32[4,128], index: 1, kind: input, shape index: {}]   ;;  %s7181_s2 = inlined_call_operand.vmem [shape: f32[4,128], index: 2, kind: input, shape index: {}]   ;;  %s7182_s3 = inlined_call_operand.hbm [shape: f32[4,128], index: 3, kind: input, shape index: {}]   ;;  %s7183_s4 = inlined_call_operand.hbm [shape: f32[1,128], index: 4, kind: input, shape index: {}]   ;;  %s7184_s5 = inlined_call_operand.hbm [shape: f32[1,128], index: 5, kind: input, shape index: {}]   ;;  %s7185_s6 = inlined_call_operand.hbm [shape: f32[1,128], index: 6, kind: input, shape index: {}]   ;;  %s7186_s7 = inlined_call_operand.vmem [shape: f32[128,32], index: 7, kind: input, shape index: {}]   ;;  %s7187_s8 = inlined_call_operand.hbm [shape: f32[32,128], index: 8, kind: input, shape index: {}]   ;;  %s7188_s9 = inlined_call_operand.hbm [shape: bf16[128,256], index: 9, kind: input, shape index: {}]   ;;  %s7189_s10 = inlined_call_operand.hbm [shape: bf16[128,256], index: 10, kind: input, shape index: {}]   ;;  %s7190_s11 = inlined_call_operand.hbm [shape: bf16[128,256], index: 11, kind: input, shape index: {}]   ;;  %s7191_s12 = inlined_call_operand.hbm [shape: f32[1,256], index: 12, kind: input, shape index: {}]   ;;  %s7192_s13 = inlined_call_operand.hbm [shape: f32[1,256], index: 13, kind: input, shape index: {}]   ;;  %s7193_s14 = inlined_call_operand.vmem [shape: f32[1,256], index: 14, kind: input, shape index: {}]   ;;  %s7194_s15 = inlined_call_operand.vmem [shape: f32[256,32], index: 15, kind: input, shape index: {}]   ;;  %s7195_s16 = inlined_call_operand.hbm [shape: f32[32,256], index: 16, kind: input, shape index: {}]   ;;  %s7196_s17 = inlined_call_operand.vmem [shape: bf16[256,512], index: 17, kind: input, shape index: {}]   ;;  %s7197_s18 = inlined_call_operand.vmem [shape: bf16[256,512], index: 18, kind: input, shape index: {}]   ;;  %s7198_s19 = inlined_call_operand.hbm [shape: bf16[256,512], index: 19, kind: input, shape index: {}]   ;;  %s7199_s20 = inlined_call_operand.vmem [shape: f32[1,512], index: 20, kind: input, shape index: {}]   ;;  %s7200_s21 = inlined_call_operand.vmem [shape: f32[1,512], index: 21, kind: input, shape index: {}]   ;;  %s7201_s22 = inlined_call_operand.vmem [shape: f32[1,512], index: 22, kind: input, shape index: {}]   ;;  %s7202_s23 = inlined_call_operand.vmem [shape: f32[512,32], index: 23, kind: input, shape index: {}]   ;;  %s7203_s24 = inlined_call_operand.hbm [shape: f32[32,512], index: 24, kind: input, shape index: {}]   ;;  %s7204_s25 = inlined_call_operand.hbm [shape: f32[2,16,512], index: 25, kind: output, shape index: {}]  }
   0x1   :  { %7209 = sst [smem:[#allocation32_spill]] %s7179_s0 }
   0x2   :  { %7210 = sst [smem:[#allocation33_spill]] %s7180_s1 }
   0x3   :  { %7211 = sst [smem:[#allocation34_spill]] %s7181_s2 }
   0x4   :  { %7212 = sst [smem:[#allocation35_spill]] %s7182_s3 }
   0x5   :  { %7213 = sst [smem:[#allocation36_spill]] %s7183_s4 }
   0x6   :  { %7214 = sst [smem:[#allocation37_spill]] %s7184_s5 }
   0x7   :  { %7215 = sst [smem:[#allocation38_spill]] %s7185_s6 }
   0x8   :  { %7216 = sst [smem:[#allocation39_spill]] %s7186_s7 }
   0x9   :  { %7217 = sst [smem:[#allocation40_spill]] %s7187_s8 }
   0xa   :  { %7218 = sst [smem:[#allocation41_spill]] %s7188_s9 }
   0xb   :  { %30 = vsyncpa [#allocation3], 0 }
   0xc   :  { %31 = vsyncpa [#allocation6], 0 }
   0xd   :  { %32 = vsyncpa [#allocation9], 0 }
   0xe   :  { %33 = vsyncpa [#allocation12], 0 }
   0xf   :  { %34 = vsyncpa [#allocation15], 0 }
  0x10   :  { %35 = vsyncpa [#allocation18], 0 }
  0x11   :  { %36 = vsyncpa [#allocation21], 0 }
  0x12   :  { %37 = vsyncpa [#allocation4], 0  ;;  %s5530_s29 = smov [#allocation5]   ;;  %s5531_s6 = smov [#allocation8]  }
  0x13   :  { %s60_s2 = sshll.u32 %s5530_s29, 4  ;;  %s80_s30 = sshll.u32 %s5531_s6, 4  ;;  %s61_s2 = int_to_ptr.vmem [resolvable:$true] %s60_s2  ;;  %s81_s30 = int_to_ptr.vmem [resolvable:$true] %s80_s30 }
  0x14   :  { %s5242_s7 = scalar_lea.vmem %s61_s2, 16  ;;  %s5246_s3 = scalar_lea.vmem %s61_s2, 32 }
  0x15   :  { %p5243_p0 = scmp.ne.s32.totalorder %s61_s2, %s5242_s7  ;;  %p5247_p1 = scmp.lt.s32.totalorder %s61_s2, %s61_s2 }
  0x16   :  { %p5248_p2 = scmp.lt.s32.totalorder %s5246_s3, %s5242_s7 }
  0x18   :  { %p5249_p3 = por %p5248_p2, %p5247_p1 }
  0x1a   :  { %p5250_p4 = pnand %p5249_p3, %p5243_p0 }
  0x1c   :  { %5253 = shalt.err (!%p5250_p4)
}
  0x1d   :  { %s7219_s8 = sld [smem:[#allocation36_spill]]  ;;  %s5262_s27 = scalar_lea.vmem %s81_s30, 16 }
  0x1e   :  { %p5263_p5 = scmp.ne.s32.totalorder %s81_s30, %s5262_s27  ;;  %s5266_s4 = scalar_lea.vmem %s81_s30, 32 }
  0x1f   :  { %p5267_p6 = scmp.lt.s32.totalorder %s81_s30, %s81_s30  ;;  %p5268_p7 = scmp.lt.s32.totalorder %s5266_s4, %s5262_s27 }
  0x21   :  { %p5269_p8 = por %p5268_p7, %p5267_p6 }
  0x23   :  { %63 = dma.hbm_to_vmem [thread:$0]  %s7219_s8, 16, %s61_s2, [#allocation6]  }
  0x24   :  { %p5270_p9 = pnand %p5269_p8, %p5263_p5 }
  0x26   :  { %5273 = shalt.err (!%p5270_p9)
}
  0x27   :  { %s7220_s5 = sld [smem:[#allocation38_spill]]  ;;  %s5532_s0 = smov [#allocation11]  }
  0x28   :  { %s103_s29 = sshll.u32 %s5532_s0, 4  ;;  %s5533_s6 = smov [#allocation14]   ;;  %s104_s29 = int_to_ptr.vmem [resolvable:$true] %s103_s29 }
  0x29   :  { %s127_s7 = sshll.u32 %s5533_s6, 4  ;;  %s5282_s3 = scalar_lea.vmem %s104_s29, 2048  ;;  %s128_s7 = int_to_ptr.vmem [resolvable:$true] %s127_s7 }
  0x2a   :  { %p5283_p10 = scmp.ne.s32.totalorder %s104_s29, %s5282_s3  ;;  %p5287_p11 = scmp.lt.s32.totalorder %s104_s29, %s104_s29 }
  0x2b   :  { %p5288_p12 = scmp.lt.s32.totalorder %s5282_s3, %s5282_s3 }
  0x2d   :  { %83 = dma.hbm_to_vmem [thread:$0]  %s7220_s5, 16, %s81_s30, [#allocation9]  }
  0x2e   :  { %p5289_p13 = por %p5288_p12, %p5287_p11 }
  0x30   :  { %p5290_p0 = pnand %p5289_p13, %p5283_p10 }
  0x32   :  { %5293 = shalt.err (!%p5290_p0)
}
  0x33   :  { %s5534_s2 = smov 128   ;;  %s5535_s26 = smov 8  }
  0x34   :  { %s7221_s8 = sld [smem:[#allocation41_spill]]  ;;  %s5302_s27 = scalar_lea.vmem %s128_s7, 2048 }
  0x35   :  { %p5303_p1 = scmp.ne.s32.totalorder %s128_s7, %s5302_s27  ;;  %p5307_p2 = scmp.lt.s32.totalorder %s128_s7, %s128_s7 }
  0x36   :  { %p5308_p3 = scmp.lt.s32.totalorder %s5302_s27, %s5302_s27 }
  0x38   :  { %p5309_p4 = por %p5308_p3, %p5307_p2 }
  0x3a   :  { %109 = dma.hbm_to_vmem [thread:$0]  %s7221_s8, 2048, %s104_s29, [#allocation12], %s5534_s2, %s5534_s2, %s5535_s26  }
  0x3b   :  { %p5310_p5 = pnand %p5309_p4, %p5303_p1 }
  0x3d   :  { %5313 = shalt.err (!%p5310_p5)
}
  0x3e   :  { %133 = dma.hbm_to_vmem [thread:$0]  %s7190_s11, 2048, %s128_s7, [#allocation15], %s5534_s2, %s5534_s2, %s5535_s26  }
  0x3f   :  { %s5536_s9 = smov [#allocation17]  }
  0x40   :  { %s150_s5 = sshll.u32 %s5536_s9, 4  ;;  %s151_s5 = int_to_ptr.vmem [resolvable:$true] %s150_s5 }
  0x41   :  { %s5322_s0 = scalar_lea.vmem %s151_s5, 32  ;;  %p5327_p7 = scmp.lt.s32.totalorder %s151_s5, %s151_s5 }
  0x42   :  { %p5323_p6 = scmp.ne.s32.totalorder %s151_s5, %s5322_s0  ;;  %p5328_p8 = scmp.lt.s32.totalorder %s5322_s0, %s5322_s0 }
  0x44   :  { %p5329_p9 = por %p5328_p8, %p5327_p7 }
  0x46   :  { %p5330_p10 = pnand %p5329_p9, %p5323_p6 }
  0x48   :  { %5333 = shalt.err (!%p5330_p10)
}
  0x49   :  { %153 = dma.hbm_to_vmem [thread:$0]  %s7192_s13, 32, %s151_s5, [#allocation18]  }
  0x4a   :  { %s5537_s3 = smov [#allocation20]   ;;  %s5538_s30 = smov [#allocation2]  }
  0x4b   :  { %s179_s1 = sshll.u32 %s5537_s3, 4  ;;  %s50_s8 = sshll.u32 %s5538_s30, 4  ;;  %s180_s1 = int_to_ptr.vmem [resolvable:$true] %s179_s1  ;;  %s51_s8 = int_to_ptr.vmem [resolvable:$true] %s50_s8 }
  0x4c   :  { %s5342_s11 = scalar_lea.vmem %s180_s1, 8192  ;;  %p5347_p12 = scmp.lt.s32.totalorder %s180_s1, %s180_s1 }
  0x4d   :  { %p5343_p11 = scmp.ne.s32.totalorder %s180_s1, %s5342_s11  ;;  %p5348_p13 = scmp.lt.s32.totalorder %s5342_s11, %s5342_s11 }
  0x4f   :  { %p5349_p0 = por %p5348_p13, %p5347_p12 }
  0x51   :  { %p5350_p1 = pnand %p5349_p0, %p5343_p11 }
  0x53   :  { %5353 = shalt.err (!%p5350_p1)
}
  0x54   :  { %s5539_s7 = smov 256   ;;  %s5540_s27 = smov 16  }
  0x55   :  { %185 = dma.hbm_to_vmem [thread:$0]  %s7198_s19, 8192, %s180_s1, [#allocation21], %s5539_s7, %s5539_s7, %s5540_s27  }
  0x56   :  { %s5362_s13 = scalar_lea.vmem %s51_s8, 64  ;;  %p5367_p3 = scmp.lt.s32.totalorder %s51_s8, %s51_s8 }
  0x57   :  { %p5363_p2 = scmp.ne.s32.totalorder %s51_s8, %s5362_s13  ;;  %p5368_p4 = scmp.lt.s32.totalorder %s5362_s13, %s5362_s13 }
  0x59   :  { %p5369_p5 = por %p5368_p4, %p5367_p3 }
  0x5b   :  { %p5370_p6 = pnand %p5369_p5, %p5363_p2 }
  0x5d   :  { %5373 = shalt.err (!%p5370_p6)
}
  0x5e   :  { %s7222_s0 = sld [smem:[#allocation35_spill]]  ;;  %s5541_s29 = smov [#allocation7]  }
  0x5f   :  { %s70_s6 = sshll.u32 %s5541_s29, 4  ;;  %s5542_s3 = smov [#allocation10]   ;;  %s71_s6 = int_to_ptr.vmem [resolvable:$true] %s70_s6 }
  0x60   :  { %s91_s30 = sshll.u32 %s5542_s3, 4  ;;  %s5382_s11 = scalar_lea.vmem %s71_s6, 16  ;;  %s92_s30 = int_to_ptr.vmem [resolvable:$true] %s91_s30 }
  0x61   :  { %p5383_p7 = scmp.ne.s32.totalorder %s71_s6, %s5382_s11  ;;  %s5386_s19 = scalar_lea.vmem %s71_s6, 32 }
  0x62   :  { %p5387_p8 = scmp.lt.s32.totalorder %s71_s6, %s71_s6  ;;  %p5388_p9 = scmp.lt.s32.totalorder %s5386_s19, %s5382_s11 }
  0x64   :  { %53 = dma.hbm_to_vmem [thread:$0]  %s7222_s0, 64, %s51_s8, [#allocation3]  }
  0x65   :  { %p5389_p10 = por %p5388_p9, %p5387_p8 }
  0x67   :  { %p5390_p11 = pnand %p5389_p10, %p5383_p7 }
  0x69   :  { %5393 = shalt.err (!%p5390_p11)
}
  0x6a   :  { %s7223_s28 = sld [smem:[#allocation37_spill]]  ;;  %s5402_s13 = scalar_lea.vmem %s92_s30, 512 }
  0x6b   :  { %p5403_p12 = scmp.ne.s32.totalorder %s92_s30, %s5402_s13  ;;  %p5407_p13 = scmp.lt.s32.totalorder %s92_s30, %s92_s30 }
  0x6c   :  { %p5408_p0 = scmp.lt.s32.totalorder %s5402_s13, %s5402_s13 }
  0x6e   :  { %p5409_p1 = por %p5408_p0, %p5407_p13 }
  0x70   :  { %73 = dma.hbm_to_vmem [thread:$0]  %s7223_s28, 16, %s71_s6, [#allocation6]  }
  0x71   :  { %p5410_p2 = pnand %p5409_p1, %p5403_p12 }
  0x73   :  { %5413 = shalt.err (!%p5410_p2)
}
  0x74   :  { %s7224_s5 = sld [smem:[#allocation40_spill]]  ;;  %s5543_s0 = smov [#allocation13]  }
  0x75   :  { %s115_s29 = sshll.u32 %s5543_s0, 4  ;;  %s5544_s3 = smov [#allocation16]   ;;  %s116_s29 = int_to_ptr.vmem [resolvable:$true] %s115_s29 }
  0x76   :  { %s140_s6 = sshll.u32 %s5544_s3, 4  ;;  %s5422_s11 = scalar_lea.vmem %s116_s29, 2048  ;;  %s141_s6 = int_to_ptr.vmem [resolvable:$true] %s140_s6 }
  0x77   :  { %p5423_p3 = scmp.ne.s32.totalorder %s116_s29, %s5422_s11  ;;  %p5427_p4 = scmp.lt.s32.totalorder %s116_s29, %s116_s29 }
  0x78   :  { %p5428_p5 = scmp.lt.s32.totalorder %s5422_s11, %s5422_s11 }
  0x7a   :  { %97 = dma.hbm_to_vmem [thread:$0]  %s7224_s5, 512, %s92_s30, [#allocation9], %s5534_s2, %s5534_s2, %s5535_s26  }
  0x7b   :  { %p5429_p6 = por %p5428_p5, %p5427_p4 }
  0x7d   :  { %p5430_p7 = pnand %p5429_p6, %p5423_p3 }
  0x7f   :  { %5433 = shalt.err (!%p5430_p7)
}
  0x80   :  { %121 = dma.hbm_to_vmem [thread:$0]  %s7189_s10, 2048, %s116_s29, [#allocation12], %s5534_s2, %s5534_s2, %s5535_s26  }
  0x81   :  { %s5442_s30 = scalar_lea.vmem %s141_s6, 32  ;;  %p5447_p9 = scmp.lt.s32.totalorder %s141_s6, %s141_s6 }
  0x82   :  { %p5443_p8 = scmp.ne.s32.totalorder %s141_s6, %s5442_s30  ;;  %p5448_p10 = scmp.lt.s32.totalorder %s5442_s30, %s5442_s30 }
  0x84   :  { %p5449_p11 = por %p5448_p10, %p5447_p9 }
  0x86   :  { %p5450_p12 = pnand %p5449_p11, %p5443_p8 }
  0x88   :  { %5453 = shalt.err (!%p5450_p12)
}
  0x89   :  { %143 = dma.hbm_to_vmem [thread:$0]  %s7191_s12, 32, %s141_s6, [#allocation15]  }
  0x8a   :  { %s5545_s13 = smov [#allocation19]   ;;  %s5546_s9 = smov [#allocation22]  }
  0x8b   :  { %s163_s8 = sshll.u32 %s5545_s13, 4  ;;  %s199_s5 = sshll.u32 %s5546_s9, 4  ;;  %s164_s8 = int_to_ptr.vmem [resolvable:$true] %s163_s8  ;;  %s200_s5 = int_to_ptr.vmem [resolvable:$true] %s199_s5 }
  0x8c   :  { %s5462_s0 = scalar_lea.vmem %s164_s8, 1024  ;;  %p5467_p0 = scmp.lt.s32.totalorder %s164_s8, %s164_s8 }
  0x8d   :  { %p5463_p13 = scmp.ne.s32.totalorder %s164_s8, %s5462_s0  ;;  %p5468_p1 = scmp.lt.s32.totalorder %s5462_s0, %s5462_s0 }
  0x8f   :  { %p5469_p2 = por %p5468_p1, %p5467_p0 }
  0x91   :  { %p5470_p3 = pnand %p5469_p2, %p5463_p13 }
  0x93   :  { %5473 = shalt.err (!%p5470_p3)
}
  0x94   :  { %169 = dma.hbm_to_vmem [thread:$0]  %s7195_s16, 1024, %s164_s8, [#allocation18], %s5539_s7, %s5539_s7, %s5540_s27  }
  0x95   :  { %s5482_s12 = scalar_lea.vmem %s200_s5, 2048  ;;  %p5487_p5 = scmp.lt.s32.totalorder %s200_s5, %s200_s5 }
  0x96   :  { %p5483_p4 = scmp.ne.s32.totalorder %s200_s5, %s5482_s12  ;;  %p5488_p6 = scmp.lt.s32.totalorder %s5482_s12, %s5482_s12 }
  0x98   :  { %p5489_p7 = por %p5488_p6, %p5487_p5 }
  0x9a   :  { %p5490_p8 = pnand %p5489_p7, %p5483_p4 }
  0x9c   :  { %5493 = shalt.err (!%p5490_p8)
}
  0x9d   :  { %s5547_s26 = smov 512   ;;  %s5548_s29 = smov 32  }
  0x9e   :  { %205 = dma.hbm_to_vmem [thread:$0]  %s7203_s24, 2048, %s200_s5, [#allocation21], %s5547_s26, %s5547_s26, %s5548_s29  }
  0x9f   :  { %5514 = dma.done.wait [#allocation3], 64  }
  0xa0   :  { %5515 = vsyncadd [#allocation3], 4294967232 }
  0xa1   :  { %5516 = dma.done.wait [#allocation6], 32  }
  0xa2   :  { %5517 = vsyncadd [#allocation6], 4294967264 }
  0xa3   :  { %5518 = dma.done.wait [#allocation9], 528  }
  0xa4   :  { %5519 = vsyncadd [#allocation9], 4294966768 }
  0xa5   :  { %5520 = dma.done.wait [#allocation12], 4096  }
  0xa6   :  { %5521 = vsyncadd [#allocation12], 4294963200 }
  0xa7   :  { %5522 = dma.done.wait [#allocation15], 2080  }
  0xa8   :  { %5523 = vsyncadd [#allocation15], 4294965216 }
  0xa9   :  { %5524 = dma.done.wait [#allocation18], 1056  }
  0xaa   :  { %5525 = vsyncadd [#allocation18], 4294966240 }
  0xab   :  { %5526 = dma.done.wait [#allocation21], 10240  }
  0xac   :  { %5527 = vsyncadd [#allocation21], 4294957056  ;;  %v246_v0 = vlaneseq  ;;  %vm368_vm0 = vcmask 1043456   ;;  %vm355_vm1 = vcmask 31744   ;;  %s7225_s7 = sld [smem:[#allocation34_spill]]  ;;  %v7207_v40 = vmov 0.0  }
  0xad   :  { %s7226_s19 = sld [smem:[#allocation32_spill]]  ;;  %v557_v15 = vld [vmem:[#allocation2] sm:$0xf]  ;;  %vm5550_vm8 = vmmov 0   ;;  %vm707_vm9 = vcmask 1041409   ;;  %vm712_vm10 = vcmask 1043459  }
  0xae   :  { %v5745_v1 = vshrl.u32 %v246_v0, 7  ;;  %s7227_s13 = sld [smem:[#allocation33_spill]]  ;;  %vm715_vm11 = vcmask 1041408   ;;  %vm818_vm12 = vcmask 261120   ;;  %vm5553_vm14 = vmmov 1   ;;  %v1589_v37 = vld [vmem:[%s7194_s15 + $0xf8] sm:$0xff] }
  0xaf   :  { %s7236_s12 = sld [smem:[#allocation39_spill]]  ;;  %v4925_v24 = vld [vmem:[#allocation14 + $0x40] ss:$8 sps:$4 sm:$0xff]  }
  0xb0   :  { %v249_v2 = vadd.s32 16, %v5745_v1  ;;  %v248_v3 = vadd.s32 8, %v5745_v1  ;;  %v255_v4 = vand.u32 15, %v5745_v1  ;;  %v250_v5 = vadd.s32 24, %v5745_v1 }
  0xb1   :  { %vm315_vm2 = vcmp.lt.s32.totalorder %v5745_v1, 1  ;;  %vm336_vm3 = vcmp.lt.s32.totalorder %v5745_v1, 7 }
  0xb2   :  { %v354_v6 = vld [vmem:[%s7225_s7] sm:$0xf]  ;;  %v269_v9 = vand.u32 15, %v249_v2  ;;  %v262_v10 = vand.u32 15, %v248_v3  ;;  %vm5773_vm4 = vcmp.eq.s32.totalorder %v255_v4, 0  ;;  %v276_v21 = vand.u32 15, %v250_v5 }
  0xb3   :  { %v307_v7 = vld [vmem:[%s7226_s19] sm:$0xff]  ;;  %v308_v8 = vld [vmem:[%s7226_s19 + $0x8] sm:$0xff]  ;;  %4773 = vmatprep.subr.msk.mxu0 %vm368_vm0, %v354_v6  ;;  %v310_v17 = vld [vmem:[%s7226_s19 + $0x18] sm:$0xff] }
  0xb4   :  { %v311_v11 = vrot.slane %v307_v7, 7  ;;  %v332_v12 = vrot.slane %v307_v7, 1  ;;  %4775 = vmatprep.mubr.msk.f32.mxu0 %vm355_vm1, %v307_v7  ;;  %v312_v13 = vrot.slane %v308_v8, 7  ;;  %v333_v14 = vrot.slane %v308_v8, 1  ;;  %4774 = vmatpush3.msk.msra.mxu0 %vm368_vm0, %v354_v6  ;;  %v353_v16 = vld [vmem:[%s7227_s13] sm:$0xf]  ;;  %vm4340_vm13 = vmneg %vm5773_vm4 }
  0xb5   :  { %4776 = vmatmul.mubr.msk.f32.vlgmr.msra.gmra.mxu0 %vm355_vm1, %v308_v8  ;;  %4789 = vmatprep.subr.msk.mxu0 %vm368_vm0, %v557_v15  ;;  %v314_v19 = vrot.slane %v310_v17, 7  ;;  %v309_v20 = vld [vmem:[%s7226_s19 + $0x10] sm:$0xff]  ;;  %vm5782_vm5 = vcmp.eq.s32.totalorder %v269_v9, 0  ;;  %vm5786_vm6 = vcmp.eq.s32.totalorder %v262_v10, 15  ;;  %v335_v29 = vrot.slane %v310_v17, 1  ;;  %v732_v41 = vld [vmem:[%s7236_s12 + $0x78] sm:$0xff]  ;;  %vm5957_vm15 = vmpackc.low %vm5553_vm14, %vm4340_vm13 }
  0xb6   :  { %4781 = vmatprep.subr.msk.mxu1 %vm368_vm0, %v353_v16  ;;  %4790 = vmatpush3.msk.msra.mxu0 %vm368_vm0, %v557_v15  ;;  %v313_v22 = vrot.slane %v309_v20, 7  ;;  %v334_v23 = vrot.slane %v309_v20, 1  ;;  %v318_v27 = vsel %vm315_vm2, %v311_v11, %v312_v13  ;;  %v339_v28 = vsel %vm336_vm3, %v332_v12, %v333_v14  ;;  %v731_v42 = vld [vmem:[%s7236_s12 + $0x70] sm:$0xff]  ;;  %v730_v43 = vld [vmem:[%s7236_s12 + $0x68] sm:$0xff]  ;;  %v729_v44 = vld [vmem:[%s7236_s12 + $0x60] sm:$0xff] }
  0xb7   :  { %4782 = vmatpush3.msk.msra.mxu1 %vm368_vm0, %v353_v16  ;;  %v319_v26 = vsel %vm315_vm2, %v314_v19, %v311_v11  ;;  %4778 = vmatprep.mubr.msk.f32.mxu0 %vm355_vm1, %v309_v20  ;;  %vm5817_vm7 = vcmp.eq.s32.totalorder %v276_v21, 15  ;;  %v340_v38 = vsel %vm336_vm3, %v335_v29, %v332_v12  ;;  %v728_v45 = vld [vmem:[%s7236_s12 + $0x58] sm:$0xff]  ;;  %v727_v46 = vld [vmem:[%s7236_s12 + $0x50] sm:$0xff]  ;;  %v726_v47 = vld [vmem:[%s7236_s12 + $0x48] sm:$0xff] }
  0xb8   :  { %v328_v30 = vsel %vm5773_vm4, 0.0, %v319_v26  ;;  %v317_v31 = vsel %vm315_vm2, %v312_v13, %v313_v22  ;;  %v338_v32 = vsel %vm336_vm3, %v333_v14, %v334_v23  ;;  %v316_v35 = vsel %vm315_vm2, %v313_v22, %v314_v19  ;;  %4797 = vmatprep.subr.mxu1 %v7207_v40  ;;  %4832 = vmatprep.subr.mxu0 %v7207_v40  ;;  %v725_v48 = vld [vmem:[%s7236_s12 + $0x40] sm:$0xff]  ;;  %v724_v49 = vld [vmem:[%s7236_s12 + $0x38] sm:$0xff]  ;;  %v723_v50 = vld [vmem:[%s7236_s12 + $0x30] sm:$0xff] }
  0xb9   :  { %4783 = vmatprep.mubr.msk.f32.mxu1 %vm355_vm1, %v328_v30  ;;  %4779 = vmatmul.mubr.msk.f32.gmra.mxu0 %vm355_vm1, %v310_v17  ;;  %v330_v33 = vsel %vm5782_vm5, 0.0, %v317_v31  ;;  %v350_v34 = vsel %vm5786_vm6, 0.0, %v338_v32  ;;  %v337_v36 = vsel %vm336_vm3, %v334_v23, %v335_v29  ;;  %v352_v39 = vsel %vm5817_vm7, 0.0, %v340_v38  ;;  %v722_v51 = vld [vmem:[%s7236_s12 + $0x28] sm:$0xff]  ;;  %v721_v52 = vld [vmem:[%s7236_s12 + $0x20] sm:$0xff]  ;;  %v720_v53 = vld [vmem:[%s7236_s12 + $0x18] sm:$0xff] }
  0xba   :  { %4784 = vmatmul.mubr.msk.f32.vlgmr.msra.gmra.mxu1 %vm355_vm1, %v318_v27  ;;  %4791 = vmatprep.mubr.msk.f32.mxu0 %vm355_vm1, %v339_v28  ;;  %v719_v54 = vld [vmem:[%s7236_s12 + $0x10] sm:$0xff]  ;;  %v718_v55 = vld [vmem:[%s7236_s12 + $0x8] sm:$0xff]  ;;  %v717_v56 = vld [vmem:[%s7236_s12] sm:$0xff] }
  0xbb   :  { %4786 = vmatprep.mubr.msk.f32.mxu1 %vm355_vm1, %v330_v33  ;;  %4798 = vmatpush3.msra.mxu1 %v732_v41  ;;  %v4304_v2 = vld [vmem:[#allocation5] ss:$0 sm:$0xff]  ;;  %vm4344_vm0 = vmneg %vm5782_vm5 }
  0xbc   :  { %4799 = vmatprep.subr.mxu1 %v7207_v40  ;;  %vm4364_vm4 = vmneg %vm5786_vm6 }
  0xbd   :  { %4792 = vmatmul.mubr.msk.f32.vlgmr.msra.gmra.mxu0 %vm355_vm1, %v350_v34  ;;  %4800 = vmatpush3.msra.mxu1 %v731_v42  ;;  %vm5993_vm5 = vmpackc.low %vm4364_vm4, %vm5553_vm14 }
  0xbe   :  { %4787 = vmatmul.mubr.msk.f32.gmra.mxu1 %vm355_vm1, %v316_v35  ;;  %4794 = vmatprep.mubr.msk.f32.mxu0 %vm355_vm1, %v337_v36  ;;  %vm4368_vm6 = vmneg %vm5817_vm7 }
  0xbf   :  { %4801 = vmatprep.subr.mxu1 %v7207_v40  ;;  %4829 = vmatprep.mubr.msk.f32.mxu1 %vm5550_vm8, %v7207_v40 }
  0xc0   :  { %4802 = vmatpush3.msra.mxu1 %v730_v43 }
  0xc1   :  { %4795 = vmatmul.mubr.msk.f32.gmra.mxu0 %vm355_vm1, %v352_v39  ;;  %4803 = vmatprep.subr.mxu1 %v7207_v40  ;;  %vm5977_vm1 = vmpackc.low %vm5553_vm14, %vm4344_vm0 }
  0xc2   :  { %4804 = vmatpush3.msra.mxu1 %v729_v44  ;;  %4840 = vmatprep.mubr.msk.f32.mxu0 %vm5550_vm8, %v7207_v40  ;;  %vm6008_vm8 = vmpackc.low %vm4368_vm6, %vm5553_vm14 }
  0xc3   :  { %4805 = vmatprep.subr.mxu1 %v7207_v40 }
  0xc4   :  { %4806 = vmatpush3.msra.mxu1 %v728_v45 }
  0xc5   :  { %4807 = vmatprep.subr.mxu1 %v7207_v40 }
  0xc6   :  { %4808 = vmatpush3.msra.mxu1 %v727_v46 }
  0xc7   :  { %4809 = vmatprep.subr.mxu1 %v7207_v40 }
  0xc8   :  { %4810 = vmatpush3.msra.mxu1 %v726_v47 }
  0xc9   :  { %4811 = vmatprep.subr.mxu1 %v7207_v40 }
  0xca   :  { %4812 = vmatpush3.msra.mxu1 %v725_v48 }
  0xcb   :  { %4813 = vmatprep.subr.mxu1 %v7207_v40 }
  0xcc   :  { %4814 = vmatpush3.msra.mxu1 %v724_v49 }
  0xcd   :  { %4815 = vmatprep.subr.mxu1 %v7207_v40 }
  0xce   :  { %4816 = vmatpush3.msra.mxu1 %v723_v50 }
  0xcf   :  { %4817 = vmatprep.subr.mxu1 %v7207_v40 }
  0xd0   :  { %4818 = vmatpush3.msra.mxu1 %v722_v51 }
  0xd1   :  { %4819 = vmatprep.subr.mxu1 %v7207_v40 }
  0xd2   :  { %4820 = vmatpush3.msra.mxu1 %v721_v52 }
  0xd3   :  { %4821 = vmatprep.subr.mxu1 %v7207_v40 }
  0xd4   :  { %4822 = vmatpush3.msra.mxu1 %v720_v53 }
  0xd5   :  { %4823 = vmatprep.subr.mxu1 %v7207_v40 }
  0xd6   :  { %4824 = vmatpush3.msra.mxu1 %v719_v54 }
  0xd7   :  { %4825 = vmatprep.subr.mxu1 %v7207_v40 }
  0xd8   :  { %4826 = vmatpush3.msra.mxu1 %v718_v55 }
  0xd9   :  { %4827 = vmatprep.subr.mxu1 %v7207_v40 }
  0xda   :  { %4828 = vmatpush3.msra.mxu1 %v717_v56 }
 0x175   :  { %v4777_v57 = vpop.f32.mrf.mxu0 }
 0x177   :  { %v438_v58 = vpop.f32.mrf.mxu0 }
 0x179   :  { %v4780_v59 = vpop.f32.mrf.mxu0 }
 0x17a   :  { %v4785_v60 = vpop.f32.mrf.mxu1 }
 0x17b   :  { %v448_v61 = vpop.f32.mrf.mxu0  ;;  %v544_v62 = vadd.f32 %v4785_v60, %v4777_v57  ;;  %v816_v60 = vld [vmem:[#allocation10 + $0x10] sm:$0xff] }
 0x17c   :  { %v538_v63 = vpop.f32.mrf.mxu1 }
 0x17d   :  { %v4793_v0 = vpop.f32.mrf.mxu0  ;;  %v539_v3 = vadd.f32 %v538_v63, %v438_v58  ;;  %v4870_v63 = vld [vmem:[#allocation13 + $0x74] ss:$8 sps:$4 sm:$0xff]  }
 0x17e   :  { %v4788_v4 = vpop.f32.mrf.mxu1  ;;  %v659_v5 = vadd.f32 %v4793_v0, %v544_v62  ;;  %v814_v62 = vld [vmem:[#allocation10] sm:$0xff]  ;;  %v4874_v0 = vld [vmem:[#allocation11 + $0x70] ss:$8 sps:$4 sm:$0xff]  }
 0x17f   :  { %v639_v6 = vpop.f32.mrf.mxu0  ;;  %v554_v7 = vadd.f32 %v4788_v4, %v4780_v59  ;;  %v817_v59 = vld [vmem:[#allocation10 + $0x18] sm:$0xff]  ;;  %v4882_v4 = vld [vmem:[#allocation11 + $0x64] ss:$8 sps:$4 sm:$0xff]  }
 0x180   :  { %v5896_v8 = vadd.f32 %v4304_v2, %v659_v5  ;;  %v548_v9 = vpop.f32.mrf.mxu1  ;;  %v658_v10 = vadd.f32 %v639_v6, %v539_v3  ;;  %4833 = vmatpush3.msra.mxu0 %v817_v59  ;;  %v4880_v3 = vld [vmem:[#allocation11 + $0x60] ss:$8 sps:$4 sm:$0xff]  }
 0x181   :  { %v4796_v11 = vpop.f32.mrf.mxu0  ;;  %v549_v12 = vadd.f32 %v548_v9, %v448_v61  ;;  %4834 = vmatprep.subr.mxu0 %v7207_v40  ;;  %v815_v61 = vld [vmem:[#allocation10 + $0x8] sm:$0xff] }
 0x182   :  { %v5898_v13 = vadd.f32 %v4304_v2, %v658_v10  ;;  %v661_v14 = vadd.f32 %v4796_v11, %v554_v7  ;;  %v688_v15 = vmul.f32 %v5896_v8, %v5896_v8  ;;  %4835 = vmatpush3.msra.mxu0 %v816_v60 }
 0x183   :  { %v649_v16 = vpop.f32.mrf.mxu0  ;;  %4836 = vmatprep.subr.mxu0 %v7207_v40 }
 0x184   :  { %v673_v17 = vadd.f32 %v5896_v8, %v5898_v13  ;;  %v687_v19 = vmul.f32 %v5898_v13, %v5898_v13  ;;  %v5906_v20 = vadd.f32 %v4304_v2, %v661_v14  ;;  %v660_v21 = vadd.f32 %v649_v16, %v549_v12  ;;  %4837 = vmatpush3.msra.mxu0 %v815_v61 }
 0x185   :  { %4838 = vmatprep.subr.mxu0 %v7207_v40 }
 0x186   :  { %v674_v22 = vrot.slane %v673_v17, 4  ;;  %v691_v23 = vadd.f32 %v688_v15, %v687_v19  ;;  %v5908_v26 = vadd.f32 %v4304_v2, %v660_v21  ;;  %v690_v27 = vmul.f32 %v5906_v20, %v5906_v20  ;;  %4839 = vmatpush3.msra.mxu0 %v814_v62  ;;  %v4876_v2 = vld [vmem:[#allocation11 + $0x74] ss:$8 sps:$4 sm:$0xff]   ;;  %v4868_v15 = vld [vmem:[#allocation13 + $0x70] ss:$8 sps:$4 sm:$0xff]  }
 0x187   :  { %1111 = vmatprep.subr.bf16.mxu0 %v4870_v63  ;;  %1244 = vmatprep.subr.bf16.mxu1 %v4876_v2  ;;  %v4871_v21 = vld [vmem:[#allocation13 + $0x60] ss:$8 sps:$4 sm:$0xff]  }
 0x188   :  { %v675_v28 = vadd.f32 %v674_v22, %v673_v17  ;;  %v692_v29 = vrot.slane %v691_v23, 4  ;;  %v680_v30 = vadd.f32 %v5906_v20, %v5908_v26  ;;  %v689_v31 = vmul.f32 %v5908_v26, %v5908_v26  ;;  %v4873_v17 = vld [vmem:[#allocation13 + $0x64] ss:$8 sps:$4 sm:$0xff]   ;;  %v4879_v22 = vld [vmem:[#allocation13 + $0x54] ss:$8 sps:$4 sm:$0xff]  }
 0x18a   :  { %v676_v32 = vrot.slane %v675_v28, 2  ;;  %v693_v33 = vadd.f32 %v692_v29, %v691_v23  ;;  %v681_v34 = vrot.slane %v680_v30, 4  ;;  %v698_v35 = vadd.f32 %v690_v27, %v689_v31  ;;  %v4877_v23 = vld [vmem:[#allocation13 + $0x50] ss:$8 sps:$4 sm:$0xff]   ;;  %v4885_v27 = vld [vmem:[#allocation13 + $0x44] ss:$8 sps:$4 sm:$0xff]  }
 0x18b   :  { %v4888_v29 = vld [vmem:[#allocation11 + $0x54] ss:$8 sps:$4 sm:$0xff]  }
 0x18c   :  { %v694_v36 = vrot.slane %v693_v33, 2  ;;  %v682_v38 = vadd.f32 %v681_v34, %v680_v30  ;;  %v699_v39 = vrot.slane %v698_v35, 4  ;;  %v677_v41 = vadd.f32 %v676_v32, %v675_v28  ;;  %v4883_v28 = vld [vmem:[#allocation13 + $0x40] ss:$8 sps:$4 sm:$0xff]   ;;  %v4886_v30 = vld [vmem:[#allocation11 + $0x50] ss:$8 sps:$4 sm:$0xff]  }
 0x18d   :  { %v4891_v31 = vld [vmem:[#allocation13 + $0x34] ss:$8 sps:$4 sm:$0xff]   ;;  %v4889_v32 = vld [vmem:[#allocation13 + $0x30] ss:$8 sps:$4 sm:$0xff]   ;;  %v4892_v34 = vld [vmem:[#allocation11 + $0x40] ss:$8 sps:$4 sm:$0xff]  }
 0x18e   :  { %v695_v42 = vadd.f32 %v694_v36, %v693_v33  ;;  %v683_v43 = vrot.slane %v682_v38, 2  ;;  %v700_v44 = vadd.f32 %v699_v39, %v698_v35  ;;  %v678_v47 = vrot.slane %v677_v41, 1  ;;  %v4894_v33 = vld [vmem:[#allocation11 + $0x44] ss:$8 sps:$4 sm:$0xff]   ;;  %v4895_v36 = vld [vmem:[#allocation13 + $0x20] ss:$8 sps:$4 sm:$0xff]  }
 0x18f   :  { %v4897_v35 = vld [vmem:[#allocation13 + $0x24] ss:$8 sps:$4 sm:$0xff]   ;;  %v4898_v39 = vld [vmem:[#allocation11 + $0x30] ss:$8 sps:$4 sm:$0xff]  }
 0x190   :  { %v684_v45 = vadd.f32 %v683_v43, %v682_v38  ;;  %v701_v46 = vrot.slane %v700_v44, 2  ;;  %v696_v50 = vrot.slane %v695_v42, 1  ;;  %v679_v53 = vadd.f32 %v678_v47, %v677_v41  ;;  %v4900_v38 = vld [vmem:[#allocation11 + $0x34] ss:$8 sps:$4 sm:$0xff]   ;;  %v4906_v43 = vld [vmem:[#allocation11 + $0x24] ss:$8 sps:$4 sm:$0xff]  }
 0x191   :  { %v4903_v41 = vld [vmem:[#allocation13 + $0x14] ss:$8 sps:$4 sm:$0xff]  }
 0x192   :  { %v685_v48 = vrot.slane %v684_v45, 1  ;;  %v702_v49 = vadd.f32 %v701_v46, %v700_v44  ;;  %v697_v54 = vadd.f32 %v696_v50, %v695_v42  ;;  %v4901_v42 = vld [vmem:[#allocation13 + $0x10] ss:$8 sps:$4 sm:$0xff]   ;;  %v4904_v44 = vld [vmem:[#allocation11 + $0x20] ss:$8 sps:$4 sm:$0xff]  }
 0x193   :  { %v4907_v46 = vld [vmem:[#allocation13] ss:$8 sps:$4 sm:$0xff]   ;;  %v4912_v47 = vld [vmem:[#allocation11 + $0x14] ss:$8 sps:$4 sm:$0xff]  }
 0x194   :  { %v686_v51 = vadd.f32 %v685_v48, %v684_v45  ;;  %v703_v52 = vrot.slane %v702_v49, 1  ;;  %v4909_v45 = vld [vmem:[#allocation13 + $0x4] ss:$8 sps:$4 sm:$0xff]   ;;  %v4910_v48 = vld [vmem:[#allocation11 + $0x10] ss:$8 sps:$4 sm:$0xff]  }
 0x195   :  { %v4915_v50 = vld [vmem:[#allocation14 + $0x74] ss:$8 sps:$4 sm:$0xff]  }
 0x196   :  { %v704_v55 = vadd.f32 %v703_v52, %v702_v49  ;;  %v708_v56 = vsel %vm707_vm9, %v686_v51, %v679_v53  ;;  %v5551_v49 = vmov 0   ;;  %v4918_v51 = vld [vmem:[#allocation11 + $0x4] ss:$8 sps:$4 sm:$0xff]   ;;  %v4916_v52 = vld [vmem:[#allocation11] ss:$8 sps:$4 sm:$0xff]  }
 0x197   :  { %v5552_v53 = vmov 1966171168  }
 0x198   :  { %v713_v57 = vsel %vm712_vm10, %v704_v55, %v697_v54  ;;  %v894_v54 = vunpack.c.l.s4 %v5552_v53 }
 0x199   :  { %v716_v58 = vsel %vm715_vm11, %v708_v56, %v713_v57 }
 0x19a   :  { %4830 = vmatmul.mubr.f32.vlgmr.msra.gmra.mxu1 %v716_v58  ;;  %v895_v55 = vunpack.c.0.s8 %v894_v54  ;;  %v5930_v58 = vsub.s32 0, %v5745_v1  ;;  %v4930_v54 = vld [vmem:[#allocation14 + $0x34] ss:$8 sps:$4 sm:$0xff]  }
 0x19b   :  { %1245 = vmatpush1.bf16.msra.mxu1 %v4874_v0  ;;  %1276 = vmatprep.mubr.bf16.mxu1 %v5551_v49 }
 0x19c   :  { %1246 = vmatprep.subr.bf16.mxu1 %v4882_v4  ;;  %v5927_v56 = vsub.s32 %v895_v55, %v5745_v1  ;;  %v4928_v55 = vld [vmem:[#allocation14 + $0x30] ss:$8 sps:$4 sm:$0xff]  }
 0x19f   :  { %1247 = vmatpush1.bf16.msra.mxu1 %v4880_v3 }
 0x1a0   :  { %1248 = vmatprep.subr.bf16.mxu1 %v4888_v29 }
 0x1a3   :  { %1249 = vmatpush1.bf16.msra.mxu1 %v4886_v30 }
 0x1a4   :  { %1250 = vmatprep.subr.bf16.mxu1 %v4894_v33 }
 0x1a7   :  { %1251 = vmatpush1.bf16.msra.mxu1 %v4892_v34 }
 0x1a8   :  { %1252 = vmatprep.subr.bf16.mxu1 %v4900_v38 }
 0x1ab   :  { %1253 = vmatpush1.bf16.msra.mxu1 %v4898_v39  ;;  %v5146_v39 = vld [vmem:[#allocation20 + $0xa4] ss:$16 sps:$4 sm:$0xff]  }
 0x1ac   :  { %1254 = vmatprep.subr.bf16.mxu1 %v4906_v43 }
 0x1af   :  { %1255 = vmatpush1.bf16.msra.mxu1 %v4904_v44  ;;  %v4924_v44 = vld [vmem:[#allocation14 + $0x54] ss:$8 sps:$4 sm:$0xff]  }
 0x1b0   :  { %1256 = vmatprep.subr.bf16.mxu1 %v4912_v47 }
 0x1b3   :  { %1257 = vmatpush1.bf16.msra.mxu1 %v4910_v48  ;;  %v4927_v48 = vld [vmem:[#allocation14 + $0x44] ss:$8 sps:$4 sm:$0xff]  }
 0x1b4   :  { %1258 = vmatprep.subr.bf16.mxu1 %v4918_v51 }
 0x1b7   :  { %1259 = vmatpush1.bf16.msra.mxu1 %v4916_v52  ;;  %v5156_v52 = vld [vmem:[#allocation20 + $0x60] ss:$16 sps:$4 sm:$0xff]  }
 0x1b8   :  { %4668 = vmatprep.subr.mxu1 %v1589_v37 }
 0x25a   :  { %v799_v5 = vpop.f32.mrf.mxu1 }
 0x25b   :  { %v804_v6 = vmul.f32 0.015625, %v799_v5 }
 0x25c   :  { %v4831_v7 = vpop.f32.mrf.mxu1 }
 0x25d   :  { %v805_v9 = vmul.f32 %v804_v6, %v804_v6 }
 0x25f   :  { %v807_v10 = vrot.slane %v805_v9, 6 }
 0x261   :  { %v809_v11 = vsub.f32 %v804_v6, %v807_v10 }
 0x263   :  { %v810_v12 = vmax.f32 %v809_v11, 0.0 }
 0x265   :  { %v811_v14 = vadd.f32 1e-05, %v810_v12  ;;  %v4306_v12 = vld [vmem:[#allocation7] ss:$0 sm:$0xff] }
 0x267   :  { %5228 = vrsqrt.f32 %v811_v14 }
 0x274   :  { %v5229_v16 = vpop.eup %5228 }
 0x275   :  { %v813_v19 = vsel %vm715_vm11, %v804_v6, %v5229_v16 }
 0x276   :  { %4841 = vmatmul.mubr.msk.f32.vlgmr.msra.gmra.mxu0 %vm818_vm12, %v813_v19  ;;  %v4307_v19 = vld [vmem:[#allocation8] ss:$0 sm:$0xff] }
 0x277   :  { %1112 = vmatpush1.bf16.msra.mxu0 %v4868_v15  ;;  %1143 = vmatprep.mubr.bf16.mxu0 %v5551_v49 }
 0x278   :  { %1113 = vmatprep.subr.bf16.mxu0 %v4873_v17 }
 0x27b   :  { %1114 = vmatpush1.bf16.msra.mxu0 %v4871_v21 }
 0x27c   :  { %1115 = vmatprep.subr.bf16.mxu0 %v4879_v22 }
 0x27f   :  { %1116 = vmatpush1.bf16.msra.mxu0 %v4877_v23 }
 0x280   :  { %1117 = vmatprep.subr.bf16.mxu0 %v4885_v27 }
 0x283   :  { %1118 = vmatpush1.bf16.msra.mxu0 %v4883_v28 }
 0x284   :  { %1119 = vmatprep.subr.bf16.mxu0 %v4891_v31  ;;  %v4913_v31 = vld [vmem:[#allocation14 + $0x70] ss:$8 sps:$4 sm:$0xff]  }
 0x287   :  { %1120 = vmatpush1.bf16.msra.mxu0 %v4889_v32 }
 0x288   :  { %1121 = vmatprep.subr.bf16.mxu0 %v4897_v35  ;;  %v4921_v35 = vld [vmem:[#allocation14 + $0x64] ss:$8 sps:$4 sm:$0xff]  }
 0x28b   :  { %1122 = vmatpush1.bf16.msra.mxu0 %v4895_v36 }
 0x28c   :  { %1123 = vmatprep.subr.bf16.mxu0 %v4903_v41 }
 0x28f   :  { %1124 = vmatpush1.bf16.msra.mxu0 %v4901_v42  ;;  %v4919_v42 = vld [vmem:[#allocation14 + $0x60] ss:$8 sps:$4 sm:$0xff]  }
 0x290   :  { %1125 = vmatprep.subr.bf16.mxu0 %v4909_v45 }
 0x293   :  { %1126 = vmatpush1.bf16.msra.mxu0 %v4907_v46  ;;  %v4922_v46 = vld [vmem:[#allocation14 + $0x50] ss:$8 sps:$4 sm:$0xff]  }
 0x294   :  { %1395 = vmatprep.subr.bf16.mxu0 %v4915_v50 }
 0x336   :  { %v888_v57 = vpop.f32.mrf.mxu0 }
 0x337   :  { %v899_v59 = vrot.slane %v888_v57, %v5927_v56  ;;  %v4933_v57 = vld [vmem:[#allocation14 + $0x24] ss:$8 sps:$4 sm:$0xff]  }
 0x338   :  { %v4842_v60 = vpop.f32.mrf.mxu0 }
 0x339   :  { %v900_v61 = vcombine.high %v899_v59, %v899_v59  ;;  %v907_v62 = vrot.slane %v899_v59, %v5927_v56  ;;  %v4931_v59 = vld [vmem:[#allocation14 + $0x20] ss:$8 sps:$4 sm:$0xff]   ;;  %v4936_v60 = vld [vmem:[#allocation14 + $0x14] ss:$8 sps:$4 sm:$0xff]  }
 0x33b   :  { %v914_v63 = vrot.slane %v900_v61, %v5927_v56  ;;  %v918_v0 = vrot.slane %v907_v62, %v5930_v58  ;;  %v929_v2 = vcombine.high %v907_v62, %v907_v62  ;;  %v4934_v61 = vld [vmem:[#allocation14 + $0x10] ss:$8 sps:$4 sm:$0xff]   ;;  %v4939_v62 = vld [vmem:[#allocation14 + $0x4] ss:$8 sps:$4 sm:$0xff]  }
 0x33d   :  { %v922_v3 = vrot.slane %v914_v63, %v5930_v58  ;;  %v925_v4 = vsub.f32 %v5898_v13, %v918_v0  ;;  %v926_v5 = vsub.f32 %v5896_v8, %v918_v0  ;;  %v930_v6 = vcombine.high %v914_v63, %v914_v63 }
 0x33e   :  { %v934_v7 = vrot.slane %v929_v2, %v5930_v58 }
 0x33f   :  { %v927_v9 = vsub.f32 %v5908_v26, %v922_v3  ;;  %v928_v10 = vsub.f32 %v5906_v20, %v922_v3  ;;  %v938_v11 = vrot.slane %v930_v6, %v5930_v58  ;;  %v4937_v3 = vld [vmem:[#allocation14] ss:$8 sps:$4 sm:$0xff]   ;;  %v3663_v6 = vld [vmem:[%s7202_s23 + $0xf8] sm:$0xff] }
 0x340   :  { %v941_v14 = vmul.f32 %v934_v7, %v925_v4  ;;  %v942_v15 = vmul.f32 %v934_v7, %v926_v5 }
 0x341   :  { %v943_v16 = vmul.f32 %v938_v11, %v927_v9  ;;  %v944_v17 = vmul.f32 %v938_v11, %v928_v10  ;;  %v3662_v11 = vld [vmem:[%s7202_s23 + $0xf0] sm:$0xff] }
 0x342   :  { %v952_v21 = vmul.f32 %v4306_v12, %v941_v14  ;;  %v953_v22 = vmul.f32 %v4306_v12, %v942_v15  ;;  %v1588_v14 = vld [vmem:[%s7194_s15 + $0xf0] sm:$0xff] }
 0x343   :  { %v955_v13 = vmul.f32 %v4306_v12, %v944_v17  ;;  %v954_v23 = vmul.f32 %v4306_v12, %v943_v16  ;;  %v1572_v15 = vld [vmem:[%s7194_s15 + $0x70] sm:$0xff]  ;;  %v1587_v16 = vld [vmem:[%s7194_s15 + $0xe8] sm:$0xff] }
 0x344   :  { %v963_v8 = vadd.f32 %v4307_v19, %v952_v21  ;;  %v964_v27 = vadd.f32 %v4307_v19, %v953_v22  ;;  %v1571_v17 = vld [vmem:[%s7194_s15 + $0x68] sm:$0xff]  ;;  %v1570_v21 = vld [vmem:[%s7194_s15 + $0x60] sm:$0xff]  ;;  %v1585_v22 = vld [vmem:[%s7194_s15 + $0xd8] sm:$0xff] }
 0x345   :  { %v966_v28 = vadd.f32 %v4307_v19, %v955_v13  ;;  %v965_v29 = vadd.f32 %v4307_v19, %v954_v23  ;;  %v1586_v19 = vld [vmem:[%s7194_s15 + $0xe0] sm:$0xff]  ;;  %v1569_v13 = vld [vmem:[%s7194_s15 + $0x58] sm:$0xff]  ;;  %v1584_v23 = vld [vmem:[%s7194_s15 + $0xd0] sm:$0xff] }
 0x346   :  { %v5943_v30 = vmax.f32 %v963_v8, 0.0  ;;  %v5945_v26 = vmax.f32 %v964_v27, 0.0  ;;  %v1568_v8 = vld [vmem:[%s7194_s15 + $0x50] sm:$0xff]  ;;  %v1583_v27 = vld [vmem:[%s7194_s15 + $0xc8] sm:$0xff] }
 0x347   :  { %v5947_v20 = vmax.f32 %v966_v28, 0.0  ;;  %v969_v38 = vmax.f32 %v965_v29, 0.0  ;;  %v1567_v28 = vld [vmem:[%s7194_s15 + $0x48] sm:$0xff]  ;;  %v1582_v29 = vld [vmem:[%s7194_s15 + $0xc0] sm:$0xff] }
 0x348   :  { %v971_v32 = vrot.slane %v5943_v30, 7  ;;  %v972_v33 = vrot.slane %v5945_v26, 7  ;;  %v1013_v34 = vpack.c.bf16 %v5945_v26, %v5943_v30  ;;  %v983_v0 = vrot.slane %v5943_v30, 1  ;;  %v1566_v30 = vld [vmem:[%s7194_s15 + $0x40] sm:$0xff] }
 0x349   :  { %v974_v36 = vrot.slane %v5947_v20, 7  ;;  %v973_v45 = vrot.slane %v969_v38, 7  ;;  %v1014_v47 = vpack.c.bf16 %v5947_v20, %v969_v38  ;;  %v985_v63 = vrot.slane %v969_v38, 1  ;;  %v1577_v38 = vld [vmem:[%s7194_s15 + $0x98] sm:$0xff] }
 0x34a   :  { %1144 = vmatmul.mubr.bf16.vlgmr.msra.gmra.mxu0 %v1013_v34  ;;  %v977_v18 = vsel %vm315_vm2, %v971_v32, %v972_v33  ;;  %v984_v2 = vrot.slane %v5945_v26, 1  ;;  %v986_v9 = vrot.slane %v5947_v20, 1  ;;  %v1581_v26 = vld [vmem:[%s7194_s15 + $0xb8] sm:$0xff]  ;;  %v1563_v34 = vld [vmem:[%s7194_s15 + $0x28] sm:$0xff] }
 0x34b   :  { %v978_v41 = vsel %vm315_vm2, %v974_v36, %v971_v32  ;;  %1396 = vmatpush1.bf16.msra.mxu0 %v4913_v31  ;;  %1153 = vmatprep.mubr.bf16.mxu0 %v5551_v49  ;;  %v975_v50 = vsel %vm315_vm2, %v973_v45, %v974_v36  ;;  %v976_v51 = vsel %vm315_vm2, %v972_v33, %v973_v45  ;;  %v1565_v20 = vld [vmem:[%s7194_s15 + $0x38] sm:$0xff]  ;;  %v1580_v31 = vld [vmem:[%s7194_s15 + $0xb0] sm:$0xff]  ;;  %v1579_v33 = vld [vmem:[%s7194_s15 + $0xa8] sm:$0xff] }
 0x34c   :  { %v4342_v43 = vpack.c.bf16 %v977_v18, %v978_v41  ;;  %1397 = vmatprep.subr.bf16.mxu0 %v4921_v35  ;;  %v4346_v53 = vpack.c.bf16 %v975_v50, %v976_v51  ;;  %v988_v4 = vsel %vm336_vm3, %v984_v2, %v985_v63  ;;  %v989_v5 = vsel %vm336_vm3, %v983_v0, %v984_v2  ;;  %v1564_v32 = vld [vmem:[%s7194_s15 + $0x30] sm:$0xff]  ;;  %v1578_v35 = vld [vmem:[%s7194_s15 + $0xa0] sm:$0xff]  ;;  %v1561_v18 = vld [vmem:[%s7194_s15 + $0x18] sm:$0xff] }
 0x34d   :  { %v4366_v7 = vpack.c.bf16 %v988_v4, %v989_v5  ;;  %v987_v25 = vsel %vm336_vm3, %v985_v63, %v986_v9  ;;  %v990_v10 = vsel %vm336_vm3, %v986_v9, %v983_v0  ;;  %v1562_v36 = vld [vmem:[%s7194_s15 + $0x20] sm:$0xff]  ;;  %v1576_v41 = vld [vmem:[%s7194_s15 + $0x90] sm:$0xff]  ;;  %v6112_v63 = vsub.s32 1, %v5745_v1 }
 0x34e   :  { %4343 = vmatmul.mubr.msk.bf16.vlgmr.msra.gmra.mxu1 %vm5957_vm15, %v4342_v43  ;;  %v4370_v12 = vpack.c.bf16 %v990_v10, %v987_v25  ;;  %v1575_v43 = vld [vmem:[%s7194_s15 + $0x88] sm:$0xff]  ;;  %v1574_v45 = vld [vmem:[%s7194_s15 + $0x80] sm:$0xff] }
 0x34f   :  { %1286 = vmatprep.mubr.bf16.mxu1 %v5551_v49  ;;  %1398 = vmatpush1.bf16.msra.mxu0 %v4919_v42  ;;  %v1560_v42 = vld [vmem:[%s7194_s15 + $0x10] sm:$0xff] }
 0x350   :  { %1399 = vmatprep.subr.bf16.mxu0 %v4924_v44  ;;  %v1559_v44 = vld [vmem:[%s7194_s15 + $0x8] sm:$0xff] }
 0x352   :  { %1154 = vmatmul.mubr.bf16.gmra.mxu0 %v1014_v47 }
 0x353   :  { %1400 = vmatpush1.bf16.msra.mxu0 %v4922_v46  ;;  %1427 = vmatprep.mubr.bf16.mxu0 %v5551_v49  ;;  %v1558_v46 = vld [vmem:[%s7194_s15] sm:$0xff] }
 0x354   :  { %1401 = vmatprep.subr.bf16.mxu0 %v4927_v48 }
 0x356   :  { %4347 = vmatmul.mubr.msk.bf16.gmra.mxu1 %vm5977_vm1, %v4346_v53 }
 0x357   :  { %1402 = vmatpush1.bf16.msra.mxu0 %v4925_v24 }
 0x358   :  { %1403 = vmatprep.subr.bf16.mxu0 %v4930_v54 }
 0x35b   :  { %1404 = vmatpush1.bf16.msra.mxu0 %v4928_v55 }
 0x35c   :  { %1405 = vmatprep.subr.bf16.mxu0 %v4933_v57 }
 0x35f   :  { %1406 = vmatpush1.bf16.msra.mxu0 %v4931_v59 }
 0x360   :  { %1407 = vmatprep.subr.bf16.mxu0 %v4936_v60 }
 0x363   :  { %1408 = vmatpush1.bf16.msra.mxu0 %v4934_v61 }
 0x364   :  { %1409 = vmatprep.subr.bf16.mxu0 %v4939_v62  ;;  %v1456_v62 = vld [vmem:[#allocation16] sm:$0x3] }
 0x365   :  { %v1465_v25 = vrot.slane %v1456_v62, %v6112_v63 }
 0x367   :  { %1410 = vmatpush1.bf16.msra.mxu0 %v4937_v3 }
 0x36a   :  { %4367 = vmatmul.mubr.msk.bf16.vlgmr.msra.gmra.mxu0 %vm5993_vm5, %v4366_v7  ;;  %v1461_v7 = vrot.slane %v1456_v62, %v5930_v58 }
 0x36b   :  { %1437 = vmatprep.mubr.bf16.mxu0 %v5551_v49  ;;  %v1573_v49 = vld [vmem:[%s7194_s15 + $0x78] sm:$0xff] }
 0x36c   :  { %4669 = vmatpush3.msra.mxu1 %v1573_v49 }
 0x36d   :  { %4670 = vmatprep.subr.mxu1 %v1588_v14 }
 0x36e   :  { %4671 = vmatpush3.msra.mxu1 %v1572_v15 }
 0x36f   :  { %4672 = vmatprep.subr.mxu1 %v1587_v16 }
 0x370   :  { %4673 = vmatpush3.msra.mxu1 %v1571_v17 }
 0x371   :  { %4674 = vmatprep.subr.mxu1 %v1586_v19 }
 0x372   :  { %4371 = vmatmul.mubr.msk.bf16.gmra.mxu0 %vm6008_vm8, %v4370_v12  ;;  %4675 = vmatpush3.msra.mxu1 %v1570_v21 }
 0x373   :  { %1746 = vmatprep.mubr.f32.mxu0 %v7207_v40  ;;  %4676 = vmatprep.subr.mxu1 %v1585_v22 }
 0x374   :  { %4677 = vmatpush3.msra.mxu1 %v1569_v13 }
 0x375   :  { %4678 = vmatprep.subr.mxu1 %v1584_v23 }
 0x376   :  { %4679 = vmatpush3.msra.mxu1 %v1568_v8 }
 0x377   :  { %4680 = vmatprep.subr.mxu1 %v1583_v27 }
 0x378   :  { %4681 = vmatpush3.msra.mxu1 %v1567_v28 }
 0x379   :  { %4682 = vmatprep.subr.mxu1 %v1582_v29 }
 0x37a   :  { %4683 = vmatpush3.msra.mxu1 %v1566_v30 }
 0x37b   :  { %4684 = vmatprep.subr.mxu1 %v1581_v26 }
 0x37c   :  { %4685 = vmatpush3.msra.mxu1 %v1565_v20 }
 0x37d   :  { %4686 = vmatprep.subr.mxu1 %v1580_v31 }
 0x37e   :  { %4687 = vmatpush3.msra.mxu1 %v1564_v32 }
 0x37f   :  { %4688 = vmatprep.subr.mxu1 %v1579_v33 }
 0x380   :  { %4689 = vmatpush3.msra.mxu1 %v1563_v34 }
 0x381   :  { %4690 = vmatprep.subr.mxu1 %v1578_v35 }
 0x382   :  { %4691 = vmatpush3.msra.mxu1 %v1562_v36 }
 0x383   :  { %4692 = vmatprep.subr.mxu1 %v1577_v38 }
 0x384   :  { %4693 = vmatpush3.msra.mxu1 %v1561_v18 }
 0x385   :  { %4694 = vmatprep.subr.mxu1 %v1576_v41 }
 0x386   :  { %4695 = vmatpush3.msra.mxu1 %v1560_v42 }
 0x387   :  { %4696 = vmatprep.subr.mxu1 %v1575_v43 }
 0x388   :  { %4697 = vmatpush3.msra.mxu1 %v1559_v44 }
 0x389   :  { %4698 = vmatprep.subr.mxu1 %v1574_v45 }
 0x38a   :  { %4699 = vmatpush3.msra.mxu1 %v1558_v46 }
 0x40a   :  { %v1145_v47 = vpop.f32.mrf.mxu0 }
 0x40c   :  { %v1147_v48 = vpop.f32.mrf.mxu0 }
 0x40e   :  { %v1149_v50 = vpop.f32.mrf.mxu0  ;;  %v1278_v24 = vpop.f32.mrf.mxu1 }
 0x40f   :  { %v1279_v0 = vadd.f32 %v1278_v24, %v1145_v47 }
 0x410   :  { %v1151_v51 = vpop.f32.mrf.mxu0  ;;  %v1280_v54 = vpop.f32.mrf.mxu1 }
 0x411   :  { %v1281_v4 = vadd.f32 %v1280_v54, %v1147_v48 }
 0x412   :  { %v1155_v53 = vpop.f32.mrf.mxu0  ;;  %v1282_v57 = vpop.f32.mrf.mxu1 }
 0x413   :  { %v1283_v10 = vadd.f32 %v1282_v57, %v1149_v50 }
 0x414   :  { %v1157_v55 = vpop.f32.mrf.mxu0  ;;  %v1284_v60 = vpop.f32.mrf.mxu1 }
 0x415   :  { %v1285_v14 = vadd.f32 %v1284_v60, %v1151_v51 }
 0x416   :  { %v1159_v59 = vpop.f32.mrf.mxu0  ;;  %v1288_v2 = vpop.f32.mrf.mxu1 }
 0x417   :  { %v1289_v23 = vadd.f32 %v1288_v2, %v1155_v53 }
 0x418   :  { %v1161_v61 = vpop.f32.mrf.mxu0  ;;  %v1290_v12 = vpop.f32.mrf.mxu1 }
 0x419   :  { %v1291_v30 = vadd.f32 %v1290_v12, %v1157_v55 }
 0x41a   :  { %v1292_v21 = vpop.f32.mrf.mxu1 }
 0x41b   :  { %v1293_v38 = vadd.f32 %v1292_v21, %v1159_v59 }
 0x41c   :  { %v1294_v32 = vpop.f32.mrf.mxu1 }
 0x41d   :  { %v1295_v45 = vadd.f32 %v1294_v32, %v1161_v61 }
 0x42a   :  { %v1429_v3 = vpop.f32.mrf.mxu0 }
 0x42b   :  { %v1448_v5 = vadd.f32 %v1429_v3, %v1279_v0 }
 0x42c   :  { %v1431_v9 = vpop.f32.mrf.mxu0 }
 0x42d   :  { %v1449_v37 = vadd.f32 %v1431_v9, %v1281_v4  ;;  %v6116_v15 = vadd.f32 %v1461_v7, %v1448_v5 }
 0x42e   :  { %v1433_v49 = vpop.f32.mrf.mxu0 }
 0x42f   :  { %v1450_v16 = vadd.f32 %v1433_v49, %v1283_v10  ;;  %v6118_v17 = vadd.f32 %v1465_v25, %v1449_v37  ;;  %v1504_v27 = vmul.f32 %v6116_v15, %v6116_v15 }
 0x430   :  { %v1435_v19 = vpop.f32.mrf.mxu0 }
 0x431   :  { %v6120_v22 = vadd.f32 %v1461_v7, %v1450_v16  ;;  %v1451_v13 = vadd.f32 %v1435_v19, %v1285_v14  ;;  %v1505_v26 = vmul.f32 %v6118_v17, %v6118_v17 }
 0x432   :  { %v1439_v8 = vpop.f32.mrf.mxu0 }
 0x433   :  { %v1506_v28 = vmul.f32 %v6120_v22, %v6120_v22  ;;  %v6126_v29 = vadd.f32 %v1465_v25, %v1451_v13  ;;  %v1452_v20 = vadd.f32 %v1439_v8, %v1289_v23  ;;  %v1476_v33 = vadd.f32 %v6120_v22, %v6116_v15 }
 0x434   :  { %v1441_v31 = vpop.f32.mrf.mxu0 }
 0x435   :  { %v1512_v34 = vadd.f32 %v1506_v28, %v1504_v27  ;;  %v1483_v35 = vadd.f32 %v6126_v29, %v6118_v17  ;;  %v1507_v36 = vmul.f32 %v6126_v29, %v6126_v29  ;;  %v1453_v18 = vadd.f32 %v1441_v31, %v1291_v30 }
 0x436   :  { %v1443_v41 = vpop.f32.mrf.mxu0  ;;  %v6136_v46 = vadd.f32 %v1461_v7, %v1452_v20  ;;  %v1477_v50 = vrot.slane %v1476_v33, 4 }
 0x437   :  { %v1513_v42 = vrot.slane %v1512_v34, 4  ;;  %v1484_v43 = vrot.slane %v1483_v35, 4  ;;  %v1519_v44 = vadd.f32 %v1507_v36, %v1505_v26  ;;  %v1454_v47 = vadd.f32 %v1443_v41, %v1293_v38 }
 0x438   :  { %v1445_v48 = vpop.f32.mrf.mxu0  ;;  %v6138_v24 = vadd.f32 %v1465_v25, %v1453_v18  ;;  %v1508_v60 = vmul.f32 %v6136_v46, %v6136_v46  ;;  %v1478_v2 = vadd.f32 %v1477_v50, %v1476_v33 }
 0x439   :  { %v1520_v51 = vrot.slane %v1519_v44, 4  ;;  %v6140_v53 = vadd.f32 %v1461_v7, %v1454_v47  ;;  %v1455_v54 = vadd.f32 %v1445_v48, %v1295_v45  ;;  %v1514_v55 = vadd.f32 %v1513_v42, %v1512_v34 }
 0x43a   :  { %v1485_v57 = vadd.f32 %v1484_v43, %v1483_v35  ;;  %v1509_v3 = vmul.f32 %v6138_v24, %v6138_v24  ;;  %v1479_v19 = vrot.slane %v1478_v2, 2 }
 0x43b   :  { %v1521_v59 = vadd.f32 %v1520_v51, %v1519_v44  ;;  %v1490_v61 = vadd.f32 %v6140_v53, %v6136_v46  ;;  %v1510_v62 = vmul.f32 %v6140_v53, %v6140_v53  ;;  %v6148_v0 = vadd.f32 %v1465_v25, %v1455_v54 }
 0x43c   :  { %v1515_v10 = vrot.slane %v1514_v55, 2  ;;  %v1486_v12 = vrot.slane %v1485_v57, 2  ;;  %v1480_v33 = vadd.f32 %v1479_v19, %v1478_v2  ;;  %v4942_v19 = vld [vmem:[%s7197_s18 + $0xe4] ss:$16 sps:$4 sm:$0xff]  }
 0x43d   :  { %v1491_v4 = vrot.slane %v1490_v61, 4  ;;  %v1526_v5 = vadd.f32 %v1510_v62, %v1508_v60  ;;  %v1497_v7 = vadd.f32 %v6148_v0, %v6138_v24  ;;  %v1511_v9 = vmul.f32 %v6148_v0, %v6148_v0 }
 0x43e   :  { %v1522_v37 = vrot.slane %v1521_v59, 2  ;;  %v1516_v27 = vadd.f32 %v1515_v10, %v1514_v55  ;;  %v1487_v28 = vadd.f32 %v1486_v12, %v1485_v57  ;;  %v1481_v47 = vrot.slane %v1480_v33, 1  ;;  %v1677_v10 = vld [vmem:[#allocation19 + $0x30] sm:$0xff]  ;;  %v1676_v12 = vld [vmem:[#allocation19 + $0x28] sm:$0xff] }
 0x43f   :  { %v1492_v49 = vadd.f32 %v1491_v4, %v1490_v61  ;;  %v1527_v14 = vrot.slane %v1526_v5, 4  ;;  %v1498_v16 = vrot.slane %v1497_v7, 4  ;;  %v1533_v25 = vadd.f32 %v1511_v9, %v1509_v3  ;;  %v1678_v9 = vld [vmem:[#allocation19 + $0x38] sm:$0xff] }
 0x440   :  { %v1523_v30 = vadd.f32 %v1522_v37, %v1521_v59  ;;  %v1488_v18 = vrot.slane %v1487_v28, 1  ;;  %v1517_v41 = vrot.slane %v1516_v27, 1  ;;  %v1482_v61 = vadd.f32 %v1481_v47, %v1480_v33  ;;  %1706 = vmatprep.subr.mxu0 %v1678_v9  ;;  %v1675_v37 = vld [vmem:[#allocation19 + $0x20] sm:$0xff]  ;;  %v4973_v33 = vld [vmem:[%s7197_s18 + $0x48] ss:$16 sps:$4 sm:$0xff]  }
 0x441   :  { %v1493_v21 = vrot.slane %v1492_v49, 2  ;;  %v1528_v13 = vadd.f32 %v1527_v14, %v1526_v5  ;;  %v1499_v23 = vadd.f32 %v1498_v16, %v1497_v7  ;;  %v1534_v8 = vrot.slane %v1533_v25, 4  ;;  %1707 = vmatpush1.msra.mxu0 %v1677_v10  ;;  %v1673_v14 = vld [vmem:[#allocation19 + $0x10] sm:$0xff]  ;;  %v1672_v16 = vld [vmem:[#allocation19 + $0x8] sm:$0xff] }
 0x442   :  { %v1524_v43 = vrot.slane %v1523_v30, 1  ;;  %v1518_v55 = vadd.f32 %v1517_v41, %v1516_v27  ;;  %v1489_v57 = vadd.f32 %v1488_v18, %v1487_v28  ;;  %1708 = vmatprep.subr.mxu0 %v1676_v12  ;;  %v4957_v27 = vld [vmem:[%s7197_s18 + $0xac] ss:$16 sps:$4 sm:$0xff]   ;;  %v4955_v28 = vld [vmem:[%s7197_s18 + $0xa8] ss:$16 sps:$4 sm:$0xff]  }
 0x443   :  { %v1494_v26 = vadd.f32 %v1493_v21, %v1492_v49  ;;  %v1529_v20 = vrot.slane %v1528_v13, 2  ;;  %v1500_v31 = vrot.slane %v1499_v23, 2  ;;  %v1535_v32 = vadd.f32 %v1534_v8, %v1533_v25  ;;  %1709 = vmatpush1.msra.mxu0 %v1675_v37  ;;  %v1674_v49 = vld [vmem:[#allocation19 + $0x18] sm:$0xff]  ;;  %v1671_v25 = vld [vmem:[#allocation19] sm:$0xff] }
 0x444   :  { %v1525_v59 = vadd.f32 %v1524_v43, %v1523_v30  ;;  %1710 = vmatprep.subr.mxu0 %v1674_v49  ;;  %v4943_v21 = vld [vmem:[%s7197_s18 + $0xe8] ss:$16 sps:$4 sm:$0xff]   ;;  %v4963_v30 = vld [vmem:[%s7197_s18 + $0x8c] ss:$16 sps:$4 sm:$0xff]   ;;  %v4960_v9 = vld [vmem:[%s7197_s18 + $0x84] ss:$16 sps:$4 sm:$0xff]  }
 0x445   :  { %v1530_v34 = vadd.f32 %v1529_v20, %v1528_v13  ;;  %v1501_v35 = vadd.f32 %v1500_v31, %v1499_v23  ;;  %v1536_v36 = vrot.slane %v1535_v32, 2  ;;  %v1495_v38 = vrot.slane %v1494_v26, 1  ;;  %1711 = vmatpush1.msra.mxu0 %v1673_v14  ;;  %v4945_v13 = vld [vmem:[%s7197_s18 + $0xec] ss:$16 sps:$4 sm:$0xff]   ;;  %v4949_v8 = vld [vmem:[%s7197_s18 + $0xc8] ss:$16 sps:$4 sm:$0xff]  }
 0x446   :  { %1712 = vmatprep.subr.mxu0 %v1672_v16  ;;  %v4951_v23 = vld [vmem:[%s7197_s18 + $0xcc] ss:$16 sps:$4 sm:$0xff]   ;;  %2441 = vmatprep.subr.bf16.mxu1 %v4945_v13  ;;  %v4967_v31 = vld [vmem:[%s7197_s18 + $0x68] ss:$16 sps:$4 sm:$0xff]   ;;  %v4958_v10 = vld [vmem:[%s7197_s18 + $0x80] ss:$16 sps:$4 sm:$0xff]  }
 0x447   :  { %v1502_v42 = vrot.slane %v1501_v35, 1  ;;  %v1537_v44 = vadd.f32 %v1536_v36, %v1535_v32  ;;  %v1531_v45 = vrot.slane %v1530_v34, 1  ;;  %v1496_v54 = vadd.f32 %v1495_v38, %v1494_v26  ;;  %1713 = vmatpush1.msra.mxu0 %v1671_v25  ;;  %v4961_v26 = vld [vmem:[%s7197_s18 + $0x88] ss:$16 sps:$4 sm:$0xff]   ;;  %v4969_v20 = vld [vmem:[%s7197_s18 + $0x6c] ss:$16 sps:$4 sm:$0xff]  }
 0x448   :  { %2388 = vmatprep.subr.bf16.mxu0 %v4942_v19  ;;  %v4975_v32 = vld [vmem:[%s7197_s18 + $0x4c] ss:$16 sps:$4 sm:$0xff]   ;;  %v4985_v38 = vld [vmem:[%s7197_s18 + $0x8] ss:$16 sps:$4 sm:$0xff]   ;;  %v4966_v12 = vld [vmem:[%s7197_s18 + $0x64] ss:$16 sps:$4 sm:$0xff]  }
 0x449   :  { %v1503_v48 = vadd.f32 %v1502_v42, %v1501_v35  ;;  %v1538_v50 = vrot.slane %v1537_v44, 1  ;;  %v1532_v51 = vadd.f32 %v1531_v45, %v1530_v34  ;;  %v1544_v5 = vsel %vm707_vm9, %v1496_v54, %v1482_v61  ;;  %v4981_v34 = vld [vmem:[%s7197_s18 + $0x2c] ss:$16 sps:$4 sm:$0xff]   ;;  %v4979_v35 = vld [vmem:[%s7197_s18 + $0x28] ss:$16 sps:$4 sm:$0xff]  }
 0x44a   :  { %v4987_v36 = vld [vmem:[%s7197_s18 + $0xc] ss:$16 sps:$4 sm:$0xff]   ;;  %v4991_v41 = vld [vmem:[%s7197_s18 + $0x1e8] ss:$16 sps:$4 sm:$0xff]   ;;  %v4940_v61 = vld [vmem:[%s7197_s18 + $0xe0] ss:$16 sps:$4 sm:$0xff]  }
 0x44b   :  { %v1539_v60 = vadd.f32 %v1538_v50, %v1537_v44  ;;  %v1552_v62 = vsel %vm712_vm10, %v1532_v51, %v1518_v55  ;;  %v1545_v2 = vsel %vm707_vm9, %v1503_v48, %v1489_v57  ;;  %v4993_v18 = vld [vmem:[%s7197_s18 + $0x1ec] ss:$16 sps:$4 sm:$0xff]   ;;  %v4997_v43 = vld [vmem:[%s7197_s18 + $0x1c8] ss:$16 sps:$4 sm:$0xff]   ;;  %v4964_v37 = vld [vmem:[%s7197_s18 + $0x60] ss:$16 sps:$4 sm:$0xff]  }
 0x44c   :  { %v1556_v7 = vsel %vm715_vm11, %v1544_v5, %v1552_v62  ;;  %v4999_v42 = vld [vmem:[%s7197_s18 + $0x1cc] ss:$16 sps:$4 sm:$0xff]   ;;  %v5003_v45 = vld [vmem:[%s7197_s18 + $0x1a8] ss:$16 sps:$4 sm:$0xff]   ;;  %v4954_v5 = vld [vmem:[%s7197_s18 + $0xa4] ss:$16 sps:$4 sm:$0xff]  }
 0x44d   :  { %v1553_v3 = vsel %vm712_vm10, %v1539_v60, %v1525_v59  ;;  %v5005_v44 = vld [vmem:[%s7197_s18 + $0x1ac] ss:$16 sps:$4 sm:$0xff]   ;;  %v4972_v49 = vld [vmem:[%s7197_s18 + $0x44] ss:$16 sps:$4 sm:$0xff]   ;;  %v4970_v14 = vld [vmem:[%s7197_s18 + $0x40] ss:$16 sps:$4 sm:$0xff]  }
 0x44e   :  { %v1557_v4 = vsel %vm715_vm11, %v1545_v2, %v1553_v3  ;;  %v4948_v2 = vld [vmem:[%s7197_s18 + $0xc4] ss:$16 sps:$4 sm:$0xff]   ;;  %v4976_v25 = vld [vmem:[%s7197_s18 + $0x20] ss:$16 sps:$4 sm:$0xff]  }
 0x44f   :  { %1654 = vmatprep.mubr.f32.mxu1 %v1557_v4  ;;  %v4946_v4 = vld [vmem:[%s7197_s18 + $0xc0] ss:$16 sps:$4 sm:$0xff]   ;;  %v4978_v16 = vld [vmem:[%s7197_s18 + $0x24] ss:$16 sps:$4 sm:$0xff]  }
 0x450   :  { %1655 = vmatmul.mubr.f32.vlgmr.msra.gmra.mxu1 %v1556_v7  ;;  %v4952_v7 = vld [vmem:[%s7197_s18 + $0xa0] ss:$16 sps:$4 sm:$0xff]   ;;  %v4984_v19 = vld [vmem:[%s7197_s18 + $0x4] ss:$16 sps:$4 sm:$0xff]  }
 0x451   :  { %2442 = vmatpush1.bf16.msra.mxu1 %v4943_v21  ;;  %v4982_v21 = vld [vmem:[%s7197_s18] ss:$16 sps:$4 sm:$0xff]   ;;  %v4990_v13 = vld [vmem:[%s7197_s18 + $0x1e4] ss:$16 sps:$4 sm:$0xff]  }
 0x452   :  { %2443 = vmatprep.subr.bf16.mxu1 %v4951_v23  ;;  %v4988_v23 = vld [vmem:[%s7197_s18 + $0x1e0] ss:$16 sps:$4 sm:$0xff]  }
 0x455   :  { %2444 = vmatpush1.bf16.msra.mxu1 %v4949_v8  ;;  %v4996_v8 = vld [vmem:[%s7197_s18 + $0x1c4] ss:$16 sps:$4 sm:$0xff]  }
 0x456   :  { %2445 = vmatprep.subr.bf16.mxu1 %v4957_v27  ;;  %v4994_v27 = vld [vmem:[%s7197_s18 + $0x1c0] ss:$16 sps:$4 sm:$0xff]  }
 0x459   :  { %2446 = vmatpush1.bf16.msra.mxu1 %v4955_v28  ;;  %v5002_v28 = vld [vmem:[%s7197_s18 + $0x1a4] ss:$16 sps:$4 sm:$0xff]  }
 0x45a   :  { %2447 = vmatprep.subr.bf16.mxu1 %v4963_v30  ;;  %v5000_v30 = vld [vmem:[%s7197_s18 + $0x1a0] ss:$16 sps:$4 sm:$0xff]  }
 0x45d   :  { %2448 = vmatpush1.bf16.msra.mxu1 %v4961_v26  ;;  %v5008_v26 = vld [vmem:[%s7197_s18 + $0x184] ss:$16 sps:$4 sm:$0xff]  }
 0x45e   :  { %2449 = vmatprep.subr.bf16.mxu1 %v4969_v20  ;;  %v5011_v20 = vld [vmem:[%s7197_s18 + $0x18c] ss:$16 sps:$4 sm:$0xff]  }
 0x461   :  { %2450 = vmatpush1.bf16.msra.mxu1 %v4967_v31  ;;  %v5006_v31 = vld [vmem:[%s7197_s18 + $0x180] ss:$16 sps:$4 sm:$0xff]  }
 0x462   :  { %2451 = vmatprep.subr.bf16.mxu1 %v4975_v32  ;;  %v5009_v32 = vld [vmem:[%s7197_s18 + $0x188] ss:$16 sps:$4 sm:$0xff]  }
 0x465   :  { %2452 = vmatpush1.bf16.msra.mxu1 %v4973_v33  ;;  %v5014_v33 = vld [vmem:[%s7197_s18 + $0x164] ss:$16 sps:$4 sm:$0xff]  }
 0x466   :  { %2453 = vmatprep.subr.bf16.mxu1 %v4981_v34  ;;  %v5017_v34 = vld [vmem:[%s7197_s18 + $0x16c] ss:$16 sps:$4 sm:$0xff]  }
 0x469   :  { %2454 = vmatpush1.bf16.msra.mxu1 %v4979_v35  ;;  %v5012_v35 = vld [vmem:[%s7197_s18 + $0x160] ss:$16 sps:$4 sm:$0xff]  }
 0x46a   :  { %2455 = vmatprep.subr.bf16.mxu1 %v4987_v36  ;;  %v5015_v36 = vld [vmem:[%s7197_s18 + $0x168] ss:$16 sps:$4 sm:$0xff]  }
 0x46d   :  { %2456 = vmatpush1.bf16.msra.mxu1 %v4985_v38  ;;  %v5020_v38 = vld [vmem:[%s7197_s18 + $0x144] ss:$16 sps:$4 sm:$0xff]  }
 0x46e   :  { %2457 = vmatprep.subr.bf16.mxu1 %v4993_v18  ;;  %v5023_v18 = vld [vmem:[%s7197_s18 + $0x14c] ss:$16 sps:$4 sm:$0xff]  }
 0x471   :  { %2458 = vmatpush2.bf16.msra.mxu1 %v4991_v41  ;;  %v5018_v41 = vld [vmem:[%s7197_s18 + $0x140] ss:$16 sps:$4 sm:$0xff]  }
 0x472   :  { %2459 = vmatprep.subr.bf16.mxu1 %v4999_v42  ;;  %v5021_v42 = vld [vmem:[%s7197_s18 + $0x148] ss:$16 sps:$4 sm:$0xff]  }
 0x475   :  { %2460 = vmatpush2.bf16.msra.mxu1 %v4997_v43  ;;  %v5024_v43 = vld [vmem:[%s7197_s18 + $0x120] ss:$16 sps:$4 sm:$0xff]  }
 0x476   :  { %2461 = vmatprep.subr.bf16.mxu1 %v5005_v44  ;;  %v5026_v44 = vld [vmem:[%s7197_s18 + $0x124] ss:$16 sps:$4 sm:$0xff]  }
 0x479   :  { %2462 = vmatpush2.bf16.msra.mxu1 %v5003_v45  ;;  %v5027_v45 = vld [vmem:[%s7197_s18 + $0x128] ss:$16 sps:$4 sm:$0xff]  }
 0x47a   :  { %2463 = vmatprep.subr.bf16.mxu1 %v5011_v20 }
 0x47d   :  { %2464 = vmatpush2.bf16.msra.mxu1 %v5009_v32 }
 0x47e   :  { %2465 = vmatprep.subr.bf16.mxu1 %v5017_v34 }
 0x481   :  { %2466 = vmatpush2.bf16.msra.mxu1 %v5015_v36 }
 0x482   :  { %2467 = vmatprep.subr.bf16.mxu1 %v5023_v18 }
 0x485   :  { %2468 = vmatpush2.bf16.msra.mxu1 %v5021_v42 }
 0x510   :  { %v4700_v47 = vpop.f32.mrf.mxu1 }
 0x512   :  { %v4701_v48 = vpop.f32.mrf.mxu1 }
 0x513   :  { %v4702_v50 = vadd.f32 %v4701_v48, %v4700_v47  ;;  %v5029_v47 = vld [vmem:[%s7197_s18 + $0x12c] ss:$16 sps:$4 sm:$0xff]   ;;  %v5032_v48 = vld [vmem:[%s7197_s18 + $0x104] ss:$16 sps:$4 sm:$0xff]  }
 0x514   :  { %2469 = vmatprep.subr.bf16.mxu1 %v5029_v47 }
 0x515   :  { %v1661_v51 = vmul.f32 0.0078125, %v4702_v50  ;;  %v5035_v50 = vld [vmem:[%s7197_s18 + $0x10c] ss:$16 sps:$4 sm:$0xff]   ;;  %2470 = vmatpush2.bf16.msra.mxu1 %v5027_v45 }
 0x516   :  { %2471 = vmatprep.subr.bf16.mxu1 %v5035_v50 }
 0x517   :  { %v1662_v54 = vmul.f32 %v1661_v51, %v1661_v51 }
 0x519   :  { %v1664_v55 = vrot.slane %v1662_v54, 6  ;;  %v5033_v54 = vld [vmem:[%s7197_s18 + $0x108] ss:$16 sps:$4 sm:$0xff]  }
 0x51a   :  { %2472 = vmatpush2.bf16.msra.mxu1 %v5033_v54 }
 0x51b   :  { %v1666_v57 = vsub.f32 %v1661_v51, %v1664_v55  ;;  %v5038_v55 = vld [vmem:[%s7196_s17 + $0xe4] ss:$16 sps:$4 sm:$0xff]  }
 0x51d   :  { %v1667_v59 = vmax.f32 %v1666_v57, 0.0  ;;  %v5041_v57 = vld [vmem:[%s7196_s17 + $0xec] ss:$16 sps:$4 sm:$0xff]  }
 0x51e   :  { %2867 = vmatprep.subr.bf16.mxu1 %v5041_v57 }
 0x51f   :  { %v1668_v60 = vadd.f32 1e-05, %v1667_v59 }
 0x521   :  { %5230 = vrsqrt.f32 %v1668_v60 }
 0x52e   :  { %v5231_v62 = vpop.eup %5230 }
 0x52f   :  { %v1670_v3 = vsel %vm715_vm11, %v1661_v51, %v5231_v62  ;;  %v5030_v51 = vld [vmem:[%s7197_s18 + $0x100] ss:$16 sps:$4 sm:$0xff]  }
 0x530   :  { %4372 = vmatmul.mubr.msk.f32.vlgmr.msra.gmra.mxu0 %vm818_vm12, %v1670_v3 }
 0x531   :  { %2389 = vmatpush1.bf16.msra.mxu0 %v4940_v61 }
 0x532   :  { %2390 = vmatprep.subr.bf16.mxu0 %v4948_v2 }
 0x535   :  { %2391 = vmatpush1.bf16.msra.mxu0 %v4946_v4  ;;  %v1836_v4 = vld [vmem:[#allocation17] sm:$0x3] }
 0x536   :  { %2392 = vmatprep.subr.bf16.mxu0 %v4954_v5  ;;  %v1856_v5 = vld [vmem:[%s7193_s14] sm:$0x3] }
 0x539   :  { %2393 = vmatpush1.bf16.msra.mxu0 %v4952_v7 }
 0x53a   :  { %2394 = vmatprep.subr.bf16.mxu0 %v4960_v9 }
 0x53d   :  { %2395 = vmatpush1.bf16.msra.mxu0 %v4958_v10 }
 0x53e   :  { %2396 = vmatprep.subr.bf16.mxu0 %v4966_v12 }
 0x541   :  { %2397 = vmatpush1.bf16.msra.mxu0 %v4964_v37  ;;  %v1841_v37 = vrot.slane %v1836_v4, %v5930_v58 }
 0x542   :  { %2398 = vmatprep.subr.bf16.mxu0 %v4972_v49  ;;  %v1845_v49 = vrot.slane %v1836_v4, %v6112_v63 }
 0x545   :  { %2399 = vmatpush1.bf16.msra.mxu0 %v4970_v14  ;;  %v1861_v14 = vrot.slane %v1856_v5, %v5930_v58 }
 0x546   :  { %2400 = vmatprep.subr.bf16.mxu0 %v4978_v16 }
 0x549   :  { %2401 = vmatpush1.bf16.msra.mxu0 %v4976_v25 }
 0x54a   :  { %2402 = vmatprep.subr.bf16.mxu0 %v4984_v19 }
 0x54d   :  { %2403 = vmatpush1.bf16.msra.mxu0 %v4982_v21 }
 0x54e   :  { %2404 = vmatprep.subr.bf16.mxu0 %v4990_v13 }
 0x551   :  { %2405 = vmatpush2.bf16.msra.mxu0 %v4988_v23 }
 0x552   :  { %2406 = vmatprep.subr.bf16.mxu0 %v4996_v8 }
 0x555   :  { %2407 = vmatpush2.bf16.msra.mxu0 %v4994_v27 }
 0x556   :  { %2408 = vmatprep.subr.bf16.mxu0 %v5002_v28 }
 0x559   :  { %2409 = vmatpush2.bf16.msra.mxu0 %v5000_v30 }
 0x55a   :  { %2410 = vmatprep.subr.bf16.mxu0 %v5008_v26 }
 0x55d   :  { %2411 = vmatpush2.bf16.msra.mxu0 %v5006_v31 }
 0x55e   :  { %2412 = vmatprep.subr.bf16.mxu0 %v5014_v33 }
 0x561   :  { %2413 = vmatpush2.bf16.msra.mxu0 %v5012_v35 }
 0x562   :  { %2414 = vmatprep.subr.bf16.mxu0 %v5020_v38 }
 0x565   :  { %2415 = vmatpush2.bf16.msra.mxu0 %v5018_v41 }
 0x566   :  { %2416 = vmatprep.subr.bf16.mxu0 %v5026_v44 }
 0x569   :  { %2417 = vmatpush2.bf16.msra.mxu0 %v5024_v43 }
 0x56a   :  { %2418 = vmatprep.subr.bf16.mxu0 %v5032_v48 }
 0x56d   :  { %2419 = vmatpush2.bf16.msra.mxu0 %v5030_v51 }
 0x56e   :  { %2814 = vmatprep.subr.bf16.mxu0 %v5038_v55 }
 0x5f0   :  { %v1748_v59 = vpop.f32.mrf.mxu0 }
 0x5f2   :  { %v1750_v60 = vpop.f32.mrf.mxu0 }
 0x5f3   :  { %v1755_v61 = vcombine.low %v1748_v59, %v1750_v60 }
 0x5f5   :  { %v1762_v62 = vrot.slane %v1755_v61, %v5927_v56 }
 0x5f7   :  { %v1763_v2 = vcombine.high %v1762_v62, %v1762_v62  ;;  %v1770_v3 = vrot.slane %v1762_v62, %v5927_v56 }
 0x5f9   :  { %v1777_v7 = vrot.slane %v1763_v2, %v5927_v56  ;;  %v1781_v9 = vrot.slane %v1770_v3, %v5930_v58  ;;  %v1785_v10 = vrot.slane %v1770_v3, %v6112_v63  ;;  %v1806_v12 = vcombine.high %v1770_v3, %v1770_v3 }
 0x5fb   :  { %v1789_v16 = vrot.slane %v1777_v7, %v5930_v58  ;;  %v1793_v25 = vrot.slane %v1777_v7, %v6112_v63  ;;  %v1798_v19 = vsub.f32 %v6116_v15, %v1781_v9  ;;  %v1799_v21 = vsub.f32 %v6118_v17, %v1785_v10 }
 0x5fc   :  { %v1800_v13 = vsub.f32 %v6120_v22, %v1781_v9  ;;  %v1801_v23 = vsub.f32 %v6126_v29, %v1785_v10  ;;  %v1807_v8 = vcombine.high %v1777_v7, %v1777_v7  ;;  %v1811_v27 = vrot.slane %v1806_v12, %v5930_v58  ;;  %v5039_v7 = vld [vmem:[%s7196_s17 + $0xe8] ss:$16 sps:$4 sm:$0xff]  }
 0x5fd   :  { %v1802_v28 = vsub.f32 %v6136_v46, %v1789_v16  ;;  %v1803_v30 = vsub.f32 %v6138_v24, %v1793_v25  ;;  %v1804_v26 = vsub.f32 %v6140_v53, %v1789_v16  ;;  %v1805_v20 = vsub.f32 %v6148_v0, %v1793_v25 }
 0x5fe   :  { %v1815_v31 = vrot.slane %v1806_v12, %v6112_v63  ;;  %v1819_v15 = vrot.slane %v1807_v8, %v5930_v58  ;;  %v1823_v17 = vrot.slane %v1807_v8, %v6112_v63  ;;  %v1828_v22 = vmul.f32 %v1811_v27, %v1798_v19  ;;  %v5042_v19 = vld [vmem:[%s7196_s17 + $0xc0] ss:$16 sps:$4 sm:$0xff]  }
 0x5ff   :  { %v1830_v32 = vmul.f32 %v1811_v27, %v1800_v13  ;;  %v1865_v29 = vrot.slane %v1856_v5, %v6112_v63  ;;  %v5036_v5 = vld [vmem:[%s7196_s17 + $0xe0] ss:$16 sps:$4 sm:$0xff]   ;;  %v5045_v13 = vld [vmem:[%s7196_s17 + $0xc8] ss:$16 sps:$4 sm:$0xff]  }
 0x600   :  { %v1829_v33 = vmul.f32 %v1815_v31, %v1799_v21  ;;  %v1831_v34 = vmul.f32 %v1815_v31, %v1801_v23  ;;  %v1848_v35 = vmul.f32 %v1841_v37, %v1828_v22  ;;  %v1833_v46 = vmul.f32 %v1823_v17, %v1803_v30  ;;  %v5050_v30 = vld [vmem:[%s7196_s17 + $0xa4] ss:$16 sps:$4 sm:$0xff]  }
 0x601   :  { %v1850_v36 = vmul.f32 %v1841_v37, %v1830_v32  ;;  %v1835_v24 = vmul.f32 %v1823_v17, %v1805_v20  ;;  %v1832_v38 = vmul.f32 %v1819_v15, %v1802_v28  ;;  %v1834_v53 = vmul.f32 %v1819_v15, %v1804_v26  ;;  %v5053_v26 = vld [vmem:[%s7196_s17 + $0xac] ss:$16 sps:$4 sm:$0xff]  }
 0x602   :  { %v1849_v18 = vmul.f32 %v1845_v49, %v1829_v33  ;;  %v1851_v0 = vmul.f32 %v1845_v49, %v1831_v34  ;;  %v1868_v41 = vadd.f32 %v1861_v14, %v1848_v35  ;;  %v1853_v42 = vmul.f32 %v1845_v49, %v1833_v46  ;;  %v5048_v33 = vld [vmem:[%s7196_s17 + $0xa0] ss:$16 sps:$4 sm:$0xff]   ;;  %v5051_v34 = vld [vmem:[%s7196_s17 + $0xa8] ss:$16 sps:$4 sm:$0xff]  }
 0x603   :  { %v1870_v43 = vadd.f32 %v1861_v14, %v1850_v36  ;;  %v1855_v44 = vmul.f32 %v1845_v49, %v1835_v24  ;;  %v1852_v45 = vmul.f32 %v1841_v37, %v1832_v38  ;;  %v1854_v47 = vmul.f32 %v1841_v37, %v1834_v53  ;;  %v5044_v49 = vld [vmem:[%s7196_s17 + $0xc4] ss:$16 sps:$4 sm:$0xff]  }
 0x604   :  { %v1869_v48 = vadd.f32 %v1865_v29, %v1849_v18  ;;  %v1871_v50 = vadd.f32 %v1865_v29, %v1851_v0  ;;  %v6388_v51 = vmax.f32 %v1868_v41, 0.0  ;;  %v1873_v54 = vadd.f32 %v1865_v29, %v1853_v42  ;;  %v5056_v41 = vld [vmem:[%s7196_s17 + $0x84] ss:$16 sps:$4 sm:$0xff]   ;;  %v5059_v42 = vld [vmem:[%s7196_s17 + $0x8c] ss:$16 sps:$4 sm:$0xff]  }
 0x605   :  { %v6390_v55 = vmax.f32 %v1870_v43, 0.0  ;;  %v1875_v57 = vadd.f32 %v1865_v29, %v1855_v44  ;;  %v1872_v59 = vadd.f32 %v1861_v14, %v1852_v45  ;;  %v1874_v3 = vadd.f32 %v1861_v14, %v1854_v47  ;;  %v5047_v14 = vld [vmem:[%s7196_s17 + $0xcc] ss:$16 sps:$4 sm:$0xff]  }
 0x606   :  { %v1877_v60 = vmax.f32 %v1869_v48, 0.0  ;;  %v6392_v61 = vmax.f32 %v1871_v50, 0.0  ;;  %v6396_v2 = vmax.f32 %v1873_v54, 0.0  ;;  %v1908_v25 = vrot.slane %v6388_v51, 1  ;;  %v5054_v50 = vld [vmem:[%s7196_s17 + $0x80] ss:$16 sps:$4 sm:$0xff]  }
 0x607   :  { %v2000_v62 = vpack.c.bf16 %v6390_v55, %v6388_v51  ;;  %v6405_v9 = vmax.f32 %v1875_v57, 0.0  ;;  %v6407_v10 = vmax.f32 %v1872_v59, 0.0  ;;  %v1910_v12 = vrot.slane %v6390_v55, 1  ;;  %v5057_v54 = vld [vmem:[%s7196_s17 + $0x88] ss:$16 sps:$4 sm:$0xff]  }
 0x608   :  { %v2001_v4 = vpack.c.bf16 %v6392_v61, %v1877_v60  ;;  %v6423_v21 = vmax.f32 %v1874_v3, 0.0  ;;  %v1909_v27 = vrot.slane %v1877_v60, 1  ;;  %v1911_v28 = vrot.slane %v6392_v61, 1  ;;  %v5062_v57 = vld [vmem:[%s7196_s17 + $0x64] ss:$16 sps:$4 sm:$0xff]  }
 0x609   :  { %v2003_v37 = vpack.c.bf16 %v6405_v9, %v6396_v2  ;;  %v1912_v16 = vrot.slane %v6407_v10, 1  ;;  %v1891_v8 = vrot.slane %v6405_v9, 7  ;;  %v1913_v20 = vrot.slane %v6396_v2, 1  ;;  %v5065_v59 = vld [vmem:[%s7196_s17 + $0x6c] ss:$16 sps:$4 sm:$0xff]  }
 0x60a   :  { %2420 = vmatprep.mubr.bf16.mxu0 %v2001_v4  ;;  %2473 = vmatprep.mubr.bf16.mxu1 %v2001_v4  ;;  %v1885_v31 = vrot.slane %v1877_v60, 7  ;;  %v1887_v15 = vrot.slane %v6392_v61, 7  ;;  %v1915_v17 = vrot.slane %v6405_v9, 1  ;;  %v1921_v32 = vsel %vm336_vm3, %v1909_v27, %v1911_v28  ;;  %v5060_v60 = vld [vmem:[%s7196_s17 + $0x60] ss:$16 sps:$4 sm:$0xff]  }
 0x60b   :  { %2421 = vmatmul.mubr.bf16.vlgmr.msra.gmra.mxu0 %v2000_v62  ;;  %2474 = vmatmul.mubr.bf16.vlgmr.msra.gmra.mxu1 %v2000_v62  ;;  %v1918_v23 = vsel %vm336_vm3, %v1910_v12, %v1912_v16  ;;  %v1919_v22 = vsel %vm336_vm3, %v1911_v28, %v1913_v20  ;;  %v1920_v29 = vsel %vm336_vm3, %v1908_v25, %v1910_v12  ;;  %v1914_v24 = vrot.slane %v6423_v21, 1  ;;  %v5063_v62 = vld [vmem:[%s7196_s17 + $0x68] ss:$16 sps:$4 sm:$0xff]   ;;  %v5068_v3 = vld [vmem:[%s7196_s17 + $0x44] ss:$16 sps:$4 sm:$0xff]  }
 0x60c   :  { %2815 = vmatpush1.bf16.msra.mxu0 %v5036_v5  ;;  %2868 = vmatpush1.bf16.msra.mxu1 %v5039_v7  ;;  %v1899_v35 = vsel %vm315_vm2, %v1891_v8, %v1885_v31  ;;  %v6457_v46 = vpack.c.bf16 %v1919_v22, %v1921_v32  ;;  %v6459_v36 = vpack.c.bf16 %v1918_v23, %v1920_v29  ;;  %v5071_v4 = vld [vmem:[%s7196_s17 + $0x4c] ss:$16 sps:$4 sm:$0xff]   ;;  %v5066_v5 = vld [vmem:[%s7196_s17 + $0x40] ss:$16 sps:$4 sm:$0xff]   ;;  %v5069_v7 = vld [vmem:[%s7196_s17 + $0x48] ss:$16 sps:$4 sm:$0xff]  }
 0x60d   :  { %2430 = vmatprep.mubr.bf16.mxu0 %v2003_v37  ;;  %2483 = vmatprep.mubr.bf16.mxu1 %v2003_v37  ;;  %v2002_v38 = vpack.c.bf16 %v6423_v21, %v6407_v10  ;;  %v1917_v53 = vsel %vm336_vm3, %v1913_v20, %v1915_v17  ;;  %v1923_v18 = vsel %vm336_vm3, %v1915_v17, %v1909_v27  ;;  %v5074_v12 = vld [vmem:[%s7196_s17 + $0x24] ss:$16 sps:$4 sm:$0xff]   ;;  %v5077_v37 = vld [vmem:[%s7196_s17 + $0x2c] ss:$16 sps:$4 sm:$0xff]   ;;  %v5084_v28 = vld [vmem:[%s7196_s17 + $0x1e0] ss:$16 sps:$4 sm:$0xff]  }
 0x60e   :  { %2816 = vmatprep.subr.bf16.mxu0 %v5044_v49  ;;  %2869 = vmatprep.subr.bf16.mxu1 %v5047_v14  ;;  %v1897_v0 = vsel %vm315_vm2, %v1885_v31, %v1887_v15  ;;  %v6478_v43 = vpack.c.bf16 %v1923_v18, %v1917_v53  ;;  %v1916_v44 = vsel %vm336_vm3, %v1912_v16, %v1914_v24  ;;  %v5072_v49 = vld [vmem:[%s7196_s17 + $0x20] ss:$16 sps:$4 sm:$0xff]   ;;  %v5075_v14 = vld [vmem:[%s7196_s17 + $0x28] ss:$16 sps:$4 sm:$0xff]   ;;  %v5080_v16 = vld [vmem:[%s7196_s17 + $0x4] ss:$16 sps:$4 sm:$0xff]  }
 0x60f   :  { %v1922_v45 = vsel %vm336_vm3, %v1914_v24, %v1908_v25  ;;  %v4503_v47 = vpack.c.bf16 %v1897_v0, %v1899_v35  ;;  %v5083_v25 = vld [vmem:[%s7196_s17 + $0xc] ss:$16 sps:$4 sm:$0xff]   ;;  %v5086_v23 = vld [vmem:[%s7196_s17 + $0x1e4] ss:$16 sps:$4 sm:$0xff]   ;;  %v5090_v31 = vld [vmem:[%s7196_s17 + $0x1c0] ss:$16 sps:$4 sm:$0xff]  }
 0x610   :  { %2817 = vmatpush1.bf16.msra.mxu0 %v5042_v19  ;;  %2870 = vmatpush1.bf16.msra.mxu1 %v5045_v13  ;;  %v6484_v48 = vpack.c.bf16 %v1922_v45, %v1916_v44  ;;  %v5078_v19 = vld [vmem:[%s7196_s17] ss:$16 sps:$4 sm:$0xff]   ;;  %v5081_v13 = vld [vmem:[%s7196_s17 + $0x8] ss:$16 sps:$4 sm:$0xff]   ;;  %v5089_v27 = vld [vmem:[%s7196_s17 + $0x1ec] ss:$16 sps:$4 sm:$0xff]  }
 0x611   :  { %2818 = vmatprep.subr.bf16.mxu0 %v5050_v30  ;;  %2871 = vmatprep.subr.bf16.mxu1 %v5053_v26  ;;  %v5087_v30 = vld [vmem:[%s7196_s17 + $0x1e8] ss:$16 sps:$4 sm:$0xff]   ;;  %v5092_v26 = vld [vmem:[%s7196_s17 + $0x1c4] ss:$16 sps:$4 sm:$0xff]   ;;  %v5095_v20 = vld [vmem:[%s7196_s17 + $0x1cc] ss:$16 sps:$4 sm:$0xff]  }
 0x612   :  { %v5093_v17 = vld [vmem:[%s7196_s17 + $0x1c8] ss:$16 sps:$4 sm:$0xff]   ;;  %v5098_v22 = vld [vmem:[%s7196_s17 + $0x1a4] ss:$16 sps:$4 sm:$0xff]   ;;  %v5101_v32 = vld [vmem:[%s7196_s17 + $0x1ac] ss:$16 sps:$4 sm:$0xff]  }
 0x613   :  { %2431 = vmatmul.mubr.bf16.gmra.mxu0 %v2002_v38  ;;  %2484 = vmatmul.mubr.bf16.gmra.mxu1 %v2002_v38  ;;  %v5096_v29 = vld [vmem:[%s7196_s17 + $0x1a0] ss:$16 sps:$4 sm:$0xff]   ;;  %v5107_v35 = vld [vmem:[%s7196_s17 + $0x18c] ss:$16 sps:$4 sm:$0xff]   ;;  %v5105_v38 = vld [vmem:[%s7196_s17 + $0x188] ss:$16 sps:$4 sm:$0xff]  }
 0x614   :  { %2819 = vmatpush1.bf16.msra.mxu0 %v5048_v33  ;;  %2872 = vmatpush1.bf16.msra.mxu1 %v5051_v34  ;;  %v5099_v33 = vld [vmem:[%s7196_s17 + $0x1a8] ss:$16 sps:$4 sm:$0xff]   ;;  %v5104_v34 = vld [vmem:[%s7196_s17 + $0x184] ss:$16 sps:$4 sm:$0xff]   ;;  %v5102_v24 = vld [vmem:[%s7196_s17 + $0x180] ss:$16 sps:$4 sm:$0xff]  }
 0x615   :  { %4504 = vmatprep.mubr.msk.bf16.mxu0 %vm5957_vm15, %v4503_v47  ;;  %4520 = vmatprep.mubr.msk.bf16.mxu1 %vm5957_vm15, %v4503_v47  ;;  %v5110_v53 = vld [vmem:[%s7196_s17 + $0x164] ss:$16 sps:$4 sm:$0xff]   ;;  %v5113_v18 = vld [vmem:[%s7196_s17 + $0x16c] ss:$16 sps:$4 sm:$0xff]   ;;  %v5108_v0 = vld [vmem:[%s7196_s17 + $0x160] ss:$16 sps:$4 sm:$0xff]  }
 0x616   :  { %2820 = vmatprep.subr.bf16.mxu0 %v5056_v41  ;;  %2873 = vmatprep.subr.bf16.mxu1 %v5059_v42  ;;  %v5111_v41 = vld [vmem:[%s7196_s17 + $0x168] ss:$16 sps:$4 sm:$0xff]   ;;  %v5116_v42 = vld [vmem:[%s7196_s17 + $0x144] ss:$16 sps:$4 sm:$0xff]   ;;  %v5119_v44 = vld [vmem:[%s7196_s17 + $0x14c] ss:$16 sps:$4 sm:$0xff]  }
 0x617   :  { %v5114_v45 = vld [vmem:[%s7196_s17 + $0x140] ss:$16 sps:$4 sm:$0xff]   ;;  %v5117_v47 = vld [vmem:[%s7196_s17 + $0x148] ss:$16 sps:$4 sm:$0xff]  }
 0x618   :  { %2821 = vmatpush1.bf16.msra.mxu0 %v5054_v50  ;;  %2874 = vmatpush1.bf16.msra.mxu1 %v5057_v54  ;;  %v5122_v50 = vld [vmem:[%s7196_s17 + $0x124] ss:$16 sps:$4 sm:$0xff]   ;;  %v5125_v54 = vld [vmem:[%s7196_s17 + $0x12c] ss:$16 sps:$4 sm:$0xff]  }
 0x619   :  { %2822 = vmatprep.subr.bf16.mxu0 %v5062_v57  ;;  %2875 = vmatprep.subr.bf16.mxu1 %v5065_v59  ;;  %v5120_v57 = vld [vmem:[%s7196_s17 + $0x120] ss:$16 sps:$4 sm:$0xff]   ;;  %v5123_v59 = vld [vmem:[%s7196_s17 + $0x128] ss:$16 sps:$4 sm:$0xff]  }
 0x61a   :  { %v5140_v9 = vld [vmem:[#allocation20 + $0xc4] ss:$16 sps:$4 sm:$0xff]   ;;  %v5138_v61 = vld [vmem:[#allocation20 + $0xc0] ss:$16 sps:$4 sm:$0xff]  }
 0x61c   :  { %2823 = vmatpush1.bf16.msra.mxu0 %v5060_v60  ;;  %2876 = vmatpush1.bf16.msra.mxu1 %v5063_v62  ;;  %v5128_v60 = vld [vmem:[%s7196_s17 + $0x104] ss:$16 sps:$4 sm:$0xff]   ;;  %v5131_v62 = vld [vmem:[%s7196_s17 + $0x10c] ss:$16 sps:$4 sm:$0xff]  }
 0x61d   :  { %2824 = vmatprep.subr.bf16.mxu0 %v5068_v3  ;;  %2877 = vmatprep.subr.bf16.mxu1 %v5071_v4  ;;  %v1890_v3 = vrot.slane %v6423_v21, 7  ;;  %v1889_v4 = vrot.slane %v6396_v2, 7  ;;  %v5137_v21 = vld [vmem:[#allocation20 + $0xec] ss:$16 sps:$4 sm:$0xff]  }
 0x620   :  { %2825 = vmatpush1.bf16.msra.mxu0 %v5066_v5  ;;  %2878 = vmatpush1.bf16.msra.mxu1 %v5069_v7  ;;  %v1884_v5 = vrot.slane %v6388_v51, 7  ;;  %v1886_v7 = vrot.slane %v6390_v55, 7  ;;  %v1893_v51 = vsel %vm315_vm2, %v1889_v4, %v1891_v8  ;;  %v1895_v55 = vsel %vm315_vm2, %v1887_v15, %v1889_v4  ;;  %v5141_v15 = vld [vmem:[#allocation20 + $0xc8] ss:$16 sps:$4 sm:$0xff]  }
 0x621   :  { %2826 = vmatprep.subr.bf16.mxu0 %v5074_v12  ;;  %2879 = vmatprep.subr.bf16.mxu1 %v5077_v37  ;;  %v5126_v12 = vld [vmem:[%s7196_s17 + $0x100] ss:$16 sps:$4 sm:$0xff]   ;;  %v5129_v37 = vld [vmem:[%s7196_s17 + $0x108] ss:$16 sps:$4 sm:$0xff]   ;;  %v1888_v8 = vrot.slane %v6407_v10, 7 }
 0x622   :  { %v1898_v2 = vsel %vm315_vm2, %v1890_v3, %v1884_v5  ;;  %v5189_v4 = vld [vmem:[#allocation20 + $0x1c8] ss:$16 sps:$4 sm:$0xff]  }
 0x623   :  { %v1892_v10 = vsel %vm315_vm2, %v1888_v8, %v1890_v3  ;;  %v5186_v3 = vld [vmem:[#allocation20 + $0x1c0] ss:$16 sps:$4 sm:$0xff]  }
 0x624   :  { %2827 = vmatpush1.bf16.msra.mxu0 %v5072_v49  ;;  %2880 = vmatpush1.bf16.msra.mxu1 %v5075_v14  ;;  %v5134_v49 = vld [vmem:[#allocation20 + $0xe4] ss:$16 sps:$4 sm:$0xff]   ;;  %v1896_v14 = vsel %vm315_vm2, %v1884_v5, %v1886_v7 }
 0x625   :  { %2828 = vmatprep.subr.bf16.mxu0 %v5080_v16  ;;  %2881 = vmatprep.subr.bf16.mxu1 %v5083_v25  ;;  %v4507_v16 = vpack.c.bf16 %v1896_v14, %v1898_v2  ;;  %v5132_v25 = vld [vmem:[#allocation20 + $0xe0] ss:$16 sps:$4 sm:$0xff]   ;;  %v5194_v5 = vld [vmem:[#allocation20 + $0x1a4] ss:$16 sps:$4 sm:$0xff]   ;;  %v5209_v14 = vld [vmem:[#allocation20 + $0x16c] ss:$16 sps:$4 sm:$0xff]  }
 0x626   :  { %v5198_v2 = vld [vmem:[#allocation20 + $0x180] ss:$16 sps:$4 sm:$0xff]  }
 0x628   :  { %2829 = vmatpush1.bf16.msra.mxu0 %v5078_v19  ;;  %2882 = vmatpush1.bf16.msra.mxu1 %v5081_v13  ;;  %v5135_v19 = vld [vmem:[#allocation20 + $0xe8] ss:$16 sps:$4 sm:$0xff]   ;;  %v4511_v13 = vpack.c.bf16 %v1893_v51, %v1895_v55  ;;  %v5206_v55 = vld [vmem:[#allocation20 + $0x164] ss:$16 sps:$4 sm:$0xff]  }
 0x629   :  { %2830 = vmatprep.subr.bf16.mxu0 %v5086_v23  ;;  %2883 = vmatprep.subr.bf16.mxu1 %v5089_v27  ;;  %v5143_v23 = vld [vmem:[#allocation20 + $0xcc] ss:$16 sps:$4 sm:$0xff]   ;;  %v1894_v27 = vsel %vm315_vm2, %v1886_v7, %v1888_v8  ;;  %v5201_v51 = vld [vmem:[#allocation20 + $0x188] ss:$16 sps:$4 sm:$0xff]   ;;  %v5218_v8 = vld [vmem:[#allocation20 + $0x124] ss:$16 sps:$4 sm:$0xff]  }
 0x62a   :  { %v5197_v7 = vld [vmem:[#allocation20 + $0x1ac] ss:$16 sps:$4 sm:$0xff]  }
 0x62c   :  { %2831 = vmatpush2.bf16.msra.mxu0 %v5084_v28  ;;  %2884 = vmatpush2.bf16.msra.mxu1 %v5087_v30  ;;  %v5149_v28 = vld [vmem:[#allocation20 + $0xac] ss:$16 sps:$4 sm:$0xff]   ;;  %v4515_v30 = vpack.c.bf16 %v1892_v10, %v1894_v27  ;;  %v5219_v10 = vld [vmem:[#allocation20 + $0x128] ss:$16 sps:$4 sm:$0xff]   ;;  %v5224_v27 = vld [vmem:[#allocation20 + $0x104] ss:$16 sps:$4 sm:$0xff]  }
 0x62d   :  { %2832 = vmatprep.subr.bf16.mxu0 %v5092_v26  ;;  %2885 = vmatprep.subr.bf16.mxu1 %v5095_v20  ;;  %v5144_v26 = vld [vmem:[#allocation20 + $0xa0] ss:$16 sps:$4 sm:$0xff]   ;;  %v5147_v20 = vld [vmem:[#allocation20 + $0xa8] ss:$16 sps:$4 sm:$0xff]  }
 0x630   :  { %2833 = vmatpush2.bf16.msra.mxu0 %v5090_v31  ;;  %2886 = vmatpush2.bf16.msra.mxu1 %v5093_v17  ;;  %v5152_v31 = vld [vmem:[#allocation20 + $0x84] ss:$16 sps:$4 sm:$0xff]   ;;  %v5155_v17 = vld [vmem:[#allocation20 + $0x8c] ss:$16 sps:$4 sm:$0xff]  }
 0x631   :  { %2834 = vmatprep.subr.bf16.mxu0 %v5098_v22  ;;  %2887 = vmatprep.subr.bf16.mxu1 %v5101_v32  ;;  %v5150_v22 = vld [vmem:[#allocation20 + $0x80] ss:$16 sps:$4 sm:$0xff]   ;;  %v5153_v32 = vld [vmem:[#allocation20 + $0x88] ss:$16 sps:$4 sm:$0xff]  }
 0x634   :  { %2835 = vmatpush2.bf16.msra.mxu0 %v5096_v29  ;;  %2888 = vmatpush2.bf16.msra.mxu1 %v5099_v33  ;;  %v5158_v29 = vld [vmem:[#allocation20 + $0x64] ss:$16 sps:$4 sm:$0xff]   ;;  %v5161_v33 = vld [vmem:[#allocation20 + $0x6c] ss:$16 sps:$4 sm:$0xff]  }
 0x635   :  { %2836 = vmatprep.subr.bf16.mxu0 %v5104_v34  ;;  %2889 = vmatprep.subr.bf16.mxu1 %v5107_v35  ;;  %v5159_v34 = vld [vmem:[#allocation20 + $0x68] ss:$16 sps:$4 sm:$0xff]   ;;  %v5164_v35 = vld [vmem:[#allocation20 + $0x44] ss:$16 sps:$4 sm:$0xff]  }
 0x638   :  { %2837 = vmatpush2.bf16.msra.mxu0 %v5102_v24  ;;  %2890 = vmatpush2.bf16.msra.mxu1 %v5105_v38  ;;  %v5167_v24 = vld [vmem:[#allocation20 + $0x4c] ss:$16 sps:$4 sm:$0xff]   ;;  %v5162_v38 = vld [vmem:[#allocation20 + $0x40] ss:$16 sps:$4 sm:$0xff]  }
 0x639   :  { %2838 = vmatprep.subr.bf16.mxu0 %v5110_v53  ;;  %2891 = vmatprep.subr.bf16.mxu1 %v5113_v18  ;;  %v5170_v53 = vld [vmem:[#allocation20 + $0x24] ss:$16 sps:$4 sm:$0xff]   ;;  %v5173_v18 = vld [vmem:[#allocation20 + $0x2c] ss:$16 sps:$4 sm:$0xff]  }
 0x63c   :  { %2839 = vmatpush2.bf16.msra.mxu0 %v5108_v0  ;;  %2892 = vmatpush2.bf16.msra.mxu1 %v5111_v41  ;;  %v5168_v0 = vld [vmem:[#allocation20 + $0x20] ss:$16 sps:$4 sm:$0xff]   ;;  %v5171_v41 = vld [vmem:[#allocation20 + $0x28] ss:$16 sps:$4 sm:$0xff]  }
 0x63d   :  { %2840 = vmatprep.subr.bf16.mxu0 %v5116_v42  ;;  %2893 = vmatprep.subr.bf16.mxu1 %v5119_v44  ;;  %v5176_v42 = vld [vmem:[#allocation20 + $0x4] ss:$16 sps:$4 sm:$0xff]   ;;  %v5179_v44 = vld [vmem:[#allocation20 + $0xc] ss:$16 sps:$4 sm:$0xff]  }
 0x640   :  { %2841 = vmatpush2.bf16.msra.mxu0 %v5114_v45  ;;  %2894 = vmatpush2.bf16.msra.mxu1 %v5117_v47  ;;  %v5174_v45 = vld [vmem:[#allocation20] ss:$16 sps:$4 sm:$0xff]   ;;  %v5177_v47 = vld [vmem:[#allocation20 + $0x8] ss:$16 sps:$4 sm:$0xff]  }
 0x641   :  { %2842 = vmatprep.subr.bf16.mxu0 %v5122_v50  ;;  %2895 = vmatprep.subr.bf16.mxu1 %v5125_v54  ;;  %v5182_v50 = vld [vmem:[#allocation20 + $0x1e4] ss:$16 sps:$4 sm:$0xff]   ;;  %v5185_v54 = vld [vmem:[#allocation20 + $0x1ec] ss:$16 sps:$4 sm:$0xff]  }
 0x644   :  { %2843 = vmatpush2.bf16.msra.mxu0 %v5120_v57  ;;  %2896 = vmatpush2.bf16.msra.mxu1 %v5123_v59  ;;  %v5180_v57 = vld [vmem:[#allocation20 + $0x1e0] ss:$16 sps:$4 sm:$0xff]   ;;  %v5183_v59 = vld [vmem:[#allocation20 + $0x1e8] ss:$16 sps:$4 sm:$0xff]  }
 0x645   :  { %2844 = vmatprep.subr.bf16.mxu0 %v5128_v60  ;;  %2897 = vmatprep.subr.bf16.mxu1 %v5131_v62  ;;  %v5188_v60 = vld [vmem:[#allocation20 + $0x1c4] ss:$16 sps:$4 sm:$0xff]   ;;  %v5191_v62 = vld [vmem:[#allocation20 + $0x1cc] ss:$16 sps:$4 sm:$0xff]  }
 0x648   :  { %2845 = vmatpush2.bf16.msra.mxu0 %v5126_v12  ;;  %2898 = vmatpush2.bf16.msra.mxu1 %v5129_v37  ;;  %v5192_v12 = vld [vmem:[#allocation20 + $0x1a0] ss:$16 sps:$4 sm:$0xff]   ;;  %v5195_v37 = vld [vmem:[#allocation20 + $0x1a8] ss:$16 sps:$4 sm:$0xff]  }
 0x649   :  { %3308 = vmatprep.subr.bf16.mxu0 %v5134_v49  ;;  %3361 = vmatprep.subr.bf16.mxu1 %v5137_v21  ;;  %v5200_v49 = vld [vmem:[#allocation20 + $0x184] ss:$16 sps:$4 sm:$0xff]   ;;  %v5203_v21 = vld [vmem:[#allocation20 + $0x18c] ss:$16 sps:$4 sm:$0xff]  }
 0x64b   :  { %4508 = vmatmul.mubr.msk.bf16.vlgmr.msra.gmra.mxu0 %vm5957_vm15, %v4507_v16  ;;  %4524 = vmatmul.mubr.msk.bf16.vlgmr.msra.gmra.mxu1 %vm5957_vm15, %v4507_v16  ;;  %v5204_v16 = vld [vmem:[#allocation20 + $0x160] ss:$16 sps:$4 sm:$0xff]  }
 0x64c   :  { %4512 = vmatprep.mubr.msk.bf16.mxu0 %vm5977_vm1, %v4511_v13  ;;  %4528 = vmatprep.mubr.msk.bf16.mxu1 %vm5977_vm1, %v4511_v13  ;;  %v5215_v13 = vld [vmem:[#allocation20 + $0x14c] ss:$16 sps:$4 sm:$0xff]  }
 0x64d   :  { %3309 = vmatpush1.bf16.msra.mxu0 %v5132_v25  ;;  %3362 = vmatpush1.bf16.msra.mxu1 %v5135_v19  ;;  %v5207_v25 = vld [vmem:[#allocation20 + $0x168] ss:$16 sps:$4 sm:$0xff]   ;;  %v5212_v19 = vld [vmem:[#allocation20 + $0x144] ss:$16 sps:$4 sm:$0xff]  }
 0x64e   :  { %3310 = vmatprep.subr.bf16.mxu0 %v5140_v9  ;;  %3363 = vmatprep.subr.bf16.mxu1 %v5143_v23  ;;  %v5210_v9 = vld [vmem:[#allocation20 + $0x140] ss:$16 sps:$4 sm:$0xff]   ;;  %v5213_v23 = vld [vmem:[#allocation20 + $0x148] ss:$16 sps:$4 sm:$0xff]  }
 0x651   :  { %3311 = vmatpush1.bf16.msra.mxu0 %v5138_v61  ;;  %3364 = vmatpush1.bf16.msra.mxu1 %v5141_v15  ;;  %v5221_v61 = vld [vmem:[#allocation20 + $0x12c] ss:$16 sps:$4 sm:$0xff]   ;;  %v5216_v15 = vld [vmem:[#allocation20 + $0x120] ss:$16 sps:$4 sm:$0xff]  }
 0x652   :  { %3312 = vmatprep.subr.bf16.mxu0 %v5146_v39  ;;  %3365 = vmatprep.subr.bf16.mxu1 %v5149_v28  ;;  %v5227_v39 = vld [vmem:[#allocation20 + $0x10c] ss:$16 sps:$4 sm:$0xff]   ;;  %v5222_v28 = vld [vmem:[#allocation20 + $0x100] ss:$16 sps:$4 sm:$0xff]  }
 0x653   :  { %4516 = vmatmul.mubr.msk.bf16.gmra.mxu0 %vm5977_vm1, %v4515_v30  ;;  %4532 = vmatmul.mubr.msk.bf16.gmra.mxu1 %vm5977_vm1, %v4515_v30  ;;  %v5225_v30 = vld [vmem:[#allocation20 + $0x108] ss:$16 sps:$4 sm:$0xff]  }
 0x654   :  { %4600 = vmatprep.mubr.msk.bf16.mxu0 %vm5993_vm5, %v6457_v46  ;;  %4616 = vmatprep.mubr.msk.bf16.mxu1 %vm5993_vm5, %v6457_v46  ;;  %v5165_v46 = vld [vmem:[#allocation20 + $0x48] ss:$16 sps:$4 sm:$0xff]  }
 0x655   :  { %3313 = vmatpush1.bf16.msra.mxu0 %v5144_v26  ;;  %3366 = vmatpush1.bf16.msra.mxu1 %v5147_v20  ;;  %v3679_v26 = vld [vmem:[%s7202_s23 + $0x178] sm:$0xff]  ;;  %v3646_v20 = vld [vmem:[%s7202_s23 + $0x70] sm:$0xff] }
 0x656   :  { %3314 = vmatprep.subr.bf16.mxu0 %v5152_v31  ;;  %3367 = vmatprep.subr.bf16.mxu1 %v5155_v17  ;;  %v3678_v31 = vld [vmem:[%s7202_s23 + $0x170] sm:$0xff]  ;;  %v3661_v17 = vld [vmem:[%s7202_s23 + $0xe8] sm:$0xff] }
 0x659   :  { %3315 = vmatpush1.bf16.msra.mxu0 %v5150_v22  ;;  %3368 = vmatpush1.bf16.msra.mxu1 %v5153_v32  ;;  %v3693_v22 = vld [vmem:[%s7202_s23 + $0x1e8] sm:$0xff] }
 0x65a   :  { %3316 = vmatprep.subr.bf16.mxu0 %v5158_v29  ;;  %3369 = vmatprep.subr.bf16.mxu1 %v5161_v33  ;;  %v3645_v32 = vld [vmem:[%s7202_s23 + $0x68] sm:$0xff]  ;;  %v3660_v33 = vld [vmem:[%s7202_s23 + $0xe0] sm:$0xff] }
 0x65b   :  { %v3677_v29 = vld [vmem:[%s7202_s23 + $0x168] sm:$0xff] }
 0x65d   :  { %3317 = vmatpush1.bf16.msra.mxu0 %v5156_v52  ;;  %3370 = vmatpush1.bf16.msra.mxu1 %v5159_v34  ;;  %v3692_v52 = vld [vmem:[%s7202_s23 + $0x1e0] sm:$0xff] }
 0x65e   :  { %3318 = vmatprep.subr.bf16.mxu0 %v5164_v35  ;;  %3371 = vmatprep.subr.bf16.mxu1 %v5167_v24  ;;  %v3644_v34 = vld [vmem:[%s7202_s23 + $0x60] sm:$0xff]  ;;  %v3659_v24 = vld [vmem:[%s7202_s23 + $0xd8] sm:$0xff] }
 0x65f   :  { %v3676_v35 = vld [vmem:[%s7202_s23 + $0x160] sm:$0xff] }
 0x661   :  { %3319 = vmatpush1.bf16.msra.mxu0 %v5162_v38  ;;  %3372 = vmatpush1.bf16.msra.mxu1 %v5165_v46  ;;  %v3691_v38 = vld [vmem:[%s7202_s23 + $0x1d8] sm:$0xff] }
 0x662   :  { %3320 = vmatprep.subr.bf16.mxu0 %v5170_v53  ;;  %3373 = vmatprep.subr.bf16.mxu1 %v5173_v18  ;;  %v3643_v46 = vld [vmem:[%s7202_s23 + $0x58] sm:$0xff]  ;;  %v3658_v18 = vld [vmem:[%s7202_s23 + $0xd0] sm:$0xff] }
 0x663   :  { %v3675_v53 = vld [vmem:[%s7202_s23 + $0x158] sm:$0xff] }
 0x665   :  { %3321 = vmatpush1.bf16.msra.mxu0 %v5168_v0  ;;  %3374 = vmatpush1.bf16.msra.mxu1 %v5171_v41  ;;  %v3690_v0 = vld [vmem:[%s7202_s23 + $0x1d0] sm:$0xff] }
 0x666   :  { %3322 = vmatprep.subr.bf16.mxu0 %v5176_v42  ;;  %3375 = vmatprep.subr.bf16.mxu1 %v5179_v44  ;;  %v3642_v41 = vld [vmem:[%s7202_s23 + $0x50] sm:$0xff]  ;;  %v3657_v44 = vld [vmem:[%s7202_s23 + $0xc8] sm:$0xff] }
 0x667   :  { %v3674_v42 = vld [vmem:[%s7202_s23 + $0x150] sm:$0xff] }
 0x669   :  { %3323 = vmatpush1.bf16.msra.mxu0 %v5174_v45  ;;  %3376 = vmatpush1.bf16.msra.mxu1 %v5177_v47  ;;  %v3689_v45 = vld [vmem:[%s7202_s23 + $0x1c8] sm:$0xff] }
 0x66a   :  { %3324 = vmatprep.subr.bf16.mxu0 %v5182_v50  ;;  %3377 = vmatprep.subr.bf16.mxu1 %v5185_v54  ;;  %v3641_v47 = vld [vmem:[%s7202_s23 + $0x48] sm:$0xff]  ;;  %v3656_v54 = vld [vmem:[%s7202_s23 + $0xc0] sm:$0xff] }
 0x66b   :  { %v3673_v50 = vld [vmem:[%s7202_s23 + $0x148] sm:$0xff] }
 0x66d   :  { %3325 = vmatpush2.bf16.msra.mxu0 %v5180_v57  ;;  %3378 = vmatpush2.bf16.msra.mxu1 %v5183_v59  ;;  %v3688_v57 = vld [vmem:[%s7202_s23 + $0x1c0] sm:$0xff] }
 0x66e   :  { %3326 = vmatprep.subr.bf16.mxu0 %v5188_v60  ;;  %3379 = vmatprep.subr.bf16.mxu1 %v5191_v62  ;;  %v3640_v59 = vld [vmem:[%s7202_s23 + $0x40] sm:$0xff]  ;;  %v3655_v62 = vld [vmem:[%s7202_s23 + $0xb8] sm:$0xff] }
 0x66f   :  { %v3672_v60 = vld [vmem:[%s7202_s23 + $0x140] sm:$0xff] }
 0x671   :  { %3327 = vmatpush2.bf16.msra.mxu0 %v5186_v3  ;;  %3380 = vmatpush2.bf16.msra.mxu1 %v5189_v4  ;;  %v3687_v3 = vld [vmem:[%s7202_s23 + $0x1b8] sm:$0xff] }
 0x672   :  { %3328 = vmatprep.subr.bf16.mxu0 %v5194_v5  ;;  %3381 = vmatprep.subr.bf16.mxu1 %v5197_v7  ;;  %v3639_v4 = vld [vmem:[%s7202_s23 + $0x38] sm:$0xff]  ;;  %v3654_v7 = vld [vmem:[%s7202_s23 + $0xb0] sm:$0xff] }
 0x673   :  { %v3671_v5 = vld [vmem:[%s7202_s23 + $0x138] sm:$0xff] }
 0x675   :  { %3329 = vmatpush2.bf16.msra.mxu0 %v5192_v12  ;;  %3382 = vmatpush2.bf16.msra.mxu1 %v5195_v37  ;;  %v3686_v12 = vld [vmem:[%s7202_s23 + $0x1b0] sm:$0xff] }
 0x676   :  { %3330 = vmatprep.subr.bf16.mxu0 %v5200_v49  ;;  %3383 = vmatprep.subr.bf16.mxu1 %v5203_v21  ;;  %v3638_v37 = vld [vmem:[%s7202_s23 + $0x30] sm:$0xff]  ;;  %v3653_v21 = vld [vmem:[%s7202_s23 + $0xa8] sm:$0xff] }
 0x677   :  { %v3670_v49 = vld [vmem:[%s7202_s23 + $0x130] sm:$0xff] }
 0x679   :  { %3331 = vmatpush2.bf16.msra.mxu0 %v5198_v2  ;;  %3384 = vmatpush2.bf16.msra.mxu1 %v5201_v51  ;;  %v3685_v2 = vld [vmem:[%s7202_s23 + $0x1a8] sm:$0xff] }
 0x67a   :  { %3332 = vmatprep.subr.bf16.mxu0 %v5206_v55  ;;  %3385 = vmatprep.subr.bf16.mxu1 %v5209_v14  ;;  %v3637_v51 = vld [vmem:[%s7202_s23 + $0x28] sm:$0xff]  ;;  %v3652_v14 = vld [vmem:[%s7202_s23 + $0xa0] sm:$0xff] }
 0x67b   :  { %v3669_v55 = vld [vmem:[%s7202_s23 + $0x128] sm:$0xff] }
 0x67d   :  { %3333 = vmatpush2.bf16.msra.mxu0 %v5204_v16  ;;  %3386 = vmatpush2.bf16.msra.mxu1 %v5207_v25  ;;  %v3684_v16 = vld [vmem:[%s7202_s23 + $0x1a0] sm:$0xff] }
 0x67e   :  { %3334 = vmatprep.subr.bf16.mxu0 %v5212_v19  ;;  %3387 = vmatprep.subr.bf16.mxu1 %v5215_v13  ;;  %v3636_v25 = vld [vmem:[%s7202_s23 + $0x20] sm:$0xff]  ;;  %v3651_v13 = vld [vmem:[%s7202_s23 + $0x98] sm:$0xff] }
 0x67f   :  { %v3668_v19 = vld [vmem:[%s7202_s23 + $0x120] sm:$0xff] }
 0x681   :  { %3335 = vmatpush2.bf16.msra.mxu0 %v5210_v9  ;;  %3388 = vmatpush2.bf16.msra.mxu1 %v5213_v23  ;;  %v3683_v9 = vld [vmem:[%s7202_s23 + $0x198] sm:$0xff] }
 0x682   :  { %3336 = vmatprep.subr.bf16.mxu0 %v5218_v8  ;;  %3389 = vmatprep.subr.bf16.mxu1 %v5221_v61  ;;  %v3635_v23 = vld [vmem:[%s7202_s23 + $0x18] sm:$0xff]  ;;  %v3650_v61 = vld [vmem:[%s7202_s23 + $0x90] sm:$0xff] }
 0x683   :  { %v3667_v8 = vld [vmem:[%s7202_s23 + $0x118] sm:$0xff] }
 0x685   :  { %3337 = vmatpush2.bf16.msra.mxu0 %v5216_v15  ;;  %3390 = vmatpush2.bf16.msra.mxu1 %v5219_v10  ;;  %v3682_v15 = vld [vmem:[%s7202_s23 + $0x190] sm:$0xff] }
 0x686   :  { %3338 = vmatprep.subr.bf16.mxu0 %v5224_v27  ;;  %3391 = vmatprep.subr.bf16.mxu1 %v5227_v39  ;;  %v3634_v10 = vld [vmem:[%s7202_s23 + $0x10] sm:$0xff]  ;;  %v3649_v39 = vld [vmem:[%s7202_s23 + $0x88] sm:$0xff] }
 0x687   :  { %v3666_v27 = vld [vmem:[%s7202_s23 + $0x110] sm:$0xff] }
 0x689   :  { %3339 = vmatpush2.bf16.msra.mxu0 %v5222_v28  ;;  %3392 = vmatpush2.bf16.msra.mxu1 %v5225_v30  ;;  %v3681_v28 = vld [vmem:[%s7202_s23 + $0x188] sm:$0xff] }
 0x68a   :  { %4703 = vmatprep.subr.mxu0 %v3663_v6  ;;  %v3633_v30 = vld [vmem:[%s7202_s23 + $0x8] sm:$0xff] }
 0x68b   :  { %v3665_v6 = vld [vmem:[%s7202_s23 + $0x108] sm:$0xff] }
 0x68c   :  { %4604 = vmatmul.mubr.msk.bf16.vlgmr.msra.gmra.mxu0 %vm5993_vm5, %v6459_v36  ;;  %4620 = vmatmul.mubr.msk.bf16.vlgmr.msra.gmra.mxu1 %vm5993_vm5, %v6459_v36  ;;  %v3695_v36 = vld [vmem:[%s7202_s23 + $0x1f8] sm:$0xff] }
 0x68d   :  { %4608 = vmatprep.mubr.msk.bf16.mxu0 %vm6008_vm8, %v6478_v43  ;;  %4624 = vmatprep.mubr.msk.bf16.mxu1 %vm6008_vm8, %v6478_v43  ;;  %v3647_v43 = vld [vmem:[%s7202_s23 + $0x78] sm:$0xff] }
 0x68e   :  { %4738 = vmatprep.subr.mxu1 %v3695_v36  ;;  %4704 = vmatpush3.msra.mxu0 %v3647_v43  ;;  %v3648_v36 = vld [vmem:[%s7202_s23 + $0x80] sm:$0xff] }
 0x68f   :  { %4739 = vmatpush3.msra.mxu1 %v3679_v26  ;;  %4705 = vmatprep.subr.mxu0 %v3662_v11  ;;  %v3680_v43 = vld [vmem:[%s7202_s23 + $0x180] sm:$0xff] }
 0x690   :  { %4706 = vmatpush3.msra.mxu0 %v3646_v20  ;;  %v3632_v26 = vld [vmem:[%s7202_s23] sm:$0xff] }
 0x691   :  { %4707 = vmatprep.subr.mxu0 %v3661_v17  ;;  %v3664_v11 = vld [vmem:[%s7202_s23 + $0x100] sm:$0xff] }
 0x692   :  { %4708 = vmatpush3.msra.mxu0 %v3645_v32 }
 0x693   :  { %4709 = vmatprep.subr.mxu0 %v3660_v33 }
 0x694   :  { %4612 = vmatmul.mubr.msk.bf16.gmra.mxu0 %vm6008_vm8, %v6484_v48  ;;  %4628 = vmatmul.mubr.msk.bf16.gmra.mxu1 %vm6008_vm8, %v6484_v48  ;;  %v3694_v48 = vld [vmem:[%s7202_s23 + $0x1f0] sm:$0xff] }
 0x695   :  { %4740 = vmatprep.subr.mxu1 %v3694_v48  ;;  %4710 = vmatpush3.msra.mxu0 %v3644_v34 }
 0x696   :  { %4741 = vmatpush3.msra.mxu1 %v3678_v31  ;;  %4711 = vmatprep.subr.mxu0 %v3659_v24 }
 0x697   :  { %4742 = vmatprep.subr.mxu1 %v3693_v22  ;;  %4712 = vmatpush3.msra.mxu0 %v3643_v46 }
 0x698   :  { %4743 = vmatpush3.msra.mxu1 %v3677_v29  ;;  %4713 = vmatprep.subr.mxu0 %v3658_v18 }
 0x699   :  { %4744 = vmatprep.subr.mxu1 %v3692_v52  ;;  %4714 = vmatpush3.msra.mxu0 %v3642_v41 }
 0x69a   :  { %4745 = vmatpush3.msra.mxu1 %v3676_v35  ;;  %4715 = vmatprep.subr.mxu0 %v3657_v44 }
 0x69b   :  { %4746 = vmatprep.subr.mxu1 %v3691_v38  ;;  %4716 = vmatpush3.msra.mxu0 %v3641_v47 }
 0x69c   :  { %4747 = vmatpush3.msra.mxu1 %v3675_v53  ;;  %4717 = vmatprep.subr.mxu0 %v3656_v54 }
 0x69d   :  { %4748 = vmatprep.subr.mxu1 %v3690_v0  ;;  %4718 = vmatpush3.msra.mxu0 %v3640_v59 }
 0x69e   :  { %4749 = vmatpush3.msra.mxu1 %v3674_v42  ;;  %4719 = vmatprep.subr.mxu0 %v3655_v62 }
 0x69f   :  { %4750 = vmatprep.subr.mxu1 %v3689_v45  ;;  %4720 = vmatpush3.msra.mxu0 %v3639_v4 }
 0x6a0   :  { %4751 = vmatpush3.msra.mxu1 %v3673_v50  ;;  %4721 = vmatprep.subr.mxu0 %v3654_v7  ;;  %v3430_v7 = vld [vmem:[%s7199_s20] sm:$0xf] }
 0x6a1   :  { %4752 = vmatprep.subr.mxu1 %v3688_v57  ;;  %4722 = vmatpush3.msra.mxu0 %v3638_v37 }
 0x6a2   :  { %4753 = vmatpush3.msra.mxu1 %v3672_v60  ;;  %4723 = vmatprep.subr.mxu0 %v3653_v21 }
 0x6a3   :  { %4754 = vmatprep.subr.mxu1 %v3687_v3  ;;  %4724 = vmatpush3.msra.mxu0 %v3637_v51  ;;  %v6915_v51 = vrot.slane %v3430_v7, %v5930_v58 }
 0x6a4   :  { %4755 = vmatpush3.msra.mxu1 %v3671_v5  ;;  %4725 = vmatprep.subr.mxu0 %v3652_v14  ;;  %v6902_v5 = vsub.s32 2, %v5745_v1 }
 0x6a5   :  { %4756 = vmatprep.subr.mxu1 %v3686_v12  ;;  %4726 = vmatpush3.msra.mxu0 %v3636_v25  ;;  %v6908_v12 = vsub.s32 3, %v5745_v1  ;;  %v6921_v25 = vrot.slane %v3430_v7, %v6112_v63 }
 0x6a6   :  { %4757 = vmatpush3.msra.mxu1 %v3670_v49  ;;  %4727 = vmatprep.subr.mxu0 %v3651_v13 }
 0x6a7   :  { %4758 = vmatprep.subr.mxu1 %v3685_v2  ;;  %4728 = vmatpush3.msra.mxu0 %v3635_v23  ;;  %v6924_v1 = vrot.slane %v3430_v7, %v6908_v12 }
 0x6a8   :  { %4759 = vmatpush3.msra.mxu1 %v3669_v55  ;;  %4729 = vmatprep.subr.mxu0 %v3650_v61  ;;  %v6918_v55 = vrot.slane %v3430_v7, %v6902_v5 }
 0x6a9   :  { %4760 = vmatprep.subr.mxu1 %v3684_v16  ;;  %4730 = vmatpush3.msra.mxu0 %v3634_v10 }
 0x6aa   :  { %4761 = vmatpush3.msra.mxu1 %v3668_v19  ;;  %4731 = vmatprep.subr.mxu0 %v3649_v39 }
 0x6ab   :  { %4762 = vmatprep.subr.mxu1 %v3683_v9  ;;  %4732 = vmatpush3.msra.mxu0 %v3633_v30 }
 0x6ac   :  { %4763 = vmatpush3.msra.mxu1 %v3667_v8  ;;  %4733 = vmatprep.subr.mxu0 %v3648_v36 }
 0x6ad   :  { %4764 = vmatprep.subr.mxu1 %v3682_v15  ;;  %4734 = vmatpush3.msra.mxu0 %v3632_v26 }
 0x6ae   :  { %4765 = vmatpush3.msra.mxu1 %v3666_v27 }
 0x6af   :  { %4766 = vmatprep.subr.mxu1 %v3681_v28 }
 0x6b0   :  { %4767 = vmatpush3.msra.mxu1 %v3665_v6 }
 0x6b1   :  { %4768 = vmatprep.subr.mxu1 %v3680_v43 }
 0x6b2   :  { %4769 = vmatpush3.msra.mxu1 %v3664_v11 }
 0x6cb   :  { %v2422_v48 = vpop.f32.mrf.mxu0  ;;  %v2475_v20 = vpop.f32.mrf.mxu1 }
 0x6cd   :  { %v2424_v31 = vpop.f32.mrf.mxu0  ;;  %v2477_v17 = vpop.f32.mrf.mxu1 }
 0x6cf   :  { %v2426_v22 = vpop.f32.mrf.mxu0  ;;  %v2479_v32 = vpop.f32.mrf.mxu1 }
 0x6d1   :  { %v2428_v29 = vpop.f32.mrf.mxu0  ;;  %v2481_v33 = vpop.f32.mrf.mxu1 }
 0x6d3   :  { %v2432_v52 = vpop.f32.mrf.mxu0  ;;  %v2485_v34 = vpop.f32.mrf.mxu1 }
 0x6d5   :  { %v2434_v35 = vpop.f32.mrf.mxu0  ;;  %v2487_v24 = vpop.f32.mrf.mxu1 }
 0x6d7   :  { %v6889_v38 = vpop.f32.mrf.mxu0  ;;  %v6891_v46 = vpop.f32.mrf.mxu1 }
 0x6d9   :  { %v6893_v53 = vpop.f32.mrf.mxu0  ;;  %v6895_v18 = vpop.f32.mrf.mxu1 }
 0x70b   :  { %v2848_v0 = vpop.f32.mrf.mxu0  ;;  %v2901_v41 = vpop.f32.mrf.mxu1 }
 0x70c   :  { %v2849_v21 = vadd.f32 %v2848_v0, %v2422_v48  ;;  %v2902_v2 = vadd.f32 %v2901_v41, %v2475_v20 }
 0x70d   :  { %v2850_v42 = vpop.f32.mrf.mxu0  ;;  %v2903_v44 = vpop.f32.mrf.mxu1 }
 0x70e   :  { %v2851_v19 = vadd.f32 %v2850_v42, %v2424_v31  ;;  %v2904_v13 = vadd.f32 %v2903_v44, %v2477_v17 }
 0x70f   :  { %v2852_v45 = vpop.f32.mrf.mxu0  ;;  %v2905_v47 = vpop.f32.mrf.mxu1 }
 0x710   :  { %v2853_v28 = vadd.f32 %v2852_v45, %v2426_v22  ;;  %v2906_v30 = vadd.f32 %v2905_v47, %v2479_v32 }
 0x711   :  { %v2854_v50 = vpop.f32.mrf.mxu0  ;;  %v2907_v54 = vpop.f32.mrf.mxu1 }
 0x712   :  { %v2855_v6 = vadd.f32 %v2854_v50, %v2428_v29  ;;  %v2908_v36 = vadd.f32 %v2907_v54, %v2481_v33 }
 0x713   :  { %v2858_v57 = vpop.f32.mrf.mxu0  ;;  %v2911_v59 = vpop.f32.mrf.mxu1 }
 0x714   :  { %v2859_v11 = vadd.f32 %v2858_v57, %v2432_v52  ;;  %v2912_v48 = vadd.f32 %v2911_v59, %v2485_v34 }
 0x715   :  { %v2860_v60 = vpop.f32.mrf.mxu0  ;;  %v2913_v62 = vpop.f32.mrf.mxu1 }
 0x716   :  { %v2861_v17 = vadd.f32 %v2860_v60, %v2434_v35  ;;  %v2914_v0 = vadd.f32 %v2913_v62, %v2487_v24 }
 0x717   :  { %v6897_v3 = vpop.f32.mrf.mxu0  ;;  %v6899_v4 = vpop.f32.mrf.mxu1 }
 0x719   :  { %v6910_v37 = vpop.f32.mrf.mxu0  ;;  %v6912_v49 = vpop.f32.mrf.mxu1 }
 0x74c   :  { %v3342_v14 = vpop.f32.mrf.mxu0  ;;  %v3395_v16 = vpop.f32.mrf.mxu1 }
 0x74d   :  { %v3414_v9 = vadd.f32 %v3342_v14, %v2849_v21  ;;  %v3416_v23 = vadd.f32 %v3395_v16, %v2902_v2 }
 0x74e   :  { %v3344_v8 = vpop.f32.mrf.mxu0  ;;  %v3397_v61 = vpop.f32.mrf.mxu1 }
 0x74f   :  { %v6927_v15 = vadd.f32 %v6915_v51, %v3414_v9  ;;  %v6930_v10 = vadd.f32 %v6918_v55, %v3416_v23  ;;  %v3415_v27 = vadd.f32 %v3344_v8, %v2851_v19  ;;  %v3417_v39 = vadd.f32 %v3397_v61, %v2904_v13 }
 0x750   :  { %v3346_v43 = vpop.f32.mrf.mxu0  ;;  %v3399_v26 = vpop.f32.mrf.mxu1 }
 0x751   :  { %v6933_v20 = vadd.f32 %v6921_v25, %v3415_v27  ;;  %v6936_v31 = vadd.f32 %v6924_v1, %v3417_v39  ;;  %v3418_v41 = vadd.f32 %v3346_v43, %v2853_v28  ;;  %v3420_v42 = vadd.f32 %v3399_v26, %v2906_v30 }
 0x752   :  { %v3348_v44 = vpop.f32.mrf.mxu0  ;;  %v3401_v7 = vpop.f32.mrf.mxu1  ;;  %v3524_v22 = vmul.f32 %v6927_v15, %v6927_v15  ;;  %v3526_v32 = vmul.f32 %v6930_v10, %v6930_v10 }
 0x753   :  { %v3419_v29 = vadd.f32 %v3348_v44, %v2855_v6  ;;  %v3421_v33 = vadd.f32 %v3401_v7, %v2908_v36  ;;  %v3525_v52 = vmul.f32 %v6933_v20, %v6933_v20  ;;  %v3527_v34 = vmul.f32 %v6936_v31, %v6936_v31 }
 0x754   :  { %v6947_v35 = vadd.f32 %v6915_v51, %v3418_v41  ;;  %v6950_v24 = vadd.f32 %v6918_v55, %v3420_v42  ;;  %v3352_v45 = vpop.f32.mrf.mxu0  ;;  %v3405_v47 = vpop.f32.mrf.mxu1 }
 0x755   :  { %v6953_v50 = vadd.f32 %v6921_v25, %v3419_v29  ;;  %v6956_v54 = vadd.f32 %v6924_v1, %v3421_v33  ;;  %v3422_v57 = vadd.f32 %v3352_v45, %v2859_v11  ;;  %v3424_v59 = vadd.f32 %v3405_v47, %v2912_v48 }
 0x756   :  { %v3468_v60 = vadd.f32 %v6947_v35, %v6927_v15  ;;  %v3528_v62 = vmul.f32 %v6947_v35, %v6947_v35  ;;  %v3482_v21 = vadd.f32 %v6950_v24, %v6930_v10  ;;  %v3530_v2 = vmul.f32 %v6950_v24, %v6950_v24  ;;  %v3354_v9 = vpop.f32.mrf.mxu0  ;;  %v3407_v23 = vpop.f32.mrf.mxu1 }
 0x757   :  { %v3475_v14 = vadd.f32 %v6953_v50, %v6933_v20  ;;  %v3529_v16 = vmul.f32 %v6953_v50, %v6953_v50  ;;  %v3489_v19 = vadd.f32 %v6956_v54, %v6936_v31  ;;  %v3531_v13 = vmul.f32 %v6956_v54, %v6956_v54 }
 0x758   :  { %v3469_v8 = vrot.slane %v3468_v60, 4  ;;  %v3540_v61 = vadd.f32 %v3528_v62, %v3524_v22  ;;  %v3483_v27 = vrot.slane %v3482_v21, 4  ;;  %v3554_v39 = vadd.f32 %v3530_v2, %v3526_v32  ;;  %v3356_v29 = vpop.f32.mrf.mxu0  ;;  %v3409_v33 = vpop.f32.mrf.mxu1 }
 0x759   :  { %v3476_v28 = vrot.slane %v3475_v14, 4  ;;  %v3547_v30 = vadd.f32 %v3529_v16, %v3525_v52  ;;  %v3490_v6 = vrot.slane %v3489_v19, 4  ;;  %v3561_v36 = vadd.f32 %v3531_v13, %v3527_v34 }
 0x75a   :  { %v3470_v43 = vadd.f32 %v3469_v8, %v3468_v60  ;;  %v3541_v26 = vrot.slane %v3540_v61, 4  ;;  %v3484_v11 = vadd.f32 %v3483_v27, %v3482_v21  ;;  %v3555_v48 = vrot.slane %v3554_v39, 4 }
 0x75b   :  { %v3477_v41 = vadd.f32 %v3476_v28, %v3475_v14  ;;  %v3548_v42 = vrot.slane %v3547_v30, 4  ;;  %v6974_v44 = vadd.f32 %v3490_v6, %v3489_v19  ;;  %v3562_v7 = vrot.slane %v3561_v36, 4 }
 0x75c   :  { %v3471_v45 = vrot.slane %v3470_v43, 2  ;;  %v3542_v47 = vadd.f32 %v3541_v26, %v3540_v61  ;;  %v3485_v22 = vrot.slane %v3484_v11, 2  ;;  %v6976_v62 = vadd.f32 %v3555_v48, %v3554_v39 }
 0x75d   :  { %v2863_v32 = vadd.f32 %v6897_v3, %v6889_v38  ;;  %v2916_v52 = vadd.f32 %v6899_v4, %v6891_v46  ;;  %v2865_v34 = vadd.f32 %v6910_v37, %v6893_v53  ;;  %v2918_v60 = vadd.f32 %v6912_v49, %v6895_v18  ;;  %v3358_v46 = vpop.f32.mrf.mxu0  ;;  %v3411_v4 = vpop.f32.mrf.mxu1 }
 0x75e   :  { %v6986_v21 = vadd.f32 %v3471_v45, %v3470_v43  ;;  %v3543_v2 = vrot.slane %v3542_v47, 2  ;;  %v3478_v14 = vrot.slane %v3477_v41, 2  ;;  %v3549_v16 = vadd.f32 %v3548_v42, %v3547_v30 }
 0x75f   :  { %v6989_v19 = vadd.f32 %v6915_v51, %v3422_v57  ;;  %v6992_v13 = vadd.f32 %v6918_v55, %v3424_v59  ;;  %v3423_v38 = vadd.f32 %v3354_v9, %v2861_v17  ;;  %v3425_v3 = vadd.f32 %v3407_v23, %v2914_v0 }
 0x760   :  { %v6994_v8 = vadd.f32 %v3485_v22, %v3484_v11  ;;  %v3492_v18 = vrot.slane %v6974_v44, 2  ;;  %v6998_v37 = vadd.f32 %v3562_v7, %v3561_v36  ;;  %v7001_v61 = vadd.f32 %v3543_v2, %v3542_v47 }
 0x761   :  { %v7004_v57 = vadd.f32 %v6921_v25, %v3423_v38  ;;  %v7007_v17 = vadd.f32 %v6924_v1, %v3425_v3  ;;  %v3426_v0 = vadd.f32 %v3356_v29, %v2863_v32  ;;  %v3428_v59 = vadd.f32 %v3409_v33, %v2916_v52 }
 0x762   :  { %v3427_v9 = vadd.f32 %v3358_v46, %v2865_v34  ;;  %v3429_v23 = vadd.f32 %v3411_v4, %v2918_v60  ;;  %v3532_v27 = vmul.f32 %v6989_v19, %v6989_v19  ;;  %v3534_v39 = vmul.f32 %v6992_v13, %v6992_v13 }
 0x763   :  { %v3479_v28 = vadd.f32 %v3478_v14, %v3477_v41  ;;  %v3550_v30 = vrot.slane %v3549_v16, 2  ;;  %v7014_v6 = vadd.f32 %v6915_v51, %v3426_v0  ;;  %v7017_v36 = vadd.f32 %v6918_v55, %v3428_v59 }
 0x764   :  { %v7020_v43 = vadd.f32 %v6921_v25, %v3427_v9  ;;  %v7023_v26 = vadd.f32 %v6924_v1, %v3429_v23  ;;  %v3533_v11 = vmul.f32 %v7004_v57, %v7004_v57  ;;  %v3535_v48 = vmul.f32 %v7007_v17, %v7007_v17 }
 0x765   :  { %v3480_v41 = vrot.slane %v3479_v28, 1  ;;  %v3551_v42 = vadd.f32 %v3550_v30, %v3549_v16  ;;  %v3496_v51 = vadd.f32 %v7014_v6, %v6989_v19  ;;  %v3536_v55 = vmul.f32 %v7014_v6, %v7014_v6 }
 0x766   :  { %v3510_v25 = vadd.f32 %v7017_v36, %v6992_v13  ;;  %v3538_v1 = vmul.f32 %v7017_v36, %v7017_v36  ;;  %v3503_v7 = vadd.f32 %v7020_v43, %v7004_v57  ;;  %v3537_v29 = vmul.f32 %v7020_v43, %v7020_v43 }
 0x767   :  { %v3517_v33 = vadd.f32 %v7023_v26, %v7007_v17  ;;  %v3539_v45 = vmul.f32 %v7023_v26, %v7023_v26  ;;  %v3497_v47 = vrot.slane %v3496_v51, 4  ;;  %v3568_v22 = vadd.f32 %v3536_v55, %v3532_v27 }
 0x768   :  { %v3511_v32 = vrot.slane %v3510_v25, 4  ;;  %v3582_v52 = vadd.f32 %v3538_v1, %v3534_v39  ;;  %v3504_v34 = vrot.slane %v3503_v7, 4  ;;  %v3575_v60 = vadd.f32 %v3537_v29, %v3533_v11 }
 0x769   :  { %v3518_v2 = vrot.slane %v3517_v33, 4  ;;  %v3589_v14 = vadd.f32 %v3539_v45, %v3535_v48  ;;  %v3498_v16 = vadd.f32 %v3497_v47, %v3496_v51  ;;  %v3569_v38 = vrot.slane %v3568_v22, 4 }
 0x76a   :  { %v3512_v3 = vadd.f32 %v3511_v32, %v3510_v25  ;;  %v3583_v46 = vrot.slane %v3582_v52, 4  ;;  %v3505_v4 = vadd.f32 %v3504_v34, %v3503_v7  ;;  %v3576_v0 = vrot.slane %v3575_v60, 4 }
 0x76b   :  { %v3519_v59 = vadd.f32 %v3518_v2, %v3517_v33  ;;  %v3590_v9 = vrot.slane %v3589_v14, 4  ;;  %v3499_v23 = vrot.slane %v3498_v16, 2  ;;  %v3570_v30 = vadd.f32 %v3569_v38, %v3568_v22 }
 0x76c   :  { %v3513_v40 = vrot.slane %v3512_v3, 2  ;;  %v3584_v49 = vadd.f32 %v3583_v46, %v3582_v52  ;;  %v3506_v53 = vrot.slane %v3505_v4, 2  ;;  %v3577_v27 = vadd.f32 %v3576_v0, %v3575_v60 }
 0x76d   :  { %v3493_v39 = vadd.f32 %v3492_v18, %v6974_v44  ;;  %v3564_v11 = vrot.slane %v6998_v37, 2  ;;  %v3500_v55 = vadd.f32 %v3499_v23, %v3498_v16  ;;  %v3571_v48 = vrot.slane %v3570_v30, 2 }
 0x76e   :  { %v3520_v51 = vrot.slane %v3519_v59, 2  ;;  %v3591_v1 = vadd.f32 %v3590_v9, %v3589_v14  ;;  %v3514_v25 = vadd.f32 %v3513_v40, %v3512_v3  ;;  %v3585_v29 = vrot.slane %v3584_v49, 2 }
 0x76f   :  { %v3507_v7 = vadd.f32 %v3506_v53, %v3505_v4  ;;  %v3578_v45 = vrot.slane %v3577_v27, 2  ;;  %v3487_v33 = vrot.slane %v6994_v8, 1  ;;  %v7245_v47 = vrot.slane %v6976_v62, 2 }
 0x770   :  { %v3481_v32 = vadd.f32 %v3480_v41, %v3479_v28  ;;  %v3552_v52 = vrot.slane %v3551_v42, 1  ;;  %v3501_v34 = vrot.slane %v3500_v55, 1  ;;  %v3572_v44 = vadd.f32 %v3571_v48, %v3570_v30 }
 0x771   :  { %v3558_v22 = vadd.f32 %v7245_v47, %v6976_v62  ;;  %v3508_v18 = vrot.slane %v3507_v7, 1  ;;  %v3579_v60 = vadd.f32 %v3578_v45, %v3577_v27  ;;  %v3494_v2 = vrot.slane %v3493_v39, 1 }
 0x772   :  { %v3521_v16 = vadd.f32 %v3520_v51, %v3519_v59  ;;  %v3565_v14 = vadd.f32 %v3564_v11, %v6998_v37  ;;  %v3592_v40 = vrot.slane %v3591_v1, 2  ;;  %v3515_v38 = vrot.slane %v3514_v25, 1 }
 0x773   :  { %v3586_v53 = vadd.f32 %v3585_v29, %v3584_v49  ;;  %v3509_v3 = vadd.f32 %v3508_v18, %v3507_v7  ;;  %v3580_v46 = vrot.slane %v3579_v60, 1  ;;  %v3545_v62 = vrot.slane %v7001_v61, 1 }
 0x774   :  { %v3522_v4 = vrot.slane %v3521_v16, 1  ;;  %v3566_v0 = vrot.slane %v3565_v14, 1  ;;  %v3593_v9 = vadd.f32 %v3592_v40, %v3591_v1  ;;  %v3553_v28 = vadd.f32 %v3552_v52, %v3551_v42 }
 0x775   :  { %v3581_v41 = vadd.f32 %v3580_v46, %v3579_v60  ;;  %v3502_v23 = vadd.f32 %v3501_v34, %v3500_v55  ;;  %v3573_v30 = vrot.slane %v3572_v44, 1  ;;  %v3495_v48 = vadd.f32 %v3494_v2, %v3493_v39  ;;  %v3859_v46 = vld [vmem:[#allocation22 + $0x60] sm:$0xff] }
 0x776   :  { %v3523_v27 = vadd.f32 %v3522_v4, %v3521_v16  ;;  %v3594_v45 = vrot.slane %v3593_v9, 1  ;;  %v7246_v37 = vrot.slane %v6986_v21, 1  ;;  %v3605_v49 = vsel %vm707_vm9, %v3509_v3, %v3481_v32  ;;  %v3862_v3 = vld [vmem:[#allocation22 + $0x78] sm:$0xff]  ;;  %v3857_v4 = vld [vmem:[#allocation22 + $0x50] sm:$0xff] }
 0x777   :  { %v3621_v11 = vsel %vm712_vm10, %v3581_v41, %v3553_v28  ;;  %v3546_v51 = vadd.f32 %v3545_v62, %v7001_v61  ;;  %v3574_v1 = vadd.f32 %v3573_v30, %v3572_v44  ;;  %v3567_v42 = vadd.f32 %v3566_v0, %v3565_v14  ;;  %3961 = vmatprep.subr.mxu1 %v3862_v3  ;;  %v3852_v0 = vld [vmem:[#allocation22 + $0x28] sm:$0xff]  ;;  %v3851_v62 = vld [vmem:[#allocation22 + $0x20] sm:$0xff]  ;;  %v3853_v28 = vld [vmem:[#allocation22 + $0x30] sm:$0xff] }
 0x778   :  { %v3474_v59 = vadd.f32 %v7246_v37, %v6986_v21  ;;  %v3629_v29 = vsel %vm715_vm11, %v3605_v49, %v3621_v11  ;;  %v3595_v7 = vadd.f32 %v3594_v45, %v3593_v9  ;;  %v3559_v55 = vrot.slane %v3558_v22, 1  ;;  %v3854_v9 = vld [vmem:[#allocation22 + $0x38] sm:$0xff]  ;;  %v3848_v41 = vld [vmem:[#allocation22 + $0x8] sm:$0xff]  ;;  %v3847_v30 = vld [vmem:[#allocation22] sm:$0xff] }
 0x779   :  { %3760 = vmatprep.mubr.f32.mxu0 %v3629_v29  ;;  %v3620_v47 = vsel %vm712_vm10, %v3574_v1, %v3546_v51  ;;  %v3516_v52 = vadd.f32 %v3515_v38, %v3514_v25  ;;  %v3587_v34 = vrot.slane %v3586_v53, 1  ;;  %v3607_v21 = vsel %vm707_vm9, %v3523_v27, %v3495_v48  ;;  %v3860_v38 = vld [vmem:[#allocation22 + $0x68] sm:$0xff]  ;;  %v3849_v48 = vld [vmem:[#allocation22 + $0x10] sm:$0xff] }
 0x77a   :  { %v3604_v39 = vsel %vm707_vm9, %v3502_v23, %v3474_v59  ;;  %v3623_v32 = vsel %vm712_vm10, %v3595_v7, %v3567_v42  ;;  %v3488_v44 = vadd.f32 %v3487_v33, %v6994_v8  ;;  %v3560_v60 = vadd.f32 %v3559_v55, %v3558_v22  ;;  %3890 = vmatprep.subr.mxu0 %v3860_v38  ;;  %v3861_v8 = vld [vmem:[#allocation22 + $0x70] sm:$0xff]  ;;  %v3856_v33 = vld [vmem:[#allocation22 + $0x48] sm:$0xff]  ;;  %v3858_v22 = vld [vmem:[#allocation22 + $0x58] sm:$0xff] }
 0x77b   :  { %v3628_v18 = vsel %vm715_vm11, %v3604_v39, %v3620_v47  ;;  %v3631_v61 = vsel %vm715_vm11, %v3607_v21, %v3623_v32  ;;  %v3588_v2 = vadd.f32 %v3587_v34, %v3586_v53  ;;  %v7247_v16 = vmov 0.0   ;;  %v3855_v53 = vld [vmem:[#allocation22 + $0x40] sm:$0xff]  ;;  %v3850_v23 = vld [vmem:[#allocation22 + $0x18] sm:$0xff] }
 0x77c   :  { %3761 = vmatmul.mubr.f32.vlgmr.msra.gmra.mxu0 %v3628_v18  ;;  %3830 = vmatprep.mubr.f32.mxu1 %v3631_v61  ;;  %v3606_v14 = vsel %vm707_vm9, %v3516_v52, %v3488_v44 }
 0x77d   :  { %3930 = vmatprep.mubr.f32.mxu0 %v7247_v16  ;;  %v3622_v25 = vsel %vm712_vm10, %v3588_v2, %v3560_v60  ;;  %3891 = vmatpush1.msra.mxu0 %v3859_v46 }
 0x77e   :  { %v3630_v40 = vsel %vm715_vm11, %v3606_v14, %v3622_v25  ;;  %3892 = vmatprep.subr.mxu0 %v3856_v33  ;;  %v4158_v25 = vld [vmem:[%s7200_s21] sm:$0xf]  ;;  %s5554_s21 = smov [#allocation23]  }
 0x77f   :  { %3831 = vmatmul.mubr.f32.vlgmr.msra.gmra.mxu1 %v3630_v40  ;;  %3893 = vmatpush1.msra.mxu0 %v3855_v53  ;;  %v7083_v3 = vrot.slane %v4158_v25, %v5930_v58  ;;  %v7086_v46 = vrot.slane %v4158_v25, %v6112_v63 }
 0x780   :  { %4001 = vmatprep.mubr.f32.mxu1 %v7247_v16  ;;  %3962 = vmatpush1.msra.mxu1 %v3861_v8  ;;  %v4196_v8 = vld [vmem:[%s7201_s22] sm:$0xf]  ;;  %s4271_s22 = sshll.u32 %s5554_s21, 4  ;;  %s4272_s22 = int_to_ptr.vmem [resolvable:$true] %s4271_s22 }
 0x781   :  { %3963 = vmatprep.subr.mxu1 %v3858_v22  ;;  %3894 = vmatprep.subr.mxu0 %v3852_v0  ;;  %s5494_s2 = scalar_lea.vmem %s4272_s22, 2048  ;;  %p5499_p10 = scmp.lt.s32.totalorder %s4272_s22, %s4272_s22 }
 0x782   :  { %3964 = vmatpush1.msra.mxu1 %v3857_v4  ;;  %3895 = vmatpush1.msra.mxu0 %v3851_v62  ;;  %v7101_v62 = vrot.slane %v4158_v25, %v6908_v12  ;;  %p5495_p9 = scmp.ne.s32.totalorder %s4272_s22, %s5494_s2  ;;  %p5500_p11 = scmp.lt.s32.totalorder %s5494_s2, %s5494_s2 }
 0x783   :  { %3965 = vmatprep.subr.mxu1 %v3854_v9  ;;  %3896 = vmatprep.subr.mxu0 %v3848_v41  ;;  %v7098_v9 = vrot.slane %v4158_v25, %v6902_v5 }
 0x784   :  { %3966 = vmatpush1.msra.mxu1 %v3853_v28  ;;  %3897 = vmatpush1.msra.mxu0 %v3847_v30  ;;  %v7109_v30 = vrot.slane %v4196_v8, %v6112_v63  ;;  %p5501_p12 = por %p5500_p11, %p5499_p10 }
 0x785   :  { %3967 = vmatprep.subr.mxu1 %v3850_v23  ;;  %v7106_v23 = vrot.slane %v4196_v8, %v5930_v58 }
 0x786   :  { %3968 = vmatpush1.msra.mxu1 %v3849_v48  ;;  %p5502_p13 = pnand %p5501_p12, %p5495_p9 }
 0x83c   :  { %v4735_v27 = vpop.f32.mrf.mxu0 }
 0x83e   :  { %v4736_v45 = vpop.f32.mrf.mxu0 }
 0x83f   :  { %v4770_v37 = vpop.f32.mrf.mxu1  ;;  %v4737_v59 = vadd.f32 %v4736_v45, %v4735_v27  ;;  %v7114_v45 = vrot.slane %v4196_v8, %v6902_v5 }
 0x841   :  { %v4771_v49 = vpop.f32.mrf.mxu1 }
 0x842   :  { %v4772_v11 = vadd.f32 %v4771_v49, %v4770_v37  ;;  %v7117_v37 = vrot.slane %v4196_v8, %v6908_v12 }
 0x844   :  { %v3833_v51 = vadd.f32 %v4772_v11, %v4737_v59 }
 0x846   :  { %v3837_v1 = vmul.f32 0.00390625, %v3833_v51 }
 0x848   :  { %v3838_v29 = vmul.f32 %v3837_v1, %v3837_v1 }
 0x84a   :  { %v3840_v42 = vrot.slane %v3838_v29, 6 }
 0x84c   :  { %v3842_v7 = vsub.f32 %v3837_v1, %v3840_v42 }
 0x84e   :  { %v3843_v55 = vmax.f32 %v3842_v7, 0.0 }
 0x850   :  { %v3844_v39 = vadd.f32 1e-05, %v3843_v55 }
 0x852   :  { %5232 = vrsqrt.f32 %v3844_v39 }
 0x85f   :  { %v5233_v47 = vpop.eup %5232 }
 0x860   :  { %v3846_v52 = vsel %vm715_vm11, %v3837_v1, %v5233_v47 }
 0x861   :  { %4629 = vmatmul.mubr.msk.f32.vlgmr.msra.gmra.mxu0 %vm818_vm12, %v3846_v52  ;;  %4630 = vmatmul.mubr.msk.f32.vlgmr.msra.gmra.mxu1 %vm818_vm12, %v3846_v52 }
 0x921   :  { %v3932_v34 = vpop.f32.mrf.mxu0  ;;  %v4003_v21 = vpop.f32.mrf.mxu1 }
 0x923   :  { %v3934_v32 = vpop.f32.mrf.mxu0  ;;  %v4005_v18 = vpop.f32.mrf.mxu1 }
 0x924   :  { %v4012_v61 = vcombine.low %v3932_v34, %v3934_v32  ;;  %v4013_v44 = vcombine.low %v4003_v21, %v4005_v18 }
 0x926   :  { %v4020_v60 = vrot.slane %v4012_v61, %v5927_v56  ;;  %v4027_v2 = vrot.slane %v4013_v44, %v5927_v56 }
 0x928   :  { %v4028_v16 = vcombine.low %v4020_v60, %v4027_v2  ;;  %v4029_v14 = vcombine.high %v4020_v60, %v4027_v2 }
 0x92a   :  { %v4036_v40 = vrot.slane %v4028_v16, %v5927_v56  ;;  %v4043_v38 = vrot.slane %v4029_v14, %v5927_v56 }
 0x92c   :  { %v4047_v33 = vrot.slane %v4036_v40, %v5930_v58  ;;  %v4051_v22 = vrot.slane %v4036_v40, %v6112_v63  ;;  %v4055_v53 = vrot.slane %v4036_v40, %v6902_v5  ;;  %v4059_v4 = vrot.slane %v4036_v40, %v6908_v12 }
 0x92d   :  { %v4063_v56 = vrot.slane %v4043_v38, %v5930_v58  ;;  %v4067_v0 = vrot.slane %v4043_v38, %v6112_v63  ;;  %v4071_v28 = vrot.slane %v4043_v38, %v6902_v5  ;;  %v4075_v41 = vrot.slane %v4043_v38, %v6908_v12 }
 0x92e   :  { %v4084_v48 = vsub.f32 %v6927_v15, %v4047_v33  ;;  %v4085_v27 = vsub.f32 %v6933_v20, %v4051_v22  ;;  %v4086_v59 = vsub.f32 %v6930_v10, %v4055_v53  ;;  %v4087_v49 = vsub.f32 %v6936_v31, %v4059_v4 }
 0x92f   :  { %v4088_v11 = vsub.f32 %v6947_v35, %v4047_v33  ;;  %v4089_v51 = vsub.f32 %v6953_v50, %v4051_v22  ;;  %v4090_v1 = vsub.f32 %v6950_v24, %v4055_v53  ;;  %v4091_v15 = vsub.f32 %v6956_v54, %v4059_v4 }
 0x930   :  { %v4092_v20 = vsub.f32 %v6989_v19, %v4063_v56  ;;  %v4093_v29 = vsub.f32 %v7004_v57, %v4067_v0  ;;  %v4094_v42 = vsub.f32 %v6992_v13, %v4071_v28  ;;  %v4095_v7 = vsub.f32 %v7007_v17, %v4075_v41 }
 0x931   :  { %v4100_v55 = vcombine.high %v4036_v40, %v4036_v40  ;;  %v4101_v10 = vcombine.high %v4043_v38, %v4043_v38  ;;  %v4096_v31 = vsub.f32 %v7014_v6, %v4063_v56  ;;  %v4097_v35 = vsub.f32 %v7020_v43, %v4067_v0 }
 0x932   :  { %v4098_v50 = vsub.f32 %v7017_v36, %v4071_v28  ;;  %v4099_v24 = vsub.f32 %v7023_v26, %v4075_v41 }
 0x933   :  { %v4105_v54 = vrot.slane %v4100_v55, %v5930_v58  ;;  %v4109_v19 = vrot.slane %v4100_v55, %v6112_v63  ;;  %v4113_v57 = vrot.slane %v4100_v55, %v6902_v5  ;;  %v4117_v13 = vrot.slane %v4100_v55, %v6908_v12 }
 0x934   :  { %v4121_v17 = vrot.slane %v4101_v10, %v5930_v58  ;;  %v4125_v39 = vrot.slane %v4101_v10, %v6112_v63  ;;  %v4129_v6 = vrot.slane %v4101_v10, %v6902_v5  ;;  %v4133_v43 = vrot.slane %v4101_v10, %v6908_v12 }
 0x935   :  { %v4142_v47 = vmul.f32 %v4105_v54, %v4084_v48  ;;  %v4143_v36 = vmul.f32 %v4109_v19, %v4085_v27  ;;  %v4144_v52 = vmul.f32 %v4113_v57, %v4086_v59  ;;  %v4145_v26 = vmul.f32 %v4117_v13, %v4087_v49 }
 0x936   :  { %v4146_v34 = vmul.f32 %v4105_v54, %v4088_v11  ;;  %v4147_v21 = vmul.f32 %v4109_v19, %v4089_v51  ;;  %v4148_v32 = vmul.f32 %v4113_v57, %v4090_v1  ;;  %v4149_v18 = vmul.f32 %v4117_v13, %v4091_v15 }
 0x937   :  { %v4150_v61 = vmul.f32 %v4121_v17, %v4092_v20  ;;  %v4151_v44 = vmul.f32 %v4125_v39, %v4093_v29  ;;  %v4152_v60 = vmul.f32 %v4129_v6, %v4094_v42  ;;  %v4153_v2 = vmul.f32 %v4133_v43, %v4095_v7 }
 0x938   :  { %v4154_v16 = vmul.f32 %v4121_v17, %v4096_v31  ;;  %v4155_v58 = vmul.f32 %v4125_v39, %v4097_v35  ;;  %v4156_v14 = vmul.f32 %v4129_v6, %v4098_v50  ;;  %v4157_v63 = vmul.f32 %v4133_v43, %v4099_v24 }
 0x939   :  { %v4180_v5 = vmul.f32 %v7083_v3, %v4142_v47  ;;  %v4181_v12 = vmul.f32 %v7086_v46, %v4143_v36  ;;  %v4182_v25 = vmul.f32 %v7098_v9, %v4144_v52  ;;  %v4183_v40 = vmul.f32 %v7101_v62, %v4145_v26 }
 0x93a   :  { %v4184_v38 = vmul.f32 %v7083_v3, %v4146_v34  ;;  %v4185_v8 = vmul.f32 %v7086_v46, %v4147_v21  ;;  %v4186_v33 = vmul.f32 %v7098_v9, %v4148_v32  ;;  %v4187_v22 = vmul.f32 %v7101_v62, %v4149_v18 }
 0x93b   :  { %v4188_v53 = vmul.f32 %v7083_v3, %v4150_v61  ;;  %v4189_v4 = vmul.f32 %v7086_v46, %v4151_v44  ;;  %v4190_v56 = vmul.f32 %v7098_v9, %v4152_v60  ;;  %v4191_v0 = vmul.f32 %v7101_v62, %v4153_v2 }
 0x93c   :  { %v4192_v28 = vmul.f32 %v7083_v3, %v4154_v16  ;;  %v4193_v41 = vmul.f32 %v7086_v46, %v4155_v58  ;;  %v4194_v48 = vmul.f32 %v7098_v9, %v4156_v14  ;;  %v4195_v27 = vmul.f32 %v7101_v62, %v4157_v63 }
 0x93d   :  { %v4218_v59 = vadd.f32 %v7106_v23, %v4180_v5  ;;  %v4219_v49 = vadd.f32 %v7109_v30, %v4181_v12  ;;  %v4220_v11 = vadd.f32 %v7114_v45, %v4182_v25  ;;  %v4221_v51 = vadd.f32 %v7117_v37, %v4183_v40 }
 0x93e   :  { %v4222_v1 = vadd.f32 %v7106_v23, %v4184_v38  ;;  %v4223_v15 = vadd.f32 %v7109_v30, %v4185_v8  ;;  %v4224_v3 = vadd.f32 %v7114_v45, %v4186_v33  ;;  %v4225_v46 = vadd.f32 %v7117_v37, %v4187_v22 }
 0x93f   :  { %v4226_v9 = vadd.f32 %v7106_v23, %v4188_v53  ;;  %v4227_v62 = vadd.f32 %v7109_v30, %v4189_v4  ;;  %v4228_v20 = vadd.f32 %v7114_v45, %v4190_v56  ;;  %v4229_v29 = vadd.f32 %v7117_v37, %v4191_v0 }
 0x940   :  { %v4230_v42 = vadd.f32 %v7106_v23, %v4192_v28  ;;  %v4231_v7 = vadd.f32 %v7109_v30, %v4193_v41  ;;  %v4232_v55 = vadd.f32 %v7114_v45, %v4194_v48  ;;  %v4233_v10 = vadd.f32 %v7117_v37, %v4195_v27 }
 0x941   :  { %v4234_v31 = vmax.f32 %v4218_v59, 0.0  ;;  %v4235_v35 = vmax.f32 %v4219_v49, 0.0  ;;  %v4236_v50 = vmax.f32 %v4220_v11, 0.0  ;;  %v4237_v24 = vmax.f32 %v4221_v51, 0.0 }
 0x942   :  { %v4238_v54 = vmax.f32 %v4222_v1, 0.0  ;;  %v4239_v19 = vmax.f32 %v4223_v15, 0.0  ;;  %v4240_v57 = vmax.f32 %v4224_v3, 0.0  ;;  %v4241_v13 = vmax.f32 %v4225_v46, 0.0 }
 0x943   :  { %v4242_v17 = vmax.f32 %v4226_v9, 0.0  ;;  %v4243_v39 = vmax.f32 %v4227_v62, 0.0  ;;  %v4244_v6 = vmax.f32 %v4228_v20, 0.0  ;;  %v4245_v23 = vmax.f32 %v4229_v29, 0.0  ;;  %4250 = vst [vmem:[#allocation23] sm:$0xff] %v4234_v31  ;;  %4251 = vst [vmem:[#allocation23 + $0x8] sm:$0xff] %v4235_v35 }
 0x944   :  { %4252 = vst [vmem:[#allocation23 + $0x10] sm:$0xff] %v4236_v50  ;;  %4253 = vst [vmem:[#allocation23 + $0x18] sm:$0xff] %v4237_v24  ;;  %v4246_v30 = vmax.f32 %v4230_v42, 0.0  ;;  %v4247_v45 = vmax.f32 %v4231_v7, 0.0  ;;  %v4248_v37 = vmax.f32 %v4232_v55, 0.0  ;;  %v4249_v43 = vmax.f32 %v4233_v10, 0.0 }
 0x945   :  { %4254 = vst [vmem:[#allocation23 + $0x20] sm:$0xff] %v4238_v54  ;;  %4255 = vst [vmem:[#allocation23 + $0x28] sm:$0xff] %v4239_v19 }
 0x946   :  { %4256 = vst [vmem:[#allocation23 + $0x30] sm:$0xff] %v4240_v57  ;;  %4257 = vst [vmem:[#allocation23 + $0x38] sm:$0xff] %v4241_v13 }
 0x947   :  { %4258 = vst [vmem:[#allocation23 + $0x40] sm:$0xff] %v4242_v17  ;;  %4259 = vst [vmem:[#allocation23 + $0x48] sm:$0xff] %v4243_v39 }
 0x948   :  { %4260 = vst [vmem:[#allocation23 + $0x50] sm:$0xff] %v4244_v6  ;;  %4261 = vst [vmem:[#allocation23 + $0x58] sm:$0xff] %v4245_v23 }
 0x949   :  { %4262 = vst [vmem:[#allocation23 + $0x60] sm:$0xff] %v4246_v30  ;;  %4263 = vst [vmem:[#allocation23 + $0x68] sm:$0xff] %v4247_v45 }
 0x94a   :  { %4264 = vst [vmem:[#allocation23 + $0x70] sm:$0xff] %v4248_v37  ;;  %4265 = vst [vmem:[#allocation23 + $0x78] sm:$0xff] %v4249_v43 }
 0x94b   :  { %5505 = shalt.err (!%p5502_p13)
}
 0x94c   :  { %4277 = dma.vmem_to_hbm [thread:$0]  %s4272_s22, 2048, %s7204_s25, [#allocation4], %s5547_s26, %s5547_s26, %s5548_s29  }
 0x94d   :  { %5528 = dma.done.wait [#allocation4], 2048  }
 0x94e   :  { %5529 = vsyncadd [#allocation4], 4294965248 }
 0x94f   :  { %4281 = vsyncpa [#allocation3], 1 }
 0x950   :  { %4282 = vsyncpa [#allocation6], 1 }
 0x951   :  { %4283 = vsyncpa [#allocation9], 1 }
 0x952   :  { %4284 = vsyncpa [#allocation12], 1 }
 0x953   :  { %4285 = vsyncpa [#allocation15], 1 }
 0x954   :  { %4286 = vsyncpa [#allocation18], 1 }
 0x955   :  { %4287 = vsyncpa [#allocation21], 1 }
 0x956   :  { %4288 = vsyncpa [#allocation4], 1 }

</bundles_post_ra>
